<compile_context>
chip_gen: v5e
topology: v5e:2x2
jax: 0.10.0
libtpu: 0.0.40
codegen_flags: <defaults>
</compile_context>

<pallas_src>
import functools

import numpy as np
import jax
import jax.numpy as jnp
from jax import lax
from jax.experimental import pallas as pl
from jax.experimental.pallas import tpu as pltpu

CP = 8  # padded channel count (one sublane tile)


# ----------------------------------------------------------------------------
# Pallas kernel: one grid cell = one batch element, all r draws in-kernel.
# ----------------------------------------------------------------------------
def varloss_kernel(h, w, r,
                   m9_ref, st_ref, feat_ref, d_ref, gtmk_ref,
                   w1_ref, b1_ref, w2_ref, b2_ref, out_ref):
    P = h * w
    beta = 0.01

    # ---- hoisted, reused across all r draws and both convs --------------
    masks = [m9_ref[k:k + 1, :] for k in range(9)]      # [1, P] boundary masks
    feat = feat_ref[0]                                   # [8, Q]  bf16
    dimg = d_ref[0]                                      # [8, P]  f32
    w1 = w1_ref[...]                                     # [72, 8] f32
    w2 = w2_ref[...]                                     # [72, 8] f32
    b1 = b1_ref[...]                                     # [8, 1]
    b2 = b2_ref[...]                                     # [8, 1]

    def conv3x3(x, wt, bias):
        """3x3 conv, padding=1: [8, P] -> [8, P] (padded channels stay zero)."""
        taps = jnp.dot(wt, x, preferred_element_type=jnp.float32)   # [9*8, P]
        acc = None
        for k in range(9):                       # static unroll (ky*3 + kx)
            dy, dx = k // 3 - 1, k % 3 - 1
            tap = taps[k * CP:(k + 1) * CP, :]   # 8-sublane aligned slice
            s = dy * w + dx                      # out[:, p] needs in[:, p + s]
            if s != 0:
                tap = pltpu.roll(tap, shift=(-s) % P, axis=1)
            if not (dy == 0 and dx == 0):
                tap = tap * masks[k]             # precomputed boundary mask
            acc = tap if acc is None else acc + tap
        return acc + bias

    lane = lax.broadcasted_iota(jnp.int32, (8, 128), 1)
    row = lax.broadcasted_iota(jnp.int32, (8, 128), 0)
    is_num_row = row == 0
    is_den_row = row == 1
    out_blk = jnp.zeros((8, 128), jnp.float32)

    # ---- static unroll over the r random-pooling draws -------------------
    for j in range(r):
        # grid_sample = one bf16 MXU matmul with f32 accumulation: [8,Q]@[Q,P]
        sampled = jnp.dot(feat, st_ref[0, j],
                          preferred_element_type=jnp.float32)        # [8, P]

        z1 = conv3x3(sampled, w1, b1)
        # sigmoid on the EUP: exp + approximate reciprocal
        att = pl.reciprocal(1.0 + jnp.exp(-z1), approx=True)

        ds = conv3x3(att * dimg, w2, b2)                              # [8, P]

        gtmk = gtmk_ref[0, j]                                         # [16, P]
        gt = gtmk[0:CP, :]
        mk = gtmk[CP:2 * CP, :]

        diff = jnp.abs(ds - gt)
        sl1 = jnp.where(diff < beta, 0.5 * diff * diff / beta, diff - 0.5 * beta)
        num_j = jnp.sum(sl1 * mk)
        den_j = jnp.sum(mk)

        out_blk = out_blk + jnp.where(
            lane == j,
            jnp.where(is_num_row, num_j, jnp.where(is_den_row, den_j, 0.0)),
            0.0)

    out_ref[0] = out_blk                                  # one unmasked store


def varloss_pallas(mask9, ST, featQ, dP, gtmk, W1p, b1p, W2p, b2p, h, w):
    """Returns per-(batch, draw) partial sums (num[n, r], den[n, r])."""
    n, r, Q, P = ST.shape
    assert r <= 128, "num/den packing uses one lane per draw"
    kernel = functools.partial(varloss_kernel, h, w, r)
    out = pl.pallas_call(
        kernel,
        out_shape=jax.ShapeDtypeStruct((n, 8, 128), jnp.float32),
        grid=(n,),
        in_specs=[
            pl.BlockSpec((9, P), lambda b: (0, 0)),                # boundary masks
            pl.BlockSpec((1, r, Q, P), lambda b: (b, 0, 0, 0)),    # S^T, all draws (bf16)
            pl.BlockSpec((1, CP, Q), lambda b: (b, 0, 0)),         # feat (bf16, padded)
            pl.BlockSpec((1, CP, P), lambda b: (b, 0, 0)),         # d    (padded)
            pl.BlockSpec((1, r, 2 * CP, P), lambda b: (b, 0, 0, 0)),  # [gt; mk] padded
            pl.BlockSpec((9 * CP, CP), lambda b: (0, 0)),          # conv1 weights
            pl.BlockSpec((CP, 1), lambda b: (0, 0)),               # conv1 bias
            pl.BlockSpec((9 * CP, CP), lambda b: (0, 0)),          # conv2 weights
            pl.BlockSpec((CP, 1), lambda b: (0, 0)),               # conv2 bias
        ],
        out_specs=pl.BlockSpec((1, 8, 128), lambda b: (b, 0, 0)),
        compiler_params=pltpu.CompilerParams(
            dimension_semantics=("parallel",),
            vmem_limit_bytes=64 * 1024 * 1024),
    )(mask9, ST, featQ, dP, gtmk, W1p, b1p, W2p, b2p)
    return out[:, 0, :r], out[:, 1, :r]


# ----------------------------------------------------------------------------
# Pure-JAX reference on the SAME prepared (padded) inputs — real convs via
# lax.conv — used only to spot-check the kernel math.
# ----------------------------------------------------------------------------
def varloss_reference(mask9, ST, featQ, dP, gtmk, W1p, b1p, W2p, b2p, h, w):
    del mask9
    n, r, Q, P = ST.shape
    w1 = W1p.reshape(3, 3, CP, CP).transpose(2, 3, 0, 1)   # OIHW
    w2 = W2p.reshape(3, 3, CP, CP).transpose(2, 3, 0, 1)
    b1 = b1p.reshape(CP)
    b2 = b2p.reshape(CP)

    sampled = jnp.einsum('ncq,nrqp->nrcp',
                         featQ.astype(jnp.float32), ST.astype(jnp.float32),
                         precision=lax.Precision.HIGHEST)            # [n, r, CP, P]
    x = sampled.reshape(n * r, CP, h, w)

    def conv(v, wk, bk):
        y = lax.conv_general_dilated(
            v, wk, window_strides=(1, 1), padding='SAME',
            dimension_numbers=('NCHW', 'OIHW', 'NCHW'),
            precision=lax.Precision.HIGHEST)
        return y + bk[None, :, None, None]

    att = jax.nn.sigmoid(conv(x, w1, b1))
    dimg = jnp.broadcast_to(dP.reshape(n, 1, CP, h, w),
                            (n, r, CP, h, w)).reshape(n * r, CP, h, w)
    ds = conv(att * dimg, w2, b2)

    gt = gtmk[:, :, 0:CP, :].reshape(n * r, CP, h, w)
    mk = gtmk[:, :, CP:2 * CP, :].reshape(n * r, CP, h, w)
    diff = jnp.abs(ds - gt)
    sl1 = jnp.where(diff < 0.01, 0.5 * diff * diff / 0.01, diff - 0.005)
    num = (sl1 * mk).reshape(n, r, -1).sum(-1)
    den = mk.reshape(n, r, -1).sum(-1)
    return num, den


# ----------------------------------------------------------------------------
# Plain-JAX glue (index bookkeeping, parameter setup, layout conversion)
# ----------------------------------------------------------------------------
def init_params(key, depth_channel, feat_channel):
    k1, k2, k3, k4 = jax.random.split(key, 4)
    return {
        'w1': jax.random.normal(k1, (depth_channel, feat_channel, 3, 3), jnp.float32) * 0.2,
        'b1': jax.random.normal(k2, (depth_channel,), jnp.float32) * 0.1,
        'w2': jax.random.normal(k3, (2, depth_channel, 3, 3), jnp.float32) * 0.2,
        'b2': jax.random.normal(k4, (2,), jnp.float32) * 0.1,
    }


def random_pooling(key, gt, ts_shape):
    """Replicates VarLoss.random_pooling (H, W divisible by target shape).
    Note: uses jax.random instead of torch RNG, so draws differ bit-for-bit."""
    n, c, H, W = gt.shape
    h, w = ts_shape
    kh, kw = H // h, W // w
    rand = jax.random.uniform(key, (n, c, H, W), dtype=gt.dtype)
    rand = rand * (gt > 0.1)
    r = rand.reshape(n, c, h, kh, w, kw).transpose(0, 1, 2, 4, 3, 5)
    r = r.reshape(n, c, h, w, kh * kw)
    local = jnp.argmax(r, axis=-1)                    # first max in window (row-major)
    ly, lx = local // kw, local % kw
    ys = jnp.arange(h)[None, None, :, None] * kh + ly
    xs = jnp.arange(w)[None, None, None, :] * kw + lx
    indices = ys * W + xs                             # flat indices into H*W
    gt_flat = gt.reshape(n, c, H * W)
    reshaped_gt = jnp.take_along_axis(gt_flat, indices.reshape(n, c, h * w), axis=-1)
    reshaped_gt = reshaped_gt.reshape(n, c, h, w)
    reshaped_gt = jnp.where(reshaped_gt < 0.1, 0.0, reshaped_gt)
    return reshaped_gt, indices


def build_sample_matrix(indices, os_shape, feat_shape):
    """Bilinear grid_sample (align_corners=True, zeros pad) as weights S[n, P, Hf*Wf]."""
    H, W = os_shape
    Hf, Wf = feat_shape
    n, _, h, w = indices.shape
    P, Q = h * w, Hf * Wf
    bias_x = W // w // 2
    bias_y = (H // h // 2) * W
    idx = indices[:, 0].reshape(n, P) + bias_x + bias_y
    ind_x = (idx % W).astype(jnp.float32) / W
    ind_y = (idx // W).astype(jnp.float32) / H
    gx = 2.0 * (ind_x - 0.5)
    gy = 2.0 * (ind_y - 0.5)
    xs = (gx + 1.0) * 0.5 * (Wf - 1)
    ys = (gy + 1.0) * 0.5 * (Hf - 1)
    x0 = jnp.floor(xs); x1 = x0 + 1.0
    y0 = jnp.floor(ys); y1 = y0 + 1.0
    wx1 = xs - x0; wx0 = 1.0 - wx1
    wy1 = ys - y0; wy0 = 1.0 - wy1

    def corner(xc, yc, wgt):
        inb = (xc >= 0) & (xc <= Wf - 1) & (yc >= 0) & (yc <= Hf - 1)
        flat = jnp.clip(yc.astype(jnp.int32) * Wf + xc.astype(jnp.int32), 0, Q - 1)
        wgt = jnp.where(inb, wgt, 0.0)
        return wgt[..., None] * jax.nn.one_hot(flat, Q, dtype=jnp.float32)

    return (corner(x0, y0, wx0 * wy0) + corner(x1, y0, wx1 * wy0)
            + corner(x0, y1, wx0 * wy1) + corner(x1, y1, wx1 * wy1))


def grad_and_mask(img):
    """Replicates VarLoss.grad; returns grad_gt[n,2,h,w], grad_mk[n,2,h,w]."""
    p = jnp.pad(img, ((0, 0), (0, 0), (1, 1), (1, 1)))
    m = p > 0.1
    gx = jnp.log(p[:, :, 1:-1, 1:-1] + 1e-6) - jnp.log(p[:, :, 1:-1, 2:] + 1e-6)
    mx = jnp.logical_and(m[:, :, 1:-1, 1:-1], m[:, :, 1:-1, 2:])
    gy = jnp.log(p[:, :, 1:-1, 1:-1] + 1e-6) - jnp.log(p[:, :, 2:, 1:-1] + 1e-6)
    my = jnp.logical_and(m[:, :, 1:-1, 1:-1], m[:, :, 2:, 1:-1])
    grad_gt = jnp.concatenate([gx, gy], axis=1)
    grad_mk = jnp.concatenate([mx, my], axis=1).astype(jnp.float32)
    return grad_gt, grad_mk


def prepare_inputs(feat, d, gts, params, key, r):
    """All r random-pooling draws + layout conversion to channels-first,
    lane-dense, 8-sublane-padded tensors consumed by the kernel."""
    n, Cf, Hf, Wf = feat.shape
    _, Cd, h, w = d.shape
    _, _, H, W = gts.shape
    P, Q = h * w, Hf * Wf

    keys = jax.random.split(key, r)

    def one_iter(k):
        reshaped_gt, indices = random_pooling(k, gts, (h, w))
        S = build_sample_matrix(indices, (H, W), (Hf, Wf))     # [n, P, Q]
        grad_gt, grad_mk = grad_and_mask(reshaped_gt)          # [n, 2, h, w]
        return S, grad_gt, grad_mk

    S, grad_gt, grad_mk = jax.vmap(one_iter)(keys)             # leading r axis
    ST = jnp.transpose(S, (1, 0, 3, 2)).astype(jnp.bfloat16)   # [n, r, Q, P]

    gt = jnp.swapaxes(grad_gt, 0, 1).reshape(n, r, 2, P)
    mk = jnp.swapaxes(grad_mk, 0, 1).reshape(n, r, 2, P)
    gtmk = jnp.zeros((n, r, 2 * CP, P), jnp.float32)
    gtmk = gtmk.at[:, :, 0:2, :].set(gt).at[:, :, CP:CP + 2, :].set(mk)

    featQ = jnp.zeros((n, CP, Q), jnp.bfloat16).at[:, :Cf, :].set(
        feat.reshape(n, Cf, Q).astype(jnp.bfloat16))
    dP = jnp.zeros((n, CP, P), jnp.float32).at[:, :Cd, :].set(d.reshape(n, Cd, P))

    # conv weights: tap-major [9, out, in] zero-padded to 8x8 per tap -> [72, 8]
    w1t = params['w1'].transpose(2, 3, 0, 1).reshape(9, Cd, Cf)
    W1p = jnp.zeros((9, CP, CP), jnp.float32).at[:, :Cd, :Cf].set(w1t).reshape(9 * CP, CP)
    w2t = params['w2'].transpose(2, 3, 0, 1).reshape(9, 2, Cd)
    W2p = jnp.zeros((9, CP, CP), jnp.float32).at[:, :2, :Cd].set(w2t).reshape(9 * CP, CP)
    b1p = jnp.zeros((CP, 1), jnp.float32).at[:Cd, 0].set(params['b1'])
    b2p = jnp.zeros((CP, 1), jnp.float32).at[:2, 0].set(params['b2'])

    # precomputed boundary masks for the roll-based 3x3 conv: [9, P]
    ypos = np.arange(P) // w
    xpos = np.arange(P) % w
    m9 = np.ones((9, P), np.float32)
    for k in range(9):
        dy, dx = k // 3 - 1, k % 3 - 1
        ok = np.ones(P, bool)
        if dy == -1:
            ok &= ypos >= 1
        if dy == 1:
            ok &= ypos <= h - 2
        if dx == -1:
            ok &= xpos >= 1
        if dx == 1:
            ok &= xpos <= w - 2
        m9[k] = ok.astype(np.float32)
    mask9 = jnp.asarray(m9)

    return (mask9, ST, featQ, dP, gtmk, W1p, b1p, W2p, b2p, h, w)


def var_loss_forward(feat, d, gts, params, key, r=10, impl=varloss_pallas):
    args = prepare_inputs(feat, d, gts, params, key, r)
    num_bj, den_bj = impl(*args)                  # [n, r] partial sums
    num_j = num_bj.sum(axis=0)                    # per random-pooling draw
    den_j = den_bj.sum(axis=0)
    # guard against an all-masked draw (den == 0) -> contributes 0 instead of NaN
    single = jnp.where(den_j > 0, num_j / jnp.maximum(den_j, 1.0), 0.0)
    return jnp.mean(single)


# ----------------------------------------------------------------------------
if __name__ == "__main__":
    key = jax.random.PRNGKey(0)
    kx, kd, kg, kp, kloss = jax.random.split(key, 5)

    n, Cf, Cd = 2, 4, 4          # batch, feat_channel, depth_channel
    Hf = Wf = 16                 # feature map spatial (x)
    H = W = 32                   # ground-truth spatial (gts)
    h = w = 16                   # depth prediction spatial (d)  ->  P = 256 (lane-dense)
    r = 10

    x = jax.random.normal(kx, (n, Cf, Hf, Wf), jnp.float32)
    d = jax.random.uniform(kd, (n, Cd, h, w), jnp.float32, minval=0.5, maxval=2.0)
    gts = jax.random.uniform(kg, (n, 1, H, W), jnp.float32, minval=0.0, maxval=3.0)

    params = init_params(kp, Cd, Cf)

    fwd_pallas = jax.jit(functools.partial(var_loss_forward, r=r, impl=varloss_pallas))
    fwd_ref = jax.jit(functools.partial(var_loss_forward, r=r, impl=varloss_reference))

    loss_pallas = jax.block_until_ready(fwd_pallas(x, d, gts, params, kloss))
    loss_ref = jax.block_until_ready(fwd_ref(x, d, gts, params, kloss))

    np.testing.assert_allclose(np.asarray(loss_pallas), np.asarray(loss_ref),
                               rtol=5e-2, atol=1e-3)
    assert np.isfinite(float(loss_pallas))
    print("KERNEL_OK")
</pallas_src>

<mosaic_0001>
module attributes {stable_mosaic.version = 11 : i64} {
  func.func @varloss_kernel(%arg0: i32, %arg1: memref<9x256xf32, #tpu.memory_space<vmem>>, %arg2: memref<1x10x256x256xbf16, #tpu.memory_space<vmem>>, %arg3: memref<1x8x256xbf16, #tpu.memory_space<vmem>>, %arg4: memref<1x8x256xf32, #tpu.memory_space<vmem>>, %arg5: memref<1x10x16x256xf32, #tpu.memory_space<vmem>>, %arg6: memref<72x8xf32, #tpu.memory_space<vmem>>, %arg7: memref<8x1xf32, #tpu.memory_space<vmem>>, %arg8: memref<72x8xf32, #tpu.memory_space<vmem>>, %arg9: memref<8x1xf32, #tpu.memory_space<vmem>>, %arg10: memref<1x8x128xf32, #tpu.memory_space<vmem>>) attributes {dimension_semantics = [#tpu.dimension_semantics<parallel>], iteration_bounds = array<i64: 2>, scalar_prefetch = 0 : i64, scratch_operands = 0 : i64, tpu.core_type = #tpu.core_type<tc>, window_params = [{pipeline_mode = #tpu.pipeline_mode<synchronous>, transform_indices = @transform_0, window_bounds = array<i64: 9, 256>}, {transform_indices = @transform_1, window_bounds = array<i64: 1, 10, 256, 256>}, {transform_indices = @transform_2, window_bounds = array<i64: 1, 8, 256>}, {transform_indices = @transform_3, window_bounds = array<i64: 1, 8, 256>}, {transform_indices = @transform_4, window_bounds = array<i64: 1, 10, 16, 256>}, {pipeline_mode = #tpu.pipeline_mode<synchronous>, transform_indices = @transform_5, window_bounds = array<i64: 72, 8>}, {pipeline_mode = #tpu.pipeline_mode<synchronous>, transform_indices = @transform_6, window_bounds = array<i64: 8, 1>}, {pipeline_mode = #tpu.pipeline_mode<synchronous>, transform_indices = @transform_7, window_bounds = array<i64: 72, 8>}, {pipeline_mode = #tpu.pipeline_mode<synchronous>, transform_indices = @transform_8, window_bounds = array<i64: 8, 1>}, {transform_indices = @transform_9, window_bounds = array<i64: 1, 8, 128>}]} {
    %c0 = arith.constant 0 : index
    %c0_0 = arith.constant 0 : index
    %0 = vector.load %arg1[%c0, %c0_0] : memref<9x256xf32, #tpu.memory_space<vmem>>, vector<1x256xf32>
    %c1 = arith.constant 1 : index
    %c0_1 = arith.constant 0 : index
    %1 = vector.load %arg1[%c1, %c0_1] : memref<9x256xf32, #tpu.memory_space<vmem>>, vector<1x256xf32>
    %c2 = arith.constant 2 : index
    %c0_2 = arith.constant 0 : index
    %2 = vector.load %arg1[%c2, %c0_2] : memref<9x256xf32, #tpu.memory_space<vmem>>, vector<1x256xf32>
    %c3 = arith.constant 3 : index
    %c0_3 = arith.constant 0 : index
    %3 = vector.load %arg1[%c3, %c0_3] : memref<9x256xf32, #tpu.memory_space<vmem>>, vector<1x256xf32>
    %c5 = arith.constant 5 : index
    %c0_4 = arith.constant 0 : index
    %4 = vector.load %arg1[%c5, %c0_4] : memref<9x256xf32, #tpu.memory_space<vmem>>, vector<1x256xf32>
    %c6 = arith.constant 6 : index
    %c0_5 = arith.constant 0 : index
    %5 = vector.load %arg1[%c6, %c0_5] : memref<9x256xf32, #tpu.memory_space<vmem>>, vector<1x256xf32>
    %c7 = arith.constant 7 : index
    %c0_6 = arith.constant 0 : index
    %6 = vector.load %arg1[%c7, %c0_6] : memref<9x256xf32, #tpu.memory_space<vmem>>, vector<1x256xf32>
    %c8 = arith.constant 8 : index
    %c0_7 = arith.constant 0 : index
    %7 = vector.load %arg1[%c8, %c0_7] : memref<9x256xf32, #tpu.memory_space<vmem>>, vector<1x256xf32>
    %c0_8 = arith.constant 0 : index
    %c0_9 = arith.constant 0 : index
    %c0_10 = arith.constant 0 : index
    %8 = vector.load %arg3[%c0_8, %c0_9, %c0_10] : memref<1x8x256xbf16, #tpu.memory_space<vmem>>, vector<1x8x256xbf16>
    %9 = vector.shape_cast %8 : vector<1x8x256xbf16> to vector<8x256xbf16>
    %c0_11 = arith.constant 0 : index
    %c0_12 = arith.constant 0 : index
    %c0_13 = arith.constant 0 : index
    %10 = vector.load %arg4[%c0_11, %c0_12, %c0_13] : memref<1x8x256xf32, #tpu.memory_space<vmem>>, vector<1x8x256xf32>
    %11 = vector.shape_cast %10 : vector<1x8x256xf32> to vector<8x256xf32>
    %c0_14 = arith.constant 0 : index
    %c0_15 = arith.constant 0 : index
    %12 = vector.load %arg6[%c0_14, %c0_15] : memref<72x8xf32, #tpu.memory_space<vmem>>, vector<72x8xf32>
    %c0_16 = arith.constant 0 : index
    %c0_17 = arith.constant 0 : index
    %13 = vector.load %arg8[%c0_16, %c0_17] : memref<72x8xf32, #tpu.memory_space<vmem>>, vector<72x8xf32>
    %c0_18 = arith.constant 0 : index
    %c0_19 = arith.constant 0 : index
    %14 = vector.load %arg7[%c0_18, %c0_19] : memref<8x1xf32, #tpu.memory_space<vmem>>, vector<8x1xf32>
    %c0_20 = arith.constant 0 : index
    %c0_21 = arith.constant 0 : index
    %15 = vector.load %arg9[%c0_20, %c0_21] : memref<8x1xf32, #tpu.memory_space<vmem>>, vector<8x1xf32>
    %16 = tpu.iota {dimensions = array<i32: 1>} : vector<8x128xi32>
    %17 = tpu.iota {dimensions = array<i32: 0>} : vector<8x128xi32>
    %c0_i32 = arith.constant 0 : i32
    %18 = vector.broadcast %c0_i32 : i32 to vector<8x128xi32>
    %19 = arith.cmpi eq, %17, %18 : vector<8x128xi32>
    %c1_i32 = arith.constant 1 : i32
    %20 = vector.broadcast %c1_i32 : i32 to vector<8x128xi32>
    %21 = arith.cmpi eq, %17, %20 : vector<8x128xi32>
    %cst = arith.constant 0.000000e+00 : f32
    %22 = vector.broadcast %cst : f32 to vector<8x128xf32>
    %c0_22 = arith.constant 0 : index
    %c0_23 = arith.constant 0 : index
    %c0_24 = arith.constant 0 : index
    %c0_25 = arith.constant 0 : index
    %23 = vector.load %arg2[%c0_22, %c0_23, %c0_24, %c0_25] : memref<1x10x256x256xbf16, #tpu.memory_space<vmem>>, vector<1x1x256x256xbf16>
    %24 = vector.shape_cast %23 : vector<1x1x256x256xbf16> to vector<256x256xbf16>
    %cst_26 = arith.constant dense<0.000000e+00> : vector<8x256xf32>
    %25 = tpu.matmul %9, %24, %cst_26 {dimension_numbers = #tpu.dot_dimension_numbers<[1], [0], [0], [1], [0, 0, 1, 1], [], []>} : vector<8x256xbf16>, vector<256x256xbf16>, vector<8x256xf32> -> vector<8x256xf32>
    %cst_27 = arith.constant dense<0.000000e+00> : vector<72x256xf32>
    %26 = tpu.matmul %12, %25, %cst_27 {dimension_numbers = #tpu.dot_dimension_numbers<[1], [0], [0], [1], [0, 0, 1, 1], [], []>} : vector<72x8xf32>, vector<8x256xf32>, vector<72x256xf32> -> vector<72x256xf32>
    %27 = vector.extract_strided_slice %26 {offsets = [0, 0], sizes = [8, 256], strides = [1, 1]} : vector<72x256xf32> to vector<8x256xf32>
    %c17_i32 = arith.constant 17 : i32
    %28 = tpu.dynamic_rotate %27 by %c17_i32 dim 1 : vector<8x256xf32>, i32 -> vector<8x256xf32>
    %29 = vector.broadcast %0 : vector<1x256xf32> to vector<8x256xf32>
    %30 = arith.mulf %28, %29 : vector<8x256xf32>
    %31 = vector.extract_strided_slice %26 {offsets = [8, 0], sizes = [8, 256], strides = [1, 1]} : vector<72x256xf32> to vector<8x256xf32>
    %c16_i32 = arith.constant 16 : i32
    %32 = tpu.dynamic_rotate %31 by %c16_i32 dim 1 : vector<8x256xf32>, i32 -> vector<8x256xf32>
    %33 = vector.broadcast %1 : vector<1x256xf32> to vector<8x256xf32>
    %34 = arith.mulf %32, %33 : vector<8x256xf32>
    %35 = arith.addf %30, %34 : vector<8x256xf32>
    %36 = vector.extract_strided_slice %26 {offsets = [16, 0], sizes = [8, 256], strides = [1, 1]} : vector<72x256xf32> to vector<8x256xf32>
    %c15_i32 = arith.constant 15 : i32
    %37 = tpu.dynamic_rotate %36 by %c15_i32 dim 1 : vector<8x256xf32>, i32 -> vector<8x256xf32>
    %38 = vector.broadcast %2 : vector<1x256xf32> to vector<8x256xf32>
    %39 = arith.mulf %37, %38 : vector<8x256xf32>
    %40 = arith.addf %35, %39 : vector<8x256xf32>
    %41 = vector.extract_strided_slice %26 {offsets = [24, 0], sizes = [8, 256], strides = [1, 1]} : vector<72x256xf32> to vector<8x256xf32>
    %c1_i32_28 = arith.constant 1 : i32
    %42 = tpu.dynamic_rotate %41 by %c1_i32_28 dim 1 : vector<8x256xf32>, i32 -> vector<8x256xf32>
    %43 = vector.broadcast %3 : vector<1x256xf32> to vector<8x256xf32>
    %44 = arith.mulf %42, %43 : vector<8x256xf32>
    %45 = arith.addf %40, %44 : vector<8x256xf32>
    %46 = vector.extract_strided_slice %26 {offsets = [32, 0], sizes = [8, 256], strides = [1, 1]} : vector<72x256xf32> to vector<8x256xf32>
    %47 = arith.addf %45, %46 : vector<8x256xf32>
    %48 = vector.extract_strided_slice %26 {offsets = [40, 0], sizes = [8, 256], strides = [1, 1]} : vector<72x256xf32> to vector<8x256xf32>
    %c255_i32 = arith.constant 255 : i32
    %49 = tpu.dynamic_rotate %48 by %c255_i32 dim 1 : vector<8x256xf32>, i32 -> vector<8x256xf32>
    %50 = vector.broadcast %4 : vector<1x256xf32> to vector<8x256xf32>
    %51 = arith.mulf %49, %50 : vector<8x256xf32>
    %52 = arith.addf %47, %51 : vector<8x256xf32>
    %53 = vector.extract_strided_slice %26 {offsets = [48, 0], sizes = [8, 256], strides = [1, 1]} : vector<72x256xf32> to vector<8x256xf32>
    %c241_i32 = arith.constant 241 : i32
    %54 = tpu.dynamic_rotate %53 by %c241_i32 dim 1 : vector<8x256xf32>, i32 -> vector<8x256xf32>
    %55 = vector.broadcast %5 : vector<1x256xf32> to vector<8x256xf32>
    %56 = arith.mulf %54, %55 : vector<8x256xf32>
    %57 = arith.addf %52, %56 : vector<8x256xf32>
    %58 = vector.extract_strided_slice %26 {offsets = [56, 0], sizes = [8, 256], strides = [1, 1]} : vector<72x256xf32> to vector<8x256xf32>
    %c240_i32 = arith.constant 240 : i32
    %59 = tpu.dynamic_rotate %58 by %c240_i32 dim 1 : vector<8x256xf32>, i32 -> vector<8x256xf32>
    %60 = vector.broadcast %6 : vector<1x256xf32> to vector<8x256xf32>
    %61 = arith.mulf %59, %60 : vector<8x256xf32>
    %62 = arith.addf %57, %61 : vector<8x256xf32>
    %63 = vector.extract_strided_slice %26 {offsets = [64, 0], sizes = [8, 256], strides = [1, 1]} : vector<72x256xf32> to vector<8x256xf32>
    %c239_i32 = arith.constant 239 : i32
    %64 = tpu.dynamic_rotate %63 by %c239_i32 dim 1 : vector<8x256xf32>, i32 -> vector<8x256xf32>
    %65 = vector.broadcast %7 : vector<1x256xf32> to vector<8x256xf32>
    %66 = arith.mulf %64, %65 : vector<8x256xf32>
    %67 = arith.addf %62, %66 : vector<8x256xf32>
    %68 = vector.broadcast %14 : vector<8x1xf32> to vector<8x256xf32>
    %69 = arith.addf %67, %68 : vector<8x256xf32>
    %cst_29 = arith.constant 0.000000e+00 : f32
    %70 = vector.broadcast %cst_29 : f32 to vector<8x256xf32>
    %71 = arith.subf %70, %69 : vector<8x256xf32>
    %72 = math.exp %71 : vector<8x256xf32>
    %cst_30 = arith.constant 1.000000e+00 : f32
    %73 = vector.broadcast %cst_30 : f32 to vector<8x256xf32>
    %74 = arith.addf %73, %72 : vector<8x256xf32>
    %75 = tpu.reciprocal %74 {approx = true} : vector<8x256xf32> -> vector<8x256xf32>
    %76 = arith.mulf %75, %11 : vector<8x256xf32>
    %cst_31 = arith.constant dense<0.000000e+00> : vector<72x256xf32>
    %77 = tpu.matmul %13, %76, %cst_31 {dimension_numbers = #tpu.dot_dimension_numbers<[1], [0], [0], [1], [0, 0, 1, 1], [], []>} : vector<72x8xf32>, vector<8x256xf32>, vector<72x256xf32> -> vector<72x256xf32>
    %78 = vector.extract_strided_slice %77 {offsets = [0, 0], sizes = [8, 256], strides = [1, 1]} : vector<72x256xf32> to vector<8x256xf32>
    %c17_i32_32 = arith.constant 17 : i32
    %79 = tpu.dynamic_rotate %78 by %c17_i32_32 dim 1 : vector<8x256xf32>, i32 -> vector<8x256xf32>
    %80 = vector.broadcast %0 : vector<1x256xf32> to vector<8x256xf32>
    %81 = arith.mulf %79, %80 : vector<8x256xf32>
    %82 = vector.extract_strided_slice %77 {offsets = [8, 0], sizes = [8, 256], strides = [1, 1]} : vector<72x256xf32> to vector<8x256xf32>
    %c16_i32_33 = arith.constant 16 : i32
    %83 = tpu.dynamic_rotate %82 by %c16_i32_33 dim 1 : vector<8x256xf32>, i32 -> vector<8x256xf32>
    %84 = vector.broadcast %1 : vector<1x256xf32> to vector<8x256xf32>
    %85 = arith.mulf %83, %84 : vector<8x256xf32>
    %86 = arith.addf %81, %85 : vector<8x256xf32>
    %87 = vector.extract_strided_slice %77 {offsets = [16, 0], sizes = [8, 256], strides = [1, 1]} : vector<72x256xf32> to vector<8x256xf32>
    %c15_i32_34 = arith.constant 15 : i32
    %88 = tpu.dynamic_rotate %87 by %c15_i32_34 dim 1 : vector<8x256xf32>, i32 -> vector<8x256xf32>
    %89 = vector.broadcast %2 : vector<1x256xf32> to vector<8x256xf32>
    %90 = arith.mulf %88, %89 : vector<8x256xf32>
    %91 = arith.addf %86, %90 : vector<8x256xf32>
    %92 = vector.extract_strided_slice %77 {offsets = [24, 0], sizes = [8, 256], strides = [1, 1]} : vector<72x256xf32> to vector<8x256xf32>
    %c1_i32_35 = arith.constant 1 : i32
    %93 = tpu.dynamic_rotate %92 by %c1_i32_35 dim 1 : vector<8x256xf32>, i32 -> vector<8x256xf32>
    %94 = vector.broadcast %3 : vector<1x256xf32> to vector<8x256xf32>
    %95 = arith.mulf %93, %94 : vector<8x256xf32>
    %96 = arith.addf %91, %95 : vector<8x256xf32>
    %97 = vector.extract_strided_slice %77 {offsets = [32, 0], sizes = [8, 256], strides = [1, 1]} : vector<72x256xf32> to vector<8x256xf32>
    %98 = arith.addf %96, %97 : vector<8x256xf32>
    %99 = vector.extract_strided_slice %77 {offsets = [40, 0], sizes = [8, 256], strides = [1, 1]} : vector<72x256xf32> to vector<8x256xf32>
    %c255_i32_36 = arith.constant 255 : i32
    %100 = tpu.dynamic_rotate %99 by %c255_i32_36 dim 1 : vector<8x256xf32>, i32 -> vector<8x256xf32>
    %101 = vector.broadcast %4 : vector<1x256xf32> to vector<8x256xf32>
    %102 = arith.mulf %100, %101 : vector<8x256xf32>
    %103 = arith.addf %98, %102 : vector<8x256xf32>
    %104 = vector.extract_strided_slice %77 {offsets = [48, 0], sizes = [8, 256], strides = [1, 1]} : vector<72x256xf32> to vector<8x256xf32>
    %c241_i32_37 = arith.constant 241 : i32
    %105 = tpu.dynamic_rotate %104 by %c241_i32_37 dim 1 : vector<8x256xf32>, i32 -> vector<8x256xf32>
    %106 = vector.broadcast %5 : vector<1x256xf32> to vector<8x256xf32>
    %107 = arith.mulf %105, %106 : vector<8x256xf32>
    %108 = arith.addf %103, %107 : vector<8x256xf32>
    %109 = vector.extract_strided_slice %77 {offsets = [56, 0], sizes = [8, 256], strides = [1, 1]} : vector<72x256xf32> to vector<8x256xf32>
    %c240_i32_38 = arith.constant 240 : i32
    %110 = tpu.dynamic_rotate %109 by %c240_i32_38 dim 1 : vector<8x256xf32>, i32 -> vector<8x256xf32>
    %111 = vector.broadcast %6 : vector<1x256xf32> to vector<8x256xf32>
    %112 = arith.mulf %110, %111 : vector<8x256xf32>
    %113 = arith.addf %108, %112 : vector<8x256xf32>
    %114 = vector.extract_strided_slice %77 {offsets = [64, 0], sizes = [8, 256], strides = [1, 1]} : vector<72x256xf32> to vector<8x256xf32>
    %c239_i32_39 = arith.constant 239 : i32
    %115 = tpu.dynamic_rotate %114 by %c239_i32_39 dim 1 : vector<8x256xf32>, i32 -> vector<8x256xf32>
    %116 = vector.broadcast %7 : vector<1x256xf32> to vector<8x256xf32>
    %117 = arith.mulf %115, %116 : vector<8x256xf32>
    %118 = arith.addf %113, %117 : vector<8x256xf32>
    %119 = vector.broadcast %15 : vector<8x1xf32> to vector<8x256xf32>
    %120 = arith.addf %118, %119 : vector<8x256xf32>
    %c0_40 = arith.constant 0 : index
    %c0_41 = arith.constant 0 : index
    %c0_42 = arith.constant 0 : index
    %c0_43 = arith.constant 0 : index
    %121 = vector.load %arg5[%c0_40, %c0_41, %c0_42, %c0_43] : memref<1x10x16x256xf32, #tpu.memory_space<vmem>>, vector<1x1x16x256xf32>
    %122 = vector.shape_cast %121 : vector<1x1x16x256xf32> to vector<16x256xf32>
    %123 = vector.extract_strided_slice %122 {offsets = [0, 0], sizes = [8, 256], strides = [1, 1]} : vector<16x256xf32> to vector<8x256xf32>
    %124 = vector.extract_strided_slice %122 {offsets = [8, 0], sizes = [8, 256], strides = [1, 1]} : vector<16x256xf32> to vector<8x256xf32>
    %125 = arith.subf %120, %123 : vector<8x256xf32>
    %126 = math.absf %125 : vector<8x256xf32>
    %cst_44 = arith.constant 0.00999999977 : f32
    %127 = vector.broadcast %cst_44 : f32 to vector<8x256xf32>
    %128 = arith.cmpf olt, %126, %127 : vector<8x256xf32>
    %cst_45 = arith.constant 5.000000e-01 : f32
    %129 = vector.broadcast %cst_45 : f32 to vector<8x256xf32>
    %130 = arith.mulf %129, %126 : vector<8x256xf32>
    %131 = arith.mulf %130, %126 : vector<8x256xf32>
    %cst_46 = arith.constant 0.00999999977 : f32
    %132 = vector.broadcast %cst_46 : f32 to vector<8x256xf32>
    %133 = arith.divf %131, %132 : vector<8x256xf32>
    %cst_47 = arith.constant 5.000000e-03 : f32
    %134 = vector.broadcast %cst_47 : f32 to vector<8x256xf32>
    %135 = arith.subf %126, %134 : vector<8x256xf32>
    %136 = arith.select %128, %133, %135 : vector<8x256xi1>, vector<8x256xf32>
    %137 = arith.mulf %136, %124 : vector<8x256xf32>
    %138 = vector.shape_cast %137 : vector<8x256xf32> to vector<1x8x256xf32>
    %cst_48 = arith.constant dense<0.000000e+00> : vector<1xf32>
    %139 = vector.multi_reduction <add>, %138, %cst_48 [1, 2] : vector<1x8x256xf32> to vector<1xf32>
    %140 = vector.shape_cast %139 : vector<1xf32> to vector<1x1x1xf32>
    %141 = vector.extract %140[0, 0, 0] : f32 from vector<1x1x1xf32>
    %142 = vector.shape_cast %124 : vector<8x256xf32> to vector<1x8x256xf32>
    %cst_49 = arith.constant dense<0.000000e+00> : vector<1xf32>
    %143 = vector.multi_reduction <add>, %142, %cst_49 [1, 2] : vector<1x8x256xf32> to vector<1xf32>
    %144 = vector.shape_cast %143 : vector<1xf32> to vector<1x1x1xf32>
    %145 = vector.extract %144[0, 0, 0] : f32 from vector<1x1x1xf32>
    %c0_i32_50 = arith.constant 0 : i32
    %146 = vector.broadcast %c0_i32_50 : i32 to vector<8x128xi32>
    %147 = arith.cmpi eq, %16, %146 : vector<8x128xi32>
    %cst_51 = arith.constant 0.000000e+00 : f32
    %148 = vector.broadcast %145 : f32 to vector<8x128xf32>
    %149 = vector.broadcast %cst_51 : f32 to vector<8x128xf32>
    %150 = arith.select %21, %148, %149 : vector<8x128xi1>, vector<8x128xf32>
    %151 = vector.broadcast %141 : f32 to vector<8x128xf32>
    %152 = arith.select %19, %151, %150 : vector<8x128xi1>, vector<8x128xf32>
    %cst_52 = arith.constant 0.000000e+00 : f32
    %153 = vector.broadcast %cst_52 : f32 to vector<8x128xf32>
    %154 = arith.select %147, %152, %153 : vector<8x128xi1>, vector<8x128xf32>
    %155 = arith.addf %22, %154 : vector<8x128xf32>
    %c0_53 = arith.constant 0 : index
    %c1_54 = arith.constant 1 : index
    %c0_55 = arith.constant 0 : index
    %c0_56 = arith.constant 0 : index
    %156 = vector.load %arg2[%c0_53, %c1_54, %c0_55, %c0_56] : memref<1x10x256x256xbf16, #tpu.memory_space<vmem>>, vector<1x1x256x256xbf16>
    %157 = vector.shape_cast %156 : vector<1x1x256x256xbf16> to vector<256x256xbf16>
    %cst_57 = arith.constant dense<0.000000e+00> : vector<8x256xf32>
    %158 = tpu.matmul %9, %157, %cst_57 {dimension_numbers = #tpu.dot_dimension_numbers<[1], [0], [0], [1], [0, 0, 1, 1], [], []>} : vector<8x256xbf16>, vector<256x256xbf16>, vector<8x256xf32> -> vector<8x256xf32>
    %cst_58 = arith.constant dense<0.000000e+00> : vector<72x256xf32>
    %159 = tpu.matmul %12, %158, %cst_58 {dimension_numbers = #tpu.dot_dimension_numbers<[1], [0], [0], [1], [0, 0, 1, 1], [], []>} : vector<72x8xf32>, vector<8x256xf32>, vector<72x256xf32> -> vector<72x256xf32>
    %160 = vector.extract_strided_slice %159 {offsets = [0, 0], sizes = [8, 256], strides = [1, 1]} : vector<72x256xf32> to vector<8x256xf32>
    %c17_i32_59 = arith.constant 17 : i32
    %161 = tpu.dynamic_rotate %160 by %c17_i32_59 dim 1 : vector<8x256xf32>, i32 -> vector<8x256xf32>
    %162 = vector.broadcast %0 : vector<1x256xf32> to vector<8x256xf32>
    %163 = arith.mulf %161, %162 : vector<8x256xf32>
    %164 = vector.extract_strided_slice %159 {offsets = [8, 0], sizes = [8, 256], strides = [1, 1]} : vector<72x256xf32> to vector<8x256xf32>
    %c16_i32_60 = arith.constant 16 : i32
    %165 = tpu.dynamic_rotate %164 by %c16_i32_60 dim 1 : vector<8x256xf32>, i32 -> vector<8x256xf32>
    %166 = vector.broadcast %1 : vector<1x256xf32> to vector<8x256xf32>
    %167 = arith.mulf %165, %166 : vector<8x256xf32>
    %168 = arith.addf %163, %167 : vector<8x256xf32>
    %169 = vector.extract_strided_slice %159 {offsets = [16, 0], sizes = [8, 256], strides = [1, 1]} : vector<72x256xf32> to vector<8x256xf32>
    %c15_i32_61 = arith.constant 15 : i32
    %170 = tpu.dynamic_rotate %169 by %c15_i32_61 dim 1 : vector<8x256xf32>, i32 -> vector<8x256xf32>
    %171 = vector.broadcast %2 : vector<1x256xf32> to vector<8x256xf32>
    %172 = arith.mulf %170, %171 : vector<8x256xf32>
    %173 = arith.addf %168, %172 : vector<8x256xf32>
    %174 = vector.extract_strided_slice %159 {offsets = [24, 0], sizes = [8, 256], strides = [1, 1]} : vector<72x256xf32> to vector<8x256xf32>
    %c1_i32_62 = arith.constant 1 : i32
    %175 = tpu.dynamic_rotate %174 by %c1_i32_62 dim 1 : vector<8x256xf32>, i32 -> vector<8x256xf32>
    %176 = vector.broadcast %3 : vector<1x256xf32> to vector<8x256xf32>
    %177 = arith.mulf %175, %176 : vector<8x256xf32>
    %178 = arith.addf %173, %177 : vector<8x256xf32>
    %179 = vector.extract_strided_slice %159 {offsets = [32, 0], sizes = [8, 256], strides = [1, 1]} : vector<72x256xf32> to vector<8x256xf32>
    %180 = arith.addf %178, %179 : vector<8x256xf32>
    %181 = vector.extract_strided_slice %159 {offsets = [40, 0], sizes = [8, 256], strides = [1, 1]} : vector<72x256xf32> to vector<8x256xf32>
    %c255_i32_63 = arith.constant 255 : i32
    %182 = tpu.dynamic_rotate %181 by %c255_i32_63 dim 1 : vector<8x256xf32>, i32 -> vector<8x256xf32>
    %183 = vector.broadcast %4 : vector<1x256xf32> to vector<8x256xf32>
    %184 = arith.mulf %182, %183 : vector<8x256xf32>
    %185 = arith.addf %180, %184 : vector<8x256xf32>
    %186 = vector.extract_strided_slice %159 {offsets = [48, 0], sizes = [8, 256], strides = [1, 1]} : vector<72x256xf32> to vector<8x256xf32>
    %c241_i32_64 = arith.constant 241 : i32
    %187 = tpu.dynamic_rotate %186 by %c241_i32_64 dim 1 : vector<8x256xf32>, i32 -> vector<8x256xf32>
    %188 = vector.broadcast %5 : vector<1x256xf32> to vector<8x256xf32>
    %189 = arith.mulf %187, %188 : vector<8x256xf32>
    %190 = arith.addf %185, %189 : vector<8x256xf32>
    %191 = vector.extract_strided_slice %159 {offsets = [56, 0], sizes = [8, 256], strides = [1, 1]} : vector<72x256xf32> to vector<8x256xf32>
    %c240_i32_65 = arith.constant 240 : i32
    %192 = tpu.dynamic_rotate %191 by %c240_i32_65 dim 1 : vector<8x256xf32>, i32 -> vector<8x256xf32>
    %193 = vector.broadcast %6 : vector<1x256xf32> to vector<8x256xf32>
    %194 = arith.mulf %192, %193 : vector<8x256xf32>
    %195 = arith.addf %190, %194 : vector<8x256xf32>
    %196 = vector.extract_strided_slice %159 {offsets = [64, 0], sizes = [8, 256], strides = [1, 1]} : vector<72x256xf32> to vector<8x256xf32>
    %c239_i32_66 = arith.constant 239 : i32
    %197 = tpu.dynamic_rotate %196 by %c239_i32_66 dim 1 : vector<8x256xf32>, i32 -> vector<8x256xf32>
    %198 = vector.broadcast %7 : vector<1x256xf32> to vector<8x256xf32>
    %199 = arith.mulf %197, %198 : vector<8x256xf32>
    %200 = arith.addf %195, %199 : vector<8x256xf32>
    %201 = vector.broadcast %14 : vector<8x1xf32> to vector<8x256xf32>
    %202 = arith.addf %200, %201 : vector<8x256xf32>
    %cst_67 = arith.constant 0.000000e+00 : f32
    %203 = vector.broadcast %cst_67 : f32 to vector<8x256xf32>
    %204 = arith.subf %203, %202 : vector<8x256xf32>
    %205 = math.exp %204 : vector<8x256xf32>
    %cst_68 = arith.constant 1.000000e+00 : f32
    %206 = vector.broadcast %cst_68 : f32 to vector<8x256xf32>
    %207 = arith.addf %206, %205 : vector<8x256xf32>
    %208 = tpu.reciprocal %207 {approx = true} : vector<8x256xf32> -> vector<8x256xf32>
    %209 = arith.mulf %208, %11 : vector<8x256xf32>
    %cst_69 = arith.constant dense<0.000000e+00> : vector<72x256xf32>
    %210 = tpu.matmul %13, %209, %cst_69 {dimension_numbers = #tpu.dot_dimension_numbers<[1], [0], [0], [1], [0, 0, 1, 1], [], []>} : vector<72x8xf32>, vector<8x256xf32>, vector<72x256xf32> -> vector<72x256xf32>
    %211 = vector.extract_strided_slice %210 {offsets = [0, 0], sizes = [8, 256], strides = [1, 1]} : vector<72x256xf32> to vector<8x256xf32>
    %c17_i32_70 = arith.constant 17 : i32
    %212 = tpu.dynamic_rotate %211 by %c17_i32_70 dim 1 : vector<8x256xf32>, i32 -> vector<8x256xf32>
    %213 = vector.broadcast %0 : vector<1x256xf32> to vector<8x256xf32>
    %214 = arith.mulf %212, %213 : vector<8x256xf32>
    %215 = vector.extract_strided_slice %210 {offsets = [8, 0], sizes = [8, 256], strides = [1, 1]} : vector<72x256xf32> to vector<8x256xf32>
    %c16_i32_71 = arith.constant 16 : i32
    %216 = tpu.dynamic_rotate %215 by %c16_i32_71 dim 1 : vector<8x256xf32>, i32 -> vector<8x256xf32>
    %217 = vector.broadcast %1 : vector<1x256xf32> to vector<8x256xf32>
    %218 = arith.mulf %216, %217 : vector<8x256xf32>
    %219 = arith.addf %214, %218 : vector<8x256xf32>
    %220 = vector.extract_strided_slice %210 {offsets = [16, 0], sizes = [8, 256], strides = [1, 1]} : vector<72x256xf32> to vector<8x256xf32>
    %c15_i32_72 = arith.constant 15 : i32
    %221 = tpu.dynamic_rotate %220 by %c15_i32_72 dim 1 : vector<8x256xf32>, i32 -> vector<8x256xf32>
    %222 = vector.broadcast %2 : vector<1x256xf32> to vector<8x256xf32>
    %223 = arith.mulf %221, %222 : vector<8x256xf32>
    %224 = arith.addf %219, %223 : vector<8x256xf32>
    %225 = vector.extract_strided_slice %210 {offsets = [24, 0], sizes = [8, 256], strides = [1, 1]} : vector<72x256xf32> to vector<8x256xf32>
    %c1_i32_73 = arith.constant 1 : i32
    %226 = tpu.dynamic_rotate %225 by %c1_i32_73 dim 1 : vector<8x256xf32>, i32 -> vector<8x256xf32>
    %227 = vector.broadcast %3 : vector<1x256xf32> to vector<8x256xf32>
    %228 = arith.mulf %226, %227 : vector<8x256xf32>
    %229 = arith.addf %224, %228 : vector<8x256xf32>
    %230 = vector.extract_strided_slice %210 {offsets = [32, 0], sizes = [8, 256], strides = [1, 1]} : vector<72x256xf32> to vector<8x256xf32>
    %231 = arith.addf %229, %230 : vector<8x256xf32>
    %232 = vector.extract_strided_slice %210 {offsets = [40, 0], sizes = [8, 256], strides = [1, 1]} : vector<72x256xf32> to vector<8x256xf32>
    %c255_i32_74 = arith.constant 255 : i32
    %233 = tpu.dynamic_rotate %232 by %c255_i32_74 dim 1 : vector<8x256xf32>, i32 -> vector<8x256xf32>
    %234 = vector.broadcast %4 : vector<1x256xf32> to vector<8x256xf32>
    %235 = arith.mulf %233, %234 : vector<8x256xf32>
    %236 = arith.addf %231, %235 : vector<8x256xf32>
    %237 = vector.extract_strided_slice %210 {offsets = [48, 0], sizes = [8, 256], strides = [1, 1]} : vector<72x256xf32> to vector<8x256xf32>
    %c241_i32_75 = arith.constant 241 : i32
    %238 = tpu.dynamic_rotate %237 by %c241_i32_75 dim 1 : vector<8x256xf32>, i32 -> vector<8x256xf32>
    %239 = vector.broadcast %5 : vector<1x256xf32> to vector<8x256xf32>
    %240 = arith.mulf %238, %239 : vector<8x256xf32>
    %241 = arith.addf %236, %240 : vector<8x256xf32>
    %242 = vector.extract_strided_slice %210 {offsets = [56, 0], sizes = [8, 256], strides = [1, 1]} : vector<72x256xf32> to vector<8x256xf32>
    %c240_i32_76 = arith.constant 240 : i32
    %243 = tpu.dynamic_rotate %242 by %c240_i32_76 dim 1 : vector<8x256xf32>, i32 -> vector<8x256xf32>
    %244 = vector.broadcast %6 : vector<1x256xf32> to vector<8x256xf32>
    %245 = arith.mulf %243, %244 : vector<8x256xf32>
    %246 = arith.addf %241, %245 : vector<8x256xf32>
    %247 = vector.extract_strided_slice %210 {offsets = [64, 0], sizes = [8, 256], strides = [1, 1]} : vector<72x256xf32> to vector<8x256xf32>
    %c239_i32_77 = arith.constant 239 : i32
    %248 = tpu.dynamic_rotate %247 by %c239_i32_77 dim 1 : vector<8x256xf32>, i32 -> vector<8x256xf32>
    %249 = vector.broadcast %7 : vector<1x256xf32> to vector<8x256xf32>
    %250 = arith.mulf %248, %249 : vector<8x256xf32>
    %251 = arith.addf %246, %250 : vector<8x256xf32>
    %252 = vector.broadcast %15 : vector<8x1xf32> to vector<8x256xf32>
    %253 = arith.addf %251, %252 : vector<8x256xf32>
    %c0_78 = arith.constant 0 : index
    %c1_79 = arith.constant 1 : index
    %c0_80 = arith.constant 0 : index
    %c0_81 = arith.constant 0 : index
    %254 = vector.load %arg5[%c0_78, %c1_79, %c0_80, %c0_81] : memref<1x10x16x256xf32, #tpu.memory_space<vmem>>, vector<1x1x16x256xf32>
    %255 = vector.shape_cast %254 : vector<1x1x16x256xf32> to vector<16x256xf32>
    %256 = vector.extract_strided_slice %255 {offsets = [0, 0], sizes = [8, 256], strides = [1, 1]} : vector<16x256xf32> to vector<8x256xf32>
    %257 = vector.extract_strided_slice %255 {offsets = [8, 0], sizes = [8, 256], strides = [1, 1]} : vector<16x256xf32> to vector<8x256xf32>
    %258 = arith.subf %253, %256 : vector<8x256xf32>
    %259 = math.absf %258 : vector<8x256xf32>
    %cst_82 = arith.constant 0.00999999977 : f32
    %260 = vector.broadcast %cst_82 : f32 to vector<8x256xf32>
    %261 = arith.cmpf olt, %259, %260 : vector<8x256xf32>
    %cst_83 = arith.constant 5.000000e-01 : f32
    %262 = vector.broadcast %cst_83 : f32 to vector<8x256xf32>
    %263 = arith.mulf %262, %259 : vector<8x256xf32>
    %264 = arith.mulf %263, %259 : vector<8x256xf32>
    %cst_84 = arith.constant 0.00999999977 : f32
    %265 = vector.broadcast %cst_84 : f32 to vector<8x256xf32>
    %266 = arith.divf %264, %265 : vector<8x256xf32>
    %cst_85 = arith.constant 5.000000e-03 : f32
    %267 = vector.broadcast %cst_85 : f32 to vector<8x256xf32>
    %268 = arith.subf %259, %267 : vector<8x256xf32>
    %269 = arith.select %261, %266, %268 : vector<8x256xi1>, vector<8x256xf32>
    %270 = arith.mulf %269, %257 : vector<8x256xf32>
    %271 = vector.shape_cast %270 : vector<8x256xf32> to vector<1x8x256xf32>
    %cst_86 = arith.constant dense<0.000000e+00> : vector<1xf32>
    %272 = vector.multi_reduction <add>, %271, %cst_86 [1, 2] : vector<1x8x256xf32> to vector<1xf32>
    %273 = vector.shape_cast %272 : vector<1xf32> to vector<1x1x1xf32>
    %274 = vector.extract %273[0, 0, 0] : f32 from vector<1x1x1xf32>
    %275 = vector.shape_cast %257 : vector<8x256xf32> to vector<1x8x256xf32>
    %cst_87 = arith.constant dense<0.000000e+00> : vector<1xf32>
    %276 = vector.multi_reduction <add>, %275, %cst_87 [1, 2] : vector<1x8x256xf32> to vector<1xf32>
    %277 = vector.shape_cast %276 : vector<1xf32> to vector<1x1x1xf32>
    %278 = vector.extract %277[0, 0, 0] : f32 from vector<1x1x1xf32>
    %c1_i32_88 = arith.constant 1 : i32
    %279 = vector.broadcast %c1_i32_88 : i32 to vector<8x128xi32>
    %280 = arith.cmpi eq, %16, %279 : vector<8x128xi32>
    %cst_89 = arith.constant 0.000000e+00 : f32
    %281 = vector.broadcast %278 : f32 to vector<8x128xf32>
    %282 = vector.broadcast %cst_89 : f32 to vector<8x128xf32>
    %283 = arith.select %21, %281, %282 : vector<8x128xi1>, vector<8x128xf32>
    %284 = vector.broadcast %274 : f32 to vector<8x128xf32>
    %285 = arith.select %19, %284, %283 : vector<8x128xi1>, vector<8x128xf32>
    %cst_90 = arith.constant 0.000000e+00 : f32
    %286 = vector.broadcast %cst_90 : f32 to vector<8x128xf32>
    %287 = arith.select %280, %285, %286 : vector<8x128xi1>, vector<8x128xf32>
    %288 = arith.addf %155, %287 : vector<8x128xf32>
    %c0_91 = arith.constant 0 : index
    %c2_92 = arith.constant 2 : index
    %c0_93 = arith.constant 0 : index
    %c0_94 = arith.constant 0 : index
    %289 = vector.load %arg2[%c0_91, %c2_92, %c0_93, %c0_94] : memref<1x10x256x256xbf16, #tpu.memory_space<vmem>>, vector<1x1x256x256xbf16>
    %290 = vector.shape_cast %289 : vector<1x1x256x256xbf16> to vector<256x256xbf16>
    %cst_95 = arith.constant dense<0.000000e+00> : vector<8x256xf32>
    %291 = tpu.matmul %9, %290, %cst_95 {dimension_numbers = #tpu.dot_dimension_numbers<[1], [0], [0], [1], [0, 0, 1, 1], [], []>} : vector<8x256xbf16>, vector<256x256xbf16>, vector<8x256xf32> -> vector<8x256xf32>
    %cst_96 = arith.constant dense<0.000000e+00> : vector<72x256xf32>
    %292 = tpu.matmul %12, %291, %cst_96 {dimension_numbers = #tpu.dot_dimension_numbers<[1], [0], [0], [1], [0, 0, 1, 1], [], []>} : vector<72x8xf32>, vector<8x256xf32>, vector<72x256xf32> -> vector<72x256xf32>
    %293 = vector.extract_strided_slice %292 {offsets = [0, 0], sizes = [8, 256], strides = [1, 1]} : vector<72x256xf32> to vector<8x256xf32>
    %c17_i32_97 = arith.constant 17 : i32
    %294 = tpu.dynamic_rotate %293 by %c17_i32_97 dim 1 : vector<8x256xf32>, i32 -> vector<8x256xf32>
    %295 = vector.broadcast %0 : vector<1x256xf32> to vector<8x256xf32>
    %296 = arith.mulf %294, %295 : vector<8x256xf32>
    %297 = vector.extract_strided_slice %292 {offsets = [8, 0], sizes = [8, 256], strides = [1, 1]} : vector<72x256xf32> to vector<8x256xf32>
    %c16_i32_98 = arith.constant 16 : i32
    %298 = tpu.dynamic_rotate %297 by %c16_i32_98 dim 1 : vector<8x256xf32>, i32 -> vector<8x256xf32>
    %299 = vector.broadcast %1 : vector<1x256xf32> to vector<8x256xf32>
    %300 = arith.mulf %298, %299 : vector<8x256xf32>
    %301 = arith.addf %296, %300 : vector<8x256xf32>
    %302 = vector.extract_strided_slice %292 {offsets = [16, 0], sizes = [8, 256], strides = [1, 1]} : vector<72x256xf32> to vector<8x256xf32>
    %c15_i32_99 = arith.constant 15 : i32
    %303 = tpu.dynamic_rotate %302 by %c15_i32_99 dim 1 : vector<8x256xf32>, i32 -> vector<8x256xf32>
    %304 = vector.broadcast %2 : vector<1x256xf32> to vector<8x256xf32>
    %305 = arith.mulf %303, %304 : vector<8x256xf32>
    %306 = arith.addf %301, %305 : vector<8x256xf32>
    %307 = vector.extract_strided_slice %292 {offsets = [24, 0], sizes = [8, 256], strides = [1, 1]} : vector<72x256xf32> to vector<8x256xf32>
    %c1_i32_100 = arith.constant 1 : i32
    %308 = tpu.dynamic_rotate %307 by %c1_i32_100 dim 1 : vector<8x256xf32>, i32 -> vector<8x256xf32>
    %309 = vector.broadcast %3 : vector<1x256xf32> to vector<8x256xf32>
    %310 = arith.mulf %308, %309 : vector<8x256xf32>
    %311 = arith.addf %306, %310 : vector<8x256xf32>
    %312 = vector.extract_strided_slice %292 {offsets = [32, 0], sizes = [8, 256], strides = [1, 1]} : vector<72x256xf32> to vector<8x256xf32>
    %313 = arith.addf %311, %312 : vector<8x256xf32>
    %314 = vector.extract_strided_slice %292 {offsets = [40, 0], sizes = [8, 256], strides = [1, 1]} : vector<72x256xf32> to vector<8x256xf32>
    %c255_i32_101 = arith.constant 255 : i32
    %315 = tpu.dynamic_rotate %314 by %c255_i32_101 dim 1 : vector<8x256xf32>, i32 -> vector<8x256xf32>
    %316 = vector.broadcast %4 : vector<1x256xf32> to vector<8x256xf32>
    %317 = arith.mulf %315, %316 : vector<8x256xf32>
    %318 = arith.addf %313, %317 : vector<8x256xf32>
    %319 = vector.extract_strided_slice %292 {offsets = [48, 0], sizes = [8, 256], strides = [1, 1]} : vector<72x256xf32> to vector<8x256xf32>
    %c241_i32_102 = arith.constant 241 : i32
    %320 = tpu.dynamic_rotate %319 by %c241_i32_102 dim 1 : vector<8x256xf32>, i32 -> vector<8x256xf32>
    %321 = vector.broadcast %5 : vector<1x256xf32> to vector<8x256xf32>
    %322 = arith.mulf %320, %321 : vector<8x256xf32>
    %323 = arith.addf %318, %322 : vector<8x256xf32>
    %324 = vector.extract_strided_slice %292 {offsets = [56, 0], sizes = [8, 256], strides = [1, 1]} : vector<72x256xf32> to vector<8x256xf32>
    %c240_i32_103 = arith.constant 240 : i32
    %325 = tpu.dynamic_rotate %324 by %c240_i32_103 dim 1 : vector<8x256xf32>, i32 -> vector<8x256xf32>
    %326 = vector.broadcast %6 : vector<1x256xf32> to vector<8x256xf32>
    %327 = arith.mulf %325, %326 : vector<8x256xf32>
    %328 = arith.addf %323, %327 : vector<8x256xf32>
    %329 = vector.extract_strided_slice %292 {offsets = [64, 0], sizes = [8, 256], strides = [1, 1]} : vector<72x256xf32> to vector<8x256xf32>
    %c239_i32_104 = arith.constant 239 : i32
    %330 = tpu.dynamic_rotate %329 by %c239_i32_104 dim 1 : vector<8x256xf32>, i32 -> vector<8x256xf32>
    %331 = vector.broadcast %7 : vector<1x256xf32> to vector<8x256xf32>
    %332 = arith.mulf %330, %331 : vector<8x256xf32>
    %333 = arith.addf %328, %332 : vector<8x256xf32>
    %334 = vector.broadcast %14 : vector<8x1xf32> to vector<8x256xf32>
    %335 = arith.addf %333, %334 : vector<8x256xf32>
    %cst_105 = arith.constant 0.000000e+00 : f32
    %336 = vector.broadcast %cst_105 : f32 to vector<8x256xf32>
    %337 = arith.subf %336, %335 : vector<8x256xf32>
    %338 = math.exp %337 : vector<8x256xf32>
    %cst_106 = arith.constant 1.000000e+00 : f32
    %339 = vector.broadcast %cst_106 : f32 to vector<8x256xf32>
    %340 = arith.addf %339, %338 : vector<8x256xf32>
    %341 = tpu.reciprocal %340 {approx = true} : vector<8x256xf32> -> vector<8x256xf32>
    %342 = arith.mulf %341, %11 : vector<8x256xf32>
    %cst_107 = arith.constant dense<0.000000e+00> : vector<72x256xf32>
    %343 = tpu.matmul %13, %342, %cst_107 {dimension_numbers = #tpu.dot_dimension_numbers<[1], [0], [0], [1], [0, 0, 1, 1], [], []>} : vector<72x8xf32>, vector<8x256xf32>, vector<72x256xf32> -> vector<72x256xf32>
    %344 = vector.extract_strided_slice %343 {offsets = [0, 0], sizes = [8, 256], strides = [1, 1]} : vector<72x256xf32> to vector<8x256xf32>
    %c17_i32_108 = arith.constant 17 : i32
    %345 = tpu.dynamic_rotate %344 by %c17_i32_108 dim 1 : vector<8x256xf32>, i32 -> vector<8x256xf32>
    %346 = vector.broadcast %0 : vector<1x256xf32> to vector<8x256xf32>
    %347 = arith.mulf %345, %346 : vector<8x256xf32>
    %348 = vector.extract_strided_slice %343 {offsets = [8, 0], sizes = [8, 256], strides = [1, 1]} : vector<72x256xf32> to vector<8x256xf32>
    %c16_i32_109 = arith.constant 16 : i32
    %349 = tpu.dynamic_rotate %348 by %c16_i32_109 dim 1 : vector<8x256xf32>, i32 -> vector<8x256xf32>
    %350 = vector.broadcast %1 : vector<1x256xf32> to vector<8x256xf32>
    %351 = arith.mulf %349, %350 : vector<8x256xf32>
    %352 = arith.addf %347, %351 : vector<8x256xf32>
    %353 = vector.extract_strided_slice %343 {offsets = [16, 0], sizes = [8, 256], strides = [1, 1]} : vector<72x256xf32> to vector<8x256xf32>
    %c15_i32_110 = arith.constant 15 : i32
    %354 = tpu.dynamic_rotate %353 by %c15_i32_110 dim 1 : vector<8x256xf32>, i32 -> vector<8x256xf32>
    %355 = vector.broadcast %2 : vector<1x256xf32> to vector<8x256xf32>
    %356 = arith.mulf %354, %355 : vector<8x256xf32>
    %357 = arith.addf %352, %356 : vector<8x256xf32>
    %358 = vector.extract_strided_slice %343 {offsets = [24, 0], sizes = [8, 256], strides = [1, 1]} : vector<72x256xf32> to vector<8x256xf32>
    %c1_i32_111 = arith.constant 1 : i32
    %359 = tpu.dynamic_rotate %358 by %c1_i32_111 dim 1 : vector<8x256xf32>, i32 -> vector<8x256xf32>
    %360 = vector.broadcast %3 : vector<1x256xf32> to vector<8x256xf32>
    %361 = arith.mulf %359, %360 : vector<8x256xf32>
    %362 = arith.addf %357, %361 : vector<8x256xf32>
    %363 = vector.extract_strided_slice %343 {offsets = [32, 0], sizes = [8, 256], strides = [1, 1]} : vector<72x256xf32> to vector<8x256xf32>
    %364 = arith.addf %362, %363 : vector<8x256xf32>
    %365 = vector.extract_strided_slice %343 {offsets = [40, 0], sizes = [8, 256], strides = [1, 1]} : vector<72x256xf32> to vector<8x256xf32>
    %c255_i32_112 = arith.constant 255 : i32
    %366 = tpu.dynamic_rotate %365 by %c255_i32_112 dim 1 : vector<8x256xf32>, i32 -> vector<8x256xf32>
    %367 = vector.broadcast %4 : vector<1x256xf32> to vector<8x256xf32>
    %368 = arith.mulf %366, %367 : vector<8x256xf32>
    %369 = arith.addf %364, %368 : vector<8x256xf32>
    %370 = vector.extract_strided_slice %343 {offsets = [48, 0], sizes = [8, 256], strides = [1, 1]} : vector<72x256xf32> to vector<8x256xf32>
    %c241_i32_113 = arith.constant 241 : i32
    %371 = tpu.dynamic_rotate %370 by %c241_i32_113 dim 1 : vector<8x256xf32>, i32 -> vector<8x256xf32>
    %372 = vector.broadcast %5 : vector<1x256xf32> to vector<8x256xf32>
    %373 = arith.mulf %371, %372 : vector<8x256xf32>
    %374 = arith.addf %369, %373 : vector<8x256xf32>
    %375 = vector.extract_strided_slice %343 {offsets = [56, 0], sizes = [8, 256], strides = [1, 1]} : vector<72x256xf32> to vector<8x256xf32>
    %c240_i32_114 = arith.constant 240 : i32
    %376 = tpu.dynamic_rotate %375 by %c240_i32_114 dim 1 : vector<8x256xf32>, i32 -> vector<8x256xf32>
    %377 = vector.broadcast %6 : vector<1x256xf32> to vector<8x256xf32>
    %378 = arith.mulf %376, %377 : vector<8x256xf32>
    %379 = arith.addf %374, %378 : vector<8x256xf32>
    %380 = vector.extract_strided_slice %343 {offsets = [64, 0], sizes = [8, 256], strides = [1, 1]} : vector<72x256xf32> to vector<8x256xf32>
    %c239_i32_115 = arith.constant 239 : i32
    %381 = tpu.dynamic_rotate %380 by %c239_i32_115 dim 1 : vector<8x256xf32>, i32 -> vector<8x256xf32>
    %382 = vector.broadcast %7 : vector<1x256xf32> to vector<8x256xf32>
    %383 = arith.mulf %381, %382 : vector<8x256xf32>
    %384 = arith.addf %379, %383 : vector<8x256xf32>
    %385 = vector.broadcast %15 : vector<8x1xf32> to vector<8x256xf32>
    %386 = arith.addf %384, %385 : vector<8x256xf32>
    %c0_116 = arith.constant 0 : index
    %c2_117 = arith.constant 2 : index
    %c0_118 = arith.constant 0 : index
    %c0_119 = arith.constant 0 : index
    %387 = vector.load %arg5[%c0_116, %c2_117, %c0_118, %c0_119] : memref<1x10x16x256xf32, #tpu.memory_space<vmem>>, vector<1x1x16x256xf32>
    %388 = vector.shape_cast %387 : vector<1x1x16x256xf32> to vector<16x256xf32>
    %389 = vector.extract_strided_slice %388 {offsets = [0, 0], sizes = [8, 256], strides = [1, 1]} : vector<16x256xf32> to vector<8x256xf32>
    %390 = vector.extract_strided_slice %388 {offsets = [8, 0], sizes = [8, 256], strides = [1, 1]} : vector<16x256xf32> to vector<8x256xf32>
    %391 = arith.subf %386, %389 : vector<8x256xf32>
    %392 = math.absf %391 : vector<8x256xf32>
    %cst_120 = arith.constant 0.00999999977 : f32
    %393 = vector.broadcast %cst_120 : f32 to vector<8x256xf32>
    %394 = arith.cmpf olt, %392, %393 : vector<8x256xf32>
    %cst_121 = arith.constant 5.000000e-01 : f32
    %395 = vector.broadcast %cst_121 : f32 to vector<8x256xf32>
    %396 = arith.mulf %395, %392 : vector<8x256xf32>
    %397 = arith.mulf %396, %392 : vector<8x256xf32>
    %cst_122 = arith.constant 0.00999999977 : f32
    %398 = vector.broadcast %cst_122 : f32 to vector<8x256xf32>
    %399 = arith.divf %397, %398 : vector<8x256xf32>
    %cst_123 = arith.constant 5.000000e-03 : f32
    %400 = vector.broadcast %cst_123 : f32 to vector<8x256xf32>
    %401 = arith.subf %392, %400 : vector<8x256xf32>
    %402 = arith.select %394, %399, %401 : vector<8x256xi1>, vector<8x256xf32>
    %403 = arith.mulf %402, %390 : vector<8x256xf32>
    %404 = vector.shape_cast %403 : vector<8x256xf32> to vector<1x8x256xf32>
    %cst_124 = arith.constant dense<0.000000e+00> : vector<1xf32>
    %405 = vector.multi_reduction <add>, %404, %cst_124 [1, 2] : vector<1x8x256xf32> to vector<1xf32>
    %406 = vector.shape_cast %405 : vector<1xf32> to vector<1x1x1xf32>
    %407 = vector.extract %406[0, 0, 0] : f32 from vector<1x1x1xf32>
    %408 = vector.shape_cast %390 : vector<8x256xf32> to vector<1x8x256xf32>
    %cst_125 = arith.constant dense<0.000000e+00> : vector<1xf32>
    %409 = vector.multi_reduction <add>, %408, %cst_125 [1, 2] : vector<1x8x256xf32> to vector<1xf32>
    %410 = vector.shape_cast %409 : vector<1xf32> to vector<1x1x1xf32>
    %411 = vector.extract %410[0, 0, 0] : f32 from vector<1x1x1xf32>
    %c2_i32 = arith.constant 2 : i32
    %412 = vector.broadcast %c2_i32 : i32 to vector<8x128xi32>
    %413 = arith.cmpi eq, %16, %412 : vector<8x128xi32>
    %cst_126 = arith.constant 0.000000e+00 : f32
    %414 = vector.broadcast %411 : f32 to vector<8x128xf32>
    %415 = vector.broadcast %cst_126 : f32 to vector<8x128xf32>
    %416 = arith.select %21, %414, %415 : vector<8x128xi1>, vector<8x128xf32>
    %417 = vector.broadcast %407 : f32 to vector<8x128xf32>
    %418 = arith.select %19, %417, %416 : vector<8x128xi1>, vector<8x128xf32>
    %cst_127 = arith.constant 0.000000e+00 : f32
    %419 = vector.broadcast %cst_127 : f32 to vector<8x128xf32>
    %420 = arith.select %413, %418, %419 : vector<8x128xi1>, vector<8x128xf32>
    %421 = arith.addf %288, %420 : vector<8x128xf32>
    %c0_128 = arith.constant 0 : index
    %c3_129 = arith.constant 3 : index
    %c0_130 = arith.constant 0 : index
    %c0_131 = arith.constant 0 : index
    %422 = vector.load %arg2[%c0_128, %c3_129, %c0_130, %c0_131] : memref<1x10x256x256xbf16, #tpu.memory_space<vmem>>, vector<1x1x256x256xbf16>
    %423 = vector.shape_cast %422 : vector<1x1x256x256xbf16> to vector<256x256xbf16>
    %cst_132 = arith.constant dense<0.000000e+00> : vector<8x256xf32>
    %424 = tpu.matmul %9, %423, %cst_132 {dimension_numbers = #tpu.dot_dimension_numbers<[1], [0], [0], [1], [0, 0, 1, 1], [], []>} : vector<8x256xbf16>, vector<256x256xbf16>, vector<8x256xf32> -> vector<8x256xf32>
    %cst_133 = arith.constant dense<0.000000e+00> : vector<72x256xf32>
    %425 = tpu.matmul %12, %424, %cst_133 {dimension_numbers = #tpu.dot_dimension_numbers<[1], [0], [0], [1], [0, 0, 1, 1], [], []>} : vector<72x8xf32>, vector<8x256xf32>, vector<72x256xf32> -> vector<72x256xf32>
    %426 = vector.extract_strided_slice %425 {offsets = [0, 0], sizes = [8, 256], strides = [1, 1]} : vector<72x256xf32> to vector<8x256xf32>
    %c17_i32_134 = arith.constant 17 : i32
    %427 = tpu.dynamic_rotate %426 by %c17_i32_134 dim 1 : vector<8x256xf32>, i32 -> vector<8x256xf32>
    %428 = vector.broadcast %0 : vector<1x256xf32> to vector<8x256xf32>
    %429 = arith.mulf %427, %428 : vector<8x256xf32>
    %430 = vector.extract_strided_slice %425 {offsets = [8, 0], sizes = [8, 256], strides = [1, 1]} : vector<72x256xf32> to vector<8x256xf32>
    %c16_i32_135 = arith.constant 16 : i32
    %431 = tpu.dynamic_rotate %430 by %c16_i32_135 dim 1 : vector<8x256xf32>, i32 -> vector<8x256xf32>
    %432 = vector.broadcast %1 : vector<1x256xf32> to vector<8x256xf32>
    %433 = arith.mulf %431, %432 : vector<8x256xf32>
    %434 = arith.addf %429, %433 : vector<8x256xf32>
    %435 = vector.extract_strided_slice %425 {offsets = [16, 0], sizes = [8, 256], strides = [1, 1]} : vector<72x256xf32> to vector<8x256xf32>
    %c15_i32_136 = arith.constant 15 : i32
    %436 = tpu.dynamic_rotate %435 by %c15_i32_136 dim 1 : vector<8x256xf32>, i32 -> vector<8x256xf32>
    %437 = vector.broadcast %2 : vector<1x256xf32> to vector<8x256xf32>
    %438 = arith.mulf %436, %437 : vector<8x256xf32>
    %439 = arith.addf %434, %438 : vector<8x256xf32>
    %440 = vector.extract_strided_slice %425 {offsets = [24, 0], sizes = [8, 256], strides = [1, 1]} : vector<72x256xf32> to vector<8x256xf32>
    %c1_i32_137 = arith.constant 1 : i32
    %441 = tpu.dynamic_rotate %440 by %c1_i32_137 dim 1 : vector<8x256xf32>, i32 -> vector<8x256xf32>
    %442 = vector.broadcast %3 : vector<1x256xf32> to vector<8x256xf32>
    %443 = arith.mulf %441, %442 : vector<8x256xf32>
    %444 = arith.addf %439, %443 : vector<8x256xf32>
    %445 = vector.extract_strided_slice %425 {offsets = [32, 0], sizes = [8, 256], strides = [1, 1]} : vector<72x256xf32> to vector<8x256xf32>
    %446 = arith.addf %444, %445 : vector<8x256xf32>
    %447 = vector.extract_strided_slice %425 {offsets = [40, 0], sizes = [8, 256], strides = [1, 1]} : vector<72x256xf32> to vector<8x256xf32>
    %c255_i32_138 = arith.constant 255 : i32
    %448 = tpu.dynamic_rotate %447 by %c255_i32_138 dim 1 : vector<8x256xf32>, i32 -> vector<8x256xf32>
    %449 = vector.broadcast %4 : vector<1x256xf32> to vector<8x256xf32>
    %450 = arith.mulf %448, %449 : vector<8x256xf32>
    %451 = arith.addf %446, %450 : vector<8x256xf32>
    %452 = vector.extract_strided_slice %425 {offsets = [48, 0], sizes = [8, 256], strides = [1, 1]} : vector<72x256xf32> to vector<8x256xf32>
    %c241_i32_139 = arith.constant 241 : i32
    %453 = tpu.dynamic_rotate %452 by %c241_i32_139 dim 1 : vector<8x256xf32>, i32 -> vector<8x256xf32>
    %454 = vector.broadcast %5 : vector<1x256xf32> to vector<8x256xf32>
    %455 = arith.mulf %453, %454 : vector<8x256xf32>
    %456 = arith.addf %451, %455 : vector<8x256xf32>
    %457 = vector.extract_strided_slice %425 {offsets = [56, 0], sizes = [8, 256], strides = [1, 1]} : vector<72x256xf32> to vector<8x256xf32>
    %c240_i32_140 = arith.constant 240 : i32
    %458 = tpu.dynamic_rotate %457 by %c240_i32_140 dim 1 : vector<8x256xf32>, i32 -> vector<8x256xf32>
    %459 = vector.broadcast %6 : vector<1x256xf32> to vector<8x256xf32>
    %460 = arith.mulf %458, %459 : vector<8x256xf32>
    %461 = arith.addf %456, %460 : vector<8x256xf32>
    %462 = vector.extract_strided_slice %425 {offsets = [64, 0], sizes = [8, 256], strides = [1, 1]} : vector<72x256xf32> to vector<8x256xf32>
    %c239_i32_141 = arith.constant 239 : i32
    %463 = tpu.dynamic_rotate %462 by %c239_i32_141 dim 1 : vector<8x256xf32>, i32 -> vector<8x256xf32>
    %464 = vector.broadcast %7 : vector<1x256xf32> to vector<8x256xf32>
    %465 = arith.mulf %463, %464 : vector<8x256xf32>
    %466 = arith.addf %461, %465 : vector<8x256xf32>
    %467 = vector.broadcast %14 : vector<8x1xf32> to vector<8x256xf32>
    %468 = arith.addf %466, %467 : vector<8x256xf32>
    %cst_142 = arith.constant 0.000000e+00 : f32
    %469 = vector.broadcast %cst_142 : f32 to vector<8x256xf32>
    %470 = arith.subf %469, %468 : vector<8x256xf32>
    %471 = math.exp %470 : vector<8x256xf32>
    %cst_143 = arith.constant 1.000000e+00 : f32
    %472 = vector.broadcast %cst_143 : f32 to vector<8x256xf32>
    %473 = arith.addf %472, %471 : vector<8x256xf32>
    %474 = tpu.reciprocal %473 {approx = true} : vector<8x256xf32> -> vector<8x256xf32>
    %475 = arith.mulf %474, %11 : vector<8x256xf32>
    %cst_144 = arith.constant dense<0.000000e+00> : vector<72x256xf32>
    %476 = tpu.matmul %13, %475, %cst_144 {dimension_numbers = #tpu.dot_dimension_numbers<[1], [0], [0], [1], [0, 0, 1, 1], [], []>} : vector<72x8xf32>, vector<8x256xf32>, vector<72x256xf32> -> vector<72x256xf32>
    %477 = vector.extract_strided_slice %476 {offsets = [0, 0], sizes = [8, 256], strides = [1, 1]} : vector<72x256xf32> to vector<8x256xf32>
    %c17_i32_145 = arith.constant 17 : i32
    %478 = tpu.dynamic_rotate %477 by %c17_i32_145 dim 1 : vector<8x256xf32>, i32 -> vector<8x256xf32>
    %479 = vector.broadcast %0 : vector<1x256xf32> to vector<8x256xf32>
    %480 = arith.mulf %478, %479 : vector<8x256xf32>
    %481 = vector.extract_strided_slice %476 {offsets = [8, 0], sizes = [8, 256], strides = [1, 1]} : vector<72x256xf32> to vector<8x256xf32>
    %c16_i32_146 = arith.constant 16 : i32
    %482 = tpu.dynamic_rotate %481 by %c16_i32_146 dim 1 : vector<8x256xf32>, i32 -> vector<8x256xf32>
    %483 = vector.broadcast %1 : vector<1x256xf32> to vector<8x256xf32>
    %484 = arith.mulf %482, %483 : vector<8x256xf32>
    %485 = arith.addf %480, %484 : vector<8x256xf32>
    %486 = vector.extract_strided_slice %476 {offsets = [16, 0], sizes = [8, 256], strides = [1, 1]} : vector<72x256xf32> to vector<8x256xf32>
    %c15_i32_147 = arith.constant 15 : i32
    %487 = tpu.dynamic_rotate %486 by %c15_i32_147 dim 1 : vector<8x256xf32>, i32 -> vector<8x256xf32>
    %488 = vector.broadcast %2 : vector<1x256xf32> to vector<8x256xf32>
    %489 = arith.mulf %487, %488 : vector<8x256xf32>
    %490 = arith.addf %485, %489 : vector<8x256xf32>
    %491 = vector.extract_strided_slice %476 {offsets = [24, 0], sizes = [8, 256], strides = [1, 1]} : vector<72x256xf32> to vector<8x256xf32>
    %c1_i32_148 = arith.constant 1 : i32
    %492 = tpu.dynamic_rotate %491 by %c1_i32_148 dim 1 : vector<8x256xf32>, i32 -> vector<8x256xf32>
    %493 = vector.broadcast %3 : vector<1x256xf32> to vector<8x256xf32>
    %494 = arith.mulf %492, %493 : vector<8x256xf32>
    %495 = arith.addf %490, %494 : vector<8x256xf32>
    %496 = vector.extract_strided_slice %476 {offsets = [32, 0], sizes = [8, 256], strides = [1, 1]} : vector<72x256xf32> to vector<8x256xf32>
    %497 = arith.addf %495, %496 : vector<8x256xf32>
    %498 = vector.extract_strided_slice %476 {offsets = [40, 0], sizes = [8, 256], strides = [1, 1]} : vector<72x256xf32> to vector<8x256xf32>
    %c255_i32_149 = arith.constant 255 : i32
    %499 = tpu.dynamic_rotate %498 by %c255_i32_149 dim 1 : vector<8x256xf32>, i32 -> vector<8x256xf32>
    %500 = vector.broadcast %4 : vector<1x256xf32> to vector<8x256xf32>
    %501 = arith.mulf %499, %500 : vector<8x256xf32>
    %502 = arith.addf %497, %501 : vector<8x256xf32>
    %503 = vector.extract_strided_slice %476 {offsets = [48, 0], sizes = [8, 256], strides = [1, 1]} : vector<72x256xf32> to vector<8x256xf32>
    %c241_i32_150 = arith.constant 241 : i32
    %504 = tpu.dynamic_rotate %503 by %c241_i32_150 dim 1 : vector<8x256xf32>, i32 -> vector<8x256xf32>
    %505 = vector.broadcast %5 : vector<1x256xf32> to vector<8x256xf32>
    %506 = arith.mulf %504, %505 : vector<8x256xf32>
    %507 = arith.addf %502, %506 : vector<8x256xf32>
    %508 = vector.extract_strided_slice %476 {offsets = [56, 0], sizes = [8, 256], strides = [1, 1]} : vector<72x256xf32> to vector<8x256xf32>
    %c240_i32_151 = arith.constant 240 : i32
    %509 = tpu.dynamic_rotate %508 by %c240_i32_151 dim 1 : vector<8x256xf32>, i32 -> vector<8x256xf32>
    %510 = vector.broadcast %6 : vector<1x256xf32> to vector<8x256xf32>
    %511 = arith.mulf %509, %510 : vector<8x256xf32>
    %512 = arith.addf %507, %511 : vector<8x256xf32>
    %513 = vector.extract_strided_slice %476 {offsets = [64, 0], sizes = [8, 256], strides = [1, 1]} : vector<72x256xf32> to vector<8x256xf32>
    %c239_i32_152 = arith.constant 239 : i32
    %514 = tpu.dynamic_rotate %513 by %c239_i32_152 dim 1 : vector<8x256xf32>, i32 -> vector<8x256xf32>
    %515 = vector.broadcast %7 : vector<1x256xf32> to vector<8x256xf32>
    %516 = arith.mulf %514, %515 : vector<8x256xf32>
    %517 = arith.addf %512, %516 : vector<8x256xf32>
    %518 = vector.broadcast %15 : vector<8x1xf32> to vector<8x256xf32>
    %519 = arith.addf %517, %518 : vector<8x256xf32>
    %c0_153 = arith.constant 0 : index
    %c3_154 = arith.constant 3 : index
    %c0_155 = arith.constant 0 : index
    %c0_156 = arith.constant 0 : index
    %520 = vector.load %arg5[%c0_153, %c3_154, %c0_155, %c0_156] : memref<1x10x16x256xf32, #tpu.memory_space<vmem>>, vector<1x1x16x256xf32>
    %521 = vector.shape_cast %520 : vector<1x1x16x256xf32> to vector<16x256xf32>
    %522 = vector.extract_strided_slice %521 {offsets = [0, 0], sizes = [8, 256], strides = [1, 1]} : vector<16x256xf32> to vector<8x256xf32>
    %523 = vector.extract_strided_slice %521 {offsets = [8, 0], sizes = [8, 256], strides = [1, 1]} : vector<16x256xf32> to vector<8x256xf32>
    %524 = arith.subf %519, %522 : vector<8x256xf32>
    %525 = math.absf %524 : vector<8x256xf32>
    %cst_157 = arith.constant 0.00999999977 : f32
    %526 = vector.broadcast %cst_157 : f32 to vector<8x256xf32>
    %527 = arith.cmpf olt, %525, %526 : vector<8x256xf32>
    %cst_158 = arith.constant 5.000000e-01 : f32
    %528 = vector.broadcast %cst_158 : f32 to vector<8x256xf32>
    %529 = arith.mulf %528, %525 : vector<8x256xf32>
    %530 = arith.mulf %529, %525 : vector<8x256xf32>
    %cst_159 = arith.constant 0.00999999977 : f32
    %531 = vector.broadcast %cst_159 : f32 to vector<8x256xf32>
    %532 = arith.divf %530, %531 : vector<8x256xf32>
    %cst_160 = arith.constant 5.000000e-03 : f32
    %533 = vector.broadcast %cst_160 : f32 to vector<8x256xf32>
    %534 = arith.subf %525, %533 : vector<8x256xf32>
    %535 = arith.select %527, %532, %534 : vector<8x256xi1>, vector<8x256xf32>
    %536 = arith.mulf %535, %523 : vector<8x256xf32>
    %537 = vector.shape_cast %536 : vector<8x256xf32> to vector<1x8x256xf32>
    %cst_161 = arith.constant dense<0.000000e+00> : vector<1xf32>
    %538 = vector.multi_reduction <add>, %537, %cst_161 [1, 2] : vector<1x8x256xf32> to vector<1xf32>
    %539 = vector.shape_cast %538 : vector<1xf32> to vector<1x1x1xf32>
    %540 = vector.extract %539[0, 0, 0] : f32 from vector<1x1x1xf32>
    %541 = vector.shape_cast %523 : vector<8x256xf32> to vector<1x8x256xf32>
    %cst_162 = arith.constant dense<0.000000e+00> : vector<1xf32>
    %542 = vector.multi_reduction <add>, %541, %cst_162 [1, 2] : vector<1x8x256xf32> to vector<1xf32>
    %543 = vector.shape_cast %542 : vector<1xf32> to vector<1x1x1xf32>
    %544 = vector.extract %543[0, 0, 0] : f32 from vector<1x1x1xf32>
    %c3_i32 = arith.constant 3 : i32
    %545 = vector.broadcast %c3_i32 : i32 to vector<8x128xi32>
    %546 = arith.cmpi eq, %16, %545 : vector<8x128xi32>
    %cst_163 = arith.constant 0.000000e+00 : f32
    %547 = vector.broadcast %544 : f32 to vector<8x128xf32>
    %548 = vector.broadcast %cst_163 : f32 to vector<8x128xf32>
    %549 = arith.select %21, %547, %548 : vector<8x128xi1>, vector<8x128xf32>
    %550 = vector.broadcast %540 : f32 to vector<8x128xf32>
    %551 = arith.select %19, %550, %549 : vector<8x128xi1>, vector<8x128xf32>
    %cst_164 = arith.constant 0.000000e+00 : f32
    %552 = vector.broadcast %cst_164 : f32 to vector<8x128xf32>
    %553 = arith.select %546, %551, %552 : vector<8x128xi1>, vector<8x128xf32>
    %554 = arith.addf %421, %553 : vector<8x128xf32>
    %c0_165 = arith.constant 0 : index
    %c4 = arith.constant 4 : index
    %c0_166 = arith.constant 0 : index
    %c0_167 = arith.constant 0 : index
    %555 = vector.load %arg2[%c0_165, %c4, %c0_166, %c0_167] : memref<1x10x256x256xbf16, #tpu.memory_space<vmem>>, vector<1x1x256x256xbf16>
    %556 = vector.shape_cast %555 : vector<1x1x256x256xbf16> to vector<256x256xbf16>
    %cst_168 = arith.constant dense<0.000000e+00> : vector<8x256xf32>
    %557 = tpu.matmul %9, %556, %cst_168 {dimension_numbers = #tpu.dot_dimension_numbers<[1], [0], [0], [1], [0, 0, 1, 1], [], []>} : vector<8x256xbf16>, vector<256x256xbf16>, vector<8x256xf32> -> vector<8x256xf32>
    %cst_169 = arith.constant dense<0.000000e+00> : vector<72x256xf32>
    %558 = tpu.matmul %12, %557, %cst_169 {dimension_numbers = #tpu.dot_dimension_numbers<[1], [0], [0], [1], [0, 0, 1, 1], [], []>} : vector<72x8xf32>, vector<8x256xf32>, vector<72x256xf32> -> vector<72x256xf32>
    %559 = vector.extract_strided_slice %558 {offsets = [0, 0], sizes = [8, 256], strides = [1, 1]} : vector<72x256xf32> to vector<8x256xf32>
    %c17_i32_170 = arith.constant 17 : i32
    %560 = tpu.dynamic_rotate %559 by %c17_i32_170 dim 1 : vector<8x256xf32>, i32 -> vector<8x256xf32>
    %561 = vector.broadcast %0 : vector<1x256xf32> to vector<8x256xf32>
    %562 = arith.mulf %560, %561 : vector<8x256xf32>
    %563 = vector.extract_strided_slice %558 {offsets = [8, 0], sizes = [8, 256], strides = [1, 1]} : vector<72x256xf32> to vector<8x256xf32>
    %c16_i32_171 = arith.constant 16 : i32
    %564 = tpu.dynamic_rotate %563 by %c16_i32_171 dim 1 : vector<8x256xf32>, i32 -> vector<8x256xf32>
    %565 = vector.broadcast %1 : vector<1x256xf32> to vector<8x256xf32>
    %566 = arith.mulf %564, %565 : vector<8x256xf32>
    %567 = arith.addf %562, %566 : vector<8x256xf32>
    %568 = vector.extract_strided_slice %558 {offsets = [16, 0], sizes = [8, 256], strides = [1, 1]} : vector<72x256xf32> to vector<8x256xf32>
    %c15_i32_172 = arith.constant 15 : i32
    %569 = tpu.dynamic_rotate %568 by %c15_i32_172 dim 1 : vector<8x256xf32>, i32 -> vector<8x256xf32>
    %570 = vector.broadcast %2 : vector<1x256xf32> to vector<8x256xf32>
    %571 = arith.mulf %569, %570 : vector<8x256xf32>
    %572 = arith.addf %567, %571 : vector<8x256xf32>
    %573 = vector.extract_strided_slice %558 {offsets = [24, 0], sizes = [8, 256], strides = [1, 1]} : vector<72x256xf32> to vector<8x256xf32>
    %c1_i32_173 = arith.constant 1 : i32
    %574 = tpu.dynamic_rotate %573 by %c1_i32_173 dim 1 : vector<8x256xf32>, i32 -> vector<8x256xf32>
    %575 = vector.broadcast %3 : vector<1x256xf32> to vector<8x256xf32>
    %576 = arith.mulf %574, %575 : vector<8x256xf32>
    %577 = arith.addf %572, %576 : vector<8x256xf32>
    %578 = vector.extract_strided_slice %558 {offsets = [32, 0], sizes = [8, 256], strides = [1, 1]} : vector<72x256xf32> to vector<8x256xf32>
    %579 = arith.addf %577, %578 : vector<8x256xf32>
    %580 = vector.extract_strided_slice %558 {offsets = [40, 0], sizes = [8, 256], strides = [1, 1]} : vector<72x256xf32> to vector<8x256xf32>
    %c255_i32_174 = arith.constant 255 : i32
    %581 = tpu.dynamic_rotate %580 by %c255_i32_174 dim 1 : vector<8x256xf32>, i32 -> vector<8x256xf32>
    %582 = vector.broadcast %4 : vector<1x256xf32> to vector<8x256xf32>
    %583 = arith.mulf %581, %582 : vector<8x256xf32>
    %584 = arith.addf %579, %583 : vector<8x256xf32>
    %585 = vector.extract_strided_slice %558 {offsets = [48, 0], sizes = [8, 256], strides = [1, 1]} : vector<72x256xf32> to vector<8x256xf32>
    %c241_i32_175 = arith.constant 241 : i32
    %586 = tpu.dynamic_rotate %585 by %c241_i32_175 dim 1 : vector<8x256xf32>, i32 -> vector<8x256xf32>
    %587 = vector.broadcast %5 : vector<1x256xf32> to vector<8x256xf32>
    %588 = arith.mulf %586, %587 : vector<8x256xf32>
    %589 = arith.addf %584, %588 : vector<8x256xf32>
    %590 = vector.extract_strided_slice %558 {offsets = [56, 0], sizes = [8, 256], strides = [1, 1]} : vector<72x256xf32> to vector<8x256xf32>
    %c240_i32_176 = arith.constant 240 : i32
    %591 = tpu.dynamic_rotate %590 by %c240_i32_176 dim 1 : vector<8x256xf32>, i32 -> vector<8x256xf32>
    %592 = vector.broadcast %6 : vector<1x256xf32> to vector<8x256xf32>
    %593 = arith.mulf %591, %592 : vector<8x256xf32>
    %594 = arith.addf %589, %593 : vector<8x256xf32>
    %595 = vector.extract_strided_slice %558 {offsets = [64, 0], sizes = [8, 256], strides = [1, 1]} : vector<72x256xf32> to vector<8x256xf32>
    %c239_i32_177 = arith.constant 239 : i32
    %596 = tpu.dynamic_rotate %595 by %c239_i32_177 dim 1 : vector<8x256xf32>, i32 -> vector<8x256xf32>
    %597 = vector.broadcast %7 : vector<1x256xf32> to vector<8x256xf32>
    %598 = arith.mulf %596, %597 : vector<8x256xf32>
    %599 = arith.addf %594, %598 : vector<8x256xf32>
    %600 = vector.broadcast %14 : vector<8x1xf32> to vector<8x256xf32>
    %601 = arith.addf %599, %600 : vector<8x256xf32>
    %cst_178 = arith.constant 0.000000e+00 : f32
    %602 = vector.broadcast %cst_178 : f32 to vector<8x256xf32>
    %603 = arith.subf %602, %601 : vector<8x256xf32>
    %604 = math.exp %603 : vector<8x256xf32>
    %cst_179 = arith.constant 1.000000e+00 : f32
    %605 = vector.broadcast %cst_179 : f32 to vector<8x256xf32>
    %606 = arith.addf %605, %604 : vector<8x256xf32>
    %607 = tpu.reciprocal %606 {approx = true} : vector<8x256xf32> -> vector<8x256xf32>
    %608 = arith.mulf %607, %11 : vector<8x256xf32>
    %cst_180 = arith.constant dense<0.000000e+00> : vector<72x256xf32>
    %609 = tpu.matmul %13, %608, %cst_180 {dimension_numbers = #tpu.dot_dimension_numbers<[1], [0], [0], [1], [0, 0, 1, 1], [], []>} : vector<72x8xf32>, vector<8x256xf32>, vector<72x256xf32> -> vector<72x256xf32>
    %610 = vector.extract_strided_slice %609 {offsets = [0, 0], sizes = [8, 256], strides = [1, 1]} : vector<72x256xf32> to vector<8x256xf32>
    %c17_i32_181 = arith.constant 17 : i32
    %611 = tpu.dynamic_rotate %610 by %c17_i32_181 dim 1 : vector<8x256xf32>, i32 -> vector<8x256xf32>
    %612 = vector.broadcast %0 : vector<1x256xf32> to vector<8x256xf32>
    %613 = arith.mulf %611, %612 : vector<8x256xf32>
    %614 = vector.extract_strided_slice %609 {offsets = [8, 0], sizes = [8, 256], strides = [1, 1]} : vector<72x256xf32> to vector<8x256xf32>
    %c16_i32_182 = arith.constant 16 : i32
    %615 = tpu.dynamic_rotate %614 by %c16_i32_182 dim 1 : vector<8x256xf32>, i32 -> vector<8x256xf32>
    %616 = vector.broadcast %1 : vector<1x256xf32> to vector<8x256xf32>
    %617 = arith.mulf %615, %616 : vector<8x256xf32>
    %618 = arith.addf %613, %617 : vector<8x256xf32>
    %619 = vector.extract_strided_slice %609 {offsets = [16, 0], sizes = [8, 256], strides = [1, 1]} : vector<72x256xf32> to vector<8x256xf32>
    %c15_i32_183 = arith.constant 15 : i32
    %620 = tpu.dynamic_rotate %619 by %c15_i32_183 dim 1 : vector<8x256xf32>, i32 -> vector<8x256xf32>
    %621 = vector.broadcast %2 : vector<1x256xf32> to vector<8x256xf32>
    %622 = arith.mulf %620, %621 : vector<8x256xf32>
    %623 = arith.addf %618, %622 : vector<8x256xf32>
    %624 = vector.extract_strided_slice %609 {offsets = [24, 0], sizes = [8, 256], strides = [1, 1]} : vector<72x256xf32> to vector<8x256xf32>
    %c1_i32_184 = arith.constant 1 : i32
    %625 = tpu.dynamic_rotate %624 by %c1_i32_184 dim 1 : vector<8x256xf32>, i32 -> vector<8x256xf32>
    %626 = vector.broadcast %3 : vector<1x256xf32> to vector<8x256xf32>
    %627 = arith.mulf %625, %626 : vector<8x256xf32>
    %628 = arith.addf %623, %627 : vector<8x256xf32>
    %629 = vector.extract_strided_slice %609 {offsets = [32, 0], sizes = [8, 256], strides = [1, 1]} : vector<72x256xf32> to vector<8x256xf32>
    %630 = arith.addf %628, %629 : vector<8x256xf32>
    %631 = vector.extract_strided_slice %609 {offsets = [40, 0], sizes = [8, 256], strides = [1, 1]} : vector<72x256xf32> to vector<8x256xf32>
    %c255_i32_185 = arith.constant 255 : i32
    %632 = tpu.dynamic_rotate %631 by %c255_i32_185 dim 1 : vector<8x256xf32>, i32 -> vector<8x256xf32>
    %633 = vector.broadcast %4 : vector<1x256xf32> to vector<8x256xf32>
    %634 = arith.mulf %632, %633 : vector<8x256xf32>
    %635 = arith.addf %630, %634 : vector<8x256xf32>
    %636 = vector.extract_strided_slice %609 {offsets = [48, 0], sizes = [8, 256], strides = [1, 1]} : vector<72x256xf32> to vector<8x256xf32>
    %c241_i32_186 = arith.constant 241 : i32
    %637 = tpu.dynamic_rotate %636 by %c241_i32_186 dim 1 : vector<8x256xf32>, i32 -> vector<8x256xf32>
    %638 = vector.broadcast %5 : vector<1x256xf32> to vector<8x256xf32>
    %639 = arith.mulf %637, %638 : vector<8x256xf32>
    %640 = arith.addf %635, %639 : vector<8x256xf32>
    %641 = vector.extract_strided_slice %609 {offsets = [56, 0], sizes = [8, 256], strides = [1, 1]} : vector<72x256xf32> to vector<8x256xf32>
    %c240_i32_187 = arith.constant 240 : i32
    %642 = tpu.dynamic_rotate %641 by %c240_i32_187 dim 1 : vector<8x256xf32>, i32 -> vector<8x256xf32>
    %643 = vector.broadcast %6 : vector<1x256xf32> to vector<8x256xf32>
    %644 = arith.mulf %642, %643 : vector<8x256xf32>
    %645 = arith.addf %640, %644 : vector<8x256xf32>
    %646 = vector.extract_strided_slice %609 {offsets = [64, 0], sizes = [8, 256], strides = [1, 1]} : vector<72x256xf32> to vector<8x256xf32>
    %c239_i32_188 = arith.constant 239 : i32
    %647 = tpu.dynamic_rotate %646 by %c239_i32_188 dim 1 : vector<8x256xf32>, i32 -> vector<8x256xf32>
    %648 = vector.broadcast %7 : vector<1x256xf32> to vector<8x256xf32>
    %649 = arith.mulf %647, %648 : vector<8x256xf32>
    %650 = arith.addf %645, %649 : vector<8x256xf32>
    %651 = vector.broadcast %15 : vector<8x1xf32> to vector<8x256xf32>
    %652 = arith.addf %650, %651 : vector<8x256xf32>
    %c0_189 = arith.constant 0 : index
    %c4_190 = arith.constant 4 : index
    %c0_191 = arith.constant 0 : index
    %c0_192 = arith.constant 0 : index
    %653 = vector.load %arg5[%c0_189, %c4_190, %c0_191, %c0_192] : memref<1x10x16x256xf32, #tpu.memory_space<vmem>>, vector<1x1x16x256xf32>
    %654 = vector.shape_cast %653 : vector<1x1x16x256xf32> to vector<16x256xf32>
    %655 = vector.extract_strided_slice %654 {offsets = [0, 0], sizes = [8, 256], strides = [1, 1]} : vector<16x256xf32> to vector<8x256xf32>
    %656 = vector.extract_strided_slice %654 {offsets = [8, 0], sizes = [8, 256], strides = [1, 1]} : vector<16x256xf32> to vector<8x256xf32>
    %657 = arith.subf %652, %655 : vector<8x256xf32>
    %658 = math.absf %657 : vector<8x256xf32>
    %cst_193 = arith.constant 0.00999999977 : f32
    %659 = vector.broadcast %cst_193 : f32 to vector<8x256xf32>
    %660 = arith.cmpf olt, %658, %659 : vector<8x256xf32>
    %cst_194 = arith.constant 5.000000e-01 : f32
    %661 = vector.broadcast %cst_194 : f32 to vector<8x256xf32>
    %662 = arith.mulf %661, %658 : vector<8x256xf32>
    %663 = arith.mulf %662, %658 : vector<8x256xf32>
    %cst_195 = arith.constant 0.00999999977 : f32
    %664 = vector.broadcast %cst_195 : f32 to vector<8x256xf32>
    %665 = arith.divf %663, %664 : vector<8x256xf32>
    %cst_196 = arith.constant 5.000000e-03 : f32
    %666 = vector.broadcast %cst_196 : f32 to vector<8x256xf32>
    %667 = arith.subf %658, %666 : vector<8x256xf32>
    %668 = arith.select %660, %665, %667 : vector<8x256xi1>, vector<8x256xf32>
    %669 = arith.mulf %668, %656 : vector<8x256xf32>
    %670 = vector.shape_cast %669 : vector<8x256xf32> to vector<1x8x256xf32>
    %cst_197 = arith.constant dense<0.000000e+00> : vector<1xf32>
    %671 = vector.multi_reduction <add>, %670, %cst_197 [1, 2] : vector<1x8x256xf32> to vector<1xf32>
    %672 = vector.shape_cast %671 : vector<1xf32> to vector<1x1x1xf32>
    %673 = vector.extract %672[0, 0, 0] : f32 from vector<1x1x1xf32>
    %674 = vector.shape_cast %656 : vector<8x256xf32> to vector<1x8x256xf32>
    %cst_198 = arith.constant dense<0.000000e+00> : vector<1xf32>
    %675 = vector.multi_reduction <add>, %674, %cst_198 [1, 2] : vector<1x8x256xf32> to vector<1xf32>
    %676 = vector.shape_cast %675 : vector<1xf32> to vector<1x1x1xf32>
    %677 = vector.extract %676[0, 0, 0] : f32 from vector<1x1x1xf32>
    %c4_i32 = arith.constant 4 : i32
    %678 = vector.broadcast %c4_i32 : i32 to vector<8x128xi32>
    %679 = arith.cmpi eq, %16, %678 : vector<8x128xi32>
    %cst_199 = arith.constant 0.000000e+00 : f32
    %680 = vector.broadcast %677 : f32 to vector<8x128xf32>
    %681 = vector.broadcast %cst_199 : f32 to vector<8x128xf32>
    %682 = arith.select %21, %680, %681 : vector<8x128xi1>, vector<8x128xf32>
    %683 = vector.broadcast %673 : f32 to vector<8x128xf32>
    %684 = arith.select %19, %683, %682 : vector<8x128xi1>, vector<8x128xf32>
    %cst_200 = arith.constant 0.000000e+00 : f32
    %685 = vector.broadcast %cst_200 : f32 to vector<8x128xf32>
    %686 = arith.select %679, %684, %685 : vector<8x128xi1>, vector<8x128xf32>
    %687 = arith.addf %554, %686 : vector<8x128xf32>
    %c0_201 = arith.constant 0 : index
    %c5_202 = arith.constant 5 : index
    %c0_203 = arith.constant 0 : index
    %c0_204 = arith.constant 0 : index
    %688 = vector.load %arg2[%c0_201, %c5_202, %c0_203, %c0_204] : memref<1x10x256x256xbf16, #tpu.memory_space<vmem>>, vector<1x1x256x256xbf16>
    %689 = vector.shape_cast %688 : vector<1x1x256x256xbf16> to vector<256x256xbf16>
    %cst_205 = arith.constant dense<0.000000e+00> : vector<8x256xf32>
    %690 = tpu.matmul %9, %689, %cst_205 {dimension_numbers = #tpu.dot_dimension_numbers<[1], [0], [0], [1], [0, 0, 1, 1], [], []>} : vector<8x256xbf16>, vector<256x256xbf16>, vector<8x256xf32> -> vector<8x256xf32>
    %cst_206 = arith.constant dense<0.000000e+00> : vector<72x256xf32>
    %691 = tpu.matmul %12, %690, %cst_206 {dimension_numbers = #tpu.dot_dimension_numbers<[1], [0], [0], [1], [0, 0, 1, 1], [], []>} : vector<72x8xf32>, vector<8x256xf32>, vector<72x256xf32> -> vector<72x256xf32>
    %692 = vector.extract_strided_slice %691 {offsets = [0, 0], sizes = [8, 256], strides = [1, 1]} : vector<72x256xf32> to vector<8x256xf32>
    %c17_i32_207 = arith.constant 17 : i32
    %693 = tpu.dynamic_rotate %692 by %c17_i32_207 dim 1 : vector<8x256xf32>, i32 -> vector<8x256xf32>
    %694 = vector.broadcast %0 : vector<1x256xf32> to vector<8x256xf32>
    %695 = arith.mulf %693, %694 : vector<8x256xf32>
    %696 = vector.extract_strided_slice %691 {offsets = [8, 0], sizes = [8, 256], strides = [1, 1]} : vector<72x256xf32> to vector<8x256xf32>
    %c16_i32_208 = arith.constant 16 : i32
    %697 = tpu.dynamic_rotate %696 by %c16_i32_208 dim 1 : vector<8x256xf32>, i32 -> vector<8x256xf32>
    %698 = vector.broadcast %1 : vector<1x256xf32> to vector<8x256xf32>
    %699 = arith.mulf %697, %698 : vector<8x256xf32>
    %700 = arith.addf %695, %699 : vector<8x256xf32>
    %701 = vector.extract_strided_slice %691 {offsets = [16, 0], sizes = [8, 256], strides = [1, 1]} : vector<72x256xf32> to vector<8x256xf32>
    %c15_i32_209 = arith.constant 15 : i32
    %702 = tpu.dynamic_rotate %701 by %c15_i32_209 dim 1 : vector<8x256xf32>, i32 -> vector<8x256xf32>
    %703 = vector.broadcast %2 : vector<1x256xf32> to vector<8x256xf32>
    %704 = arith.mulf %702, %703 : vector<8x256xf32>
    %705 = arith.addf %700, %704 : vector<8x256xf32>
    %706 = vector.extract_strided_slice %691 {offsets = [24, 0], sizes = [8, 256], strides = [1, 1]} : vector<72x256xf32> to vector<8x256xf32>
    %c1_i32_210 = arith.constant 1 : i32
    %707 = tpu.dynamic_rotate %706 by %c1_i32_210 dim 1 : vector<8x256xf32>, i32 -> vector<8x256xf32>
    %708 = vector.broadcast %3 : vector<1x256xf32> to vector<8x256xf32>
    %709 = arith.mulf %707, %708 : vector<8x256xf32>
    %710 = arith.addf %705, %709 : vector<8x256xf32>
    %711 = vector.extract_strided_slice %691 {offsets = [32, 0], sizes = [8, 256], strides = [1, 1]} : vector<72x256xf32> to vector<8x256xf32>
    %712 = arith.addf %710, %711 : vector<8x256xf32>
    %713 = vector.extract_strided_slice %691 {offsets = [40, 0], sizes = [8, 256], strides = [1, 1]} : vector<72x256xf32> to vector<8x256xf32>
    %c255_i32_211 = arith.constant 255 : i32
    %714 = tpu.dynamic_rotate %713 by %c255_i32_211 dim 1 : vector<8x256xf32>, i32 -> vector<8x256xf32>
    %715 = vector.broadcast %4 : vector<1x256xf32> to vector<8x256xf32>
    %716 = arith.mulf %714, %715 : vector<8x256xf32>
    %717 = arith.addf %712, %716 : vector<8x256xf32>
    %718 = vector.extract_strided_slice %691 {offsets = [48, 0], sizes = [8, 256], strides = [1, 1]} : vector<72x256xf32> to vector<8x256xf32>
    %c241_i32_212 = arith.constant 241 : i32
    %719 = tpu.dynamic_rotate %718 by %c241_i32_212 dim 1 : vector<8x256xf32>, i32 -> vector<8x256xf32>
    %720 = vector.broadcast %5 : vector<1x256xf32> to vector<8x256xf32>
    %721 = arith.mulf %719, %720 : vector<8x256xf32>
    %722 = arith.addf %717, %721 : vector<8x256xf32>
    %723 = vector.extract_strided_slice %691 {offsets = [56, 0], sizes = [8, 256], strides = [1, 1]} : vector<72x256xf32> to vector<8x256xf32>
    %c240_i32_213 = arith.constant 240 : i32
    %724 = tpu.dynamic_rotate %723 by %c240_i32_213 dim 1 : vector<8x256xf32>, i32 -> vector<8x256xf32>
    %725 = vector.broadcast %6 : vector<1x256xf32> to vector<8x256xf32>
    %726 = arith.mulf %724, %725 : vector<8x256xf32>
    %727 = arith.addf %722, %726 : vector<8x256xf32>
    %728 = vector.extract_strided_slice %691 {offsets = [64, 0], sizes = [8, 256], strides = [1, 1]} : vector<72x256xf32> to vector<8x256xf32>
    %c239_i32_214 = arith.constant 239 : i32
    %729 = tpu.dynamic_rotate %728 by %c239_i32_214 dim 1 : vector<8x256xf32>, i32 -> vector<8x256xf32>
    %730 = vector.broadcast %7 : vector<1x256xf32> to vector<8x256xf32>
    %731 = arith.mulf %729, %730 : vector<8x256xf32>
    %732 = arith.addf %727, %731 : vector<8x256xf32>
    %733 = vector.broadcast %14 : vector<8x1xf32> to vector<8x256xf32>
    %734 = arith.addf %732, %733 : vector<8x256xf32>
    %cst_215 = arith.constant 0.000000e+00 : f32
    %735 = vector.broadcast %cst_215 : f32 to vector<8x256xf32>
    %736 = arith.subf %735, %734 : vector<8x256xf32>
    %737 = math.exp %736 : vector<8x256xf32>
    %cst_216 = arith.constant 1.000000e+00 : f32
    %738 = vector.broadcast %cst_216 : f32 to vector<8x256xf32>
    %739 = arith.addf %738, %737 : vector<8x256xf32>
    %740 = tpu.reciprocal %739 {approx = true} : vector<8x256xf32> -> vector<8x256xf32>
    %741 = arith.mulf %740, %11 : vector<8x256xf32>
    %cst_217 = arith.constant dense<0.000000e+00> : vector<72x256xf32>
    %742 = tpu.matmul %13, %741, %cst_217 {dimension_numbers = #tpu.dot_dimension_numbers<[1], [0], [0], [1], [0, 0, 1, 1], [], []>} : vector<72x8xf32>, vector<8x256xf32>, vector<72x256xf32> -> vector<72x256xf32>
    %743 = vector.extract_strided_slice %742 {offsets = [0, 0], sizes = [8, 256], strides = [1, 1]} : vector<72x256xf32> to vector<8x256xf32>
    %c17_i32_218 = arith.constant 17 : i32
    %744 = tpu.dynamic_rotate %743 by %c17_i32_218 dim 1 : vector<8x256xf32>, i32 -> vector<8x256xf32>
    %745 = vector.broadcast %0 : vector<1x256xf32> to vector<8x256xf32>
    %746 = arith.mulf %744, %745 : vector<8x256xf32>
    %747 = vector.extract_strided_slice %742 {offsets = [8, 0], sizes = [8, 256], strides = [1, 1]} : vector<72x256xf32> to vector<8x256xf32>
    %c16_i32_219 = arith.constant 16 : i32
    %748 = tpu.dynamic_rotate %747 by %c16_i32_219 dim 1 : vector<8x256xf32>, i32 -> vector<8x256xf32>
    %749 = vector.broadcast %1 : vector<1x256xf32> to vector<8x256xf32>
    %750 = arith.mulf %748, %749 : vector<8x256xf32>
    %751 = arith.addf %746, %750 : vector<8x256xf32>
    %752 = vector.extract_strided_slice %742 {offsets = [16, 0], sizes = [8, 256], strides = [1, 1]} : vector<72x256xf32> to vector<8x256xf32>
    %c15_i32_220 = arith.constant 15 : i32
    %753 = tpu.dynamic_rotate %752 by %c15_i32_220 dim 1 : vector<8x256xf32>, i32 -> vector<8x256xf32>
    %754 = vector.broadcast %2 : vector<1x256xf32> to vector<8x256xf32>
    %755 = arith.mulf %753, %754 : vector<8x256xf32>
    %756 = arith.addf %751, %755 : vector<8x256xf32>
    %757 = vector.extract_strided_slice %742 {offsets = [24, 0], sizes = [8, 256], strides = [1, 1]} : vector<72x256xf32> to vector<8x256xf32>
    %c1_i32_221 = arith.constant 1 : i32
    %758 = tpu.dynamic_rotate %757 by %c1_i32_221 dim 1 : vector<8x256xf32>, i32 -> vector<8x256xf32>
    %759 = vector.broadcast %3 : vector<1x256xf32> to vector<8x256xf32>
    %760 = arith.mulf %758, %759 : vector<8x256xf32>
    %761 = arith.addf %756, %760 : vector<8x256xf32>
    %762 = vector.extract_strided_slice %742 {offsets = [32, 0], sizes = [8, 256], strides = [1, 1]} : vector<72x256xf32> to vector<8x256xf32>
    %763 = arith.addf %761, %762 : vector<8x256xf32>
    %764 = vector.extract_strided_slice %742 {offsets = [40, 0], sizes = [8, 256], strides = [1, 1]} : vector<72x256xf32> to vector<8x256xf32>
    %c255_i32_222 = arith.constant 255 : i32
    %765 = tpu.dynamic_rotate %764 by %c255_i32_222 dim 1 : vector<8x256xf32>, i32 -> vector<8x256xf32>
    %766 = vector.broadcast %4 : vector<1x256xf32> to vector<8x256xf32>
    %767 = arith.mulf %765, %766 : vector<8x256xf32>
    %768 = arith.addf %763, %767 : vector<8x256xf32>
    %769 = vector.extract_strided_slice %742 {offsets = [48, 0], sizes = [8, 256], strides = [1, 1]} : vector<72x256xf32> to vector<8x256xf32>
    %c241_i32_223 = arith.constant 241 : i32
    %770 = tpu.dynamic_rotate %769 by %c241_i32_223 dim 1 : vector<8x256xf32>, i32 -> vector<8x256xf32>
    %771 = vector.broadcast %5 : vector<1x256xf32> to vector<8x256xf32>
    %772 = arith.mulf %770, %771 : vector<8x256xf32>
    %773 = arith.addf %768, %772 : vector<8x256xf32>
    %774 = vector.extract_strided_slice %742 {offsets = [56, 0], sizes = [8, 256], strides = [1, 1]} : vector<72x256xf32> to vector<8x256xf32>
    %c240_i32_224 = arith.constant 240 : i32
    %775 = tpu.dynamic_rotate %774 by %c240_i32_224 dim 1 : vector<8x256xf32>, i32 -> vector<8x256xf32>
    %776 = vector.broadcast %6 : vector<1x256xf32> to vector<8x256xf32>
    %777 = arith.mulf %775, %776 : vector<8x256xf32>
    %778 = arith.addf %773, %777 : vector<8x256xf32>
    %779 = vector.extract_strided_slice %742 {offsets = [64, 0], sizes = [8, 256], strides = [1, 1]} : vector<72x256xf32> to vector<8x256xf32>
    %c239_i32_225 = arith.constant 239 : i32
    %780 = tpu.dynamic_rotate %779 by %c239_i32_225 dim 1 : vector<8x256xf32>, i32 -> vector<8x256xf32>
    %781 = vector.broadcast %7 : vector<1x256xf32> to vector<8x256xf32>
    %782 = arith.mulf %780, %781 : vector<8x256xf32>
    %783 = arith.addf %778, %782 : vector<8x256xf32>
    %784 = vector.broadcast %15 : vector<8x1xf32> to vector<8x256xf32>
    %785 = arith.addf %783, %784 : vector<8x256xf32>
    %c0_226 = arith.constant 0 : index
    %c5_227 = arith.constant 5 : index
    %c0_228 = arith.constant 0 : index
    %c0_229 = arith.constant 0 : index
    %786 = vector.load %arg5[%c0_226, %c5_227, %c0_228, %c0_229] : memref<1x10x16x256xf32, #tpu.memory_space<vmem>>, vector<1x1x16x256xf32>
    %787 = vector.shape_cast %786 : vector<1x1x16x256xf32> to vector<16x256xf32>
    %788 = vector.extract_strided_slice %787 {offsets = [0, 0], sizes = [8, 256], strides = [1, 1]} : vector<16x256xf32> to vector<8x256xf32>
    %789 = vector.extract_strided_slice %787 {offsets = [8, 0], sizes = [8, 256], strides = [1, 1]} : vector<16x256xf32> to vector<8x256xf32>
    %790 = arith.subf %785, %788 : vector<8x256xf32>
    %791 = math.absf %790 : vector<8x256xf32>
    %cst_230 = arith.constant 0.00999999977 : f32
    %792 = vector.broadcast %cst_230 : f32 to vector<8x256xf32>
    %793 = arith.cmpf olt, %791, %792 : vector<8x256xf32>
    %cst_231 = arith.constant 5.000000e-01 : f32
    %794 = vector.broadcast %cst_231 : f32 to vector<8x256xf32>
    %795 = arith.mulf %794, %791 : vector<8x256xf32>
    %796 = arith.mulf %795, %791 : vector<8x256xf32>
    %cst_232 = arith.constant 0.00999999977 : f32
    %797 = vector.broadcast %cst_232 : f32 to vector<8x256xf32>
    %798 = arith.divf %796, %797 : vector<8x256xf32>
    %cst_233 = arith.constant 5.000000e-03 : f32
    %799 = vector.broadcast %cst_233 : f32 to vector<8x256xf32>
    %800 = arith.subf %791, %799 : vector<8x256xf32>
    %801 = arith.select %793, %798, %800 : vector<8x256xi1>, vector<8x256xf32>
    %802 = arith.mulf %801, %789 : vector<8x256xf32>
    %803 = vector.shape_cast %802 : vector<8x256xf32> to vector<1x8x256xf32>
    %cst_234 = arith.constant dense<0.000000e+00> : vector<1xf32>
    %804 = vector.multi_reduction <add>, %803, %cst_234 [1, 2] : vector<1x8x256xf32> to vector<1xf32>
    %805 = vector.shape_cast %804 : vector<1xf32> to vector<1x1x1xf32>
    %806 = vector.extract %805[0, 0, 0] : f32 from vector<1x1x1xf32>
    %807 = vector.shape_cast %789 : vector<8x256xf32> to vector<1x8x256xf32>
    %cst_235 = arith.constant dense<0.000000e+00> : vector<1xf32>
    %808 = vector.multi_reduction <add>, %807, %cst_235 [1, 2] : vector<1x8x256xf32> to vector<1xf32>
    %809 = vector.shape_cast %808 : vector<1xf32> to vector<1x1x1xf32>
    %810 = vector.extract %809[0, 0, 0] : f32 from vector<1x1x1xf32>
    %c5_i32 = arith.constant 5 : i32
    %811 = vector.broadcast %c5_i32 : i32 to vector<8x128xi32>
    %812 = arith.cmpi eq, %16, %811 : vector<8x128xi32>
    %cst_236 = arith.constant 0.000000e+00 : f32
    %813 = vector.broadcast %810 : f32 to vector<8x128xf32>
    %814 = vector.broadcast %cst_236 : f32 to vector<8x128xf32>
    %815 = arith.select %21, %813, %814 : vector<8x128xi1>, vector<8x128xf32>
    %816 = vector.broadcast %806 : f32 to vector<8x128xf32>
    %817 = arith.select %19, %816, %815 : vector<8x128xi1>, vector<8x128xf32>
    %cst_237 = arith.constant 0.000000e+00 : f32
    %818 = vector.broadcast %cst_237 : f32 to vector<8x128xf32>
    %819 = arith.select %812, %817, %818 : vector<8x128xi1>, vector<8x128xf32>
    %820 = arith.addf %687, %819 : vector<8x128xf32>
    %c0_238 = arith.constant 0 : index
    %c6_239 = arith.constant 6 : index
    %c0_240 = arith.constant 0 : index
    %c0_241 = arith.constant 0 : index
    %821 = vector.load %arg2[%c0_238, %c6_239, %c0_240, %c0_241] : memref<1x10x256x256xbf16, #tpu.memory_space<vmem>>, vector<1x1x256x256xbf16>
    %822 = vector.shape_cast %821 : vector<1x1x256x256xbf16> to vector<256x256xbf16>
    %cst_242 = arith.constant dense<0.000000e+00> : vector<8x256xf32>
    %823 = tpu.matmul %9, %822, %cst_242 {dimension_numbers = #tpu.dot_dimension_numbers<[1], [0], [0], [1], [0, 0, 1, 1], [], []>} : vector<8x256xbf16>, vector<256x256xbf16>, vector<8x256xf32> -> vector<8x256xf32>
    %cst_243 = arith.constant dense<0.000000e+00> : vector<72x256xf32>
    %824 = tpu.matmul %12, %823, %cst_243 {dimension_numbers = #tpu.dot_dimension_numbers<[1], [0], [0], [1], [0, 0, 1, 1], [], []>} : vector<72x8xf32>, vector<8x256xf32>, vector<72x256xf32> -> vector<72x256xf32>
    %825 = vector.extract_strided_slice %824 {offsets = [0, 0], sizes = [8, 256], strides = [1, 1]} : vector<72x256xf32> to vector<8x256xf32>
    %c17_i32_244 = arith.constant 17 : i32
    %826 = tpu.dynamic_rotate %825 by %c17_i32_244 dim 1 : vector<8x256xf32>, i32 -> vector<8x256xf32>
    %827 = vector.broadcast %0 : vector<1x256xf32> to vector<8x256xf32>
    %828 = arith.mulf %826, %827 : vector<8x256xf32>
    %829 = vector.extract_strided_slice %824 {offsets = [8, 0], sizes = [8, 256], strides = [1, 1]} : vector<72x256xf32> to vector<8x256xf32>
    %c16_i32_245 = arith.constant 16 : i32
    %830 = tpu.dynamic_rotate %829 by %c16_i32_245 dim 1 : vector<8x256xf32>, i32 -> vector<8x256xf32>
    %831 = vector.broadcast %1 : vector<1x256xf32> to vector<8x256xf32>
    %832 = arith.mulf %830, %831 : vector<8x256xf32>
    %833 = arith.addf %828, %832 : vector<8x256xf32>
    %834 = vector.extract_strided_slice %824 {offsets = [16, 0], sizes = [8, 256], strides = [1, 1]} : vector<72x256xf32> to vector<8x256xf32>
    %c15_i32_246 = arith.constant 15 : i32
    %835 = tpu.dynamic_rotate %834 by %c15_i32_246 dim 1 : vector<8x256xf32>, i32 -> vector<8x256xf32>
    %836 = vector.broadcast %2 : vector<1x256xf32> to vector<8x256xf32>
    %837 = arith.mulf %835, %836 : vector<8x256xf32>
    %838 = arith.addf %833, %837 : vector<8x256xf32>
    %839 = vector.extract_strided_slice %824 {offsets = [24, 0], sizes = [8, 256], strides = [1, 1]} : vector<72x256xf32> to vector<8x256xf32>
    %c1_i32_247 = arith.constant 1 : i32
    %840 = tpu.dynamic_rotate %839 by %c1_i32_247 dim 1 : vector<8x256xf32>, i32 -> vector<8x256xf32>
    %841 = vector.broadcast %3 : vector<1x256xf32> to vector<8x256xf32>
    %842 = arith.mulf %840, %841 : vector<8x256xf32>
    %843 = arith.addf %838, %842 : vector<8x256xf32>
    %844 = vector.extract_strided_slice %824 {offsets = [32, 0], sizes = [8, 256], strides = [1, 1]} : vector<72x256xf32> to vector<8x256xf32>
    %845 = arith.addf %843, %844 : vector<8x256xf32>
    %846 = vector.extract_strided_slice %824 {offsets = [40, 0], sizes = [8, 256], strides = [1, 1]} : vector<72x256xf32> to vector<8x256xf32>
    %c255_i32_248 = arith.constant 255 : i32
    %847 = tpu.dynamic_rotate %846 by %c255_i32_248 dim 1 : vector<8x256xf32>, i32 -> vector<8x256xf32>
    %848 = vector.broadcast %4 : vector<1x256xf32> to vector<8x256xf32>
    %849 = arith.mulf %847, %848 : vector<8x256xf32>
    %850 = arith.addf %845, %849 : vector<8x256xf32>
    %851 = vector.extract_strided_slice %824 {offsets = [48, 0], sizes = [8, 256], strides = [1, 1]} : vector<72x256xf32> to vector<8x256xf32>
    %c241_i32_249 = arith.constant 241 : i32
    %852 = tpu.dynamic_rotate %851 by %c241_i32_249 dim 1 : vector<8x256xf32>, i32 -> vector<8x256xf32>
    %853 = vector.broadcast %5 : vector<1x256xf32> to vector<8x256xf32>
    %854 = arith.mulf %852, %853 : vector<8x256xf32>
    %855 = arith.addf %850, %854 : vector<8x256xf32>
    %856 = vector.extract_strided_slice %824 {offsets = [56, 0], sizes = [8, 256], strides = [1, 1]} : vector<72x256xf32> to vector<8x256xf32>
    %c240_i32_250 = arith.constant 240 : i32
    %857 = tpu.dynamic_rotate %856 by %c240_i32_250 dim 1 : vector<8x256xf32>, i32 -> vector<8x256xf32>
    %858 = vector.broadcast %6 : vector<1x256xf32> to vector<8x256xf32>
    %859 = arith.mulf %857, %858 : vector<8x256xf32>
    %860 = arith.addf %855, %859 : vector<8x256xf32>
    %861 = vector.extract_strided_slice %824 {offsets = [64, 0], sizes = [8, 256], strides = [1, 1]} : vector<72x256xf32> to vector<8x256xf32>
    %c239_i32_251 = arith.constant 239 : i32
    %862 = tpu.dynamic_rotate %861 by %c239_i32_251 dim 1 : vector<8x256xf32>, i32 -> vector<8x256xf32>
    %863 = vector.broadcast %7 : vector<1x256xf32> to vector<8x256xf32>
    %864 = arith.mulf %862, %863 : vector<8x256xf32>
    %865 = arith.addf %860, %864 : vector<8x256xf32>
    %866 = vector.broadcast %14 : vector<8x1xf32> to vector<8x256xf32>
    %867 = arith.addf %865, %866 : vector<8x256xf32>
    %cst_252 = arith.constant 0.000000e+00 : f32
    %868 = vector.broadcast %cst_252 : f32 to vector<8x256xf32>
    %869 = arith.subf %868, %867 : vector<8x256xf32>
    %870 = math.exp %869 : vector<8x256xf32>
    %cst_253 = arith.constant 1.000000e+00 : f32
    %871 = vector.broadcast %cst_253 : f32 to vector<8x256xf32>
    %872 = arith.addf %871, %870 : vector<8x256xf32>
    %873 = tpu.reciprocal %872 {approx = true} : vector<8x256xf32> -> vector<8x256xf32>
    %874 = arith.mulf %873, %11 : vector<8x256xf32>
    %cst_254 = arith.constant dense<0.000000e+00> : vector<72x256xf32>
    %875 = tpu.matmul %13, %874, %cst_254 {dimension_numbers = #tpu.dot_dimension_numbers<[1], [0], [0], [1], [0, 0, 1, 1], [], []>} : vector<72x8xf32>, vector<8x256xf32>, vector<72x256xf32> -> vector<72x256xf32>
    %876 = vector.extract_strided_slice %875 {offsets = [0, 0], sizes = [8, 256], strides = [1, 1]} : vector<72x256xf32> to vector<8x256xf32>
    %c17_i32_255 = arith.constant 17 : i32
    %877 = tpu.dynamic_rotate %876 by %c17_i32_255 dim 1 : vector<8x256xf32>, i32 -> vector<8x256xf32>
    %878 = vector.broadcast %0 : vector<1x256xf32> to vector<8x256xf32>
    %879 = arith.mulf %877, %878 : vector<8x256xf32>
    %880 = vector.extract_strided_slice %875 {offsets = [8, 0], sizes = [8, 256], strides = [1, 1]} : vector<72x256xf32> to vector<8x256xf32>
    %c16_i32_256 = arith.constant 16 : i32
    %881 = tpu.dynamic_rotate %880 by %c16_i32_256 dim 1 : vector<8x256xf32>, i32 -> vector<8x256xf32>
    %882 = vector.broadcast %1 : vector<1x256xf32> to vector<8x256xf32>
    %883 = arith.mulf %881, %882 : vector<8x256xf32>
    %884 = arith.addf %879, %883 : vector<8x256xf32>
    %885 = vector.extract_strided_slice %875 {offsets = [16, 0], sizes = [8, 256], strides = [1, 1]} : vector<72x256xf32> to vector<8x256xf32>
    %c15_i32_257 = arith.constant 15 : i32
    %886 = tpu.dynamic_rotate %885 by %c15_i32_257 dim 1 : vector<8x256xf32>, i32 -> vector<8x256xf32>
    %887 = vector.broadcast %2 : vector<1x256xf32> to vector<8x256xf32>
    %888 = arith.mulf %886, %887 : vector<8x256xf32>
    %889 = arith.addf %884, %888 : vector<8x256xf32>
    %890 = vector.extract_strided_slice %875 {offsets = [24, 0], sizes = [8, 256], strides = [1, 1]} : vector<72x256xf32> to vector<8x256xf32>
    %c1_i32_258 = arith.constant 1 : i32
    %891 = tpu.dynamic_rotate %890 by %c1_i32_258 dim 1 : vector<8x256xf32>, i32 -> vector<8x256xf32>
    %892 = vector.broadcast %3 : vector<1x256xf32> to vector<8x256xf32>
    %893 = arith.mulf %891, %892 : vector<8x256xf32>
    %894 = arith.addf %889, %893 : vector<8x256xf32>
    %895 = vector.extract_strided_slice %875 {offsets = [32, 0], sizes = [8, 256], strides = [1, 1]} : vector<72x256xf32> to vector<8x256xf32>
    %896 = arith.addf %894, %895 : vector<8x256xf32>
    %897 = vector.extract_strided_slice %875 {offsets = [40, 0], sizes = [8, 256], strides = [1, 1]} : vector<72x256xf32> to vector<8x256xf32>
    %c255_i32_259 = arith.constant 255 : i32
    %898 = tpu.dynamic_rotate %897 by %c255_i32_259 dim 1 : vector<8x256xf32>, i32 -> vector<8x256xf32>
    %899 = vector.broadcast %4 : vector<1x256xf32> to vector<8x256xf32>
    %900 = arith.mulf %898, %899 : vector<8x256xf32>
    %901 = arith.addf %896, %900 : vector<8x256xf32>
    %902 = vector.extract_strided_slice %875 {offsets = [48, 0], sizes = [8, 256], strides = [1, 1]} : vector<72x256xf32> to vector<8x256xf32>
    %c241_i32_260 = arith.constant 241 : i32
    %903 = tpu.dynamic_rotate %902 by %c241_i32_260 dim 1 : vector<8x256xf32>, i32 -> vector<8x256xf32>
    %904 = vector.broadcast %5 : vector<1x256xf32> to vector<8x256xf32>
    %905 = arith.mulf %903, %904 : vector<8x256xf32>
    %906 = arith.addf %901, %905 : vector<8x256xf32>
    %907 = vector.extract_strided_slice %875 {offsets = [56, 0], sizes = [8, 256], strides = [1, 1]} : vector<72x256xf32> to vector<8x256xf32>
    %c240_i32_261 = arith.constant 240 : i32
    %908 = tpu.dynamic_rotate %907 by %c240_i32_261 dim 1 : vector<8x256xf32>, i32 -> vector<8x256xf32>
    %909 = vector.broadcast %6 : vector<1x256xf32> to vector<8x256xf32>
    %910 = arith.mulf %908, %909 : vector<8x256xf32>
    %911 = arith.addf %906, %910 : vector<8x256xf32>
    %912 = vector.extract_strided_slice %875 {offsets = [64, 0], sizes = [8, 256], strides = [1, 1]} : vector<72x256xf32> to vector<8x256xf32>
    %c239_i32_262 = arith.constant 239 : i32
    %913 = tpu.dynamic_rotate %912 by %c239_i32_262 dim 1 : vector<8x256xf32>, i32 -> vector<8x256xf32>
    %914 = vector.broadcast %7 : vector<1x256xf32> to vector<8x256xf32>
    %915 = arith.mulf %913, %914 : vector<8x256xf32>
    %916 = arith.addf %911, %915 : vector<8x256xf32>
    %917 = vector.broadcast %15 : vector<8x1xf32> to vector<8x256xf32>
    %918 = arith.addf %916, %917 : vector<8x256xf32>
    %c0_263 = arith.constant 0 : index
    %c6_264 = arith.constant 6 : index
    %c0_265 = arith.constant 0 : index
    %c0_266 = arith.constant 0 : index
    %919 = vector.load %arg5[%c0_263, %c6_264, %c0_265, %c0_266] : memref<1x10x16x256xf32, #tpu.memory_space<vmem>>, vector<1x1x16x256xf32>
    %920 = vector.shape_cast %919 : vector<1x1x16x256xf32> to vector<16x256xf32>
    %921 = vector.extract_strided_slice %920 {offsets = [0, 0], sizes = [8, 256], strides = [1, 1]} : vector<16x256xf32> to vector<8x256xf32>
    %922 = vector.extract_strided_slice %920 {offsets = [8, 0], sizes = [8, 256], strides = [1, 1]} : vector<16x256xf32> to vector<8x256xf32>
    %923 = arith.subf %918, %921 : vector<8x256xf32>
    %924 = math.absf %923 : vector<8x256xf32>
    %cst_267 = arith.constant 0.00999999977 : f32
    %925 = vector.broadcast %cst_267 : f32 to vector<8x256xf32>
    %926 = arith.cmpf olt, %924, %925 : vector<8x256xf32>
    %cst_268 = arith.constant 5.000000e-01 : f32
    %927 = vector.broadcast %cst_268 : f32 to vector<8x256xf32>
    %928 = arith.mulf %927, %924 : vector<8x256xf32>
    %929 = arith.mulf %928, %924 : vector<8x256xf32>
    %cst_269 = arith.constant 0.00999999977 : f32
    %930 = vector.broadcast %cst_269 : f32 to vector<8x256xf32>
    %931 = arith.divf %929, %930 : vector<8x256xf32>
    %cst_270 = arith.constant 5.000000e-03 : f32
    %932 = vector.broadcast %cst_270 : f32 to vector<8x256xf32>
    %933 = arith.subf %924, %932 : vector<8x256xf32>
    %934 = arith.select %926, %931, %933 : vector<8x256xi1>, vector<8x256xf32>
    %935 = arith.mulf %934, %922 : vector<8x256xf32>
    %936 = vector.shape_cast %935 : vector<8x256xf32> to vector<1x8x256xf32>
    %cst_271 = arith.constant dense<0.000000e+00> : vector<1xf32>
    %937 = vector.multi_reduction <add>, %936, %cst_271 [1, 2] : vector<1x8x256xf32> to vector<1xf32>
    %938 = vector.shape_cast %937 : vector<1xf32> to vector<1x1x1xf32>
    %939 = vector.extract %938[0, 0, 0] : f32 from vector<1x1x1xf32>
    %940 = vector.shape_cast %922 : vector<8x256xf32> to vector<1x8x256xf32>
    %cst_272 = arith.constant dense<0.000000e+00> : vector<1xf32>
    %941 = vector.multi_reduction <add>, %940, %cst_272 [1, 2] : vector<1x8x256xf32> to vector<1xf32>
    %942 = vector.shape_cast %941 : vector<1xf32> to vector<1x1x1xf32>
    %943 = vector.extract %942[0, 0, 0] : f32 from vector<1x1x1xf32>
    %c6_i32 = arith.constant 6 : i32
    %944 = vector.broadcast %c6_i32 : i32 to vector<8x128xi32>
    %945 = arith.cmpi eq, %16, %944 : vector<8x128xi32>
    %cst_273 = arith.constant 0.000000e+00 : f32
    %946 = vector.broadcast %943 : f32 to vector<8x128xf32>
    %947 = vector.broadcast %cst_273 : f32 to vector<8x128xf32>
    %948 = arith.select %21, %946, %947 : vector<8x128xi1>, vector<8x128xf32>
    %949 = vector.broadcast %939 : f32 to vector<8x128xf32>
    %950 = arith.select %19, %949, %948 : vector<8x128xi1>, vector<8x128xf32>
    %cst_274 = arith.constant 0.000000e+00 : f32
    %951 = vector.broadcast %cst_274 : f32 to vector<8x128xf32>
    %952 = arith.select %945, %950, %951 : vector<8x128xi1>, vector<8x128xf32>
    %953 = arith.addf %820, %952 : vector<8x128xf32>
    %c0_275 = arith.constant 0 : index
    %c7_276 = arith.constant 7 : index
    %c0_277 = arith.constant 0 : index
    %c0_278 = arith.constant 0 : index
    %954 = vector.load %arg2[%c0_275, %c7_276, %c0_277, %c0_278] : memref<1x10x256x256xbf16, #tpu.memory_space<vmem>>, vector<1x1x256x256xbf16>
    %955 = vector.shape_cast %954 : vector<1x1x256x256xbf16> to vector<256x256xbf16>
    %cst_279 = arith.constant dense<0.000000e+00> : vector<8x256xf32>
    %956 = tpu.matmul %9, %955, %cst_279 {dimension_numbers = #tpu.dot_dimension_numbers<[1], [0], [0], [1], [0, 0, 1, 1], [], []>} : vector<8x256xbf16>, vector<256x256xbf16>, vector<8x256xf32> -> vector<8x256xf32>
    %cst_280 = arith.constant dense<0.000000e+00> : vector<72x256xf32>
    %957 = tpu.matmul %12, %956, %cst_280 {dimension_numbers = #tpu.dot_dimension_numbers<[1], [0], [0], [1], [0, 0, 1, 1], [], []>} : vector<72x8xf32>, vector<8x256xf32>, vector<72x256xf32> -> vector<72x256xf32>
    %958 = vector.extract_strided_slice %957 {offsets = [0, 0], sizes = [8, 256], strides = [1, 1]} : vector<72x256xf32> to vector<8x256xf32>
    %c17_i32_281 = arith.constant 17 : i32
    %959 = tpu.dynamic_rotate %958 by %c17_i32_281 dim 1 : vector<8x256xf32>, i32 -> vector<8x256xf32>
    %960 = vector.broadcast %0 : vector<1x256xf32> to vector<8x256xf32>
    %961 = arith.mulf %959, %960 : vector<8x256xf32>
    %962 = vector.extract_strided_slice %957 {offsets = [8, 0], sizes = [8, 256], strides = [1, 1]} : vector<72x256xf32> to vector<8x256xf32>
    %c16_i32_282 = arith.constant 16 : i32
    %963 = tpu.dynamic_rotate %962 by %c16_i32_282 dim 1 : vector<8x256xf32>, i32 -> vector<8x256xf32>
    %964 = vector.broadcast %1 : vector<1x256xf32> to vector<8x256xf32>
    %965 = arith.mulf %963, %964 : vector<8x256xf32>
    %966 = arith.addf %961, %965 : vector<8x256xf32>
    %967 = vector.extract_strided_slice %957 {offsets = [16, 0], sizes = [8, 256], strides = [1, 1]} : vector<72x256xf32> to vector<8x256xf32>
    %c15_i32_283 = arith.constant 15 : i32
    %968 = tpu.dynamic_rotate %967 by %c15_i32_283 dim 1 : vector<8x256xf32>, i32 -> vector<8x256xf32>
    %969 = vector.broadcast %2 : vector<1x256xf32> to vector<8x256xf32>
    %970 = arith.mulf %968, %969 : vector<8x256xf32>
    %971 = arith.addf %966, %970 : vector<8x256xf32>
    %972 = vector.extract_strided_slice %957 {offsets = [24, 0], sizes = [8, 256], strides = [1, 1]} : vector<72x256xf32> to vector<8x256xf32>
    %c1_i32_284 = arith.constant 1 : i32
    %973 = tpu.dynamic_rotate %972 by %c1_i32_284 dim 1 : vector<8x256xf32>, i32 -> vector<8x256xf32>
    %974 = vector.broadcast %3 : vector<1x256xf32> to vector<8x256xf32>
    %975 = arith.mulf %973, %974 : vector<8x256xf32>
    %976 = arith.addf %971, %975 : vector<8x256xf32>
    %977 = vector.extract_strided_slice %957 {offsets = [32, 0], sizes = [8, 256], strides = [1, 1]} : vector<72x256xf32> to vector<8x256xf32>
    %978 = arith.addf %976, %977 : vector<8x256xf32>
    %979 = vector.extract_strided_slice %957 {offsets = [40, 0], sizes = [8, 256], strides = [1, 1]} : vector<72x256xf32> to vector<8x256xf32>
    %c255_i32_285 = arith.constant 255 : i32
    %980 = tpu.dynamic_rotate %979 by %c255_i32_285 dim 1 : vector<8x256xf32>, i32 -> vector<8x256xf32>
    %981 = vector.broadcast %4 : vector<1x256xf32> to vector<8x256xf32>
    %982 = arith.mulf %980, %981 : vector<8x256xf32>
    %983 = arith.addf %978, %982 : vector<8x256xf32>
    %984 = vector.extract_strided_slice %957 {offsets = [48, 0], sizes = [8, 256], strides = [1, 1]} : vector<72x256xf32> to vector<8x256xf32>
    %c241_i32_286 = arith.constant 241 : i32
    %985 = tpu.dynamic_rotate %984 by %c241_i32_286 dim 1 : vector<8x256xf32>, i32 -> vector<8x256xf32>
    %986 = vector.broadcast %5 : vector<1x256xf32> to vector<8x256xf32>
    %987 = arith.mulf %985, %986 : vector<8x256xf32>
    %988 = arith.addf %983, %987 : vector<8x256xf32>
    %989 = vector.extract_strided_slice %957 {offsets = [56, 0], sizes = [8, 256], strides = [1, 1]} : vector<72x256xf32> to vector<8x256xf32>
    %c240_i32_287 = arith.constant 240 : i32
    %990 = tpu.dynamic_rotate %989 by %c240_i32_287 dim 1 : vector<8x256xf32>, i32 -> vector<8x256xf32>
    %991 = vector.broadcast %6 : vector<1x256xf32> to vector<8x256xf32>
    %992 = arith.mulf %990, %991 : vector<8x256xf32>
    %993 = arith.addf %988, %992 : vector<8x256xf32>
    %994 = vector.extract_strided_slice %957 {offsets = [64, 0], sizes = [8, 256], strides = [1, 1]} : vector<72x256xf32> to vector<8x256xf32>
    %c239_i32_288 = arith.constant 239 : i32
    %995 = tpu.dynamic_rotate %994 by %c239_i32_288 dim 1 : vector<8x256xf32>, i32 -> vector<8x256xf32>
    %996 = vector.broadcast %7 : vector<1x256xf32> to vector<8x256xf32>
    %997 = arith.mulf %995, %996 : vector<8x256xf32>
    %998 = arith.addf %993, %997 : vector<8x256xf32>
    %999 = vector.broadcast %14 : vector<8x1xf32> to vector<8x256xf32>
    %1000 = arith.addf %998, %999 : vector<8x256xf32>
    %cst_289 = arith.constant 0.000000e+00 : f32
    %1001 = vector.broadcast %cst_289 : f32 to vector<8x256xf32>
    %1002 = arith.subf %1001, %1000 : vector<8x256xf32>
    %1003 = math.exp %1002 : vector<8x256xf32>
    %cst_290 = arith.constant 1.000000e+00 : f32
    %1004 = vector.broadcast %cst_290 : f32 to vector<8x256xf32>
    %1005 = arith.addf %1004, %1003 : vector<8x256xf32>
    %1006 = tpu.reciprocal %1005 {approx = true} : vector<8x256xf32> -> vector<8x256xf32>
    %1007 = arith.mulf %1006, %11 : vector<8x256xf32>
    %cst_291 = arith.constant dense<0.000000e+00> : vector<72x256xf32>
    %1008 = tpu.matmul %13, %1007, %cst_291 {dimension_numbers = #tpu.dot_dimension_numbers<[1], [0], [0], [1], [0, 0, 1, 1], [], []>} : vector<72x8xf32>, vector<8x256xf32>, vector<72x256xf32> -> vector<72x256xf32>
    %1009 = vector.extract_strided_slice %1008 {offsets = [0, 0], sizes = [8, 256], strides = [1, 1]} : vector<72x256xf32> to vector<8x256xf32>
    %c17_i32_292 = arith.constant 17 : i32
    %1010 = tpu.dynamic_rotate %1009 by %c17_i32_292 dim 1 : vector<8x256xf32>, i32 -> vector<8x256xf32>
    %1011 = vector.broadcast %0 : vector<1x256xf32> to vector<8x256xf32>
    %1012 = arith.mulf %1010, %1011 : vector<8x256xf32>
    %1013 = vector.extract_strided_slice %1008 {offsets = [8, 0], sizes = [8, 256], strides = [1, 1]} : vector<72x256xf32> to vector<8x256xf32>
    %c16_i32_293 = arith.constant 16 : i32
    %1014 = tpu.dynamic_rotate %1013 by %c16_i32_293 dim 1 : vector<8x256xf32>, i32 -> vector<8x256xf32>
    %1015 = vector.broadcast %1 : vector<1x256xf32> to vector<8x256xf32>
    %1016 = arith.mulf %1014, %1015 : vector<8x256xf32>
    %1017 = arith.addf %1012, %1016 : vector<8x256xf32>
    %1018 = vector.extract_strided_slice %1008 {offsets = [16, 0], sizes = [8, 256], strides = [1, 1]} : vector<72x256xf32> to vector<8x256xf32>
    %c15_i32_294 = arith.constant 15 : i32
    %1019 = tpu.dynamic_rotate %1018 by %c15_i32_294 dim 1 : vector<8x256xf32>, i32 -> vector<8x256xf32>
    %1020 = vector.broadcast %2 : vector<1x256xf32> to vector<8x256xf32>
    %1021 = arith.mulf %1019, %1020 : vector<8x256xf32>
    %1022 = arith.addf %1017, %1021 : vector<8x256xf32>
    %1023 = vector.extract_strided_slice %1008 {offsets = [24, 0], sizes = [8, 256], strides = [1, 1]} : vector<72x256xf32> to vector<8x256xf32>
    %c1_i32_295 = arith.constant 1 : i32
    %1024 = tpu.dynamic_rotate %1023 by %c1_i32_295 dim 1 : vector<8x256xf32>, i32 -> vector<8x256xf32>
    %1025 = vector.broadcast %3 : vector<1x256xf32> to vector<8x256xf32>
    %1026 = arith.mulf %1024, %1025 : vector<8x256xf32>
    %1027 = arith.addf %1022, %1026 : vector<8x256xf32>
    %1028 = vector.extract_strided_slice %1008 {offsets = [32, 0], sizes = [8, 256], strides = [1, 1]} : vector<72x256xf32> to vector<8x256xf32>
    %1029 = arith.addf %1027, %1028 : vector<8x256xf32>
    %1030 = vector.extract_strided_slice %1008 {offsets = [40, 0], sizes = [8, 256], strides = [1, 1]} : vector<72x256xf32> to vector<8x256xf32>
    %c255_i32_296 = arith.constant 255 : i32
    %1031 = tpu.dynamic_rotate %1030 by %c255_i32_296 dim 1 : vector<8x256xf32>, i32 -> vector<8x256xf32>
    %1032 = vector.broadcast %4 : vector<1x256xf32> to vector<8x256xf32>
    %1033 = arith.mulf %1031, %1032 : vector<8x256xf32>
    %1034 = arith.addf %1029, %1033 : vector<8x256xf32>
    %1035 = vector.extract_strided_slice %1008 {offsets = [48, 0], sizes = [8, 256], strides = [1, 1]} : vector<72x256xf32> to vector<8x256xf32>
    %c241_i32_297 = arith.constant 241 : i32
    %1036 = tpu.dynamic_rotate %1035 by %c241_i32_297 dim 1 : vector<8x256xf32>, i32 -> vector<8x256xf32>
    %1037 = vector.broadcast %5 : vector<1x256xf32> to vector<8x256xf32>
    %1038 = arith.mulf %1036, %1037 : vector<8x256xf32>
    %1039 = arith.addf %1034, %1038 : vector<8x256xf32>
    %1040 = vector.extract_strided_slice %1008 {offsets = [56, 0], sizes = [8, 256], strides = [1, 1]} : vector<72x256xf32> to vector<8x256xf32>
    %c240_i32_298 = arith.constant 240 : i32
    %1041 = tpu.dynamic_rotate %1040 by %c240_i32_298 dim 1 : vector<8x256xf32>, i32 -> vector<8x256xf32>
    %1042 = vector.broadcast %6 : vector<1x256xf32> to vector<8x256xf32>
    %1043 = arith.mulf %1041, %1042 : vector<8x256xf32>
    %1044 = arith.addf %1039, %1043 : vector<8x256xf32>
    %1045 = vector.extract_strided_slice %1008 {offsets = [64, 0], sizes = [8, 256], strides = [1, 1]} : vector<72x256xf32> to vector<8x256xf32>
    %c239_i32_299 = arith.constant 239 : i32
    %1046 = tpu.dynamic_rotate %1045 by %c239_i32_299 dim 1 : vector<8x256xf32>, i32 -> vector<8x256xf32>
    %1047 = vector.broadcast %7 : vector<1x256xf32> to vector<8x256xf32>
    %1048 = arith.mulf %1046, %1047 : vector<8x256xf32>
    %1049 = arith.addf %1044, %1048 : vector<8x256xf32>
    %1050 = vector.broadcast %15 : vector<8x1xf32> to vector<8x256xf32>
    %1051 = arith.addf %1049, %1050 : vector<8x256xf32>
    %c0_300 = arith.constant 0 : index
    %c7_301 = arith.constant 7 : index
    %c0_302 = arith.constant 0 : index
    %c0_303 = arith.constant 0 : index
    %1052 = vector.load %arg5[%c0_300, %c7_301, %c0_302, %c0_303] : memref<1x10x16x256xf32, #tpu.memory_space<vmem>>, vector<1x1x16x256xf32>
    %1053 = vector.shape_cast %1052 : vector<1x1x16x256xf32> to vector<16x256xf32>
    %1054 = vector.extract_strided_slice %1053 {offsets = [0, 0], sizes = [8, 256], strides = [1, 1]} : vector<16x256xf32> to vector<8x256xf32>
    %1055 = vector.extract_strided_slice %1053 {offsets = [8, 0], sizes = [8, 256], strides = [1, 1]} : vector<16x256xf32> to vector<8x256xf32>
    %1056 = arith.subf %1051, %1054 : vector<8x256xf32>
    %1057 = math.absf %1056 : vector<8x256xf32>
    %cst_304 = arith.constant 0.00999999977 : f32
    %1058 = vector.broadcast %cst_304 : f32 to vector<8x256xf32>
    %1059 = arith.cmpf olt, %1057, %1058 : vector<8x256xf32>
    %cst_305 = arith.constant 5.000000e-01 : f32
    %1060 = vector.broadcast %cst_305 : f32 to vector<8x256xf32>
    %1061 = arith.mulf %1060, %1057 : vector<8x256xf32>
    %1062 = arith.mulf %1061, %1057 : vector<8x256xf32>
    %cst_306 = arith.constant 0.00999999977 : f32
    %1063 = vector.broadcast %cst_306 : f32 to vector<8x256xf32>
    %1064 = arith.divf %1062, %1063 : vector<8x256xf32>
    %cst_307 = arith.constant 5.000000e-03 : f32
    %1065 = vector.broadcast %cst_307 : f32 to vector<8x256xf32>
    %1066 = arith.subf %1057, %1065 : vector<8x256xf32>
    %1067 = arith.select %1059, %1064, %1066 : vector<8x256xi1>, vector<8x256xf32>
    %1068 = arith.mulf %1067, %1055 : vector<8x256xf32>
    %1069 = vector.shape_cast %1068 : vector<8x256xf32> to vector<1x8x256xf32>
    %cst_308 = arith.constant dense<0.000000e+00> : vector<1xf32>
    %1070 = vector.multi_reduction <add>, %1069, %cst_308 [1, 2] : vector<1x8x256xf32> to vector<1xf32>
    %1071 = vector.shape_cast %1070 : vector<1xf32> to vector<1x1x1xf32>
    %1072 = vector.extract %1071[0, 0, 0] : f32 from vector<1x1x1xf32>
    %1073 = vector.shape_cast %1055 : vector<8x256xf32> to vector<1x8x256xf32>
    %cst_309 = arith.constant dense<0.000000e+00> : vector<1xf32>
    %1074 = vector.multi_reduction <add>, %1073, %cst_309 [1, 2] : vector<1x8x256xf32> to vector<1xf32>
    %1075 = vector.shape_cast %1074 : vector<1xf32> to vector<1x1x1xf32>
    %1076 = vector.extract %1075[0, 0, 0] : f32 from vector<1x1x1xf32>
    %c7_i32 = arith.constant 7 : i32
    %1077 = vector.broadcast %c7_i32 : i32 to vector<8x128xi32>
    %1078 = arith.cmpi eq, %16, %1077 : vector<8x128xi32>
    %cst_310 = arith.constant 0.000000e+00 : f32
    %1079 = vector.broadcast %1076 : f32 to vector<8x128xf32>
    %1080 = vector.broadcast %cst_310 : f32 to vector<8x128xf32>
    %1081 = arith.select %21, %1079, %1080 : vector<8x128xi1>, vector<8x128xf32>
    %1082 = vector.broadcast %1072 : f32 to vector<8x128xf32>
    %1083 = arith.select %19, %1082, %1081 : vector<8x128xi1>, vector<8x128xf32>
    %cst_311 = arith.constant 0.000000e+00 : f32
    %1084 = vector.broadcast %cst_311 : f32 to vector<8x128xf32>
    %1085 = arith.select %1078, %1083, %1084 : vector<8x128xi1>, vector<8x128xf32>
    %1086 = arith.addf %953, %1085 : vector<8x128xf32>
    %c0_312 = arith.constant 0 : index
    %c8_313 = arith.constant 8 : index
    %c0_314 = arith.constant 0 : index
    %c0_315 = arith.constant 0 : index
    %1087 = vector.load %arg2[%c0_312, %c8_313, %c0_314, %c0_315] : memref<1x10x256x256xbf16, #tpu.memory_space<vmem>>, vector<1x1x256x256xbf16>
    %1088 = vector.shape_cast %1087 : vector<1x1x256x256xbf16> to vector<256x256xbf16>
    %cst_316 = arith.constant dense<0.000000e+00> : vector<8x256xf32>
    %1089 = tpu.matmul %9, %1088, %cst_316 {dimension_numbers = #tpu.dot_dimension_numbers<[1], [0], [0], [1], [0, 0, 1, 1], [], []>} : vector<8x256xbf16>, vector<256x256xbf16>, vector<8x256xf32> -> vector<8x256xf32>
    %cst_317 = arith.constant dense<0.000000e+00> : vector<72x256xf32>
    %1090 = tpu.matmul %12, %1089, %cst_317 {dimension_numbers = #tpu.dot_dimension_numbers<[1], [0], [0], [1], [0, 0, 1, 1], [], []>} : vector<72x8xf32>, vector<8x256xf32>, vector<72x256xf32> -> vector<72x256xf32>
    %1091 = vector.extract_strided_slice %1090 {offsets = [0, 0], sizes = [8, 256], strides = [1, 1]} : vector<72x256xf32> to vector<8x256xf32>
    %c17_i32_318 = arith.constant 17 : i32
    %1092 = tpu.dynamic_rotate %1091 by %c17_i32_318 dim 1 : vector<8x256xf32>, i32 -> vector<8x256xf32>
    %1093 = vector.broadcast %0 : vector<1x256xf32> to vector<8x256xf32>
    %1094 = arith.mulf %1092, %1093 : vector<8x256xf32>
    %1095 = vector.extract_strided_slice %1090 {offsets = [8, 0], sizes = [8, 256], strides = [1, 1]} : vector<72x256xf32> to vector<8x256xf32>
    %c16_i32_319 = arith.constant 16 : i32
    %1096 = tpu.dynamic_rotate %1095 by %c16_i32_319 dim 1 : vector<8x256xf32>, i32 -> vector<8x256xf32>
    %1097 = vector.broadcast %1 : vector<1x256xf32> to vector<8x256xf32>
    %1098 = arith.mulf %1096, %1097 : vector<8x256xf32>
    %1099 = arith.addf %1094, %1098 : vector<8x256xf32>
    %1100 = vector.extract_strided_slice %1090 {offsets = [16, 0], sizes = [8, 256], strides = [1, 1]} : vector<72x256xf32> to vector<8x256xf32>
    %c15_i32_320 = arith.constant 15 : i32
    %1101 = tpu.dynamic_rotate %1100 by %c15_i32_320 dim 1 : vector<8x256xf32>, i32 -> vector<8x256xf32>
    %1102 = vector.broadcast %2 : vector<1x256xf32> to vector<8x256xf32>
    %1103 = arith.mulf %1101, %1102 : vector<8x256xf32>
    %1104 = arith.addf %1099, %1103 : vector<8x256xf32>
    %1105 = vector.extract_strided_slice %1090 {offsets = [24, 0], sizes = [8, 256], strides = [1, 1]} : vector<72x256xf32> to vector<8x256xf32>
    %c1_i32_321 = arith.constant 1 : i32
    %1106 = tpu.dynamic_rotate %1105 by %c1_i32_321 dim 1 : vector<8x256xf32>, i32 -> vector<8x256xf32>
    %1107 = vector.broadcast %3 : vector<1x256xf32> to vector<8x256xf32>
    %1108 = arith.mulf %1106, %1107 : vector<8x256xf32>
    %1109 = arith.addf %1104, %1108 : vector<8x256xf32>
    %1110 = vector.extract_strided_slice %1090 {offsets = [32, 0], sizes = [8, 256], strides = [1, 1]} : vector<72x256xf32> to vector<8x256xf32>
    %1111 = arith.addf %1109, %1110 : vector<8x256xf32>
    %1112 = vector.extract_strided_slice %1090 {offsets = [40, 0], sizes = [8, 256], strides = [1, 1]} : vector<72x256xf32> to vector<8x256xf32>
    %c255_i32_322 = arith.constant 255 : i32
    %1113 = tpu.dynamic_rotate %1112 by %c255_i32_322 dim 1 : vector<8x256xf32>, i32 -> vector<8x256xf32>
    %1114 = vector.broadcast %4 : vector<1x256xf32> to vector<8x256xf32>
    %1115 = arith.mulf %1113, %1114 : vector<8x256xf32>
    %1116 = arith.addf %1111, %1115 : vector<8x256xf32>
    %1117 = vector.extract_strided_slice %1090 {offsets = [48, 0], sizes = [8, 256], strides = [1, 1]} : vector<72x256xf32> to vector<8x256xf32>
    %c241_i32_323 = arith.constant 241 : i32
    %1118 = tpu.dynamic_rotate %1117 by %c241_i32_323 dim 1 : vector<8x256xf32>, i32 -> vector<8x256xf32>
    %1119 = vector.broadcast %5 : vector<1x256xf32> to vector<8x256xf32>
    %1120 = arith.mulf %1118, %1119 : vector<8x256xf32>
    %1121 = arith.addf %1116, %1120 : vector<8x256xf32>
    %1122 = vector.extract_strided_slice %1090 {offsets = [56, 0], sizes = [8, 256], strides = [1, 1]} : vector<72x256xf32> to vector<8x256xf32>
    %c240_i32_324 = arith.constant 240 : i32
    %1123 = tpu.dynamic_rotate %1122 by %c240_i32_324 dim 1 : vector<8x256xf32>, i32 -> vector<8x256xf32>
    %1124 = vector.broadcast %6 : vector<1x256xf32> to vector<8x256xf32>
    %1125 = arith.mulf %1123, %1124 : vector<8x256xf32>
    %1126 = arith.addf %1121, %1125 : vector<8x256xf32>
    %1127 = vector.extract_strided_slice %1090 {offsets = [64, 0], sizes = [8, 256], strides = [1, 1]} : vector<72x256xf32> to vector<8x256xf32>
    %c239_i32_325 = arith.constant 239 : i32
    %1128 = tpu.dynamic_rotate %1127 by %c239_i32_325 dim 1 : vector<8x256xf32>, i32 -> vector<8x256xf32>
    %1129 = vector.broadcast %7 : vector<1x256xf32> to vector<8x256xf32>
    %1130 = arith.mulf %1128, %1129 : vector<8x256xf32>
    %1131 = arith.addf %1126, %1130 : vector<8x256xf32>
    %1132 = vector.broadcast %14 : vector<8x1xf32> to vector<8x256xf32>
    %1133 = arith.addf %1131, %1132 : vector<8x256xf32>
    %cst_326 = arith.constant 0.000000e+00 : f32
    %1134 = vector.broadcast %cst_326 : f32 to vector<8x256xf32>
    %1135 = arith.subf %1134, %1133 : vector<8x256xf32>
    %1136 = math.exp %1135 : vector<8x256xf32>
    %cst_327 = arith.constant 1.000000e+00 : f32
    %1137 = vector.broadcast %cst_327 : f32 to vector<8x256xf32>
    %1138 = arith.addf %1137, %1136 : vector<8x256xf32>
    %1139 = tpu.reciprocal %1138 {approx = true} : vector<8x256xf32> -> vector<8x256xf32>
    %1140 = arith.mulf %1139, %11 : vector<8x256xf32>
    %cst_328 = arith.constant dense<0.000000e+00> : vector<72x256xf32>
    %1141 = tpu.matmul %13, %1140, %cst_328 {dimension_numbers = #tpu.dot_dimension_numbers<[1], [0], [0], [1], [0, 0, 1, 1], [], []>} : vector<72x8xf32>, vector<8x256xf32>, vector<72x256xf32> -> vector<72x256xf32>
    %1142 = vector.extract_strided_slice %1141 {offsets = [0, 0], sizes = [8, 256], strides = [1, 1]} : vector<72x256xf32> to vector<8x256xf32>
    %c17_i32_329 = arith.constant 17 : i32
    %1143 = tpu.dynamic_rotate %1142 by %c17_i32_329 dim 1 : vector<8x256xf32>, i32 -> vector<8x256xf32>
    %1144 = vector.broadcast %0 : vector<1x256xf32> to vector<8x256xf32>
    %1145 = arith.mulf %1143, %1144 : vector<8x256xf32>
    %1146 = vector.extract_strided_slice %1141 {offsets = [8, 0], sizes = [8, 256], strides = [1, 1]} : vector<72x256xf32> to vector<8x256xf32>
    %c16_i32_330 = arith.constant 16 : i32
    %1147 = tpu.dynamic_rotate %1146 by %c16_i32_330 dim 1 : vector<8x256xf32>, i32 -> vector<8x256xf32>
    %1148 = vector.broadcast %1 : vector<1x256xf32> to vector<8x256xf32>
    %1149 = arith.mulf %1147, %1148 : vector<8x256xf32>
    %1150 = arith.addf %1145, %1149 : vector<8x256xf32>
    %1151 = vector.extract_strided_slice %1141 {offsets = [16, 0], sizes = [8, 256], strides = [1, 1]} : vector<72x256xf32> to vector<8x256xf32>
    %c15_i32_331 = arith.constant 15 : i32
    %1152 = tpu.dynamic_rotate %1151 by %c15_i32_331 dim 1 : vector<8x256xf32>, i32 -> vector<8x256xf32>
    %1153 = vector.broadcast %2 : vector<1x256xf32> to vector<8x256xf32>
    %1154 = arith.mulf %1152, %1153 : vector<8x256xf32>
    %1155 = arith.addf %1150, %1154 : vector<8x256xf32>
    %1156 = vector.extract_strided_slice %1141 {offsets = [24, 0], sizes = [8, 256], strides = [1, 1]} : vector<72x256xf32> to vector<8x256xf32>
    %c1_i32_332 = arith.constant 1 : i32
    %1157 = tpu.dynamic_rotate %1156 by %c1_i32_332 dim 1 : vector<8x256xf32>, i32 -> vector<8x256xf32>
    %1158 = vector.broadcast %3 : vector<1x256xf32> to vector<8x256xf32>
    %1159 = arith.mulf %1157, %1158 : vector<8x256xf32>
    %1160 = arith.addf %1155, %1159 : vector<8x256xf32>
    %1161 = vector.extract_strided_slice %1141 {offsets = [32, 0], sizes = [8, 256], strides = [1, 1]} : vector<72x256xf32> to vector<8x256xf32>
    %1162 = arith.addf %1160, %1161 : vector<8x256xf32>
    %1163 = vector.extract_strided_slice %1141 {offsets = [40, 0], sizes = [8, 256], strides = [1, 1]} : vector<72x256xf32> to vector<8x256xf32>
    %c255_i32_333 = arith.constant 255 : i32
    %1164 = tpu.dynamic_rotate %1163 by %c255_i32_333 dim 1 : vector<8x256xf32>, i32 -> vector<8x256xf32>
    %1165 = vector.broadcast %4 : vector<1x256xf32> to vector<8x256xf32>
    %1166 = arith.mulf %1164, %1165 : vector<8x256xf32>
    %1167 = arith.addf %1162, %1166 : vector<8x256xf32>
    %1168 = vector.extract_strided_slice %1141 {offsets = [48, 0], sizes = [8, 256], strides = [1, 1]} : vector<72x256xf32> to vector<8x256xf32>
    %c241_i32_334 = arith.constant 241 : i32
    %1169 = tpu.dynamic_rotate %1168 by %c241_i32_334 dim 1 : vector<8x256xf32>, i32 -> vector<8x256xf32>
    %1170 = vector.broadcast %5 : vector<1x256xf32> to vector<8x256xf32>
    %1171 = arith.mulf %1169, %1170 : vector<8x256xf32>
    %1172 = arith.addf %1167, %1171 : vector<8x256xf32>
    %1173 = vector.extract_strided_slice %1141 {offsets = [56, 0], sizes = [8, 256], strides = [1, 1]} : vector<72x256xf32> to vector<8x256xf32>
    %c240_i32_335 = arith.constant 240 : i32
    %1174 = tpu.dynamic_rotate %1173 by %c240_i32_335 dim 1 : vector<8x256xf32>, i32 -> vector<8x256xf32>
    %1175 = vector.broadcast %6 : vector<1x256xf32> to vector<8x256xf32>
    %1176 = arith.mulf %1174, %1175 : vector<8x256xf32>
    %1177 = arith.addf %1172, %1176 : vector<8x256xf32>
    %1178 = vector.extract_strided_slice %1141 {offsets = [64, 0], sizes = [8, 256], strides = [1, 1]} : vector<72x256xf32> to vector<8x256xf32>
    %c239_i32_336 = arith.constant 239 : i32
    %1179 = tpu.dynamic_rotate %1178 by %c239_i32_336 dim 1 : vector<8x256xf32>, i32 -> vector<8x256xf32>
    %1180 = vector.broadcast %7 : vector<1x256xf32> to vector<8x256xf32>
    %1181 = arith.mulf %1179, %1180 : vector<8x256xf32>
    %1182 = arith.addf %1177, %1181 : vector<8x256xf32>
    %1183 = vector.broadcast %15 : vector<8x1xf32> to vector<8x256xf32>
    %1184 = arith.addf %1182, %1183 : vector<8x256xf32>
    %c0_337 = arith.constant 0 : index
    %c8_338 = arith.constant 8 : index
    %c0_339 = arith.constant 0 : index
    %c0_340 = arith.constant 0 : index
    %1185 = vector.load %arg5[%c0_337, %c8_338, %c0_339, %c0_340] : memref<1x10x16x256xf32, #tpu.memory_space<vmem>>, vector<1x1x16x256xf32>
    %1186 = vector.shape_cast %1185 : vector<1x1x16x256xf32> to vector<16x256xf32>
    %1187 = vector.extract_strided_slice %1186 {offsets = [0, 0], sizes = [8, 256], strides = [1, 1]} : vector<16x256xf32> to vector<8x256xf32>
    %1188 = vector.extract_strided_slice %1186 {offsets = [8, 0], sizes = [8, 256], strides = [1, 1]} : vector<16x256xf32> to vector<8x256xf32>
    %1189 = arith.subf %1184, %1187 : vector<8x256xf32>
    %1190 = math.absf %1189 : vector<8x256xf32>
    %cst_341 = arith.constant 0.00999999977 : f32
    %1191 = vector.broadcast %cst_341 : f32 to vector<8x256xf32>
    %1192 = arith.cmpf olt, %1190, %1191 : vector<8x256xf32>
    %cst_342 = arith.constant 5.000000e-01 : f32
    %1193 = vector.broadcast %cst_342 : f32 to vector<8x256xf32>
    %1194 = arith.mulf %1193, %1190 : vector<8x256xf32>
    %1195 = arith.mulf %1194, %1190 : vector<8x256xf32>
    %cst_343 = arith.constant 0.00999999977 : f32
    %1196 = vector.broadcast %cst_343 : f32 to vector<8x256xf32>
    %1197 = arith.divf %1195, %1196 : vector<8x256xf32>
    %cst_344 = arith.constant 5.000000e-03 : f32
    %1198 = vector.broadcast %cst_344 : f32 to vector<8x256xf32>
    %1199 = arith.subf %1190, %1198 : vector<8x256xf32>
    %1200 = arith.select %1192, %1197, %1199 : vector<8x256xi1>, vector<8x256xf32>
    %1201 = arith.mulf %1200, %1188 : vector<8x256xf32>
    %1202 = vector.shape_cast %1201 : vector<8x256xf32> to vector<1x8x256xf32>
    %cst_345 = arith.constant dense<0.000000e+00> : vector<1xf32>
    %1203 = vector.multi_reduction <add>, %1202, %cst_345 [1, 2] : vector<1x8x256xf32> to vector<1xf32>
    %1204 = vector.shape_cast %1203 : vector<1xf32> to vector<1x1x1xf32>
    %1205 = vector.extract %1204[0, 0, 0] : f32 from vector<1x1x1xf32>
    %1206 = vector.shape_cast %1188 : vector<8x256xf32> to vector<1x8x256xf32>
    %cst_346 = arith.constant dense<0.000000e+00> : vector<1xf32>
    %1207 = vector.multi_reduction <add>, %1206, %cst_346 [1, 2] : vector<1x8x256xf32> to vector<1xf32>
    %1208 = vector.shape_cast %1207 : vector<1xf32> to vector<1x1x1xf32>
    %1209 = vector.extract %1208[0, 0, 0] : f32 from vector<1x1x1xf32>
    %c8_i32 = arith.constant 8 : i32
    %1210 = vector.broadcast %c8_i32 : i32 to vector<8x128xi32>
    %1211 = arith.cmpi eq, %16, %1210 : vector<8x128xi32>
    %cst_347 = arith.constant 0.000000e+00 : f32
    %1212 = vector.broadcast %1209 : f32 to vector<8x128xf32>
    %1213 = vector.broadcast %cst_347 : f32 to vector<8x128xf32>
    %1214 = arith.select %21, %1212, %1213 : vector<8x128xi1>, vector<8x128xf32>
    %1215 = vector.broadcast %1205 : f32 to vector<8x128xf32>
    %1216 = arith.select %19, %1215, %1214 : vector<8x128xi1>, vector<8x128xf32>
    %cst_348 = arith.constant 0.000000e+00 : f32
    %1217 = vector.broadcast %cst_348 : f32 to vector<8x128xf32>
    %1218 = arith.select %1211, %1216, %1217 : vector<8x128xi1>, vector<8x128xf32>
    %1219 = arith.addf %1086, %1218 : vector<8x128xf32>
    %c0_349 = arith.constant 0 : index
    %c9 = arith.constant 9 : index
    %c0_350 = arith.constant 0 : index
    %c0_351 = arith.constant 0 : index
    %1220 = vector.load %arg2[%c0_349, %c9, %c0_350, %c0_351] : memref<1x10x256x256xbf16, #tpu.memory_space<vmem>>, vector<1x1x256x256xbf16>
    %1221 = vector.shape_cast %1220 : vector<1x1x256x256xbf16> to vector<256x256xbf16>
    %cst_352 = arith.constant dense<0.000000e+00> : vector<8x256xf32>
    %1222 = tpu.matmul %9, %1221, %cst_352 {dimension_numbers = #tpu.dot_dimension_numbers<[1], [0], [0], [1], [0, 0, 1, 1], [], []>} : vector<8x256xbf16>, vector<256x256xbf16>, vector<8x256xf32> -> vector<8x256xf32>
    %cst_353 = arith.constant dense<0.000000e+00> : vector<72x256xf32>
    %1223 = tpu.matmul %12, %1222, %cst_353 {dimension_numbers = #tpu.dot_dimension_numbers<[1], [0], [0], [1], [0, 0, 1, 1], [], []>} : vector<72x8xf32>, vector<8x256xf32>, vector<72x256xf32> -> vector<72x256xf32>
    %1224 = vector.extract_strided_slice %1223 {offsets = [0, 0], sizes = [8, 256], strides = [1, 1]} : vector<72x256xf32> to vector<8x256xf32>
    %c17_i32_354 = arith.constant 17 : i32
    %1225 = tpu.dynamic_rotate %1224 by %c17_i32_354 dim 1 : vector<8x256xf32>, i32 -> vector<8x256xf32>
    %1226 = vector.broadcast %0 : vector<1x256xf32> to vector<8x256xf32>
    %1227 = arith.mulf %1225, %1226 : vector<8x256xf32>
    %1228 = vector.extract_strided_slice %1223 {offsets = [8, 0], sizes = [8, 256], strides = [1, 1]} : vector<72x256xf32> to vector<8x256xf32>
    %c16_i32_355 = arith.constant 16 : i32
    %1229 = tpu.dynamic_rotate %1228 by %c16_i32_355 dim 1 : vector<8x256xf32>, i32 -> vector<8x256xf32>
    %1230 = vector.broadcast %1 : vector<1x256xf32> to vector<8x256xf32>
    %1231 = arith.mulf %1229, %1230 : vector<8x256xf32>
    %1232 = arith.addf %1227, %1231 : vector<8x256xf32>
    %1233 = vector.extract_strided_slice %1223 {offsets = [16, 0], sizes = [8, 256], strides = [1, 1]} : vector<72x256xf32> to vector<8x256xf32>
    %c15_i32_356 = arith.constant 15 : i32
    %1234 = tpu.dynamic_rotate %1233 by %c15_i32_356 dim 1 : vector<8x256xf32>, i32 -> vector<8x256xf32>
    %1235 = vector.broadcast %2 : vector<1x256xf32> to vector<8x256xf32>
    %1236 = arith.mulf %1234, %1235 : vector<8x256xf32>
    %1237 = arith.addf %1232, %1236 : vector<8x256xf32>
    %1238 = vector.extract_strided_slice %1223 {offsets = [24, 0], sizes = [8, 256], strides = [1, 1]} : vector<72x256xf32> to vector<8x256xf32>
    %c1_i32_357 = arith.constant 1 : i32
    %1239 = tpu.dynamic_rotate %1238 by %c1_i32_357 dim 1 : vector<8x256xf32>, i32 -> vector<8x256xf32>
    %1240 = vector.broadcast %3 : vector<1x256xf32> to vector<8x256xf32>
    %1241 = arith.mulf %1239, %1240 : vector<8x256xf32>
    %1242 = arith.addf %1237, %1241 : vector<8x256xf32>
    %1243 = vector.extract_strided_slice %1223 {offsets = [32, 0], sizes = [8, 256], strides = [1, 1]} : vector<72x256xf32> to vector<8x256xf32>
    %1244 = arith.addf %1242, %1243 : vector<8x256xf32>
    %1245 = vector.extract_strided_slice %1223 {offsets = [40, 0], sizes = [8, 256], strides = [1, 1]} : vector<72x256xf32> to vector<8x256xf32>
    %c255_i32_358 = arith.constant 255 : i32
    %1246 = tpu.dynamic_rotate %1245 by %c255_i32_358 dim 1 : vector<8x256xf32>, i32 -> vector<8x256xf32>
    %1247 = vector.broadcast %4 : vector<1x256xf32> to vector<8x256xf32>
    %1248 = arith.mulf %1246, %1247 : vector<8x256xf32>
    %1249 = arith.addf %1244, %1248 : vector<8x256xf32>
    %1250 = vector.extract_strided_slice %1223 {offsets = [48, 0], sizes = [8, 256], strides = [1, 1]} : vector<72x256xf32> to vector<8x256xf32>
    %c241_i32_359 = arith.constant 241 : i32
    %1251 = tpu.dynamic_rotate %1250 by %c241_i32_359 dim 1 : vector<8x256xf32>, i32 -> vector<8x256xf32>
    %1252 = vector.broadcast %5 : vector<1x256xf32> to vector<8x256xf32>
    %1253 = arith.mulf %1251, %1252 : vector<8x256xf32>
    %1254 = arith.addf %1249, %1253 : vector<8x256xf32>
    %1255 = vector.extract_strided_slice %1223 {offsets = [56, 0], sizes = [8, 256], strides = [1, 1]} : vector<72x256xf32> to vector<8x256xf32>
    %c240_i32_360 = arith.constant 240 : i32
    %1256 = tpu.dynamic_rotate %1255 by %c240_i32_360 dim 1 : vector<8x256xf32>, i32 -> vector<8x256xf32>
    %1257 = vector.broadcast %6 : vector<1x256xf32> to vector<8x256xf32>
    %1258 = arith.mulf %1256, %1257 : vector<8x256xf32>
    %1259 = arith.addf %1254, %1258 : vector<8x256xf32>
    %1260 = vector.extract_strided_slice %1223 {offsets = [64, 0], sizes = [8, 256], strides = [1, 1]} : vector<72x256xf32> to vector<8x256xf32>
    %c239_i32_361 = arith.constant 239 : i32
    %1261 = tpu.dynamic_rotate %1260 by %c239_i32_361 dim 1 : vector<8x256xf32>, i32 -> vector<8x256xf32>
    %1262 = vector.broadcast %7 : vector<1x256xf32> to vector<8x256xf32>
    %1263 = arith.mulf %1261, %1262 : vector<8x256xf32>
    %1264 = arith.addf %1259, %1263 : vector<8x256xf32>
    %1265 = vector.broadcast %14 : vector<8x1xf32> to vector<8x256xf32>
    %1266 = arith.addf %1264, %1265 : vector<8x256xf32>
    %cst_362 = arith.constant 0.000000e+00 : f32
    %1267 = vector.broadcast %cst_362 : f32 to vector<8x256xf32>
    %1268 = arith.subf %1267, %1266 : vector<8x256xf32>
    %1269 = math.exp %1268 : vector<8x256xf32>
    %cst_363 = arith.constant 1.000000e+00 : f32
    %1270 = vector.broadcast %cst_363 : f32 to vector<8x256xf32>
    %1271 = arith.addf %1270, %1269 : vector<8x256xf32>
    %1272 = tpu.reciprocal %1271 {approx = true} : vector<8x256xf32> -> vector<8x256xf32>
    %1273 = arith.mulf %1272, %11 : vector<8x256xf32>
    %cst_364 = arith.constant dense<0.000000e+00> : vector<72x256xf32>
    %1274 = tpu.matmul %13, %1273, %cst_364 {dimension_numbers = #tpu.dot_dimension_numbers<[1], [0], [0], [1], [0, 0, 1, 1], [], []>} : vector<72x8xf32>, vector<8x256xf32>, vector<72x256xf32> -> vector<72x256xf32>
    %1275 = vector.extract_strided_slice %1274 {offsets = [0, 0], sizes = [8, 256], strides = [1, 1]} : vector<72x256xf32> to vector<8x256xf32>
    %c17_i32_365 = arith.constant 17 : i32
    %1276 = tpu.dynamic_rotate %1275 by %c17_i32_365 dim 1 : vector<8x256xf32>, i32 -> vector<8x256xf32>
    %1277 = vector.broadcast %0 : vector<1x256xf32> to vector<8x256xf32>
    %1278 = arith.mulf %1276, %1277 : vector<8x256xf32>
    %1279 = vector.extract_strided_slice %1274 {offsets = [8, 0], sizes = [8, 256], strides = [1, 1]} : vector<72x256xf32> to vector<8x256xf32>
    %c16_i32_366 = arith.constant 16 : i32
    %1280 = tpu.dynamic_rotate %1279 by %c16_i32_366 dim 1 : vector<8x256xf32>, i32 -> vector<8x256xf32>
    %1281 = vector.broadcast %1 : vector<1x256xf32> to vector<8x256xf32>
    %1282 = arith.mulf %1280, %1281 : vector<8x256xf32>
    %1283 = arith.addf %1278, %1282 : vector<8x256xf32>
    %1284 = vector.extract_strided_slice %1274 {offsets = [16, 0], sizes = [8, 256], strides = [1, 1]} : vector<72x256xf32> to vector<8x256xf32>
    %c15_i32_367 = arith.constant 15 : i32
    %1285 = tpu.dynamic_rotate %1284 by %c15_i32_367 dim 1 : vector<8x256xf32>, i32 -> vector<8x256xf32>
    %1286 = vector.broadcast %2 : vector<1x256xf32> to vector<8x256xf32>
    %1287 = arith.mulf %1285, %1286 : vector<8x256xf32>
    %1288 = arith.addf %1283, %1287 : vector<8x256xf32>
    %1289 = vector.extract_strided_slice %1274 {offsets = [24, 0], sizes = [8, 256], strides = [1, 1]} : vector<72x256xf32> to vector<8x256xf32>
    %c1_i32_368 = arith.constant 1 : i32
    %1290 = tpu.dynamic_rotate %1289 by %c1_i32_368 dim 1 : vector<8x256xf32>, i32 -> vector<8x256xf32>
    %1291 = vector.broadcast %3 : vector<1x256xf32> to vector<8x256xf32>
    %1292 = arith.mulf %1290, %1291 : vector<8x256xf32>
    %1293 = arith.addf %1288, %1292 : vector<8x256xf32>
    %1294 = vector.extract_strided_slice %1274 {offsets = [32, 0], sizes = [8, 256], strides = [1, 1]} : vector<72x256xf32> to vector<8x256xf32>
    %1295 = arith.addf %1293, %1294 : vector<8x256xf32>
    %1296 = vector.extract_strided_slice %1274 {offsets = [40, 0], sizes = [8, 256], strides = [1, 1]} : vector<72x256xf32> to vector<8x256xf32>
    %c255_i32_369 = arith.constant 255 : i32
    %1297 = tpu.dynamic_rotate %1296 by %c255_i32_369 dim 1 : vector<8x256xf32>, i32 -> vector<8x256xf32>
    %1298 = vector.broadcast %4 : vector<1x256xf32> to vector<8x256xf32>
    %1299 = arith.mulf %1297, %1298 : vector<8x256xf32>
    %1300 = arith.addf %1295, %1299 : vector<8x256xf32>
    %1301 = vector.extract_strided_slice %1274 {offsets = [48, 0], sizes = [8, 256], strides = [1, 1]} : vector<72x256xf32> to vector<8x256xf32>
    %c241_i32_370 = arith.constant 241 : i32
    %1302 = tpu.dynamic_rotate %1301 by %c241_i32_370 dim 1 : vector<8x256xf32>, i32 -> vector<8x256xf32>
    %1303 = vector.broadcast %5 : vector<1x256xf32> to vector<8x256xf32>
    %1304 = arith.mulf %1302, %1303 : vector<8x256xf32>
    %1305 = arith.addf %1300, %1304 : vector<8x256xf32>
    %1306 = vector.extract_strided_slice %1274 {offsets = [56, 0], sizes = [8, 256], strides = [1, 1]} : vector<72x256xf32> to vector<8x256xf32>
    %c240_i32_371 = arith.constant 240 : i32
    %1307 = tpu.dynamic_rotate %1306 by %c240_i32_371 dim 1 : vector<8x256xf32>, i32 -> vector<8x256xf32>
    %1308 = vector.broadcast %6 : vector<1x256xf32> to vector<8x256xf32>
    %1309 = arith.mulf %1307, %1308 : vector<8x256xf32>
    %1310 = arith.addf %1305, %1309 : vector<8x256xf32>
    %1311 = vector.extract_strided_slice %1274 {offsets = [64, 0], sizes = [8, 256], strides = [1, 1]} : vector<72x256xf32> to vector<8x256xf32>
    %c239_i32_372 = arith.constant 239 : i32
    %1312 = tpu.dynamic_rotate %1311 by %c239_i32_372 dim 1 : vector<8x256xf32>, i32 -> vector<8x256xf32>
    %1313 = vector.broadcast %7 : vector<1x256xf32> to vector<8x256xf32>
    %1314 = arith.mulf %1312, %1313 : vector<8x256xf32>
    %1315 = arith.addf %1310, %1314 : vector<8x256xf32>
    %1316 = vector.broadcast %15 : vector<8x1xf32> to vector<8x256xf32>
    %1317 = arith.addf %1315, %1316 : vector<8x256xf32>
    %c0_373 = arith.constant 0 : index
    %c9_374 = arith.constant 9 : index
    %c0_375 = arith.constant 0 : index
    %c0_376 = arith.constant 0 : index
    %1318 = vector.load %arg5[%c0_373, %c9_374, %c0_375, %c0_376] : memref<1x10x16x256xf32, #tpu.memory_space<vmem>>, vector<1x1x16x256xf32>
    %1319 = vector.shape_cast %1318 : vector<1x1x16x256xf32> to vector<16x256xf32>
    %1320 = vector.extract_strided_slice %1319 {offsets = [0, 0], sizes = [8, 256], strides = [1, 1]} : vector<16x256xf32> to vector<8x256xf32>
    %1321 = vector.extract_strided_slice %1319 {offsets = [8, 0], sizes = [8, 256], strides = [1, 1]} : vector<16x256xf32> to vector<8x256xf32>
    %1322 = arith.subf %1317, %1320 : vector<8x256xf32>
    %1323 = math.absf %1322 : vector<8x256xf32>
    %cst_377 = arith.constant 0.00999999977 : f32
    %1324 = vector.broadcast %cst_377 : f32 to vector<8x256xf32>
    %1325 = arith.cmpf olt, %1323, %1324 : vector<8x256xf32>
    %cst_378 = arith.constant 5.000000e-01 : f32
    %1326 = vector.broadcast %cst_378 : f32 to vector<8x256xf32>
    %1327 = arith.mulf %1326, %1323 : vector<8x256xf32>
    %1328 = arith.mulf %1327, %1323 : vector<8x256xf32>
    %cst_379 = arith.constant 0.00999999977 : f32
    %1329 = vector.broadcast %cst_379 : f32 to vector<8x256xf32>
    %1330 = arith.divf %1328, %1329 : vector<8x256xf32>
    %cst_380 = arith.constant 5.000000e-03 : f32
    %1331 = vector.broadcast %cst_380 : f32 to vector<8x256xf32>
    %1332 = arith.subf %1323, %1331 : vector<8x256xf32>
    %1333 = arith.select %1325, %1330, %1332 : vector<8x256xi1>, vector<8x256xf32>
    %1334 = arith.mulf %1333, %1321 : vector<8x256xf32>
    %1335 = vector.shape_cast %1334 : vector<8x256xf32> to vector<1x8x256xf32>
    %cst_381 = arith.constant dense<0.000000e+00> : vector<1xf32>
    %1336 = vector.multi_reduction <add>, %1335, %cst_381 [1, 2] : vector<1x8x256xf32> to vector<1xf32>
    %1337 = vector.shape_cast %1336 : vector<1xf32> to vector<1x1x1xf32>
    %1338 = vector.extract %1337[0, 0, 0] : f32 from vector<1x1x1xf32>
    %1339 = vector.shape_cast %1321 : vector<8x256xf32> to vector<1x8x256xf32>
    %cst_382 = arith.constant dense<0.000000e+00> : vector<1xf32>
    %1340 = vector.multi_reduction <add>, %1339, %cst_382 [1, 2] : vector<1x8x256xf32> to vector<1xf32>
    %1341 = vector.shape_cast %1340 : vector<1xf32> to vector<1x1x1xf32>
    %1342 = vector.extract %1341[0, 0, 0] : f32 from vector<1x1x1xf32>
    %c9_i32 = arith.constant 9 : i32
    %1343 = vector.broadcast %c9_i32 : i32 to vector<8x128xi32>
    %1344 = arith.cmpi eq, %16, %1343 : vector<8x128xi32>
    %cst_383 = arith.constant 0.000000e+00 : f32
    %1345 = vector.broadcast %1342 : f32 to vector<8x128xf32>
    %1346 = vector.broadcast %cst_383 : f32 to vector<8x128xf32>
    %1347 = arith.select %21, %1345, %1346 : vector<8x128xi1>, vector<8x128xf32>
    %1348 = vector.broadcast %1338 : f32 to vector<8x128xf32>
    %1349 = arith.select %19, %1348, %1347 : vector<8x128xi1>, vector<8x128xf32>
    %cst_384 = arith.constant 0.000000e+00 : f32
    %1350 = vector.broadcast %cst_384 : f32 to vector<8x128xf32>
    %1351 = arith.select %1344, %1349, %1350 : vector<8x128xi1>, vector<8x128xf32>
    %1352 = arith.addf %1219, %1351 : vector<8x128xf32>
    %c0_385 = arith.constant 0 : index
    %c0_386 = arith.constant 0 : index
    %c0_387 = arith.constant 0 : index
    %1353 = vector.load %arg10[%c0_385, %c0_386, %c0_387] : memref<1x8x128xf32, #tpu.memory_space<vmem>>, vector<1x8x128xf32>
    %1354 = vector.shape_cast %1353 : vector<1x8x128xf32> to vector<8x128xf32>
    %1355 = vector.shape_cast %1352 : vector<8x128xf32> to vector<1x8x128xf32>
    tpu.vector_store %arg10[%c0_385, %c0_386, %c0_387], %1355 {strides = array<i32>} : memref<1x8x128xf32, #tpu.memory_space<vmem>>, vector<1x8x128xf32>,
    return
  }
  func.func @transform_0(%arg0: i32) -> (i32, i32) {
    %c0_i32 = arith.constant 0 : i32
    %c0_i32_0 = arith.constant 0 : i32
    %c0_i32_1 = arith.constant 0 : i32
    return %c0_i32, %c0_i32_0 : i32, i32
  }
  func.func @transform_1(%arg0: i32) -> (i32, i32, i32, i32) {
    %c0_i32 = arith.constant 0 : i32
    %c0_i32_0 = arith.constant 0 : i32
    %c0_i32_1 = arith.constant 0 : i32
    %c0_i32_2 = arith.constant 0 : i32
    return %arg0, %c0_i32, %c0_i32_0, %c0_i32_1 : i32, i32, i32, i32
  }
  func.func @transform_2(%arg0: i32) -> (i32, i32, i32) {
    %c0_i32 = arith.constant 0 : i32
    %c0_i32_0 = arith.constant 0 : i32
    %c0_i32_1 = arith.constant 0 : i32
    return %arg0, %c0_i32, %c0_i32_0 : i32, i32, i32
  }
  func.func @transform_3(%arg0: i32) -> (i32, i32, i32) {
    %c0_i32 = arith.constant 0 : i32
    %c0_i32_0 = arith.constant 0 : i32
    %c0_i32_1 = arith.constant 0 : i32
    return %arg0, %c0_i32, %c0_i32_0 : i32, i32, i32
  }
  func.func @transform_4(%arg0: i32) -> (i32, i32, i32, i32) {
    %c0_i32 = arith.constant 0 : i32
    %c0_i32_0 = arith.constant 0 : i32
    %c0_i32_1 = arith.constant 0 : i32
    %c0_i32_2 = arith.constant 0 : i32
    return %arg0, %c0_i32, %c0_i32_0, %c0_i32_1 : i32, i32, i32, i32
  }
  func.func @transform_5(%arg0: i32) -> (i32, i32) {
    %c0_i32 = arith.constant 0 : i32
    %c0_i32_0 = arith.constant 0 : i32
    %c0_i32_1 = arith.constant 0 : i32
    return %c0_i32, %c0_i32_0 : i32, i32
  }
  func.func @transform_6(%arg0: i32) -> (i32, i32) {
    %c0_i32 = arith.constant 0 : i32
    %c0_i32_0 = arith.constant 0 : i32
    %c0_i32_1 = arith.constant 0 : i32
    return %c0_i32, %c0_i32_0 : i32, i32
  }
  func.func @transform_7(%arg0: i32) -> (i32, i32) {
    %c0_i32 = arith.constant 0 : i32
    %c0_i32_0 = arith.constant 0 : i32
    %c0_i32_1 = arith.constant 0 : i32
    return %c0_i32, %c0_i32_0 : i32, i32
  }
  func.func @transform_8(%arg0: i32) -> (i32, i32) {
    %c0_i32 = arith.constant 0 : i32
    %c0_i32_0 = arith.constant 0 : i32
    %c0_i32_1 = arith.constant 0 : i32
    return %c0_i32, %c0_i32_0 : i32, i32
  }
  func.func @transform_9(%arg0: i32) -> (i32, i32, i32) {
    %c0_i32 = arith.constant 0 : i32
    %c0_i32_0 = arith.constant 0 : i32
    %c0_i32_1 = arith.constant 0 : i32
    return %arg0, %c0_i32, %c0_i32_0 : i32, i32, i32
  }
}

</mosaic_0001>

<bundles_post_ra>
// kernel: var_loss_forward.1
= control target key start
LH: loop header
LB: loop body
LE: loop exit
PB: predicated region body
PF: predicated region fallthrough
CT: control target
= control target key end

     0   :  { %s9762_s30 = smov 0   ;;  %s13977_s0 = inlined_call_operand.vmem [shape: f32[9,256], index: 0, kind: input, shape index: {}]   ;;  %s13978_s1 = inlined_call_operand.vmem [shape: bf16[2,10,256,256], index: 1, kind: input, shape index: {}]   ;;  %s13979_s2 = inlined_call_operand.vmem [shape: bf16[2,8,256], index: 2, kind: input, shape index: {}]   ;;  %s13980_s3 = inlined_call_operand.vmem [shape: f32[2,8,256], index: 3, kind: input, shape index: {}]   ;;  %s13981_s4 = inlined_call_operand.vmem [shape: f32[2,10,16,256], index: 4, kind: input, shape index: {}]   ;;  %s13982_s5 = inlined_call_operand.vmem [shape: f32[72,8], index: 5, kind: input, shape index: {}]   ;;  %s13983_s6 = inlined_call_operand.vmem [shape: f32[8,1], index: 6, kind: input, shape index: {}]   ;;  %s13984_s7 = inlined_call_operand.vmem [shape: f32[72,8], index: 7, kind: input, shape index: {}]   ;;  %s13985_s8 = inlined_call_operand.vmem [shape: f32[8,1], index: 8, kind: input, shape index: {}]   ;;  %s13986_s9 = inlined_call_operand.vmem [shape: f32[2,8,128], index: 9, kind: output, shape index: {}]  }
   0x1 LB: > { %s7120_s10 = sadd.s32 4294967295, %s9700_s30   ;;  %p7124_p0 = scmp.ge.s32.totalorder %s9700_s30, 1  ;;  %s9700_s30 = sphi %s9762_s30, %s19_s30  }
   0x2   : > { %p317_p1 = scmp.lt.s32.totalorder %s9700_s30, 3 }
   0x4   : > { %p318_p2 = pnand %p7124_p0, %p317_p1 }
   0x6   : > { %321 = sbr.rel (%p318_p2) target bundleno = 6444 (0x192c), region = 56 }
   0xb   : > { %p367_p3 = scmp.lt.s32.totalorder %s7120_s10, 1  ;;  %vm686_vm0 = vcmask 64512   ;;  %s9702_s20 = smov 17  }
   0xc   : > { %s9703_s21 = smov 16   ;;  %s9704_s22 = smov 15  }
   0xd   : > { %s14296_s10 = smov (!%p367_p3, %s7120_s10), 1  ;;  %s9705_s23 = smov 1  }
   0xe   : > { %s9447_s11 = smul.u32 2560, %s14296_s10  ;;  %s9125_s15 = sshll.u32 %s14296_s10, 3 }
   0xf   : > { %s376_s18 = scalar_lea.vmem %s13979_s2, %s9125_s15  ;;  %s9706_s24 = smov 127  }
  0x10   : > { %s9776_s14 = scalar_lea.vmem %s13978_s1, %s9447_s11  ;;  %s9708_s25 = smov 113  }
  0x11   : > { %v7197_v0 = vld [vmem:[%s9776_s14 + $0x70] sm:$0xf]  ;;  %v9142_v1 = vld [vmem:[%s9776_s14 + $0x74] sm:$0xf0]  ;;  %v9141_v5 = vld [vmem:[%s9776_s14 + $0x74] sm:$0xf] }
  0x12   : > { %v7261_v2 = vld [vmem:[%s9776_s14 + $0xf0] sm:$0xf]  ;;  %v7198_v3 = vor.u32 %v9142_v1, %v7197_v0  ;;  %v9158_v4 = vld [vmem:[%s9776_s14 + $0xf4] sm:$0xf0]  ;;  %v7199_v6 = vld [vmem:[%s9776_s14 + $0x78] sm:$0xf0] }
  0x13   : > { %v7262_v7 = vor.u32 %v9158_v4, %v7261_v2  ;;  %v7202_v8 = vor.u32 %v9141_v5, %v7199_v6  ;;  %v9157_v9 = vld [vmem:[%s9776_s14 + $0xf4] sm:$0xf]  ;;  %v7263_v10 = vld [vmem:[%s9776_s14 + $0xf8] sm:$0xf0]  ;;  %v7189_v11 = vld [vmem:[%s9776_s14 + $0x60] sm:$0xf] }
  0x14   : > { %634 = vmatpush.bf16.msra.mxu0 %v7198_v3  ;;  %v7266_v12 = vor.u32 %v9157_v9, %v7263_v10  ;;  %v9140_v13 = vld [vmem:[%s9776_s14 + $0x64] sm:$0xf0]  ;;  %v7253_v14 = vld [vmem:[%s9776_s14 + $0xe0] sm:$0xf]  ;;  %v9139_v18 = vld [vmem:[%s9776_s14 + $0x64] sm:$0xf] }
  0x15   : > { %v9156_v15 = vld [vmem:[%s9776_s14 + $0xe4] sm:$0xf0]  ;;  %647 = vmatpush.bf16.msra.mxu1 %v7262_v7  ;;  %660 = vmatpush.bf16.msra.mxu2 %v7202_v8  ;;  %v7190_v16 = vor.u32 %v9140_v13, %v7189_v11  ;;  %v7191_v19 = vld [vmem:[%s9776_s14 + $0x68] sm:$0xf0]  ;;  %v9155_v20 = vld [vmem:[%s9776_s14 + $0xe4] sm:$0xf] }
  0x16   : > { %v7254_v17 = vor.u32 %v9156_v15, %v7253_v14  ;;  %673 = vmatpush.bf16.msra.mxu3 %v7266_v12  ;;  %v7194_v21 = vor.u32 %v9139_v18, %v7191_v19  ;;  %v7255_v22 = vld [vmem:[%s9776_s14 + $0xe8] sm:$0xf0]  ;;  %v7181_v23 = vld [vmem:[%s9776_s14 + $0x50] sm:$0xf]  ;;  %v9138_v24 = vld [vmem:[%s9776_s14 + $0x54] sm:$0xf0] }
  0x17   : > { %v7258_v25 = vor.u32 %v9155_v20, %v7255_v22  ;;  %v7245_v26 = vld [vmem:[%s9776_s14 + $0xd0] sm:$0xf]  ;;  %v9154_v27 = vld [vmem:[%s9776_s14 + $0xd4] sm:$0xf0]  ;;  %v9137_v28 = vld [vmem:[%s9776_s14 + $0x54] sm:$0xf]  ;;  %v7182_v29 = vor.u32 %v9138_v24, %v7181_v23 }
  0x18   : > { %635 = vmatpush.bf16.msra.mxu0 %v7190_v16  ;;  %v7183_v30 = vld [vmem:[%s9776_s14 + $0x58] sm:$0xf0]  ;;  %v9153_v31 = vld [vmem:[%s9776_s14 + $0xd4] sm:$0xf]  ;;  %v7246_v33 = vor.u32 %v9154_v27, %v7245_v26  ;;  %v7173_v35 = vld [vmem:[%s9776_s14 + $0x40] sm:$0xf] }
  0x19   : > { %v7247_v32 = vld [vmem:[%s9776_s14 + $0xd8] sm:$0xf0]  ;;  %648 = vmatpush.bf16.msra.mxu1 %v7254_v17  ;;  %661 = vmatpush.bf16.msra.mxu2 %v7194_v21  ;;  %v7186_v34 = vor.u32 %v9137_v28, %v7183_v30  ;;  %v9136_v36 = vld [vmem:[%s9776_s14 + $0x44] sm:$0xf0]  ;;  %v7237_v37 = vld [vmem:[%s9776_s14 + $0xc0] sm:$0xf] }
  0x1a   : > { %674 = vmatpush.bf16.msra.mxu3 %v7258_v25  ;;  %v7250_v38 = vor.u32 %v9153_v31, %v7247_v32  ;;  %v9152_v39 = vld [vmem:[%s9776_s14 + $0xc4] sm:$0xf0]  ;;  %v9135_v40 = vld [vmem:[%s9776_s14 + $0x44] sm:$0xf]  ;;  %v7175_v41 = vld [vmem:[%s9776_s14 + $0x48] sm:$0xf0]  ;;  %v7174_v44 = vor.u32 %v9136_v36, %v7173_v35 }
  0x1b   : > { %v9151_v42 = vld [vmem:[%s9776_s14 + $0xc4] sm:$0xf]  ;;  %v7239_v43 = vld [vmem:[%s9776_s14 + $0xc8] sm:$0xf0]  ;;  %v7238_v45 = vor.u32 %v9152_v39, %v7237_v37  ;;  %v7178_v46 = vor.u32 %v9135_v40, %v7175_v41  ;;  %v7165_v47 = vld [vmem:[%s9776_s14 + $0x30] sm:$0xf] }
  0x1c   : > { %636 = vmatpush.bf16.msra.mxu0 %v7182_v29  ;;  %v9134_v48 = vld [vmem:[%s9776_s14 + $0x34] sm:$0xf0]  ;;  %v7229_v49 = vld [vmem:[%s9776_s14 + $0xb0] sm:$0xf]  ;;  %v7242_v50 = vor.u32 %v9151_v42, %v7239_v43  ;;  %v9133_v52 = vld [vmem:[%s9776_s14 + $0x34] sm:$0xf] }
  0x1d   : > { %649 = vmatpush.bf16.msra.mxu1 %v7246_v33  ;;  %662 = vmatpush.bf16.msra.mxu2 %v7186_v34  ;;  %v9150_v51 = vld [vmem:[%s9776_s14 + $0xb4] sm:$0xf0]  ;;  %v7167_v53 = vld [vmem:[%s9776_s14 + $0x38] sm:$0xf0]  ;;  %v9149_v54 = vld [vmem:[%s9776_s14 + $0xb4] sm:$0xf]  ;;  %v7166_v56 = vor.u32 %v9134_v48, %v7165_v47 }
  0x1e   : > { %675 = vmatpush.bf16.msra.mxu3 %v7250_v38  ;;  %v7231_v55 = vld [vmem:[%s9776_s14 + $0xb8] sm:$0xf0]  ;;  %v7230_v57 = vor.u32 %v9150_v51, %v7229_v49  ;;  %v7170_v58 = vor.u32 %v9133_v52, %v7167_v53  ;;  %v7157_v59 = vld [vmem:[%s9776_s14 + $0x20] sm:$0xf]  ;;  %v9132_v60 = vld [vmem:[%s9776_s14 + $0x24] sm:$0xf0] }
  0x1f   : > { %v7221_v61 = vld [vmem:[%s9776_s14 + $0xa0] sm:$0xf]  ;;  %v7234_v62 = vor.u32 %v9149_v54, %v7231_v55  ;;  %v9148_v63 = vld [vmem:[%s9776_s14 + $0xa4] sm:$0xf0]  ;;  %v9131_v0 = vld [vmem:[%s9776_s14 + $0x24] sm:$0xf]  ;;  %v7158_v4 = vor.u32 %v9132_v60, %v7157_v59 }
  0x20   : > { %637 = vmatpush.bf16.msra.mxu0 %v7174_v44  ;;  %v7159_v1 = vld [vmem:[%s9776_s14 + $0x28] sm:$0xf0]  ;;  %v9147_v2 = vld [vmem:[%s9776_s14 + $0xa4] sm:$0xf]  ;;  %v7222_v5 = vor.u32 %v9148_v63, %v7221_v61  ;;  %v7149_v7 = vld [vmem:[%s9776_s14 + $0x10] sm:$0xf] }
  0x21   : > { %650 = vmatpush.bf16.msra.mxu1 %v7238_v45  ;;  %663 = vmatpush.bf16.msra.mxu2 %v7178_v46  ;;  %v7223_v3 = vld [vmem:[%s9776_s14 + $0xa8] sm:$0xf0]  ;;  %v7162_v6 = vor.u32 %v9131_v0, %v7159_v1  ;;  %v9130_v8 = vld [vmem:[%s9776_s14 + $0x14] sm:$0xf0]  ;;  %v7213_v9 = vld [vmem:[%s9776_s14 + $0x90] sm:$0xf] }
  0x22   : > { %676 = vmatpush.bf16.msra.mxu3 %v7242_v50  ;;  %v7226_v10 = vor.u32 %v9147_v2, %v7223_v3  ;;  %v9146_v11 = vld [vmem:[%s9776_s14 + $0x94] sm:$0xf0]  ;;  %v9129_v12 = vld [vmem:[%s9776_s14 + $0x14] sm:$0xf]  ;;  %v7151_v13 = vld [vmem:[%s9776_s14 + $0x18] sm:$0xf0]  ;;  %v7150_v16 = vor.u32 %v9130_v8, %v7149_v7 }
  0x23   : > { %v9145_v14 = vld [vmem:[%s9776_s14 + $0x94] sm:$0xf]  ;;  %v7215_v15 = vld [vmem:[%s9776_s14 + $0x98] sm:$0xf0]  ;;  %v406_v17 = vld [vmem:[%s376_s18] sm:$0xff]  ;;  %v7214_v18 = vor.u32 %v9146_v11, %v7213_v9  ;;  %v7154_v19 = vor.u32 %v9129_v12, %v7151_v13  ;;  %v9707_v3 = vmov 0  }
  0x24   : > { %638 = vmatpush.bf16.msra.mxu0 %v7166_v56  ;;  %v7141_v20 = vld [vmem:[%s9776_s14] sm:$0xf]  ;;  %v9128_v21 = vld [vmem:[%s9776_s14 + $0x4] sm:$0xf0]  ;;  %v7218_v23 = vor.u32 %v9145_v14, %v7215_v15  ;;  %v9127_v25 = vld [vmem:[%s9776_s14 + $0x4] sm:$0xf]  ;;  %v468_v29 = vunpack.c.l.b16 %v406_v17  ;;  %v469_v31 = vunpack.c.h.b16 %v406_v17  ;;  %9507 = vset.pattern.permute.xlu1 %v9707_v3  ;;  %v13987_v15 = vlaneseq }
  0x25   : > { %651 = vmatpush.bf16.msra.mxu1 %v7230_v57  ;;  %664 = vmatpush.bf16.msra.mxu2 %v7170_v58  ;;  %v7205_v22 = vld [vmem:[%s9776_s14 + $0x80] sm:$0xf]  ;;  %v9144_v24 = vld [vmem:[%s9776_s14 + $0x84] sm:$0xf0]  ;;  %v7143_v26 = vld [vmem:[%s9776_s14 + $0x8] sm:$0xf0]  ;;  %v7142_v30 = vor.u32 %v9128_v21, %v7141_v20 }
  0x26   : > { %677 = vmatpush.bf16.msra.mxu3 %v7234_v62  ;;  %v9143_v27 = vld [vmem:[%s9776_s14 + $0x84] sm:$0xf]  ;;  %v7207_v28 = vld [vmem:[%s9776_s14 + $0x88] sm:$0xf0]  ;;  %v7206_v32 = vor.u32 %v9144_v24, %v7205_v22  ;;  %v7146_v33 = vor.u32 %v9127_v25, %v7143_v26  ;;  %v9848_v35 = vpack.c.b16 %v468_v29, %v468_v29  ;;  %v9850_v36 = vpack.c.b16 %v469_v31, %v469_v31  ;;  %v9875_v49 = vld [vmem:[%s13982_s5 + $0x10] sm:$0xff]  ;;  %s9709_s26 = smov 112  }
  0x27   : > { %v7210_v34 = vor.u32 %v9143_v27, %v7207_v28  ;;  %v9859_v40 = vld [vmem:[%s13982_s5] sm:$0xff]  ;;  %v9866_v46 = vld [vmem:[%s13982_s5 + $0x8] sm:$0xff]  ;;  %v9884_v50 = vld [vmem:[%s13982_s5 + $0x18] sm:$0xff]  ;;  %9508 = vset.pattern.permute.xlu2 %v9707_v3  ;;  %9509 = vset.pattern.permute.xlu0 %v9707_v3  ;;  %s9710_s27 = smov 111   ;;  %s9126_s28 = sshll.u32 %s14296_s10, 4 }
  0x28   : > { %639 = vmatpush.bf16.msra.mxu0 %v7158_v4  ;;  %v9893_v51 = vld [vmem:[%s13982_s5 + $0x20] sm:$0xff]  ;;  %v9902_v52 = vld [vmem:[%s13982_s5 + $0x28] sm:$0xff]  ;;  %v9911_v53 = vld [vmem:[%s13982_s5 + $0x30] sm:$0xff]  ;;  %s10117_s12 = scalar_lea.vmem %s13980_s3, %s9126_s28  ;;  %s9448_s17 = smul.u32 320, %s14296_s10 }
  0x29   : > { %652 = vmatpush.bf16.msra.mxu1 %v7222_v5  ;;  %665 = vmatpush.bf16.msra.mxu2 %v7162_v6  ;;  %v9920_v54 = vld [vmem:[%s13982_s5 + $0x38] sm:$0xff]  ;;  %v9931_v55 = vld [vmem:[%s13982_s5 + $0x40] sm:$0xff]  ;;  %v7395_v22 = vld [vmem:[%s9776_s14 + $0x170] sm:$0xf] }
  0x2a   : > { %678 = vmatpush.bf16.msra.mxu3 %v7226_v10  ;;  %v427_v10 = vld [vmem:[%s13983_s6] sm:$0xff]  ;;  %v7459_v24 = vld [vmem:[%s9776_s14 + $0x1f0] sm:$0xf]  ;;  %v9190_v26 = vld [vmem:[%s9776_s14 + $0x1f4] sm:$0xf0]  ;;  %s12456_s28 = scalar_lea.vmem %s13981_s4, %s9448_s17 }
  0x2b   : > { %v391_v21 = vld [vmem:[%s13977_s0] ss:$8 sm:$0x3] }
  0x2c   : > { %640 = vmatpush.bf16.msra.mxu0 %v7150_v16  ;;  %v7387_v27 = vld [vmem:[%s9776_s14 + $0x160] sm:$0xf]  ;;  %v9172_v28 = vld [vmem:[%s9776_s14 + $0x164] sm:$0xf0] }
  0x2d   : > { %653 = vmatpush.bf16.msra.mxu1 %v7214_v18  ;;  %666 = vmatpush.bf16.msra.mxu2 %v7154_v19  ;;  %v9961_v18 = vand.u32 127, %v13987_v15  ;;  %v7132_v19 = vld [vmem:[%s13977_s0 + $0x1] ss:$8 sm:$0x3] }
  0x2e   : > { %679 = vmatpush.bf16.msra.mxu3 %v7218_v23  ;;  %v9174_v23 = vld [vmem:[%s9776_s14 + $0x174] sm:$0xf0]  ;;  %v7451_v31 = vld [vmem:[%s9776_s14 + $0x1e0] sm:$0xf] }
  0x2f   : > { %vm820_vm1 = vcmp.lt.s32.totalorder %v9961_v18, 16  ;;  %v7396_v25 = vor.u32 %v9174_v23, %v7395_v22  ;;  %vm806_vm2 = vcmp.lt.s32.totalorder %v9961_v18, 17  ;;  %vm836_vm3 = vcmp.lt.s32.totalorder %v9961_v18, 15 }
  0x30   : > { %641 = vmatpush.bf16.msra.mxu0 %v7142_v30  ;;  %v7460_v30 = vor.u32 %v9190_v26, %v7459_v24  ;;  %vm852_vm4 = vcmp.lt.s32.totalorder %v9961_v18, 1  ;;  %vm870_vm5 = vcmp.lt.s32.totalorder %v9961_v18, 127  ;;  %v7136_v24 = vld [vmem:[%s13977_s0 + $0x6] ss:$8 sm:$0x3]  ;;  %vm886_vm6 = vcmp.lt.s32.totalorder %v9961_v18, 113 }
  0x31   : > { %654 = vmatpush.bf16.msra.mxu1 %v7206_v32  ;;  %667 = vmatpush.bf16.msra.mxu2 %v7146_v33  ;;  %v9188_v32 = vld [vmem:[%s9776_s14 + $0x1e4] sm:$0xf0]  ;;  %v9979_v33 = vperm.slane %v7132_v19, 0  ;;  %vm902_vm7 = vcmp.lt.s32.totalorder %v9961_v18, 112  ;;  %vm918_vm8 = vcmp.lt.s32.totalorder %v9961_v18, 111 }
  0x32   : > { %680 = vmatpush.bf16.msra.mxu3 %v7210_v34  ;;  %v7388_v34 = vor.u32 %v9172_v28, %v7387_v27 }
  0x33   : > { %642 = vmatmul.bf16.vlgmr.msra.gmra.mxu0 %v9848_v35 }
  0x34   : > { %655 = vmatmul.bf16.vlgmr.msra.gmra.mxu1 %v9850_v36  ;;  %668 = vmatmul.bf16.vlgmr.msra.gmra.mxu2 %v9848_v35 }
  0x35   : > { %681 = vmatmul.bf16.vlgmr.msra.gmra.mxu3 %v9850_v36 }
  0xb0   : > { %v643_v37 = vpop.f32.mrf.mxu0 }
  0xb1   : > { %v656_v38 = vpop.f32.mrf.mxu1 }
  0xb2   : > { %v657_v39 = vadd.f32 %v656_v38, %v643_v37  ;;  %v9981_v37 = vperm.slane %v7132_v19, 1 }
  0xb4   : > { %729 = vmatpush.msrb.mxu0 %v657_v39 }
  0xb5   : > { %7267 = vmatmul.msk.f32.vlgmr.msrb.gmra.mxu0 %vm686_vm0, %v9859_v40 }
  0xb6   : > { %1400 = vmatpush.bf16.msra.mxu0 %v7396_v25 }
  0xb7   : > { %v669_v41 = vpop.f32.mrf.mxu2 }
  0xb8   : > { %v682_v42 = vpop.f32.mrf.mxu3  ;;  %v645_v43 = vpop.f32.mrf.mxu0 }
  0xb9   : > { %v658_v44 = vpop.f32.mrf.mxu1  ;;  %v683_v45 = vadd.f32 %v682_v42, %v669_v41  ;;  %v7452_v41 = vor.u32 %v9188_v32, %v7451_v31  ;;  %v7133_v42 = vld [vmem:[%s13977_s0 + $0x2] ss:$8 sm:$0x3]  ;;  %v9988_v43 = vperm.slane %v391_v21, 0  ;;  %v10047_v32 = vperm.slane %v7136_v24, 0 }
  0xba   : > { %1401 = vmatpush.bf16.msra.mxu0 %v7388_v34 }
  0xbb   : > { %773 = vmatpush.msrb.mxu1 %v683_v45  ;;  %v9992_v45 = vperm.slane %v391_v21, 1 }
  0xbc   : > { %7276 = vmatmul.msk.f32.vlgmr.msrb.gmra.mxu1 %vm686_vm0, %v9859_v40 }
  0xbd   : > { %7268 = vmatmul.msk.f32.gmra.mxu0 %vm686_vm0, %v9866_v46  ;;  %1413 = vmatpush.bf16.msra.mxu1 %v7460_v30  ;;  %v7137_v30 = vld [vmem:[%s13977_s0 + $0x7] ss:$8 sm:$0x3] }
  0xbf   : > { %v671_v47 = vpop.f32.mrf.mxu2 }
  0xc0   : > { %v684_v48 = vpop.f32.mrf.mxu3 }
  0xc1   : > { %v7134_v48 = vld [vmem:[%s13977_s0 + $0x3] ss:$8 sm:$0x3]  ;;  %1414 = vmatpush.bf16.msra.mxu1 %v7452_v41 }
  0xc4   : > { %7277 = vmatmul.msk.f32.gmra.mxu1 %vm686_vm0, %v9866_v46 }
  0xc5   : > { %7269 = vmatmul.msk.f32.gmra.mxu0 %vm686_vm0, %v9875_v49 }
  0xcc   : > { %7278 = vmatmul.msk.f32.gmra.mxu1 %vm686_vm0, %v9875_v49 }
  0xcd   : > { %7270 = vmatmul.msk.f32.gmra.mxu0 %vm686_vm0, %v9884_v50 }
  0xd4   : > { %7279 = vmatmul.msk.f32.gmra.mxu1 %vm686_vm0, %v9884_v50 }
  0xd5   : > { %7271 = vmatmul.msk.f32.gmra.mxu0 %vm686_vm0, %v9893_v51 }
  0xdc   : > { %7280 = vmatmul.msk.f32.gmra.mxu1 %vm686_vm0, %v9893_v51 }
  0xdd   : > { %7272 = vmatmul.msk.f32.gmra.mxu0 %vm686_vm0, %v9902_v52 }
  0xe4   : > { %7281 = vmatmul.msk.f32.gmra.mxu1 %vm686_vm0, %v9902_v52 }
  0xe5   : > { %7273 = vmatmul.msk.f32.gmra.mxu0 %vm686_vm0, %v9911_v53 }
  0xec   : > { %7282 = vmatmul.msk.f32.gmra.mxu1 %vm686_vm0, %v9911_v53 }
  0xed   : > { %7274 = vmatmul.msk.f32.gmra.mxu0 %vm686_vm0, %v9920_v54 }
  0xf4   : > { %7283 = vmatmul.msk.f32.gmra.mxu1 %vm686_vm0, %v9920_v54 }
  0xf5   : > { %7275 = vmatmul.msk.f32.gmra.mxu0 %vm686_vm0, %v9931_v55 }
  0xfc   : > { %7284 = vmatmul.msk.f32.gmra.mxu1 %vm686_vm0, %v9931_v55 }
 0x132   : > { %v731_v56 = vpop.f32.mrf.mxu0 }
 0x133   : > { %802 = vrot.lane.b32.xlu0 %v731_v56, %s9702_s20 }
 0x139   : > { %v775_v57 = vpop.f32.mrf.mxu1 }
 0x13a   : > { %v734_v58 = vpop.f32.mrf.mxu0 }
 0x13b   : > { %816 = vrot.lane.b32.xlu1 %v734_v58, %s9703_s21  ;;  %804 = vrot.lane.b32.xlu0 %v775_v57, %s9702_s20 }
 0x141   : > { %v778_v59 = vpop.f32.mrf.mxu1 }
 0x142   : > { %v737_v60 = vpop.f32.mrf.mxu0 }
 0x143   : > { %832 = vrot.lane.b32.xlu2 %v737_v60, %s9704_s22  ;;  %818 = vrot.lane.b32.xlu1 %v778_v59, %s9703_s21  ;;  %v10005_v60 = vperm.slane %v7133_v42, 0 }
 0x149   : > { %v781_v61 = vpop.f32.mrf.mxu1 }
 0x14a   : > { %v740_v62 = vpop.f32.mrf.mxu0 }
 0x14b   : > { %834 = vrot.lane.b32.xlu2 %v781_v61, %s9704_s22  ;;  %848 = vrot.lane.b32.xlu0 %v740_v62, %s9705_s23  ;;  %v10007_v61 = vperm.slane %v7133_v42, 1 }
 0x151   : > { %v784_v63 = vpop.f32.mrf.mxu1 }
 0x152   : > { %850 = vrot.lane.b32.xlu1 %v784_v63, %s9705_s23  ;;  %v9945_v0 = vpop.f32.mrf.mxu0  ;;  %v10010_v63 = vperm.slane %v7134_v48, 0 }
 0x159   : > { %v9947_v1 = vpop.f32.mrf.mxu1 }
 0x15a   : > { %v746_v2 = vpop.f32.mrf.mxu0 }
 0x15b   : > { %866 = vrot.lane.b32.xlu2 %v746_v2, %s9706_s24 }
 0x161   : > { %v790_v4 = vpop.f32.mrf.mxu1 }
 0x162   : > { %868 = vrot.lane.b32.xlu0 %v790_v4, %s9706_s24  ;;  %v749_v5 = vpop.f32.mrf.mxu0  ;;  %v10015_v4 = vperm.slane %v7134_v48, 1 }
 0x163   : > { %882 = vrot.lane.b32.xlu1 %v749_v5, %s9708_s25 }
 0x169   : > { %v793_v6 = vpop.f32.mrf.mxu1 }
 0x16a   : > { %884 = vrot.lane.b32.xlu2 %v793_v6, %s9708_s25  ;;  %v752_v7 = vpop.f32.mrf.mxu0 }
 0x16b   : > { %898 = vrot.lane.b32.xlu0 %v752_v7, %s9709_s26 }
 0x171   : > { %v796_v8 = vpop.f32.mrf.mxu1 }
 0x172   : > { %900 = vrot.lane.b32.xlu1 %v796_v8, %s9709_s26  ;;  %v755_v9 = vpop.f32.mrf.mxu0 }
 0x173   : > { %914 = vrot.lane.b32.xlu2 %v755_v9, %s9710_s27 }
 0x179   : > { %v799_v11 = vpop.f32.mrf.mxu1 }
 0x17a   : > { %916 = vrot.lane.b32.xlu0 %v799_v11, %s9710_s27  ;;  %932 = vperm.xlu1 %9507, %v427_v10   ;;  %v7135_v11 = vld [vmem:[%s13977_s0 + $0x5] ss:$8 sm:$0x3] }
 0x17b   : > { %v10033_v22 = vperm.slane %v7135_v11, 1 }
 0x19d   : > { %v833_v14 = vpop.permute.xlu2 %832 }
 0x1a5   : > { %v803_v12 = vpop.permute.xlu0 %802  ;;  %v835_v20 = vpop.permute.xlu2 %834 }
 0x1a6   : > { %v838_v2 = vsel %vm836_vm3, %v835_v20, %v833_v14  ;;  %v837_v7 = vsel %vm836_vm3, %v833_v14, %v835_v20  ;;  %v10031_v20 = vperm.slane %v7135_v11, 0 }
 0x1ad   : > { %v817_v13 = vpop.permute.xlu1 %816  ;;  %v805_v16 = vpop.permute.xlu0 %804 }
 0x1ae   : > { %v808_v47 = vsel %vm806_vm2, %v805_v16, %v803_v12  ;;  %v807_v56 = vsel %vm806_vm2, %v803_v12, %v805_v16 }
 0x1af   : > { %v814_v62 = vmul.f32 %v9988_v43, %v808_v47  ;;  %v815_v3 = vmul.f32 %v9992_v45, %v807_v56  ;;  %v10058_v47 = vperm.slane %v7137_v30, 0  ;;  %v10061_v56 = vperm.slane %v7137_v30, 1  ;;  %v7363_v30 = vld [vmem:[%s9776_s14 + $0x130] sm:$0xf] }
 0x1b5   : > { %v819_v17 = vpop.permute.xlu1 %818  ;;  %v867_v59 = vpop.permute.xlu2 %866 }
 0x1b6   : > { %v822_v38 = vsel %vm820_vm1, %v819_v17, %v817_v13  ;;  %v821_v44 = vsel %vm820_vm1, %v817_v13, %v819_v17  ;;  %v844_v13 = vmul.f32 %v10005_v60, %v838_v2  ;;  %v845_v17 = vmul.f32 %v10007_v61, %v837_v7 }
 0x1b7   : > { %v828_v57 = vmul.f32 %v9979_v33, %v822_v38  ;;  %v829_v58 = vmul.f32 %v9981_v37, %v821_v44  ;;  %v10051_v38 = vperm.slane %v7136_v24, 1  ;;  %v7435_v24 = vld [vmem:[%s9776_s14 + $0x1c0] sm:$0xf] }
 0x1b9   : > { %v830_v8 = vadd.f32 %v828_v57, %v814_v62  ;;  %v831_v10 = vadd.f32 %v829_v58, %v815_v3 }
 0x1bb   : > { %v846_v19 = vadd.f32 %v844_v13, %v830_v8  ;;  %v847_v21 = vadd.f32 %v845_v17, %v831_v10 }
 0x1bd   : > { %v849_v29 = vpop.permute.xlu0 %848 }
 0x1c4   : > { %v851_v39 = vpop.permute.xlu1 %850  ;;  %v885_v28 = vpop.permute.xlu2 %884 }
 0x1c5   : > { %v854_v5 = vsel %vm852_vm4, %v851_v39, %v849_v29  ;;  %v853_v9 = vsel %vm852_vm4, %v849_v29, %v851_v39 }
 0x1c6   : > { %v860_v16 = vmul.f32 %v10010_v63, %v854_v5  ;;  %v861_v14 = vmul.f32 %v10015_v4, %v853_v9  ;;  %v7379_v5 = vld [vmem:[%s9776_s14 + $0x150] sm:$0xf]  ;;  %v9186_v9 = vld [vmem:[%s9776_s14 + $0x1d4] sm:$0xf0] }
 0x1c8   : > { %v862_v25 = vadd.f32 %v860_v16, %v846_v19  ;;  %v863_v27 = vadd.f32 %v861_v14, %v847_v21  ;;  %v7371_v21 = vld [vmem:[%s9776_s14 + $0x140] sm:$0xf] }
 0x1ca   : > { %v864_v42 = vadd.f32 %v862_v25, %v9945_v0  ;;  %v865_v48 = vadd.f32 %v863_v27, %v9947_v1  ;;  %v7138_v0 = vld [vmem:[%s13977_s0 + $0x10] ss:$8 sm:$0x3] }
 0x1cb   : > { %v9170_v1 = vld [vmem:[%s9776_s14 + $0x154] sm:$0xf0]  ;;  %v10081_v13 = vperm.slane %v7138_v0, 1 }
 0x1cc   : > { %v7380_v8 = vor.u32 %v9170_v1, %v7379_v5 }
 0x1cd   : > { %v915_v11 = vpop.permute.xlu2 %914 }
 0x1ce   : > { %1402 = vmatpush.bf16.msra.mxu0 %v7380_v8 }
 0x1d4   : > { %v869_v6 = vpop.permute.xlu0 %868 }
 0x1d5   : > { %v883_v12 = vpop.permute.xlu1 %882  ;;  %v871_v23 = vsel %vm870_vm5, %v867_v59, %v869_v6  ;;  %v872_v26 = vsel %vm870_vm5, %v869_v6, %v867_v59  ;;  %v7443_v6 = vld [vmem:[%s9776_s14 + $0x1d0] sm:$0xf] }
 0x1d6   : > { %v878_v31 = vmul.f32 %v10031_v20, %v871_v23  ;;  %v879_v34 = vmul.f32 %v10033_v22, %v872_v26  ;;  %v887_v39 = vsel %vm886_vm6, %v883_v12, %v885_v28  ;;  %v888_v44 = vsel %vm886_vm6, %v885_v28, %v883_v12  ;;  %v9168_v23 = vld [vmem:[%s9776_s14 + $0x144] sm:$0xf0] }
 0x1d7   : > { %v894_v59 = vmul.f32 %v10047_v32, %v887_v39  ;;  %v895_v3 = vmul.f32 %v10051_v38, %v888_v44  ;;  %v10079_v12 = vperm.slane %v7138_v0, 0  ;;  %v7444_v16 = vor.u32 %v9186_v9, %v7443_v6  ;;  %v7427_v44 = vld [vmem:[%s9776_s14 + $0x1b0] sm:$0xf]  ;;  %v7355_v6 = vld [vmem:[%s9776_s14 + $0x120] sm:$0xf] }
 0x1d8   : > { %v880_v58 = vadd.f32 %v878_v31, %v864_v42  ;;  %v881_v2 = vadd.f32 %v879_v34, %v865_v48  ;;  %v7372_v28 = vor.u32 %v9168_v23, %v7371_v21  ;;  %v9166_v31 = vld [vmem:[%s9776_s14 + $0x134] sm:$0xf0]  ;;  %v7419_v9 = vld [vmem:[%s9776_s14 + $0x1a0] sm:$0xf]  ;;  %v7411_v23 = vld [vmem:[%s9776_s14 + $0x190] sm:$0xf] }
 0x1d9   : > { %1415 = vmatpush.bf16.msra.mxu1 %v7444_v16  ;;  %v9182_v48 = vld [vmem:[%s9776_s14 + $0x1b4] sm:$0xf0] }
 0x1da   : > { %v896_v17 = vadd.f32 %v894_v59, %v880_v58  ;;  %v897_v14 = vadd.f32 %v895_v3, %v881_v2  ;;  %1403 = vmatpush.bf16.msra.mxu0 %v7372_v28  ;;  %v7364_v58 = vor.u32 %v9166_v31, %v7363_v30  ;;  %v7428_v0 = vor.u32 %v9182_v48, %v7427_v44  ;;  %v7403_v28 = vld [vmem:[%s9776_s14 + $0x180] sm:$0xf]  ;;  %v9176_v30 = vld [vmem:[%s9776_s14 + $0x184] sm:$0xf0]  ;;  %v9173_v48 = vld [vmem:[%s9776_s14 + $0x174] sm:$0xf] }
 0x1db   : > { %v10122_v44 = vld [vmem:[%s10117_s12] sm:$0xff] }
 0x1dd   : > { %v899_v29 = vpop.permute.xlu0 %898 }
 0x1de   : > { %1404 = vmatpush.bf16.msra.mxu0 %v7364_v58  ;;  %v7397_v58 = vld [vmem:[%s9776_s14 + $0x178] sm:$0xf0] }
 0x1e4   : > { %v901_v41 = vpop.permute.xlu1 %900 }
 0x1e5   : > { %v903_v57 = vsel %vm902_vm7, %v899_v29, %v901_v41  ;;  %v904_v62 = vsel %vm902_vm7, %v901_v41, %v899_v29  ;;  %v9184_v29 = vld [vmem:[%s9776_s14 + $0x1c4] sm:$0xf0] }
 0x1e6   : > { %v910_v7 = vmul.f32 %v10058_v47, %v903_v57  ;;  %v911_v10 = vmul.f32 %v10061_v56, %v904_v62  ;;  %v7436_v42 = vor.u32 %v9184_v29, %v7435_v24  ;;  %v9178_v24 = vld [vmem:[%s9776_s14 + $0x194] sm:$0xf0] }
 0x1e8   : > { %v912_v25 = vadd.f32 %v910_v7, %v896_v17  ;;  %v913_v34 = vadd.f32 %v911_v10, %v897_v14  ;;  %1416 = vmatpush.bf16.msra.mxu1 %v7436_v42  ;;  %v9164_v7 = vld [vmem:[%s9776_s14 + $0x124] sm:$0xf0] }
 0x1e9   : > { %v7356_v8 = vor.u32 %v9164_v7, %v7355_v6  ;;  %v9180_v10 = vld [vmem:[%s9776_s14 + $0x1a4] sm:$0xf0]  ;;  %v7400_v6 = vor.u32 %v9173_v48, %v7397_v58  ;;  %v7365_v48 = vld [vmem:[%s9776_s14 + $0x138] sm:$0xf0]  ;;  %v9181_v58 = vld [vmem:[%s9776_s14 + $0x1b4] sm:$0xf] }
 0x1ea   : > { %v7420_v14 = vor.u32 %v9180_v10, %v7419_v9  ;;  %v9171_v9 = vld [vmem:[%s9776_s14 + $0x164] sm:$0xf]  ;;  %v7389_v10 = vld [vmem:[%s9776_s14 + $0x168] sm:$0xf0] }
 0x1eb   : > { %1405 = vmatpush.bf16.msra.mxu0 %v7356_v8 }
 0x1ec   : > { %v917_v19 = vpop.permute.xlu0 %916  ;;  %v10097_v57 = vpop.permute.xlu1 %932  ;;  %1417 = vmatpush.bf16.msra.mxu1 %v7428_v0  ;;  %v7461_v0 = vld [vmem:[%s9776_s14 + $0x1f8] sm:$0xf0] }
 0x1ed   : > { %v919_v26 = vsel %vm918_vm8, %v915_v11, %v917_v19  ;;  %v920_v27 = vsel %vm918_vm8, %v917_v19, %v915_v11  ;;  %13992 = vst [vmem:[#allocation2_spill] sm:$0xff] %v10097_v57  ;;  %v7347_v11 = vld [vmem:[%s9776_s14 + $0x110] sm:$0xf]  ;;  %v9162_v19 = vld [vmem:[%s9776_s14 + $0x114] sm:$0xf0] }
 0x1ee   : > { %v926_v39 = vmul.f32 %v10079_v12, %v919_v26  ;;  %v927_v41 = vmul.f32 %v10081_v13, %v920_v27  ;;  %v7348_v21 = vor.u32 %v9162_v19, %v7347_v11  ;;  %v7339_v26 = vld [vmem:[%s9776_s14 + $0x100] sm:$0xf]  ;;  %v9160_v27 = vld [vmem:[%s9776_s14 + $0x104] sm:$0xf0]  ;;  %v9187_v11 = vld [vmem:[%s9776_s14 + $0x1e4] sm:$0xf] }
 0x1ef   : > { %v7340_v29 = vor.u32 %v9160_v27, %v7339_v26  ;;  %v9169_v19 = vld [vmem:[%s9776_s14 + $0x154] sm:$0xf] }
 0x1f0   : > { %v928_v59 = vadd.f32 %v926_v39, %v912_v25  ;;  %v929_v62 = vadd.f32 %v927_v41, %v913_v34  ;;  %1418 = vmatpush.bf16.msra.mxu1 %v7420_v14  ;;  %v7412_v25 = vor.u32 %v9178_v24, %v7411_v23  ;;  %1406 = vmatpush.bf16.msra.mxu0 %v7348_v21  ;;  %v7381_v21 = vld [vmem:[%s9776_s14 + $0x158] sm:$0xf0]  ;;  %v9185_v23 = vld [vmem:[%s9776_s14 + $0x1d4] sm:$0xf] }
 0x1f1   : > { %v7404_v34 = vor.u32 %v9176_v30, %v7403_v28  ;;  %v7445_v24 = vld [vmem:[%s9776_s14 + $0x1d8] sm:$0xf0]  ;;  %v7384_v26 = vor.u32 %v9169_v19, %v7381_v21  ;;  %v9167_v28 = vld [vmem:[%s9776_s14 + $0x144] sm:$0xf] }
 0x1f2   : > { %v935_v2 = vadd.f32 %v10097_v57, %v928_v59  ;;  %v936_v3 = vadd.f32 %v10097_v57, %v929_v62  ;;  %v10127_v59 = vld [vmem:[%s10117_s12 + $0x8] sm:$0xff]  ;;  %v9189_v62 = vld [vmem:[%s9776_s14 + $0x1f4] sm:$0xf]  ;;  %v7448_v27 = vor.u32 %v9185_v23, %v7445_v24  ;;  %v9183_v30 = vld [vmem:[%s9776_s14 + $0x1c4] sm:$0xf] }
 0x1f3   : > { %v7464_v8 = vor.u32 %v9189_v62, %v7461_v0  ;;  %v7429_v0 = vld [vmem:[%s9776_s14 + $0x1b8] sm:$0xf0]  ;;  %v9159_v24 = vld [vmem:[%s9776_s14 + $0x104] sm:$0xf] }
 0x1f4   : > { %v937_v5 = vsub.f32 0.0, %v935_v2  ;;  %v938_v1 = vsub.f32 0.0, %v936_v3  ;;  %1419 = vmatpush.bf16.msra.mxu1 %v7412_v25  ;;  %1407 = vmatpush.bf16.msra.mxu0 %v7340_v29  ;;  %v10153_v25 = vld [vmem:[%s13984_s7 + $0x8] sm:$0xff]  ;;  %v7413_v21 = vld [vmem:[%s9776_s14 + $0x198] sm:$0xf0] }
 0x1f5   : > { %v7373_v29 = vld [vmem:[%s9776_s14 + $0x148] sm:$0xf0] }
 0x1f6   : > { %v939_v16 = vmul.f32 1.442695, %v937_v5  ;;  %v941_v17 = vmul.f32 1.442695, %v938_v1  ;;  %v10135_v1 = vld [vmem:[%s13984_s7] sm:$0xff] }
 0x1f7   : > { %1408 = vmatmul.bf16.vlgmr.msra.gmra.mxu0 %v9848_v35 }
 0x1f8   : > { %9510 = vpow2.f32 %v939_v16  ;;  %1420 = vmatpush.bf16.msra.mxu1 %v7404_v34  ;;  %v7453_v16 = vld [vmem:[%s9776_s14 + $0x1e8] sm:$0xf0] }
 0x1f9   : > { %9512 = vpow2.f32 %v941_v17  ;;  %v7392_v17 = vor.u32 %v9171_v9, %v7389_v10  ;;  %v7456_v14 = vor.u32 %v9187_v11, %v7453_v16  ;;  %v7437_v34 = vld [vmem:[%s9776_s14 + $0x1c8] sm:$0xf0]  ;;  %v10192_v11 = vld [vmem:[%s13984_s7 + $0x20] sm:$0xff]  ;;  %v9161_v16 = vld [vmem:[%s9776_s14 + $0x114] sm:$0xf] }
 0x1fa   : > { %v7421_v9 = vld [vmem:[%s9776_s14 + $0x1a8] sm:$0xf0] }
 0x1fb   : > { %1421 = vmatmul.bf16.vlgmr.msra.gmra.mxu1 %v9850_v36 }
 0x1fe   : > { %v9511_v31 = vpop.eup %9510 }
 0x1ff   : > { %v9513_v39 = vpop.eup %9512  ;;  %v943_v41 = vadd.f32 1.0, %v9511_v31  ;;  %v7376_v31 = vor.u32 %v9167_v28, %v7373_v29  ;;  %v7405_v29 = vld [vmem:[%s9776_s14 + $0x188] sm:$0xf0] }
 0x200   : > { %v944_v42 = vadd.f32 1.0, %v9513_v39  ;;  %v7440_v39 = vor.u32 %v9183_v30, %v7437_v34  ;;  %v10218_v34 = vld [vmem:[%s13984_s7 + $0x30] sm:$0xff] }
 0x201   : > { %9514 = vrcp.f32 %v943_v41  ;;  %v10166_v41 = vld [vmem:[%s13984_s7 + $0x10] sm:$0xff] }
 0x202   : > { %9516 = vrcp.f32 %v944_v42  ;;  %v9165_v42 = vld [vmem:[%s9776_s14 + $0x134] sm:$0xf] }
 0x203   : > { %v7368_v62 = vor.u32 %v9165_v42, %v7365_v48  ;;  %v10236_v42 = vld [vmem:[%s13984_s7 + $0x40] sm:$0xff] }
 0x207   : > { %v9515_v2 = vpop.eup %9514 }
 0x208   : > { %v9517_v3 = vpop.eup %9516  ;;  %v947_v5 = vmul.f32 %v9515_v2, %v10122_v44  ;;  %v7432_v2 = vor.u32 %v9181_v58, %v7429_v0 }
 0x209   : > { %v948_v7 = vmul.f32 %v9517_v3, %v10127_v59  ;;  %v10179_v3 = vld [vmem:[%s13984_s7 + $0x18] sm:$0xff] }
 0x20a   : > { %991 = vmatpush.msrb.mxu2 %v947_v5  ;;  %v9163_v5 = vld [vmem:[%s9776_s14 + $0x124] sm:$0xf] }
 0x20b   : > { %1035 = vmatpush.msrb.mxu3 %v948_v7  ;;  %7285 = vmatmul.msk.f32.vlgmr.msrb.gmra.mxu2 %vm686_vm0, %v10135_v1  ;;  %v9179_v7 = vld [vmem:[%s9776_s14 + $0x1a4] sm:$0xf] }
 0x20c   : > { %7294 = vmatmul.msk.f32.vlgmr.msrb.gmra.mxu3 %vm686_vm0, %v10135_v1  ;;  %1426 = vmatpush.bf16.msra.mxu2 %v7400_v6  ;;  %v7357_v6 = vld [vmem:[%s9776_s14 + $0x128] sm:$0xf0]  ;;  %v7424_v10 = vor.u32 %v9179_v7, %v7421_v9 }
 0x20d   : > { %1439 = vmatpush.bf16.msra.mxu3 %v7464_v8  ;;  %v7360_v8 = vor.u32 %v9163_v5, %v7357_v6 }
 0x210   : > { %1427 = vmatpush.bf16.msra.mxu2 %v7392_v17  ;;  %v7349_v17 = vld [vmem:[%s9776_s14 + $0x118] sm:$0xf0] }
 0x211   : > { %1440 = vmatpush.bf16.msra.mxu3 %v7456_v14  ;;  %v9177_v14 = vld [vmem:[%s9776_s14 + $0x194] sm:$0xf]  ;;  %v7352_v19 = vor.u32 %v9161_v16, %v7349_v17 }
 0x212   : > { %v7416_v23 = vor.u32 %v9177_v14, %v7413_v21 }
 0x213   : > { %7286 = vmatmul.msk.f32.gmra.mxu2 %vm686_vm0, %v10153_v25 }
 0x214   : > { %7295 = vmatmul.msk.f32.gmra.mxu3 %vm686_vm0, %v10153_v25  ;;  %1428 = vmatpush.bf16.msra.mxu2 %v7384_v26  ;;  %v7341_v26 = vld [vmem:[%s9776_s14 + $0x108] sm:$0xf0] }
 0x215   : > { %1441 = vmatpush.bf16.msra.mxu3 %v7448_v27  ;;  %v9175_v27 = vld [vmem:[%s9776_s14 + $0x184] sm:$0xf]  ;;  %v7344_v28 = vor.u32 %v9159_v24, %v7341_v26 }
 0x216   : > { %v7408_v30 = vor.u32 %v9175_v27, %v7405_v29 }
 0x218   : > { %1429 = vmatpush.bf16.msra.mxu2 %v7376_v31  ;;  %v10209_v31 = vld [vmem:[%s13984_s7 + $0x28] sm:$0xff] }
 0x219   : > { %1442 = vmatpush.bf16.msra.mxu3 %v7440_v39  ;;  %v10227_v39 = vld [vmem:[%s13984_s7 + $0x38] sm:$0xff] }
 0x21b   : > { %7287 = vmatmul.msk.f32.gmra.mxu2 %vm686_vm0, %v10166_v41 }
 0x21c   : > { %7296 = vmatmul.msk.f32.gmra.mxu3 %vm686_vm0, %v10166_v41  ;;  %1430 = vmatpush.bf16.msra.mxu2 %v7368_v62 }
 0x21d   : > { %1443 = vmatpush.bf16.msra.mxu3 %v7432_v2 }
 0x220   : > { %1431 = vmatpush.bf16.msra.mxu2 %v7360_v8 }
 0x221   : > { %1444 = vmatpush.bf16.msra.mxu3 %v7424_v10 }
 0x223   : > { %7288 = vmatmul.msk.f32.gmra.mxu2 %vm686_vm0, %v10179_v3 }
 0x224   : > { %7297 = vmatmul.msk.f32.gmra.mxu3 %vm686_vm0, %v10179_v3  ;;  %1432 = vmatpush.bf16.msra.mxu2 %v7352_v19 }
 0x225   : > { %1445 = vmatpush.bf16.msra.mxu3 %v7416_v23 }
 0x228   : > { %1433 = vmatpush.bf16.msra.mxu2 %v7344_v28 }
 0x229   : > { %1446 = vmatpush.bf16.msra.mxu3 %v7408_v30 }
 0x22b   : > { %7289 = vmatmul.msk.f32.gmra.mxu2 %vm686_vm0, %v10192_v11 }
 0x22c   : > { %7298 = vmatmul.msk.f32.gmra.mxu3 %vm686_vm0, %v10192_v11 }
 0x233   : > { %7290 = vmatmul.msk.f32.gmra.mxu2 %vm686_vm0, %v10209_v31 }
 0x234   : > { %7299 = vmatmul.msk.f32.gmra.mxu3 %vm686_vm0, %v10209_v31 }
 0x23b   : > { %7291 = vmatmul.msk.f32.gmra.mxu2 %vm686_vm0, %v10218_v34 }
 0x23c   : > { %7300 = vmatmul.msk.f32.gmra.mxu3 %vm686_vm0, %v10218_v34 }
 0x243   : > { %7292 = vmatmul.msk.f32.gmra.mxu2 %vm686_vm0, %v10227_v39 }
 0x244   : > { %7301 = vmatmul.msk.f32.gmra.mxu3 %vm686_vm0, %v10227_v39 }
 0x24b   : > { %7293 = vmatmul.msk.f32.gmra.mxu2 %vm686_vm0, %v10236_v42 }
 0x24c   : > { %7302 = vmatmul.msk.f32.gmra.mxu3 %vm686_vm0, %v10236_v42 }
 0x253   : > { %1434 = vmatmul.bf16.vlgmr.msra.gmra.mxu2 %v9848_v35 }
 0x254   : > { %1447 = vmatmul.bf16.vlgmr.msra.gmra.mxu3 %v9850_v36 }
 0x274   : > { %v1409_v48 = vpop.f32.mrf.mxu0 }
 0x278   : > { %v1422_v58 = vpop.f32.mrf.mxu1 }
 0x279   : > { %v1423_v62 = vadd.f32 %v1422_v58, %v1409_v48 }
 0x27b   : > { %1467 = vmatpush.msrb.mxu0 %v1423_v62 }
 0x27c   : > { %7465 = vmatmul.msk.f32.vlgmr.msrb.gmra.mxu0 %vm686_vm0, %v9859_v40  ;;  %v1411_v0 = vpop.f32.mrf.mxu0 }
 0x280   : > { %v1424_v2 = vpop.f32.mrf.mxu1 }
 0x284   : > { %7466 = vmatmul.msk.f32.gmra.mxu0 %vm686_vm0, %v9866_v46 }
 0x28c   : > { %7467 = vmatmul.msk.f32.gmra.mxu0 %vm686_vm0, %v9875_v49 }
 0x28e   : > { %v10248_v5 = vpop.f32.mrf.mxu2 }
 0x28f   : > { %v10250_v6 = vpop.f32.mrf.mxu3 }
 0x294   : > { %7468 = vmatmul.msk.f32.gmra.mxu0 %vm686_vm0, %v9884_v50 }
 0x296   : > { %v10254_v7 = vpop.f32.mrf.mxu2 }
 0x297   : > { %v10256_v8 = vpop.f32.mrf.mxu3 }
 0x29c   : > { %7469 = vmatmul.msk.f32.gmra.mxu0 %vm686_vm0, %v9893_v51 }
 0x29e   : > { %v10260_v9 = vpop.f32.mrf.mxu2 }
 0x29f   : > { %v10262_v10 = vpop.f32.mrf.mxu3 }
 0x2a0   : > { %13993 = vst [vmem:[#allocation3_spill] sm:$0xff] %v10262_v10 }
 0x2a4   : > { %7470 = vmatmul.msk.f32.gmra.mxu0 %vm686_vm0, %v9902_v52 }
 0x2a6   : > { %v10266_v16 = vpop.f32.mrf.mxu2 }
 0x2a7   : > { %13994 = vst [vmem:[#allocation4_spill] sm:$0xff] %v10266_v16  ;;  %v10268_v17 = vpop.f32.mrf.mxu3  ;;  %v9206_v16 = vld [vmem:[%s9776_s14 + $0x274] sm:$0xf0] }
 0x2ac   : > { %7471 = vmatmul.msk.f32.gmra.mxu0 %vm686_vm0, %v9911_v53 }
 0x2ae   : > { %v10272_v14 = vpop.f32.mrf.mxu2 }
 0x2af   : > { %13995 = vst [vmem:[#allocation5_spill] sm:$0xff] %v10272_v14  ;;  %v10274_v19 = vpop.f32.mrf.mxu3 }
 0x2b0   : > { %13996 = vst [vmem:[#allocation6_spill] sm:$0xff] %v10274_v19 }
 0x2b4   : > { %7472 = vmatmul.msk.f32.gmra.mxu0 %vm686_vm0, %v9920_v54 }
 0x2b6   : > { %v10278_v21 = vpop.f32.mrf.mxu2 }
 0x2b7   : > { %13997 = vst [vmem:[#allocation7_spill] sm:$0xff] %v10278_v21  ;;  %v10280_v23 = vpop.f32.mrf.mxu3 }
 0x2b8   : > { %13998 = vst [vmem:[#allocation8_spill] sm:$0xff] %v10280_v23 }
 0x2bc   : > { %7473 = vmatmul.msk.f32.gmra.mxu0 %vm686_vm0, %v9931_v55 }
 0x2be   : > { %v10284_v24 = vpop.f32.mrf.mxu2 }
 0x2bf   : > { %13999 = vst [vmem:[#allocation9_spill] sm:$0xff] %v10284_v24  ;;  %v10286_v26 = vpop.f32.mrf.mxu3 }
 0x2c0   : > { %14000 = vst [vmem:[#allocation10_spill] sm:$0xff] %v10286_v26 }
 0x2c6   : > { %v10290_v27 = vpop.f32.mrf.mxu2 }
 0x2c7   : > { %14001 = vst [vmem:[#allocation11_spill] sm:$0xff] %v10290_v27  ;;  %v10292_v28 = vpop.f32.mrf.mxu3 }
 0x2c8   : > { %14002 = vst [vmem:[#allocation12_spill] sm:$0xff] %v10292_v28 }
 0x2ce   : > { %v10294_v29 = vpop.f32.mrf.mxu2 }
 0x2cf   : > { %14003 = vst [vmem:[#allocation13_spill] sm:$0xff] %v10294_v29  ;;  %v10296_v30 = vpop.f32.mrf.mxu3 }
 0x2d0   : > { %14004 = vst [vmem:[#allocation14_spill] sm:$0xff] %v10296_v30 }
 0x2d6   : > { %v1435_v48 = vpop.f32.mrf.mxu2 }
 0x2d7   : > { %v1448_v58 = vpop.f32.mrf.mxu3 }
 0x2d8   : > { %v1449_v62 = vadd.f32 %v1448_v58, %v1435_v48 }
 0x2da   : > { %1511 = vmatpush.msrb.mxu1 %v1449_v62 }
 0x2db   : > { %7474 = vmatmul.msk.f32.vlgmr.msrb.gmra.mxu1 %vm686_vm0, %v9859_v40 }
 0x2de   : > { %v1437_v0 = vpop.f32.mrf.mxu2 }
 0x2df   : > { %v1450_v2 = vpop.f32.mrf.mxu3 }
 0x2e3   : > { %7475 = vmatmul.msk.f32.gmra.mxu1 %vm686_vm0, %v9866_v46 }
 0x2eb   : > { %7476 = vmatmul.msk.f32.gmra.mxu1 %vm686_vm0, %v9875_v49 }
 0x2f3   : > { %7477 = vmatmul.msk.f32.gmra.mxu1 %vm686_vm0, %v9884_v50 }
 0x2f9   : > { %v1469_v15 = vpop.f32.mrf.mxu0 }
 0x2fa   : > { %1540 = vrot.lane.b32.xlu2 %v1469_v15, %s9702_s20 }
 0x2fb   : > { %7478 = vmatmul.msk.f32.gmra.mxu1 %vm686_vm0, %v9893_v51 }
 0x301   : > { %v1472_v40 = vpop.f32.mrf.mxu0 }
 0x302   : > { %1548 = vrot.lane.b32.xlu1 %v1472_v40, %s9703_s21 }
 0x303   : > { %7479 = vmatmul.msk.f32.gmra.mxu1 %vm686_vm0, %v9902_v52 }
 0x309   : > { %v1475_v46 = vpop.f32.mrf.mxu0 }
 0x30a   : > { %1558 = vrot.lane.b32.xlu0 %v1475_v46, %s9704_s22 }
 0x30b   : > { %7480 = vmatmul.msk.f32.gmra.mxu1 %vm686_vm0, %v9911_v53 }
 0x311   : > { %v1478_v49 = vpop.f32.mrf.mxu0 }
 0x312   : > { %1568 = vrot.lane.b32.xlu2 %v1478_v49, %s9705_s23 }
 0x313   : > { %7481 = vmatmul.msk.f32.gmra.mxu1 %vm686_vm0, %v9920_v54 }
 0x319   : > { %v10320_v50 = vpop.f32.mrf.mxu0 }
 0x31b   : > { %7482 = vmatmul.msk.f32.gmra.mxu1 %vm686_vm0, %v9931_v55 }
 0x321   : > { %v1484_v51 = vpop.f32.mrf.mxu0 }
 0x322   : > { %1580 = vrot.lane.b32.xlu1 %v1484_v51, %s9706_s24 }
 0x329   : > { %v1487_v52 = vpop.f32.mrf.mxu0 }
 0x32a   : > { %1590 = vrot.lane.b32.xlu0 %v1487_v52, %s9708_s25 }
 0x331   : > { %v1490_v53 = vpop.f32.mrf.mxu0 }
 0x332   : > { %1600 = vrot.lane.b32.xlu2 %v1490_v53, %s9709_s26 }
 0x339   : > { %v1493_v2 = vpop.f32.mrf.mxu0 }
 0x354   : > { %v1541_v49 = vpop.permute.xlu2 %1540 }
 0x358   : > { %v1513_v15 = vpop.f32.mrf.mxu1 }
 0x359   : > { %1542 = vrot.lane.b32.xlu0 %v1513_v15, %s9702_s20 }
 0x360   : > { %v1516_v54 = vpop.f32.mrf.mxu1 }
 0x361   : > { %1550 = vrot.lane.b32.xlu2 %v1516_v54, %s9703_s21 }
 0x368   : > { %v1519_v48 = vpop.f32.mrf.mxu1 }
 0x369   : > { %1560 = vrot.lane.b32.xlu1 %v1519_v48, %s9704_s22 }
 0x36c   : > { %v1569_v52 = vpop.permute.xlu2 %1568 }
 0x370   : > { %v1522_v55 = vpop.f32.mrf.mxu1 }
 0x371   : > { %1570 = vrot.lane.b32.xlu0 %v1522_v55, %s9705_s23 }
 0x374   : > { %v1549_v53 = vpop.permute.xlu1 %1548 }
 0x378   : > { %v10329_v58 = vpop.f32.mrf.mxu1 }
 0x37c   : > { %v1559_v51 = vpop.permute.xlu0 %1558 }
 0x380   : > { %v1528_v62 = vpop.f32.mrf.mxu1 }
 0x381   : > { %1582 = vrot.lane.b32.xlu2 %v1528_v62, %s9706_s24 }
 0x388   : > { %v1531_v0 = vpop.f32.mrf.mxu1 }
 0x389   : > { %1592 = vrot.lane.b32.xlu1 %v1531_v0, %s9708_s25 }
 0x38c   : > { %v10336_v54 = vpop.permute.xlu2 %1600 }
 0x390   : > { %v1534_v40 = vpop.f32.mrf.mxu1 }
 0x391   : > { %1602 = vrot.lane.b32.xlu0 %v1534_v40, %s9709_s26  ;;  %1610 = vrot.lane.b32.xlu1 %v1493_v2, %s9710_s27 }
 0x394   : > { %v1581_v48 = vpop.permute.xlu1 %1580 }
 0x398   : > { %v1537_v46 = vpop.f32.mrf.mxu1 }
 0x399   : > { %1612 = vrot.lane.b32.xlu2 %v1537_v46, %s9710_s27 }
 0x39c   : > { %v1591_v15 = vpop.permute.xlu0 %1590 }
 0x3bb   : > { %v1551_v62 = vpop.permute.xlu2 %1550 }
 0x3bc   : > { %v1552_v46 = vsel %vm820_vm1, %v1549_v53, %v1551_v62  ;;  %v1553_v14 = vsel %vm820_vm1, %v1551_v62, %v1549_v53 }
 0x3bd   : > { %v1554_v53 = vmul.f32 %v1553_v14, %v9979_v33  ;;  %v1555_v62 = vmul.f32 %v1552_v46, %v9981_v37  ;;  %v7597_v46 = vld [vmem:[%s9776_s14 + $0x270] sm:$0xf] }
 0x3be   : > { %v7598_v24 = vor.u32 %v9206_v16, %v7597_v46 }
 0x3c0   : > { %2047 = vmatpush.bf16.msra.mxu0 %v7598_v24 }
 0x3cb   : > { %v1543_v55 = vpop.permute.xlu0 %1542 }
 0x3cc   : > { %v1544_v19 = vsel %vm806_vm2, %v1541_v49, %v1543_v55  ;;  %v1545_v2 = vsel %vm806_vm2, %v1543_v55, %v1541_v49 }
 0x3cd   : > { %v1546_v26 = vmul.f32 %v1545_v2, %v9988_v43  ;;  %v1547_v27 = vmul.f32 %v1544_v19, %v9992_v45 }
 0x3cf   : > { %v1556_v2 = vadd.f32 %v1554_v53, %v1546_v26  ;;  %v1557_v19 = vadd.f32 %v1555_v62, %v1547_v27  ;;  %v7589_v53 = vld [vmem:[%s9776_s14 + $0x260] sm:$0xf]  ;;  %v9204_v62 = vld [vmem:[%s9776_s14 + $0x264] sm:$0xf0] }
 0x3d0   : > { %v7590_v16 = vor.u32 %v9204_v62, %v7589_v53 }
 0x3d2   : > { %2048 = vmatpush.bf16.msra.mxu0 %v7590_v16 }
 0x3db   : > { %v1561_v0 = vpop.permute.xlu1 %1560  ;;  %v1583_v28 = vpop.permute.xlu2 %1582 }
 0x3dc   : > { %v1562_v29 = vsel %vm836_vm3, %v1559_v51, %v1561_v0  ;;  %v1563_v30 = vsel %vm836_vm3, %v1561_v0, %v1559_v51  ;;  %v1584_v26 = vsel %vm870_vm5, %v1581_v48, %v1583_v28 }
 0x3dd   : > { %v1564_v51 = vmul.f32 %v1563_v30, %v10005_v60  ;;  %v1565_v0 = vmul.f32 %v1562_v29, %v10007_v61  ;;  %v7661_v30 = vld [vmem:[%s9776_s14 + $0x2f0] sm:$0xf]  ;;  %v9222_v29 = vld [vmem:[%s9776_s14 + $0x2f4] sm:$0xf0] }
 0x3e3   : > { %v1571_v40 = vpop.permute.xlu0 %1570 }
 0x3e4   : > { %v1572_v49 = vsel %vm852_vm4, %v1569_v52, %v1571_v40  ;;  %v1573_v55 = vsel %vm852_vm4, %v1571_v40, %v1569_v52  ;;  %v1566_v52 = vadd.f32 %v1564_v51, %v1556_v2  ;;  %v1567_v40 = vadd.f32 %v1565_v0, %v1557_v19  ;;  %v9220_v0 = vld [vmem:[%s9776_s14 + $0x2e4] sm:$0xf0] }
 0x3e5   : > { %v1574_v21 = vmul.f32 %v1573_v55, %v10010_v63  ;;  %v1575_v23 = vmul.f32 %v1572_v49, %v10015_v4  ;;  %v7662_v55 = vor.u32 %v9222_v29, %v7661_v30  ;;  %v7653_v49 = vld [vmem:[%s9776_s14 + $0x2e0] sm:$0xf]  ;;  %v1585_v51 = vsel %vm870_vm5, %v1583_v28, %v1581_v48  ;;  %v7581_v29 = vld [vmem:[%s9776_s14 + $0x250] sm:$0xf] }
 0x3e6   : > { %v1586_v28 = vmul.f32 %v1584_v26, %v10031_v20  ;;  %v1587_v48 = vmul.f32 %v1585_v51, %v10033_v22 }
 0x3e7   : > { %v1576_v14 = vadd.f32 %v1574_v21, %v1566_v52  ;;  %v1577_v10 = vadd.f32 %v1575_v23, %v1567_v40  ;;  %2060 = vmatpush.bf16.msra.mxu1 %v7662_v55  ;;  %v7654_v52 = vor.u32 %v9220_v0, %v7653_v49 }
 0x3e9   : > { %v1578_v2 = vadd.f32 %v1576_v14, %v10320_v50  ;;  %v1579_v19 = vadd.f32 %v1577_v10, %v10329_v58  ;;  %v9202_v50 = vld [vmem:[%s9776_s14 + $0x254] sm:$0xf0]  ;;  %v7645_v14 = vld [vmem:[%s9776_s14 + $0x2d0] sm:$0xf] }
 0x3ea   : > { %v7582_v10 = vor.u32 %v9202_v50, %v7581_v29  ;;  %v9218_v58 = vld [vmem:[%s9776_s14 + $0x2d4] sm:$0xf0]  ;;  %v7629_v50 = vld [vmem:[%s9776_s14 + $0x2b0] sm:$0xf] }
 0x3eb   : > { %v1589_v46 = vadd.f32 %v1587_v48, %v1579_v19  ;;  %2061 = vmatpush.bf16.msra.mxu1 %v7654_v52  ;;  %v7646_v62 = vor.u32 %v9218_v58, %v7645_v14  ;;  %v7573_v52 = vld [vmem:[%s9776_s14 + $0x240] sm:$0xf]  ;;  %v9214_v14 = vld [vmem:[%s9776_s14 + $0x2b4] sm:$0xf0] }
 0x3ec   : > { %2049 = vmatpush.bf16.msra.mxu0 %v7582_v10 }
 0x3ef   : > { %2062 = vmatpush.bf16.msra.mxu1 %v7646_v62 }
 0x3f3   : > { %v1613_v30 = vpop.permute.xlu2 %1612 }
 0x3fb   : > { %v1593_v27 = vpop.permute.xlu1 %1592 }
 0x3fc   : > { %v1594_v21 = vsel %vm886_vm6, %v1591_v15, %v1593_v27  ;;  %v1595_v23 = vsel %vm886_vm6, %v1593_v27, %v1591_v15  ;;  %v1588_v15 = vadd.f32 %v1586_v28, %v1578_v2  ;;  %v7637_v28 = vld [vmem:[%s9776_s14 + $0x2c0] sm:$0xf] }
 0x3fd   : > { %v1596_v40 = vmul.f32 %v1594_v21, %v10047_v32  ;;  %v1597_v24 = vmul.f32 %v1595_v23, %v10051_v38 }
 0x3ff   : > { %v1598_v27 = vadd.f32 %v1596_v40, %v1588_v15  ;;  %v1599_v26 = vadd.f32 %v1597_v24, %v1589_v46  ;;  %v9216_v40 = vld [vmem:[%s9776_s14 + $0x2c4] sm:$0xf0]  ;;  %v7565_v24 = vld [vmem:[%s9776_s14 + $0x230] sm:$0xf]  ;;  %v9198_v15 = vld [vmem:[%s9776_s14 + $0x234] sm:$0xf0] }
 0x400   : > { %v7638_v29 = vor.u32 %v9216_v40, %v7637_v28  ;;  %v7566_v10 = vor.u32 %v9198_v15, %v7565_v24  ;;  %v9194_v28 = vld [vmem:[%s9776_s14 + $0x214] sm:$0xf0]  ;;  %v7613_v40 = vld [vmem:[%s9776_s14 + $0x290] sm:$0xf] }
 0x401   : > { %v9210_v24 = vld [vmem:[%s9776_s14 + $0x294] sm:$0xf0] }
 0x402   : > { %2063 = vmatpush.bf16.msra.mxu1 %v7638_v29  ;;  %v7614_v15 = vor.u32 %v9210_v24, %v7613_v40  ;;  %v7605_v29 = vld [vmem:[%s9776_s14 + $0x280] sm:$0xf]  ;;  %v9201_v40 = vld [vmem:[%s9776_s14 + $0x254] sm:$0xf]  ;;  %v7583_v24 = vld [vmem:[%s9776_s14 + $0x258] sm:$0xf0] }
 0x403   : > { %v1603_v55 = vpop.permute.xlu0 %1602  ;;  %v1611_v53 = vpop.permute.xlu1 %1610 }
 0x404   : > { %v1604_v49 = vsel %vm902_vm7, %v10336_v54, %v1603_v55  ;;  %v1605_v51 = vsel %vm902_vm7, %v1603_v55, %v10336_v54  ;;  %v1614_v21 = vsel %vm918_vm8, %v1611_v53, %v1613_v30  ;;  %v1615_v23 = vsel %vm918_vm8, %v1613_v30, %v1611_v53  ;;  %v9200_v54 = vld [vmem:[%s9776_s14 + $0x244] sm:$0xf0] }
 0x405   : > { %v1606_v16 = vmul.f32 %v1604_v49, %v10058_v47  ;;  %v1607_v0 = vmul.f32 %v1605_v51, %v10061_v56  ;;  %v1616_v2 = vmul.f32 %v1614_v21, %v10079_v12  ;;  %v1617_v19 = vmul.f32 %v1615_v23, %v10081_v13  ;;  %v7557_v51 = vld [vmem:[%s9776_s14 + $0x220] sm:$0xf]  ;;  %v9196_v21 = vld [vmem:[%s9776_s14 + $0x224] sm:$0xf0] }
 0x406   : > { %v7574_v48 = vor.u32 %v9200_v54, %v7573_v52  ;;  %v7630_v53 = vor.u32 %v9214_v14, %v7629_v50  ;;  %v7558_v23 = vor.u32 %v9196_v21, %v7557_v51  ;;  %v9208_v14 = vld [vmem:[%s9776_s14 + $0x284] sm:$0xf0]  ;;  %v7663_v51 = vld [vmem:[%s9776_s14 + $0x2f8] sm:$0xf0] }
 0x407   : > { %v1608_v46 = vadd.f32 %v1606_v16, %v1598_v27  ;;  %v1609_v30 = vadd.f32 %v1607_v0, %v1599_v26  ;;  %v7621_v16 = vld [vmem:[%s9776_s14 + $0x2a0] sm:$0xf]  ;;  %v9212_v0 = vld [vmem:[%s9776_s14 + $0x2a4] sm:$0xf0] }
 0x408   : > { %2050 = vmatpush.bf16.msra.mxu0 %v7574_v48  ;;  %2064 = vmatpush.bf16.msra.mxu1 %v7630_v53  ;;  %v7622_v54 = vor.u32 %v9212_v0, %v7621_v16 }
 0x409   : > { %v1618_v58 = vadd.f32 %v1616_v2, %v1608_v46  ;;  %v1619_v55 = vadd.f32 %v1617_v19, %v1609_v30  ;;  %v7549_v2 = vld [vmem:[%s9776_s14 + $0x210] sm:$0xf]  ;;  %v7541_v46 = vld [vmem:[%s9776_s14 + $0x200] sm:$0xf]  ;;  %v9192_v30 = vld [vmem:[%s9776_s14 + $0x204] sm:$0xf0] }
 0x40a   : > { %v7550_v48 = vor.u32 %v9194_v28, %v7549_v2  ;;  %v7542_v50 = vor.u32 %v9192_v30, %v7541_v46  ;;  %v9219_v28 = vld [vmem:[%s9776_s14 + $0x2e4] sm:$0xf]  ;;  %v7647_v46 = vld [vmem:[%s9776_s14 + $0x2d8] sm:$0xf0]  ;;  %v7586_v30 = vor.u32 %v9201_v40, %v7583_v24  ;;  %v7607_v24 = vld [vmem:[%s9776_s14 + $0x288] sm:$0xf0] }
 0x40b   : > { %v1620_v62 = vadd.f32 %v1618_v58, %v10097_v57  ;;  %v1621_v27 = vadd.f32 %v1619_v55, %v10097_v57  ;;  %v7606_v58 = vor.u32 %v9208_v14, %v7605_v29  ;;  %v9215_v14 = vld [vmem:[%s9776_s14 + $0x2c4] sm:$0xf] }
 0x40c   : > { %2051 = vmatpush.bf16.msra.mxu0 %v7566_v10  ;;  %2065 = vmatpush.bf16.msra.mxu1 %v7622_v54  ;;  %v7591_v54 = vld [vmem:[%s9776_s14 + $0x268] sm:$0xf0] }
 0x40d   : > { %v1622_v26 = vsub.f32 0.0, %v1620_v62  ;;  %v1623_v49 = vsub.f32 0.0, %v1621_v27  ;;  %v9205_v27 = vld [vmem:[%s9776_s14 + $0x274] sm:$0xf] }
 0x40f   : > { %v1624_v19 = vmul.f32 1.442695, %v1622_v26  ;;  %v1626_v52 = vmul.f32 1.442695, %v1623_v49  ;;  %v7599_v26 = vld [vmem:[%s9776_s14 + $0x278] sm:$0xf0] }
 0x410   : > { %2052 = vmatpush.bf16.msra.mxu0 %v7558_v23  ;;  %2066 = vmatpush.bf16.msra.mxu1 %v7614_v15  ;;  %v9221_v49 = vld [vmem:[%s9776_s14 + $0x2f4] sm:$0xf]  ;;  %v7602_v0 = vor.u32 %v9205_v27, %v7599_v26  ;;  %v7631_v26 = vld [vmem:[%s9776_s14 + $0x2b8] sm:$0xf0] }
 0x411   : > { %9518 = vpow2.f32 %v1624_v19  ;;  %v7666_v19 = vor.u32 %v9221_v49, %v7663_v51  ;;  %v9217_v15 = vld [vmem:[%s9776_s14 + $0x2d4] sm:$0xf]  ;;  %v9195_v51 = vld [vmem:[%s9776_s14 + $0x224] sm:$0xf] }
 0x412   : > { %9520 = vpow2.f32 %v1626_v52  ;;  %v9203_v52 = vld [vmem:[%s9776_s14 + $0x264] sm:$0xf]  ;;  %v7650_v29 = vor.u32 %v9217_v15, %v7647_v46 }
 0x414   : > { %2053 = vmatpush.bf16.msra.mxu0 %v7550_v48  ;;  %2067 = vmatpush.bf16.msra.mxu1 %v7606_v58  ;;  %v7655_v48 = vld [vmem:[%s9776_s14 + $0x2e8] sm:$0xf0] }
 0x415   : > { %v7639_v58 = vld [vmem:[%s9776_s14 + $0x2c8] sm:$0xf0] }
 0x417   : > { %v9519_v10 = vpop.eup %9518  ;;  %2068 = vmatmul.bf16.vlgmr.msra.gmra.mxu1 %v9850_v36 }
 0x418   : > { %v9521_v55 = vpop.eup %9520  ;;  %v1628_v53 = vadd.f32 1.0, %v9519_v10  ;;  %2054 = vmatpush.bf16.msra.mxu0 %v7542_v50  ;;  %v7575_v50 = vld [vmem:[%s9776_s14 + $0x248] sm:$0xf0] }
 0x419   : > { %v1629_v62 = vadd.f32 1.0, %v9521_v55  ;;  %v7642_v55 = vor.u32 %v9215_v14, %v7639_v58  ;;  %v10530_v58 = vld [vmem:[%s13982_s5 + $0x18] sm:$0xff] }
 0x41a   : > { %9522 = vrcp.f32 %v1628_v53  ;;  %v7567_v53 = vld [vmem:[%s9776_s14 + $0x238] sm:$0xf0] }
 0x41b   : > { %9524 = vrcp.f32 %v1629_v62  ;;  %2055 = vmatmul.bf16.vlgmr.msra.gmra.mxu0 %v9848_v35  ;;  %v9213_v62 = vld [vmem:[%s9776_s14 + $0x2b4] sm:$0xf] }
 0x41c   : > { %v7634_v49 = vor.u32 %v9213_v62, %v7631_v26  ;;  %v10552_v26 = vld [vmem:[%s13982_s5 + $0x28] sm:$0xff] }
 0x420   : > { %v9523_v21 = vpop.eup %9522 }
 0x421   : > { %v9525_v23 = vpop.eup %9524  ;;  %v1632_v16 = vmul.f32 %v9523_v21, %v10122_v44  ;;  %v7594_v44 = vor.u32 %v9203_v52, %v7591_v54  ;;  %v9211_v21 = vld [vmem:[%s9776_s14 + $0x2a4] sm:$0xf]  ;;  %v9209_v52 = vld [vmem:[%s9776_s14 + $0x294] sm:$0xf] }
 0x422   : > { %v1633_v2 = vmul.f32 %v9525_v23, %v10127_v59  ;;  %v7658_v59 = vor.u32 %v9219_v28, %v7655_v48  ;;  %v9191_v48 = vld [vmem:[%s9776_s14 + $0x204] sm:$0xf] }
 0x423   : > { %1649 = vmatpush.msrb.mxu2 %v1632_v16  ;;  %v7623_v16 = vld [vmem:[%s9776_s14 + $0x2a8] sm:$0xf0] }
 0x424   : > { %1693 = vmatpush.msrb.mxu3 %v1633_v2  ;;  %7483 = vmatmul.msk.f32.vlgmr.msrb.gmra.mxu2 %vm686_vm0, %v10135_v1  ;;  %v9193_v2 = vld [vmem:[%s9776_s14 + $0x214] sm:$0xf] }
 0x425   : > { %7492 = vmatmul.msk.f32.vlgmr.msrb.gmra.mxu3 %vm686_vm0, %v10135_v1  ;;  %2073 = vmatpush.bf16.msra.mxu2 %v7602_v0  ;;  %v9199_v1 = vld [vmem:[%s9776_s14 + $0x244] sm:$0xf]  ;;  %v7626_v0 = vor.u32 %v9211_v21, %v7623_v16  ;;  %v10574_v16 = vld [vmem:[%s13982_s5 + $0x38] sm:$0xff] }
 0x426   : > { %2086 = vmatpush.bf16.msra.mxu3 %v7666_v19  ;;  %v7578_v10 = vor.u32 %v9199_v1, %v7575_v50  ;;  %v7551_v19 = vld [vmem:[%s9776_s14 + $0x218] sm:$0xf0]  ;;  %v10519_v50 = vld [vmem:[%s13982_s5 + $0x10] sm:$0xff] }
 0x427   : > { %v7554_v54 = vor.u32 %v9193_v2, %v7551_v19  ;;  %v10585_v19 = vld [vmem:[%s13982_s5 + $0x40] sm:$0xff] }
 0x429   : > { %2074 = vmatpush.bf16.msra.mxu2 %v7594_v44  ;;  %v7543_v44 = vld [vmem:[%s9776_s14 + $0x208] sm:$0xf0] }
 0x42a   : > { %2087 = vmatpush.bf16.msra.mxu3 %v7658_v59  ;;  %v9207_v59 = vld [vmem:[%s9776_s14 + $0x284] sm:$0xf]  ;;  %v7546_v40 = vor.u32 %v9191_v48, %v7543_v44 }
 0x42b   : > { %v7610_v15 = vor.u32 %v9207_v59, %v7607_v24 }
 0x42c   : > { %7484 = vmatmul.msk.f32.gmra.mxu2 %vm686_vm0, %v10153_v25 }
 0x42d   : > { %7493 = vmatmul.msk.f32.gmra.mxu3 %vm686_vm0, %v10153_v25  ;;  %2075 = vmatpush.bf16.msra.mxu2 %v7586_v30  ;;  %v9197_v25 = vld [vmem:[%s9776_s14 + $0x234] sm:$0xf] }
 0x42e   : > { %2088 = vmatpush.bf16.msra.mxu3 %v7650_v29  ;;  %v7570_v27 = vor.u32 %v9197_v25, %v7567_v53  ;;  %v10541_v53 = vld [vmem:[%s13982_s5 + $0x20] sm:$0xff] }
 0x431   : > { %2076 = vmatpush.bf16.msra.mxu2 %v7578_v10 }
 0x432   : > { %2089 = vmatpush.bf16.msra.mxu3 %v7642_v55 }
 0x434   : > { %7485 = vmatmul.msk.f32.gmra.mxu2 %vm686_vm0, %v10166_v41 }
 0x435   : > { %7494 = vmatmul.msk.f32.gmra.mxu3 %vm686_vm0, %v10166_v41  ;;  %2077 = vmatpush.bf16.msra.mxu2 %v7570_v27  ;;  %v7559_v41 = vld [vmem:[%s9776_s14 + $0x228] sm:$0xf0] }
 0x436   : > { %2090 = vmatpush.bf16.msra.mxu3 %v7634_v49  ;;  %v7562_v23 = vor.u32 %v9195_v51, %v7559_v41  ;;  %v10563_v41 = vld [vmem:[%s13982_s5 + $0x30] sm:$0xff] }
 0x439   : > { %2078 = vmatpush.bf16.msra.mxu2 %v7562_v23 }
 0x43a   : > { %2091 = vmatpush.bf16.msra.mxu3 %v7626_v0 }
 0x43c   : > { %7486 = vmatmul.msk.f32.gmra.mxu2 %vm686_vm0, %v10179_v3 }
 0x43d   : > { %7495 = vmatmul.msk.f32.gmra.mxu3 %vm686_vm0, %v10179_v3  ;;  %v7615_v3 = vld [vmem:[%s9776_s14 + $0x298] sm:$0xf0]  ;;  %2079 = vmatpush.bf16.msra.mxu2 %v7554_v54 }
 0x43e   : > { %v7618_v28 = vor.u32 %v9209_v52, %v7615_v3 }
 0x440   : > { %2092 = vmatpush.bf16.msra.mxu3 %v7618_v28 }
 0x441   : > { %2080 = vmatpush.bf16.msra.mxu2 %v7546_v40 }
 0x444   : > { %7487 = vmatmul.msk.f32.gmra.mxu2 %vm686_vm0, %v10192_v11  ;;  %2093 = vmatpush.bf16.msra.mxu3 %v7610_v15 }
 0x445   : > { %7496 = vmatmul.msk.f32.gmra.mxu3 %vm686_vm0, %v10192_v11 }
 0x44c   : > { %7488 = vmatmul.msk.f32.gmra.mxu2 %vm686_vm0, %v10209_v31 }
 0x44d   : > { %7497 = vmatmul.msk.f32.gmra.mxu3 %vm686_vm0, %v10209_v31 }
 0x454   : > { %7489 = vmatmul.msk.f32.gmra.mxu2 %vm686_vm0, %v10218_v34 }
 0x455   : > { %7498 = vmatmul.msk.f32.gmra.mxu3 %vm686_vm0, %v10218_v34  ;;  %v10501_v34 = vld [vmem:[%s13982_s5] sm:$0xff] }
 0x45c   : > { %7490 = vmatmul.msk.f32.gmra.mxu2 %vm686_vm0, %v10227_v39 }
 0x45d   : > { %7499 = vmatmul.msk.f32.gmra.mxu3 %vm686_vm0, %v10227_v39 }
 0x464   : > { %7491 = vmatmul.msk.f32.gmra.mxu2 %vm686_vm0, %v10236_v42 }
 0x465   : > { %7500 = vmatmul.msk.f32.gmra.mxu3 %vm686_vm0, %v10236_v42  ;;  %v10508_v42 = vld [vmem:[%s13982_s5 + $0x8] sm:$0xff] }
 0x46c   : > { %2081 = vmatmul.bf16.vlgmr.msra.gmra.mxu2 %v9848_v35 }
 0x46d   : > { %2094 = vmatmul.bf16.vlgmr.msra.gmra.mxu3 %v9850_v36 }
 0x494   : > { %v2069_v31 = vpop.f32.mrf.mxu1 }
 0x498   : > { %v2056_v11 = vpop.f32.mrf.mxu0 }
 0x499   : > { %v2070_v46 = vadd.f32 %v2069_v31, %v2056_v11 }
 0x49b   : > { %2114 = vmatpush.msrb.mxu0 %v2070_v46 }
 0x49c   : > { %7667 = vmatmul.msk.f32.vlgmr.msrb.gmra.mxu0 %vm686_vm0, %v10501_v34  ;;  %v2071_v30 = vpop.f32.mrf.mxu1 }
 0x4a0   : > { %v2058_v39 = vpop.f32.mrf.mxu0 }
 0x4a4   : > { %7668 = vmatmul.msk.f32.gmra.mxu0 %vm686_vm0, %v10508_v42 }
 0x4a7   : > { %v10512_v29 = vpop.f32.mrf.mxu2 }
 0x4a8   : > { %14005 = vst [vmem:[#allocation15_spill] sm:$0xff] %v10512_v29  ;;  %v10514_v1 = vpop.f32.mrf.mxu3 }
 0x4a9   : > { %14006 = vst [vmem:[#allocation16_spill] sm:$0xff] %v10514_v1 }
 0x4ac   : > { %7669 = vmatmul.msk.f32.gmra.mxu0 %vm686_vm0, %v10519_v50 }
 0x4af   : > { %v10523_v14 = vpop.f32.mrf.mxu2 }
 0x4b0   : > { %14007 = vst [vmem:[#allocation17_spill] sm:$0xff] %v10523_v14  ;;  %v10525_v10 = vpop.f32.mrf.mxu3  ;;  %v9236_v14 = vld [vmem:[%s9776_s14 + $0x364] sm:$0xf0] }
 0x4b1   : > { %14008 = vst [vmem:[#allocation18_spill] sm:$0xff] %v10525_v10 }
 0x4b4   : > { %7670 = vmatmul.msk.f32.gmra.mxu0 %vm686_vm0, %v10530_v58 }
 0x4b7   : > { %v10534_v55 = vpop.f32.mrf.mxu2 }
 0x4b8   : > { %14009 = vst [vmem:[#allocation19_spill] sm:$0xff] %v10534_v55  ;;  %v10536_v25 = vpop.f32.mrf.mxu3 }
 0x4b9   : > { %14010 = vst [vmem:[#allocation20_spill] sm:$0xff] %v10536_v25 }
 0x4bc   : > { %7671 = vmatmul.msk.f32.gmra.mxu0 %vm686_vm0, %v10541_v53 }
 0x4bf   : > { %v10545_v62 = vpop.f32.mrf.mxu2 }
 0x4c0   : > { %14011 = vst [vmem:[#allocation21_spill] sm:$0xff] %v10545_v62  ;;  %v10547_v27 = vpop.f32.mrf.mxu3 }
 0x4c1   : > { %14012 = vst [vmem:[#allocation22_spill] sm:$0xff] %v10547_v27 }
 0x4c4   : > { %7672 = vmatmul.msk.f32.gmra.mxu0 %vm686_vm0, %v10552_v26 }
 0x4c7   : > { %v10556_v49 = vpop.f32.mrf.mxu2 }
 0x4c8   : > { %14013 = vst [vmem:[#allocation23_spill] sm:$0xff] %v10556_v49  ;;  %v10558_v51 = vpop.f32.mrf.mxu3 }
 0x4c9   : > { %14014 = vst [vmem:[#allocation24_spill] sm:$0xff] %v10558_v51 }
 0x4cc   : > { %7673 = vmatmul.msk.f32.gmra.mxu0 %vm686_vm0, %v10563_v41 }
 0x4cf   : > { %v10567_v21 = vpop.f32.mrf.mxu2 }
 0x4d0   : > { %14015 = vst [vmem:[#allocation25_spill] sm:$0xff] %v10567_v21  ;;  %v10569_v23 = vpop.f32.mrf.mxu3 }
 0x4d1   : > { %14016 = vst [vmem:[#allocation26_spill] sm:$0xff] %v10569_v23 }
 0x4d4   : > { %7674 = vmatmul.msk.f32.gmra.mxu0 %vm686_vm0, %v10574_v16 }
 0x4d7   : > { %v10578_v0 = vpop.f32.mrf.mxu2 }
 0x4d8   : > { %14017 = vst [vmem:[#allocation27_spill] sm:$0xff] %v10578_v0  ;;  %v10580_v2 = vpop.f32.mrf.mxu3 }
 0x4d9   : > { %14018 = vst [vmem:[#allocation28_spill] sm:$0xff] %v10580_v2 }
 0x4dc   : > { %7675 = vmatmul.msk.f32.gmra.mxu0 %vm686_vm0, %v10585_v19 }
 0x4df   : > { %v10589_v52 = vpop.f32.mrf.mxu2 }
 0x4e0   : > { %14019 = vst [vmem:[#allocation29_spill] sm:$0xff] %v10589_v52  ;;  %v10591_v54 = vpop.f32.mrf.mxu3 }
 0x4e1   : > { %14020 = vst [vmem:[#allocation30_spill] sm:$0xff] %v10591_v54 }
 0x4e7   : > { %v10593_v3 = vpop.f32.mrf.mxu2 }
 0x4e8   : > { %14021 = vst [vmem:[#allocation31_spill] sm:$0xff] %v10593_v3  ;;  %v10595_v28 = vpop.f32.mrf.mxu3 }
 0x4e9   : > { %14022 = vst [vmem:[#allocation32_spill] sm:$0xff] %v10595_v28 }
 0x4ef   : > { %v2082_v48 = vpop.f32.mrf.mxu2 }
 0x4f0   : > { %v2095_v44 = vpop.f32.mrf.mxu3 }
 0x4f1   : > { %v2096_v59 = vadd.f32 %v2095_v44, %v2082_v48 }
 0x4f3   : > { %2158 = vmatpush.msrb.mxu1 %v2096_v59 }
 0x4f4   : > { %7676 = vmatmul.msk.f32.vlgmr.msrb.gmra.mxu1 %vm686_vm0, %v10501_v34 }
 0x4f7   : > { %v2084_v40 = vpop.f32.mrf.mxu2 }
 0x4f8   : > { %v2097_v24 = vpop.f32.mrf.mxu3 }
 0x4fc   : > { %7677 = vmatmul.msk.f32.gmra.mxu1 %vm686_vm0, %v10508_v42 }
 0x504   : > { %7678 = vmatmul.msk.f32.gmra.mxu1 %vm686_vm0, %v10519_v50 }
 0x50c   : > { %7679 = vmatmul.msk.f32.gmra.mxu1 %vm686_vm0, %v10530_v58 }
 0x514   : > { %7680 = vmatmul.msk.f32.gmra.mxu1 %vm686_vm0, %v10541_v53 }
 0x519   : > { %v2116_v15 = vpop.f32.mrf.mxu0 }
 0x51a   : > { %2187 = vrot.lane.b32.xlu0 %v2116_v15, %s9702_s20 }
 0x51c   : > { %7681 = vmatmul.msk.f32.gmra.mxu1 %vm686_vm0, %v10552_v26 }
 0x521   : > { %v2119_v11 = vpop.f32.mrf.mxu0 }
 0x522   : > { %2195 = vrot.lane.b32.xlu2 %v2119_v11, %s9703_s21 }
 0x524   : > { %7682 = vmatmul.msk.f32.gmra.mxu1 %vm686_vm0, %v10563_v41 }
 0x529   : > { %v2122_v31 = vpop.f32.mrf.mxu0 }
 0x52a   : > { %2205 = vrot.lane.b32.xlu1 %v2122_v31, %s9704_s22 }
 0x52c   : > { %7683 = vmatmul.msk.f32.gmra.mxu1 %vm686_vm0, %v10574_v16 }
 0x531   : > { %v2125_v46 = vpop.f32.mrf.mxu0 }
 0x532   : > { %2215 = vrot.lane.b32.xlu0 %v2125_v46, %s9705_s23 }
 0x534   : > { %7684 = vmatmul.msk.f32.gmra.mxu1 %vm686_vm0, %v10585_v19 }
 0x539   : > { %v10619_v39 = vpop.f32.mrf.mxu0 }
 0x541   : > { %v2131_v30 = vpop.f32.mrf.mxu0 }
 0x542   : > { %2227 = vrot.lane.b32.xlu2 %v2131_v30, %s9706_s24 }
 0x549   : > { %v2134_v48 = vpop.f32.mrf.mxu0 }
 0x54a   : > { %2237 = vrot.lane.b32.xlu1 %v2134_v48, %s9708_s25 }
 0x551   : > { %v2137_v44 = vpop.f32.mrf.mxu0 }
 0x552   : > { %2247 = vrot.lane.b32.xlu0 %v2137_v44, %s9709_s26 }
 0x559   : > { %v2140_v30 = vpop.f32.mrf.mxu0 }
 0x571   : > { %v2160_v59 = vpop.f32.mrf.mxu1 }
 0x572   : > { %2189 = vrot.lane.b32.xlu1 %v2160_v59, %s9702_s20 }
 0x579   : > { %v2163_v40 = vpop.f32.mrf.mxu1 }
 0x57a   : > { %2197 = vrot.lane.b32.xlu0 %v2163_v40, %s9703_s21 }
 0x581   : > { %v2166_v24 = vpop.f32.mrf.mxu1 }
 0x582   : > { %2207 = vrot.lane.b32.xlu2 %v2166_v24, %s9704_s22 }
 0x589   : > { %v2169_v15 = vpop.f32.mrf.mxu1 }
 0x58a   : > { %2217 = vrot.lane.b32.xlu1 %v2169_v15, %s9705_s23  ;;  %v2196_v15 = vpop.permute.xlu2 %2195 }
 0x58c   : > { %v2188_v59 = vpop.permute.xlu0 %2187 }
 0x591   : > { %v10628_v11 = vpop.f32.mrf.mxu1 }
 0x599   : > { %v2175_v31 = vpop.f32.mrf.mxu1 }
 0x59a   : > { %2229 = vrot.lane.b32.xlu0 %v2175_v31, %s9706_s24 }
 0x59c   : > { %v2206_v40 = vpop.permute.xlu1 %2205  ;;  %v2228_v54 = vpop.permute.xlu2 %2227 }
 0x5a1   : > { %v2178_v46 = vpop.f32.mrf.mxu1 }
 0x5a2   : > { %2239 = vrot.lane.b32.xlu2 %v2178_v46, %s9708_s25 }
 0x5a4   : > { %v2216_v24 = vpop.permute.xlu0 %2215 }
 0x5a9   : > { %v2181_v48 = vpop.f32.mrf.mxu1 }
 0x5aa   : > { %2249 = vrot.lane.b32.xlu1 %v2181_v48, %s9709_s26  ;;  %2257 = vrot.lane.b32.xlu2 %v2140_v30, %s9710_s27 }
 0x5b1   : > { %v2184_v44 = vpop.f32.mrf.mxu1 }
 0x5b2   : > { %2259 = vrot.lane.b32.xlu0 %v2184_v44, %s9710_s27 }
 0x5bc   : > { %v2238_v51 = vpop.permute.xlu1 %2237 }
 0x5c4   : > { %v2248_v49 = vpop.permute.xlu0 %2247 }
 0x5dc   : > { %v2208_v62 = vpop.permute.xlu2 %2207 }
 0x5dd   : > { %v2210_v2 = vsel %vm836_vm3, %v2208_v62, %v2206_v40 }
 0x5e4   : > { %v2190_v31 = vpop.permute.xlu1 %2189 }
 0x5e5   : > { %v2192_v30 = vsel %vm806_vm2, %v2190_v31, %v2188_v59  ;;  %v2191_v44 = vsel %vm806_vm2, %v2188_v59, %v2190_v31  ;;  %v2209_v59 = vsel %vm836_vm3, %v2206_v40, %v2208_v62 }
 0x5e6   : > { %v2193_v27 = vmul.f32 %v2192_v30, %v9988_v43  ;;  %v2211_v30 = vmul.f32 %v2210_v2, %v10005_v60 }
 0x5ec   : > { %v2198_v0 = vpop.permute.xlu0 %2197 }
 0x5ed   : > { %v2200_v46 = vsel %vm820_vm1, %v2198_v0, %v2196_v15  ;;  %v2199_v48 = vsel %vm820_vm1, %v2196_v15, %v2198_v0  ;;  %v2194_v0 = vmul.f32 %v2191_v44, %v9992_v45  ;;  %v2212_v44 = vmul.f32 %v2209_v59, %v10007_v61 }
 0x5ee   : > { %v2201_v28 = vmul.f32 %v2200_v46, %v9979_v33  ;;  %v2202_v3 = vmul.f32 %v2199_v48, %v9981_v37 }
 0x5f0   : > { %v2203_v31 = vadd.f32 %v2201_v28, %v2193_v27  ;;  %v2204_v48 = vadd.f32 %v2202_v3, %v2194_v0  ;;  %v9238_v3 = vld [vmem:[%s9776_s14 + $0x374] sm:$0xf0]  ;;  %v7863_v28 = vld [vmem:[%s9776_s14 + $0x3f0] sm:$0xf] }
 0x5f1   : > { %v9254_v0 = vld [vmem:[%s9776_s14 + $0x3f4] sm:$0xf0] }
 0x5f2   : > { %v2213_v55 = vadd.f32 %v2211_v30, %v2203_v31  ;;  %v2214_v62 = vadd.f32 %v2212_v44, %v2204_v48  ;;  %v7864_v10 = vor.u32 %v9254_v0, %v7863_v28  ;;  %v7855_v31 = vld [vmem:[%s9776_s14 + $0x3e0] sm:$0xf]  ;;  %v9252_v44 = vld [vmem:[%s9776_s14 + $0x3e4] sm:$0xf0]  ;;  %v9234_v28 = vld [vmem:[%s9776_s14 + $0x354] sm:$0xf0] }
 0x5f3   : > { %v9250_v0 = vld [vmem:[%s9776_s14 + $0x3d4] sm:$0xf0] }
 0x5f4   : > { %2707 = vmatpush.bf16.msra.mxu1 %v7864_v10 }
 0x5fc   : > { %v2218_v52 = vpop.permute.xlu1 %2217  ;;  %v2240_v59 = vpop.permute.xlu2 %2239 }
 0x5fd   : > { %v2220_v15 = vsel %vm852_vm4, %v2218_v52, %v2216_v24  ;;  %v2219_v46 = vsel %vm852_vm4, %v2216_v24, %v2218_v52  ;;  %v7799_v52 = vld [vmem:[%s9776_s14 + $0x370] sm:$0xf] }
 0x5fe   : > { %v2221_v23 = vmul.f32 %v2220_v15, %v10010_v63  ;;  %v2222_v25 = vmul.f32 %v2219_v46, %v10015_v4  ;;  %v7800_v24 = vor.u32 %v9238_v3, %v7799_v52  ;;  %v7791_v46 = vld [vmem:[%s9776_s14 + $0x360] sm:$0xf] }
 0x5ff   : > { %v7792_v30 = vor.u32 %v9236_v14, %v7791_v46 }
 0x600   : > { %v2223_v2 = vadd.f32 %v2221_v23, %v2213_v55  ;;  %v2224_v15 = vadd.f32 %v2222_v25, %v2214_v62  ;;  %2694 = vmatpush.bf16.msra.mxu0 %v7800_v24 }
 0x602   : > { %v2225_v25 = vadd.f32 %v2223_v2, %v10619_v39  ;;  %v2226_v62 = vadd.f32 %v2224_v15, %v10628_v11  ;;  %v7783_v39 = vld [vmem:[%s9776_s14 + $0x350] sm:$0xf] }
 0x603   : > { %v7847_v2 = vld [vmem:[%s9776_s14 + $0x3d0] sm:$0xf]  ;;  %v7784_v24 = vor.u32 %v9234_v28, %v7783_v39 }
 0x604   : > { %2695 = vmatpush.bf16.msra.mxu0 %v7792_v30  ;;  %v2258_v15 = vpop.permute.xlu2 %2257  ;;  %v7775_v30 = vld [vmem:[%s9776_s14 + $0x340] sm:$0xf]  ;;  %v7831_v28 = vld [vmem:[%s9776_s14 + $0x3b0] sm:$0xf] }
 0x608   : > { %2696 = vmatpush.bf16.msra.mxu0 %v7784_v24 }
 0x60c   : > { %v2230_v21 = vpop.permute.xlu0 %2229 }
 0x60d   : > { %v2231_v27 = vsel %vm870_vm5, %v2228_v54, %v2230_v21  ;;  %v2232_v40 = vsel %vm870_vm5, %v2230_v21, %v2228_v54  ;;  %v7856_v21 = vor.u32 %v9252_v44, %v7855_v31  ;;  %v2241_v54 = vsel %vm886_vm6, %v2238_v51, %v2240_v59  ;;  %v9232_v44 = vld [vmem:[%s9776_s14 + $0x344] sm:$0xf0] }
 0x60e   : > { %v2233_v48 = vmul.f32 %v2231_v27, %v10031_v20  ;;  %v2234_v55 = vmul.f32 %v2232_v40, %v10033_v22  ;;  %v2242_v27 = vsel %vm886_vm6, %v2240_v59, %v2238_v51  ;;  %v2243_v11 = vmul.f32 %v2241_v54, %v10047_v32 }
 0x60f   : > { %2708 = vmatpush.bf16.msra.mxu1 %v7856_v21  ;;  %v2244_v51 = vmul.f32 %v2242_v27, %v10051_v38  ;;  %v7848_v59 = vor.u32 %v9250_v0, %v7847_v2  ;;  %v7776_v54 = vor.u32 %v9232_v44, %v7775_v30  ;;  %v9230_v27 = vld [vmem:[%s9776_s14 + $0x334] sm:$0xf0]  ;;  %v7823_v30 = vld [vmem:[%s9776_s14 + $0x3a0] sm:$0xf]  ;;  %v9244_v44 = vld [vmem:[%s9776_s14 + $0x3a4] sm:$0xf0] }
 0x610   : > { %v2235_v52 = vadd.f32 %v2233_v48, %v2225_v25  ;;  %v2236_v10 = vadd.f32 %v2234_v55, %v2226_v62  ;;  %v7839_v55 = vld [vmem:[%s9776_s14 + $0x3c0] sm:$0xf]  ;;  %v9248_v62 = vld [vmem:[%s9776_s14 + $0x3c4] sm:$0xf0]  ;;  %v9246_v2 = vld [vmem:[%s9776_s14 + $0x3b4] sm:$0xf0] }
 0x611   : > { %v7840_v39 = vor.u32 %v9248_v62, %v7839_v55  ;;  %2697 = vmatpush.bf16.msra.mxu0 %v7776_v54  ;;  %v7832_v0 = vor.u32 %v9246_v2, %v7831_v28  ;;  %v7751_v55 = vld [vmem:[%s9776_s14 + $0x310] sm:$0xf]  ;;  %v9226_v54 = vld [vmem:[%s9776_s14 + $0x314] sm:$0xf0]  ;;  %v9240_v2 = vld [vmem:[%s9776_s14 + $0x384] sm:$0xf0] }
 0x612   : > { %v2245_v46 = vadd.f32 %v2243_v11, %v2235_v52  ;;  %v2246_v31 = vadd.f32 %v2244_v51, %v2236_v10  ;;  %v7752_v62 = vor.u32 %v9226_v54, %v7751_v55  ;;  %v9235_v54 = vld [vmem:[%s9776_s14 + $0x364] sm:$0xf] }
 0x613   : > { %2709 = vmatpush.bf16.msra.mxu1 %v7848_v59 }
 0x617   : > { %2710 = vmatpush.bf16.msra.mxu1 %v7840_v39  ;;  %v7807_v39 = vld [vmem:[%s9776_s14 + $0x380] sm:$0xf] }
 0x61b   : > { %2711 = vmatpush.bf16.msra.mxu1 %v7832_v0 }
 0x61c   : > { %v2250_v23 = vpop.permute.xlu1 %2249 }
 0x61d   : > { %v2251_v14 = vsel %vm902_vm7, %v2248_v49, %v2250_v23  ;;  %v2252_v3 = vsel %vm902_vm7, %v2250_v23, %v2248_v49 }
 0x61e   : > { %v2253_v40 = vmul.f32 %v2251_v14, %v10058_v47  ;;  %v2254_v49 = vmul.f32 %v2252_v3, %v10061_v56  ;;  %v7767_v14 = vld [vmem:[%s9776_s14 + $0x330] sm:$0xf] }
 0x61f   : > { %v7768_v11 = vor.u32 %v9230_v27, %v7767_v14  ;;  %v7815_v14 = vld [vmem:[%s9776_s14 + $0x390] sm:$0xf]  ;;  %v9242_v27 = vld [vmem:[%s9776_s14 + $0x394] sm:$0xf0] }
 0x620   : > { %v2255_v23 = vadd.f32 %v2253_v40, %v2245_v46  ;;  %v2256_v52 = vadd.f32 %v2254_v49, %v2246_v31  ;;  %v7759_v46 = vld [vmem:[%s9776_s14 + $0x320] sm:$0xf]  ;;  %v9228_v31 = vld [vmem:[%s9776_s14 + $0x324] sm:$0xf0] }
 0x621   : > { %2698 = vmatpush.bf16.msra.mxu0 %v7768_v11 }
 0x624   : > { %v2260_v48 = vpop.permute.xlu0 %2259 }
 0x625   : > { %v2261_v21 = vsel %vm918_vm8, %v2258_v15, %v2260_v48  ;;  %v2262_v25 = vsel %vm918_vm8, %v2260_v48, %v2258_v15  ;;  %v7760_v48 = vor.u32 %v9228_v31, %v7759_v46  ;;  %v7865_v46 = vld [vmem:[%s9776_s14 + $0x3f8] sm:$0xf0] }
 0x626   : > { %v2263_v3 = vmul.f32 %v2261_v21, %v10079_v12  ;;  %v2264_v10 = vmul.f32 %v2262_v25, %v10081_v13  ;;  %v7824_v25 = vor.u32 %v9244_v44, %v7823_v30  ;;  %v10726_v30 = vld [vmem:[%s10117_s12] sm:$0xff] }
 0x627   : > { %2699 = vmatpush.bf16.msra.mxu0 %v7760_v48 }
 0x628   : > { %v2265_v40 = vadd.f32 %v2263_v3, %v2255_v23  ;;  %v2266_v24 = vadd.f32 %v2264_v10, %v2256_v52  ;;  %2712 = vmatpush.bf16.msra.mxu1 %v7824_v25  ;;  %v7816_v52 = vor.u32 %v9242_v27, %v7815_v14  ;;  %v7743_v3 = vld [vmem:[%s9776_s14 + $0x300] sm:$0xf]  ;;  %v9224_v10 = vld [vmem:[%s9776_s14 + $0x304] sm:$0xf0]  ;;  %v9251_v14 = vld [vmem:[%s9776_s14 + $0x3e4] sm:$0xf] }
 0x629   : > { %v7744_v28 = vor.u32 %v9224_v10, %v7743_v3  ;;  %v7857_v27 = vld [vmem:[%s9776_s14 + $0x3e8] sm:$0xf0] }
 0x62a   : > { %v2267_v51 = vadd.f32 %v2265_v40, %v10097_v57  ;;  %v2268_v49 = vadd.f32 %v2266_v24, %v10097_v57  ;;  %v7808_v40 = vor.u32 %v9240_v2, %v7807_v39  ;;  %v7860_v10 = vor.u32 %v9251_v14, %v7857_v27  ;;  %v9233_v39 = vld [vmem:[%s9776_s14 + $0x354] sm:$0xf]  ;;  %v10779_v14 = vld [vmem:[%s13984_s7 + $0x18] sm:$0xff]  ;;  %v9227_v27 = vld [vmem:[%s9776_s14 + $0x324] sm:$0xf] }
 0x62b   : > { %2700 = vmatpush.bf16.msra.mxu0 %v7752_v62  ;;  %v7793_v62 = vld [vmem:[%s9776_s14 + $0x368] sm:$0xf0]  ;;  %v9249_v2 = vld [vmem:[%s9776_s14 + $0x3d4] sm:$0xf] }
 0x62c   : > { %v2269_v15 = vsub.f32 0.0, %v2267_v51  ;;  %v2270_v59 = vsub.f32 0.0, %v2268_v49  ;;  %2713 = vmatpush.bf16.msra.mxu1 %v7816_v52  ;;  %v9237_v49 = vld [vmem:[%s9776_s14 + $0x374] sm:$0xf]  ;;  %v10740_v52 = vld [vmem:[%s13984_s7] sm:$0xff]  ;;  %v7796_v3 = vor.u32 %v9235_v54, %v7793_v62 }
 0x62d   : > { %v7833_v54 = vld [vmem:[%s9776_s14 + $0x3b8] sm:$0xf0] }
 0x62e   : > { %v2271_v23 = vmul.f32 1.442695, %v2269_v15  ;;  %v2273_v21 = vmul.f32 1.442695, %v2270_v59  ;;  %v7801_v15 = vld [vmem:[%s9776_s14 + $0x378] sm:$0xf0] }
 0x62f   : > { %2701 = vmatpush.bf16.msra.mxu0 %v7744_v28  ;;  %v9253_v59 = vld [vmem:[%s9776_s14 + $0x3f4] sm:$0xf]  ;;  %v7804_v55 = vor.u32 %v9237_v49, %v7801_v15  ;;  %v7785_v28 = vld [vmem:[%s9776_s14 + $0x358] sm:$0xf0]  ;;  %v7777_v49 = vld [vmem:[%s9776_s14 + $0x348] sm:$0xf0] }
 0x630   : > { %9526 = vpow2.f32 %v2271_v23  ;;  %2714 = vmatpush.bf16.msra.mxu1 %v7808_v40  ;;  %v10730_v23 = vld [vmem:[%s10117_s12 + $0x8] sm:$0xff]  ;;  %v7868_v25 = vor.u32 %v9253_v59, %v7865_v46  ;;  %v7788_v40 = vor.u32 %v9233_v39, %v7785_v28  ;;  %v9247_v15 = vld [vmem:[%s9776_s14 + $0x3c4] sm:$0xf] }
 0x631   : > { %9528 = vpow2.f32 %v2273_v21  ;;  %v7841_v46 = vld [vmem:[%s9776_s14 + $0x3c8] sm:$0xf0] }
 0x632   : > { %2702 = vmatmul.bf16.vlgmr.msra.gmra.mxu0 %v9848_v35  ;;  %v7825_v28 = vld [vmem:[%s9776_s14 + $0x3a8] sm:$0xf0] }
 0x633   : > { %2715 = vmatmul.bf16.vlgmr.msra.gmra.mxu1 %v9850_v36 }
 0x636   : > { %v9527_v11 = vpop.eup %9526 }
 0x637   : > { %v9529_v24 = vpop.eup %9528  ;;  %v2275_v0 = vadd.f32 1.0, %v9527_v11  ;;  %v7849_v11 = vld [vmem:[%s9776_s14 + $0x3d8] sm:$0xf0] }
 0x638   : > { %v2276_v51 = vadd.f32 1.0, %v9529_v24  ;;  %v7852_v24 = vor.u32 %v9249_v2, %v7849_v11  ;;  %v9225_v11 = vld [vmem:[%s9776_s14 + $0x314] sm:$0xf] }
 0x639   : > { %9530 = vrcp.f32 %v2275_v0  ;;  %v10753_v0 = vld [vmem:[%s13984_s7 + $0x8] sm:$0xff] }
 0x63a   : > { %9532 = vrcp.f32 %v2276_v51  ;;  %v9231_v51 = vld [vmem:[%s9776_s14 + $0x344] sm:$0xf] }
 0x63b   : > { %v7780_v59 = vor.u32 %v9231_v51, %v7777_v49  ;;  %v10795_v51 = vld [vmem:[%s13984_s7 + $0x20] sm:$0xff] }
 0x63f   : > { %v9531_v31 = vpop.eup %9530 }
 0x640   : > { %v9533_v48 = vpop.eup %9532  ;;  %v2279_v44 = vmul.f32 %v10726_v30, %v9531_v31  ;;  %v7844_v31 = vor.u32 %v9247_v15, %v7841_v46  ;;  %v7817_v15 = vld [vmem:[%s9776_s14 + $0x398] sm:$0xf0]  ;;  %v9223_v46 = vld [vmem:[%s9776_s14 + $0x304] sm:$0xf] }
 0x641   : > { %v2280_v21 = vmul.f32 %v10730_v23, %v9533_v48  ;;  %v10766_v48 = vld [vmem:[%s13984_s7 + $0x10] sm:$0xff] }
 0x642   : > { %2296 = vmatpush.msrb.mxu2 %v2279_v44  ;;  %v9229_v44 = vld [vmem:[%s9776_s14 + $0x334] sm:$0xf] }
 0x643   : > { %2340 = vmatpush.msrb.mxu3 %v2280_v21  ;;  %7685 = vmatmul.msk.f32.vlgmr.msrb.gmra.mxu2 %vm686_vm0, %v10740_v52  ;;  %v9245_v21 = vld [vmem:[%s9776_s14 + $0x3b4] sm:$0xf] }
 0x644   : > { %7694 = vmatmul.msk.f32.vlgmr.msrb.gmra.mxu3 %vm686_vm0, %v10740_v52  ;;  %2720 = vmatpush.bf16.msra.mxu2 %v7804_v55  ;;  %v7769_v55 = vld [vmem:[%s9776_s14 + $0x338] sm:$0xf0]  ;;  %v7836_v62 = vor.u32 %v9245_v21, %v7833_v54  ;;  %v7809_v21 = vld [vmem:[%s9776_s14 + $0x388] sm:$0xf0] }
 0x645   : > { %2733 = vmatpush.bf16.msra.mxu3 %v7868_v25  ;;  %v7772_v25 = vor.u32 %v9229_v44, %v7769_v55  ;;  %v9239_v44 = vld [vmem:[%s9776_s14 + $0x384] sm:$0xf]  ;;  %v10809_v54 = vld [vmem:[%s13984_s7 + $0x28] sm:$0xff] }
 0x648   : > { %2721 = vmatpush.bf16.msra.mxu2 %v7796_v3  ;;  %v7761_v3 = vld [vmem:[%s9776_s14 + $0x328] sm:$0xf0] }
 0x649   : > { %2734 = vmatpush.bf16.msra.mxu3 %v7860_v10  ;;  %v9243_v10 = vld [vmem:[%s9776_s14 + $0x3a4] sm:$0xf]  ;;  %v7764_v39 = vor.u32 %v9227_v27, %v7761_v3  ;;  %v10827_v27 = vld [vmem:[%s13984_s7 + $0x38] sm:$0xff] }
 0x64a   : > { %v7828_v2 = vor.u32 %v9243_v10, %v7825_v28  ;;  %v10836_v3 = vld [vmem:[%s13984_s7 + $0x40] sm:$0xff] }
 0x64b   : > { %7686 = vmatmul.msk.f32.gmra.mxu2 %vm686_vm0, %v10753_v0 }
 0x64c   : > { %7695 = vmatmul.msk.f32.gmra.mxu3 %vm686_vm0, %v10753_v0  ;;  %2722 = vmatpush.bf16.msra.mxu2 %v7788_v40  ;;  %v7753_v40 = vld [vmem:[%s9776_s14 + $0x318] sm:$0xf0] }
 0x64d   : > { %2735 = vmatpush.bf16.msra.mxu3 %v7852_v24  ;;  %v9241_v24 = vld [vmem:[%s9776_s14 + $0x394] sm:$0xf]  ;;  %v7756_v49 = vor.u32 %v9225_v11, %v7753_v40 }
 0x650   : > { %2723 = vmatpush.bf16.msra.mxu2 %v7780_v59  ;;  %v7820_v59 = vor.u32 %v9241_v24, %v7817_v15 }
 0x651   : > { %2736 = vmatpush.bf16.msra.mxu3 %v7844_v31  ;;  %v7745_v31 = vld [vmem:[%s9776_s14 + $0x308] sm:$0xf0] }
 0x652   : > { %v7748_v55 = vor.u32 %v9223_v46, %v7745_v31 }
 0x653   : > { %7687 = vmatmul.msk.f32.gmra.mxu2 %vm686_vm0, %v10766_v48 }
 0x654   : > { %7696 = vmatmul.msk.f32.gmra.mxu3 %vm686_vm0, %v10766_v48  ;;  %2724 = vmatpush.bf16.msra.mxu2 %v7772_v25  ;;  %v7812_v25 = vor.u32 %v9239_v44, %v7809_v21 }
 0x655   : > { %2737 = vmatpush.bf16.msra.mxu3 %v7836_v62  ;;  %v10818_v62 = vld [vmem:[%s13984_s7 + $0x30] sm:$0xff] }
 0x658   : > { %2725 = vmatpush.bf16.msra.mxu2 %v7764_v39 }
 0x659   : > { %2738 = vmatpush.bf16.msra.mxu3 %v7828_v2 }
 0x65b   : > { %7688 = vmatmul.msk.f32.gmra.mxu2 %vm686_vm0, %v10779_v14 }
 0x65c   : > { %7697 = vmatmul.msk.f32.gmra.mxu3 %vm686_vm0, %v10779_v14  ;;  %2726 = vmatpush.bf16.msra.mxu2 %v7756_v49 }
 0x65d   : > { %2739 = vmatpush.bf16.msra.mxu3 %v7820_v59 }
 0x660   : > { %2727 = vmatpush.bf16.msra.mxu2 %v7748_v55 }
 0x661   : > { %2740 = vmatpush.bf16.msra.mxu3 %v7812_v25 }
 0x663   : > { %7689 = vmatmul.msk.f32.gmra.mxu2 %vm686_vm0, %v10795_v51 }
 0x664   : > { %7698 = vmatmul.msk.f32.gmra.mxu3 %vm686_vm0, %v10795_v51 }
 0x66b   : > { %7690 = vmatmul.msk.f32.gmra.mxu2 %vm686_vm0, %v10809_v54 }
 0x66c   : > { %7699 = vmatmul.msk.f32.gmra.mxu3 %vm686_vm0, %v10809_v54 }
 0x673   : > { %7691 = vmatmul.msk.f32.gmra.mxu2 %vm686_vm0, %v10818_v62 }
 0x674   : > { %7700 = vmatmul.msk.f32.gmra.mxu3 %vm686_vm0, %v10818_v62 }
 0x67b   : > { %7692 = vmatmul.msk.f32.gmra.mxu2 %vm686_vm0, %v10827_v27 }
 0x67c   : > { %7701 = vmatmul.msk.f32.gmra.mxu3 %vm686_vm0, %v10827_v27 }
 0x683   : > { %7693 = vmatmul.msk.f32.gmra.mxu2 %vm686_vm0, %v10836_v3 }
 0x684   : > { %7702 = vmatmul.msk.f32.gmra.mxu3 %vm686_vm0, %v10836_v3 }
 0x68b   : > { %2728 = vmatmul.bf16.vlgmr.msra.gmra.mxu2 %v9848_v35 }
 0x68c   : > { %2741 = vmatmul.bf16.vlgmr.msra.gmra.mxu3 %v9850_v36 }
 0x6af   : > { %v2703_v10 = vpop.f32.mrf.mxu0 }
 0x6b0   : > { %v2716_v39 = vpop.f32.mrf.mxu1 }
 0x6b1   : > { %v2717_v28 = vadd.f32 %v2716_v39, %v2703_v10 }
 0x6b3   : > { %2761 = vmatpush.msrb.mxu0 %v2717_v28 }
 0x6b4   : > { %7869 = vmatmul.msk.f32.vlgmr.msrb.gmra.mxu0 %vm686_vm0, %v10501_v34 }
 0x6b7   : > { %v2705_v2 = vpop.f32.mrf.mxu0 }
 0x6b8   : > { %v2718_v11 = vpop.f32.mrf.mxu1 }
 0x6bc   : > { %7870 = vmatmul.msk.f32.gmra.mxu0 %vm686_vm0, %v10508_v42 }
 0x6c4   : > { %7871 = vmatmul.msk.f32.gmra.mxu0 %vm686_vm0, %v10519_v50 }
 0x6c6   : > { %v10848_v40 = vpop.f32.mrf.mxu2 }
 0x6c7   : > { %14023 = vst [vmem:[#allocation33_spill] sm:$0xff] %v10848_v40  ;;  %v10850_v24 = vpop.f32.mrf.mxu3  ;;  %v8057_v40 = vld [vmem:[%s9776_s14 + $0x4e0] sm:$0xf] }
 0x6c8   : > { %14024 = vst [vmem:[#allocation34_spill] sm:$0xff] %v10850_v24  ;;  %v9270_v24 = vld [vmem:[%s9776_s14 + $0x474] sm:$0xf0] }
 0x6cc   : > { %7872 = vmatmul.msk.f32.gmra.mxu0 %vm686_vm0, %v10530_v58 }
 0x6ce   : > { %v10854_v49 = vpop.f32.mrf.mxu2 }
 0x6cf   : > { %14025 = vst [vmem:[#allocation35_spill] sm:$0xff] %v10854_v49  ;;  %v10856_v15 = vpop.f32.mrf.mxu3 }
 0x6d0   : > { %14026 = vst [vmem:[#allocation36_spill] sm:$0xff] %v10856_v15 }
 0x6d4   : > { %7873 = vmatmul.msk.f32.gmra.mxu0 %vm686_vm0, %v10541_v53 }
 0x6d6   : > { %v10860_v59 = vpop.f32.mrf.mxu2 }
 0x6d7   : > { %14027 = vst [vmem:[#allocation37_spill] sm:$0xff] %v10860_v59  ;;  %v10862_v46 = vpop.f32.mrf.mxu3 }
 0x6d8   : > { %14028 = vst [vmem:[#allocation38_spill] sm:$0xff] %v10862_v46 }
 0x6dc   : > { %7874 = vmatmul.msk.f32.gmra.mxu0 %vm686_vm0, %v10552_v26 }
 0x6de   : > { %v10866_v31 = vpop.f32.mrf.mxu2 }
 0x6df   : > { %14029 = vst [vmem:[#allocation39_spill] sm:$0xff] %v10866_v31  ;;  %v10868_v44 = vpop.f32.mrf.mxu3 }
 0x6e0   : > { %14030 = vst [vmem:[#allocation40_spill] sm:$0xff] %v10868_v44 }
 0x6e4   : > { %7875 = vmatmul.msk.f32.gmra.mxu0 %vm686_vm0, %v10563_v41 }
 0x6e6   : > { %v10872_v55 = vpop.f32.mrf.mxu2 }
 0x6e7   : > { %14031 = vst [vmem:[#allocation41_spill] sm:$0xff] %v10872_v55  ;;  %v10874_v21 = vpop.f32.mrf.mxu3 }
 0x6e8   : > { %14032 = vst [vmem:[#allocation42_spill] sm:$0xff] %v10874_v21 }
 0x6ec   : > { %7876 = vmatmul.msk.f32.gmra.mxu0 %vm686_vm0, %v10574_v16 }
 0x6ee   : > { %v10878_v25 = vpop.f32.mrf.mxu2 }
 0x6ef   : > { %14033 = vst [vmem:[#allocation43_spill] sm:$0xff] %v10878_v25  ;;  %v10880_v10 = vpop.f32.mrf.mxu3 }
 0x6f0   : > { %14034 = vst [vmem:[#allocation44_spill] sm:$0xff] %v10880_v10 }
 0x6f4   : > { %7877 = vmatmul.msk.f32.gmra.mxu0 %vm686_vm0, %v10585_v19 }
 0x6f6   : > { %v10884_v39 = vpop.f32.mrf.mxu2 }
 0x6f7   : > { %14035 = vst [vmem:[#allocation45_spill] sm:$0xff] %v10884_v39  ;;  %v10886_v28 = vpop.f32.mrf.mxu3 }
 0x6f8   : > { %14036 = vst [vmem:[#allocation46_spill] sm:$0xff] %v10886_v28 }
 0x6fe   : > { %v10890_v2 = vpop.f32.mrf.mxu2 }
 0x6ff   : > { %14037 = vst [vmem:[#allocation47_spill] sm:$0xff] %v10890_v2  ;;  %v10892_v11 = vpop.f32.mrf.mxu3 }
 0x700   : > { %14038 = vst [vmem:[#allocation48_spill] sm:$0xff] %v10892_v11 }
 0x706   : > { %v10894_v21 = vpop.f32.mrf.mxu2 }
 0x707   : > { %14039 = vst [vmem:[#allocation49_spill] sm:$0xff] %v10894_v21  ;;  %v10896_v55 = vpop.f32.mrf.mxu3 }
 0x708   : > { %14040 = vst [vmem:[#allocation50_spill] sm:$0xff] %v10896_v55 }
 0x70e   : > { %v2729_v46 = vpop.f32.mrf.mxu2 }
 0x70f   : > { %v2742_v10 = vpop.f32.mrf.mxu3 }
 0x710   : > { %v2743_v25 = vadd.f32 %v2742_v10, %v2729_v46 }
 0x712   : > { %2805 = vmatpush.msrb.mxu1 %v2743_v25 }
 0x713   : > { %7878 = vmatmul.msk.f32.vlgmr.msrb.gmra.mxu1 %vm686_vm0, %v10501_v34 }
 0x716   : > { %v2731_v39 = vpop.f32.mrf.mxu2 }
 0x717   : > { %v2744_v28 = vpop.f32.mrf.mxu3 }
 0x71b   : > { %7879 = vmatmul.msk.f32.gmra.mxu1 %vm686_vm0, %v10508_v42 }
 0x723   : > { %7880 = vmatmul.msk.f32.gmra.mxu1 %vm686_vm0, %v10519_v50 }
 0x72b   : > { %7881 = vmatmul.msk.f32.gmra.mxu1 %vm686_vm0, %v10530_v58 }
 0x731   : > { %v2763_v11 = vpop.f32.mrf.mxu0 }
 0x732   : > { %2834 = vrot.lane.b32.xlu1 %v2763_v11, %s9702_s20 }
 0x733   : > { %7882 = vmatmul.msk.f32.gmra.mxu1 %vm686_vm0, %v10541_v53 }
 0x739   : > { %v2766_v34 = vpop.f32.mrf.mxu0 }
 0x73a   : > { %2842 = vrot.lane.b32.xlu0 %v2766_v34, %s9703_s21 }
 0x73b   : > { %7883 = vmatmul.msk.f32.gmra.mxu1 %vm686_vm0, %v10552_v26 }
 0x741   : > { %v2769_v42 = vpop.f32.mrf.mxu0 }
 0x742   : > { %2852 = vrot.lane.b32.xlu2 %v2769_v42, %s9704_s22 }
 0x743   : > { %7884 = vmatmul.msk.f32.gmra.mxu1 %vm686_vm0, %v10563_v41 }
 0x749   : > { %v2772_v50 = vpop.f32.mrf.mxu0 }
 0x74a   : > { %2862 = vrot.lane.b32.xlu1 %v2772_v50, %s9705_s23 }
 0x74b   : > { %7885 = vmatmul.msk.f32.gmra.mxu1 %vm686_vm0, %v10574_v16 }
 0x751   : > { %v10920_v58 = vpop.f32.mrf.mxu0 }
 0x753   : > { %7886 = vmatmul.msk.f32.gmra.mxu1 %vm686_vm0, %v10585_v19 }
 0x759   : > { %v2778_v53 = vpop.f32.mrf.mxu0 }
 0x75a   : > { %2874 = vrot.lane.b32.xlu0 %v2778_v53, %s9706_s24 }
 0x761   : > { %v2781_v26 = vpop.f32.mrf.mxu0 }
 0x762   : > { %2884 = vrot.lane.b32.xlu2 %v2781_v26, %s9708_s25 }
 0x769   : > { %v2784_v41 = vpop.f32.mrf.mxu0 }
 0x76a   : > { %2894 = vrot.lane.b32.xlu1 %v2784_v41, %s9709_s26 }
 0x771   : > { %v2787_v11 = vpop.f32.mrf.mxu0 }
 0x790   : > { %v2807_v46 = vpop.f32.mrf.mxu1 }
 0x791   : > { %2836 = vrot.lane.b32.xlu2 %v2807_v46, %s9702_s20 }
 0x798   : > { %v2810_v16 = vpop.f32.mrf.mxu1 }
 0x799   : > { %2844 = vrot.lane.b32.xlu1 %v2810_v16, %s9703_s21 }
 0x79c   : > { %v2853_v53 = vpop.permute.xlu2 %2852 }
 0x7a0   : > { %v2813_v25 = vpop.f32.mrf.mxu1 }
 0x7a1   : > { %2854 = vrot.lane.b32.xlu0 %v2813_v25, %s9704_s22 }
 0x7a4   : > { %v2835_v50 = vpop.permute.xlu1 %2834 }
 0x7a8   : > { %v2816_v19 = vpop.f32.mrf.mxu1 }
 0x7a9   : > { %2864 = vrot.lane.b32.xlu2 %v2816_v19, %s9705_s23 }
 0x7ac   : > { %v2843_v41 = vpop.permute.xlu0 %2842 }
 0x7b0   : > { %v10929_v10 = vpop.f32.mrf.mxu1 }
 0x7b8   : > { %v2822_v39 = vpop.f32.mrf.mxu1 }
 0x7b9   : > { %2876 = vrot.lane.b32.xlu1 %v2822_v39, %s9706_s24 }
 0x7bc   : > { %v2863_v26 = vpop.permute.xlu1 %2862  ;;  %v2885_v46 = vpop.permute.xlu2 %2884 }
 0x7c0   : > { %v2825_v28 = vpop.f32.mrf.mxu1 }
 0x7c1   : > { %2886 = vrot.lane.b32.xlu0 %v2825_v28, %s9708_s25 }
 0x7c8   : > { %v2828_v34 = vpop.f32.mrf.mxu1 }
 0x7c9   : > { %2896 = vrot.lane.b32.xlu2 %v2828_v34, %s9709_s26  ;;  %2904 = vrot.lane.b32.xlu0 %v2787_v11, %s9710_s27 }
 0x7cc   : > { %v2875_v25 = vpop.permute.xlu0 %2874 }
 0x7d0   : > { %v2831_v42 = vpop.f32.mrf.mxu1 }
 0x7d1   : > { %2906 = vrot.lane.b32.xlu1 %v2831_v42, %s9710_s27 }
 0x7dc   : > { %v10936_v16 = vpop.permute.xlu1 %2894 }
 0x7eb   : > { %v2837_v19 = vpop.permute.xlu2 %2836 }
 0x7ec   : > { %v2839_v34 = vsel %vm806_vm2, %v2837_v19, %v2835_v50  ;;  %v2838_v2 = vsel %vm806_vm2, %v2835_v50, %v2837_v19 }
 0x7ed   : > { %v2840_v59 = vmul.f32 %v2839_v34, %v9988_v43  ;;  %v2841_v15 = vmul.f32 %v2838_v2, %v9992_v45 }
 0x80b   : > { %v2845_v39 = vpop.permute.xlu1 %2844 }
 0x80c   : > { %v2847_v55 = vsel %vm820_vm1, %v2845_v39, %v2843_v41  ;;  %v2846_v11 = vsel %vm820_vm1, %v2843_v41, %v2845_v39  ;;  %v2865_v41 = vpop.permute.xlu2 %2864 }
 0x80d   : > { %v2848_v21 = vmul.f32 %v2847_v55, %v9979_v33  ;;  %v2849_v44 = vmul.f32 %v2846_v11, %v9981_v37  ;;  %v2867_v55 = vsel %vm852_vm4, %v2865_v41, %v2863_v26  ;;  %v2866_v19 = vsel %vm852_vm4, %v2863_v26, %v2865_v41 }
 0x80f   : > { %v2850_v50 = vadd.f32 %v2848_v21, %v2840_v59  ;;  %v8001_v21 = vld [vmem:[%s9776_s14 + $0x470] sm:$0xf] }
 0x810   : > { %v8002_v41 = vor.u32 %v9270_v24, %v8001_v21 }
 0x812   : > { %3341 = vmatpush.bf16.msra.mxu0 %v8002_v41 }
 0x813   : > { %v2855_v28 = vpop.permute.xlu0 %2854 }
 0x814   : > { %v2857_v42 = vsel %vm836_vm3, %v2855_v28, %v2853_v53  ;;  %v2856_v31 = vsel %vm836_vm3, %v2853_v53, %v2855_v28  ;;  %v2851_v53 = vadd.f32 %v2849_v44, %v2841_v15  ;;  %v8065_v15 = vld [vmem:[%s9776_s14 + $0x4f0] sm:$0xf] }
 0x815   : > { %v2858_v39 = vmul.f32 %v2857_v42, %v10005_v60  ;;  %v2859_v49 = vmul.f32 %v2856_v31, %v10007_v61  ;;  %v2868_v42 = vmul.f32 %v2867_v55, %v10010_v63  ;;  %v2869_v31 = vmul.f32 %v2866_v19, %v10015_v4  ;;  %v9268_v19 = vld [vmem:[%s9776_s14 + $0x464] sm:$0xf0] }
 0x817   : > { %v2860_v28 = vadd.f32 %v2858_v39, %v2850_v50  ;;  %v2861_v34 = vadd.f32 %v2859_v49, %v2851_v53  ;;  %v9286_v49 = vld [vmem:[%s9776_s14 + $0x4f4] sm:$0xf0]  ;;  %v7993_v53 = vld [vmem:[%s9776_s14 + $0x460] sm:$0xf] }
 0x818   : > { %v8066_v55 = vor.u32 %v9286_v49, %v8065_v15 }
 0x819   : > { %v2870_v44 = vadd.f32 %v2868_v42, %v2860_v28  ;;  %v2871_v39 = vadd.f32 %v2869_v31, %v2861_v34  ;;  %v7994_v28 = vor.u32 %v9268_v19, %v7993_v53  ;;  %v7977_v19 = vld [vmem:[%s9776_s14 + $0x440] sm:$0xf] }
 0x81a   : > { %3354 = vmatpush.bf16.msra.mxu1 %v8066_v55 }
 0x81b   : > { %v2872_v42 = vadd.f32 %v2870_v44, %v10920_v58  ;;  %3342 = vmatpush.bf16.msra.mxu0 %v7994_v28  ;;  %v8049_v58 = vld [vmem:[%s9776_s14 + $0x4d0] sm:$0xf]  ;;  %v8041_v28 = vld [vmem:[%s9776_s14 + $0x4c0] sm:$0xf] }
 0x823   : > { %v2897_v34 = vpop.permute.xlu2 %2896 }
 0x824   : > { %v2898_v21 = vsel %vm902_vm7, %v10936_v16, %v2897_v34 }
 0x82b   : > { %v2877_v11 = vpop.permute.xlu1 %2876 }
 0x82c   : > { %v2878_v59 = vsel %vm870_vm5, %v2875_v25, %v2877_v11  ;;  %v2879_v26 = vsel %vm870_vm5, %v2877_v11, %v2875_v25  ;;  %v9284_v25 = vld [vmem:[%s9776_s14 + $0x4e4] sm:$0xf0] }
 0x82d   : > { %v2880_v1 = vmul.f32 %v2878_v59, %v10031_v20  ;;  %v2881_v24 = vmul.f32 %v2879_v26, %v10033_v22  ;;  %v8058_v11 = vor.u32 %v9284_v25, %v8057_v40  ;;  %v2873_v59 = vadd.f32 %v2871_v39, %v10929_v10  ;;  %v7985_v40 = vld [vmem:[%s9776_s14 + $0x450] sm:$0xf]  ;;  %v9266_v26 = vld [vmem:[%s9776_s14 + $0x454] sm:$0xf0] }
 0x82e   : > { %v2899_v10 = vsel %vm902_vm7, %v2897_v34, %v10936_v16  ;;  %v9264_v16 = vld [vmem:[%s9776_s14 + $0x444] sm:$0xf0] }
 0x82f   : > { %v2883_v15 = vadd.f32 %v2881_v24, %v2873_v59  ;;  %3355 = vmatpush.bf16.msra.mxu1 %v8058_v11  ;;  %v2901_v55 = vmul.f32 %v2899_v10, %v10061_v56  ;;  %v7978_v34 = vor.u32 %v9264_v16, %v7977_v19  ;;  %v9262_v59 = vld [vmem:[%s9776_s14 + $0x434] sm:$0xf0]  ;;  %v8025_v19 = vld [vmem:[%s9776_s14 + $0x4a0] sm:$0xf]  ;;  %v9276_v16 = vld [vmem:[%s9776_s14 + $0x4a4] sm:$0xf0] }
 0x833   : > { %v2887_v2 = vpop.permute.xlu0 %2886 }
 0x834   : > { %v2888_v50 = vsel %vm886_vm6, %v2885_v46, %v2887_v2  ;;  %v2889_v29 = vsel %vm886_vm6, %v2887_v2, %v2885_v46  ;;  %v2882_v2 = vadd.f32 %v2880_v1, %v2872_v42  ;;  %v9282_v1 = vld [vmem:[%s9776_s14 + $0x4d4] sm:$0xf0]  ;;  %v9280_v42 = vld [vmem:[%s9776_s14 + $0x4c4] sm:$0xf0] }
 0x835   : > { %v2890_v31 = vmul.f32 %v2888_v50, %v10047_v32  ;;  %v2891_v46 = vmul.f32 %v2889_v29, %v10051_v38  ;;  %v7986_v29 = vor.u32 %v9266_v26, %v7985_v40  ;;  %v8050_v39 = vor.u32 %v9282_v1, %v8049_v58  ;;  %v8033_v40 = vld [vmem:[%s9776_s14 + $0x4b0] sm:$0xf]  ;;  %v9278_v26 = vld [vmem:[%s9776_s14 + $0x4b4] sm:$0xf0] }
 0x836   : > { %v2900_v50 = vmul.f32 %v2898_v21, %v10058_v47 }
 0x837   : > { %v2892_v44 = vadd.f32 %v2890_v31, %v2882_v2  ;;  %v2893_v41 = vadd.f32 %v2891_v46, %v2883_v15  ;;  %3343 = vmatpush.bf16.msra.mxu0 %v7986_v29  ;;  %3356 = vmatpush.bf16.msra.mxu1 %v8050_v39  ;;  %v7969_v31 = vld [vmem:[%s9776_s14 + $0x430] sm:$0xf]  ;;  %v8042_v15 = vor.u32 %v9280_v42, %v8041_v28 }
 0x838   : > { %v7970_v58 = vor.u32 %v9262_v59, %v7969_v31  ;;  %v8034_v29 = vor.u32 %v9278_v26, %v8033_v40  ;;  %v7953_v28 = vld [vmem:[%s9776_s14 + $0x410] sm:$0xf]  ;;  %v9274_v59 = vld [vmem:[%s9776_s14 + $0x494] sm:$0xf0]  ;;  %v9272_v26 = vld [vmem:[%s9776_s14 + $0x484] sm:$0xf0] }
 0x839   : > { %v2902_v25 = vadd.f32 %v2900_v50, %v2892_v44  ;;  %v2903_v46 = vadd.f32 %v2901_v55, %v2893_v41  ;;  %v7961_v50 = vld [vmem:[%s9776_s14 + $0x420] sm:$0xf]  ;;  %v9260_v55 = vld [vmem:[%s9776_s14 + $0x424] sm:$0xf0]  ;;  %v8017_v31 = vld [vmem:[%s9776_s14 + $0x490] sm:$0xf] }
 0x83b   : > { %v2905_v49 = vpop.permute.xlu0 %2904  ;;  %3344 = vmatpush.bf16.msra.mxu0 %v7978_v34  ;;  %3357 = vmatpush.bf16.msra.mxu1 %v8042_v15  ;;  %v9258_v34 = vld [vmem:[%s9776_s14 + $0x414] sm:$0xf0]  ;;  %v8009_v15 = vld [vmem:[%s9776_s14 + $0x480] sm:$0xf] }
 0x83c   : > { %v7954_v42 = vor.u32 %v9258_v34, %v7953_v28  ;;  %v9283_v34 = vld [vmem:[%s9776_s14 + $0x4e4] sm:$0xf] }
 0x83f   : > { %3345 = vmatpush.bf16.msra.mxu0 %v7970_v58  ;;  %3358 = vmatpush.bf16.msra.mxu1 %v8034_v29 }
 0x843   : > { %v2907_v53 = vpop.permute.xlu1 %2906 }
 0x844   : > { %v2908_v24 = vsel %vm918_vm8, %v2905_v49, %v2907_v53  ;;  %v2909_v11 = vsel %vm918_vm8, %v2907_v53, %v2905_v49  ;;  %v7962_v53 = vor.u32 %v9260_v55, %v7961_v50  ;;  %v8067_v50 = vld [vmem:[%s9776_s14 + $0x4f8] sm:$0xf0] }
 0x845   : > { %v2910_v2 = vmul.f32 %v2908_v24, %v10079_v12  ;;  %v2911_v21 = vmul.f32 %v2909_v11, %v10081_v13  ;;  %v8026_v11 = vor.u32 %v9276_v16, %v8025_v19 }
 0x846   : > { %3346 = vmatpush.bf16.msra.mxu0 %v7962_v53 }
 0x847   : > { %v2912_v10 = vadd.f32 %v2910_v2, %v2902_v25  ;;  %v2913_v44 = vadd.f32 %v2911_v21, %v2903_v46  ;;  %3359 = vmatpush.bf16.msra.mxu1 %v8026_v11  ;;  %v8018_v46 = vor.u32 %v9274_v59, %v8017_v31  ;;  %v7945_v2 = vld [vmem:[%s9776_s14 + $0x400] sm:$0xf]  ;;  %v9256_v21 = vld [vmem:[%s9776_s14 + $0x404] sm:$0xf0]  ;;  %v7995_v11 = vld [vmem:[%s9776_s14 + $0x468] sm:$0xf0] }
 0x848   : > { %v7946_v40 = vor.u32 %v9256_v21, %v7945_v2  ;;  %v9265_v31 = vld [vmem:[%s9776_s14 + $0x454] sm:$0xf]  ;;  %v7987_v59 = vld [vmem:[%s9776_s14 + $0x458] sm:$0xf0] }
 0x849   : > { %v2914_v1 = vadd.f32 %v2912_v10, %v10097_v57  ;;  %v2915_v41 = vadd.f32 %v2913_v44, %v10097_v57  ;;  %v8010_v10 = vor.u32 %v9272_v26, %v8009_v15  ;;  %v8051_v2 = vld [vmem:[%s9776_s14 + $0x4d8] sm:$0xf0]  ;;  %v7990_v21 = vor.u32 %v9265_v31, %v7987_v59  ;;  %v9279_v26 = vld [vmem:[%s9776_s14 + $0x4c4] sm:$0xf]  ;;  %v8011_v59 = vld [vmem:[%s9776_s14 + $0x488] sm:$0xf0] }
 0x84a   : > { %3347 = vmatpush.bf16.msra.mxu0 %v7954_v42  ;;  %v8059_v42 = vld [vmem:[%s9776_s14 + $0x4e8] sm:$0xf0] }
 0x84b   : > { %v2916_v49 = vsub.f32 0.0, %v2914_v1  ;;  %v2917_v39 = vsub.f32 0.0, %v2915_v41  ;;  %3360 = vmatpush.bf16.msra.mxu1 %v8018_v46  ;;  %v9269_v41 = vld [vmem:[%s9776_s14 + $0x474] sm:$0xf] }
 0x84c   : > { %v9281_v46 = vld [vmem:[%s9776_s14 + $0x4d4] sm:$0xf] }
 0x84d   : > { %v2918_v25 = vmul.f32 1.442695, %v2916_v49  ;;  %v2920_v24 = vmul.f32 1.442695, %v2917_v39  ;;  %v8003_v49 = vld [vmem:[%s9776_s14 + $0x478] sm:$0xf0]  ;;  %v8054_v15 = vor.u32 %v9281_v46, %v8051_v2 }
 0x84e   : > { %3348 = vmatpush.bf16.msra.mxu0 %v7946_v40  ;;  %v9285_v39 = vld [vmem:[%s9776_s14 + $0x4f4] sm:$0xf]  ;;  %v8006_v16 = vor.u32 %v9269_v41, %v8003_v49  ;;  %v7979_v40 = vld [vmem:[%s9776_s14 + $0x448] sm:$0xf0]  ;;  %v8035_v49 = vld [vmem:[%s9776_s14 + $0x4b8] sm:$0xf0] }
 0x84f   : > { %9534 = vpow2.f32 %v2918_v25  ;;  %3361 = vmatpush.bf16.msra.mxu1 %v8010_v10  ;;  %v8070_v25 = vor.u32 %v9285_v39, %v8067_v50  ;;  %v8043_v10 = vld [vmem:[%s9776_s14 + $0x4c8] sm:$0xf0]  ;;  %v9259_v50 = vld [vmem:[%s9776_s14 + $0x424] sm:$0xf] }
 0x850   : > { %9536 = vpow2.f32 %v2920_v24  ;;  %v9267_v24 = vld [vmem:[%s9776_s14 + $0x464] sm:$0xf] }
 0x851   : > { %3349 = vmatmul.bf16.vlgmr.msra.gmra.mxu0 %v9848_v35 }
 0x852   : > { %3362 = vmatmul.bf16.vlgmr.msra.gmra.mxu1 %v9850_v36 }
 0x855   : > { %v9535_v58 = vpop.eup %9534 }
 0x856   : > { %v9537_v44 = vpop.eup %9536  ;;  %v2922_v29 = vadd.f32 1.0, %v9535_v58 }
 0x857   : > { %v2923_v1 = vadd.f32 1.0, %v9537_v44  ;;  %v8046_v44 = vor.u32 %v9279_v26, %v8043_v10  ;;  %v11130_v10 = vld [vmem:[%s13982_s5 + $0x18] sm:$0xff] }
 0x858   : > { %9538 = vrcp.f32 %v2922_v29  ;;  %v7971_v29 = vld [vmem:[%s9776_s14 + $0x438] sm:$0xf0] }
 0x859   : > { %9540 = vrcp.f32 %v2923_v1  ;;  %v9277_v1 = vld [vmem:[%s9776_s14 + $0x4b4] sm:$0xf] }
 0x85a   : > { %v8038_v39 = vor.u32 %v9277_v1, %v8035_v49  ;;  %v11152_v49 = vld [vmem:[%s13982_s5 + $0x28] sm:$0xff] }
 0x85e   : > { %v9539_v55 = vpop.eup %9538 }
 0x85f   : > { %v9541_v53 = vpop.eup %9540  ;;  %v2926_v19 = vmul.f32 %v10726_v30, %v9539_v55  ;;  %v7998_v30 = vor.u32 %v9267_v24, %v7995_v11  ;;  %v9275_v55 = vld [vmem:[%s9776_s14 + $0x4a4] sm:$0xf]  ;;  %v9273_v24 = vld [vmem:[%s9776_s14 + $0x494] sm:$0xf] }
 0x860   : > { %v2927_v28 = vmul.f32 %v10730_v23, %v9541_v53  ;;  %v8062_v23 = vor.u32 %v9283_v34, %v8059_v42  ;;  %v9255_v42 = vld [vmem:[%s9776_s14 + $0x404] sm:$0xf] }
 0x861   : > { %2943 = vmatpush.msrb.mxu2 %v2926_v19  ;;  %v8027_v19 = vld [vmem:[%s9776_s14 + $0x4a8] sm:$0xf0] }
 0x862   : > { %2987 = vmatpush.msrb.mxu3 %v2927_v28  ;;  %7887 = vmatmul.msk.f32.vlgmr.msrb.gmra.mxu2 %vm686_vm0, %v10740_v52  ;;  %v9257_v28 = vld [vmem:[%s9776_s14 + $0x414] sm:$0xf] }
 0x863   : > { %7896 = vmatmul.msk.f32.vlgmr.msrb.gmra.mxu3 %vm686_vm0, %v10740_v52  ;;  %3367 = vmatpush.bf16.msra.mxu2 %v8006_v16  ;;  %v9263_v52 = vld [vmem:[%s9776_s14 + $0x444] sm:$0xf]  ;;  %v8030_v16 = vor.u32 %v9275_v55, %v8027_v19  ;;  %v11174_v19 = vld [vmem:[%s13982_s5 + $0x38] sm:$0xff] }
 0x864   : > { %3380 = vmatpush.bf16.msra.mxu3 %v8070_v25  ;;  %v7982_v58 = vor.u32 %v9263_v52, %v7979_v40  ;;  %v7955_v25 = vld [vmem:[%s9776_s14 + $0x418] sm:$0xf0]  ;;  %v11119_v40 = vld [vmem:[%s13982_s5 + $0x10] sm:$0xff] }
 0x865   : > { %v7958_v11 = vor.u32 %v9257_v28, %v7955_v25  ;;  %v11185_v25 = vld [vmem:[%s13982_s5 + $0x40] sm:$0xff] }
 0x867   : > { %3368 = vmatpush.bf16.msra.mxu2 %v7998_v30  ;;  %v7947_v30 = vld [vmem:[%s9776_s14 + $0x408] sm:$0xf0] }
 0x868   : > { %3381 = vmatpush.bf16.msra.mxu3 %v8062_v23  ;;  %v9271_v23 = vld [vmem:[%s9776_s14 + $0x484] sm:$0xf]  ;;  %v7950_v31 = vor.u32 %v9255_v42, %v7947_v30 }
 0x869   : > { %v8014_v46 = vor.u32 %v9271_v23, %v8011_v59 }
 0x86a   : > { %7888 = vmatmul.msk.f32.gmra.mxu2 %vm686_vm0, %v10753_v0 }
 0x86b   : > { %7897 = vmatmul.msk.f32.gmra.mxu3 %vm686_vm0, %v10753_v0  ;;  %3369 = vmatpush.bf16.msra.mxu2 %v7990_v21  ;;  %v9261_v0 = vld [vmem:[%s9776_s14 + $0x434] sm:$0xf] }
 0x86c   : > { %3382 = vmatpush.bf16.msra.mxu3 %v8054_v15  ;;  %v7974_v41 = vor.u32 %v9261_v0, %v7971_v29  ;;  %v11141_v29 = vld [vmem:[%s13982_s5 + $0x20] sm:$0xff] }
 0x86f   : > { %3370 = vmatpush.bf16.msra.mxu2 %v7982_v58 }
 0x870   : > { %3383 = vmatpush.bf16.msra.mxu3 %v8046_v44 }
 0x872   : > { %7889 = vmatmul.msk.f32.gmra.mxu2 %vm686_vm0, %v10766_v48 }
 0x873   : > { %7898 = vmatmul.msk.f32.gmra.mxu3 %vm686_vm0, %v10766_v48  ;;  %3371 = vmatpush.bf16.msra.mxu2 %v7974_v41  ;;  %v7963_v48 = vld [vmem:[%s9776_s14 + $0x428] sm:$0xf0] }
 0x874   : > { %3384 = vmatpush.bf16.msra.mxu3 %v8038_v39  ;;  %v7966_v53 = vor.u32 %v9259_v50, %v7963_v48  ;;  %v11163_v48 = vld [vmem:[%s13982_s5 + $0x30] sm:$0xff] }
 0x877   : > { %3372 = vmatpush.bf16.msra.mxu2 %v7966_v53 }
 0x878   : > { %3385 = vmatpush.bf16.msra.mxu3 %v8030_v16 }
 0x87a   : > { %7890 = vmatmul.msk.f32.gmra.mxu2 %vm686_vm0, %v10779_v14 }
 0x87b   : > { %7899 = vmatmul.msk.f32.gmra.mxu3 %vm686_vm0, %v10779_v14  ;;  %v8019_v14 = vld [vmem:[%s9776_s14 + $0x498] sm:$0xf0]  ;;  %3373 = vmatpush.bf16.msra.mxu2 %v7958_v11 }
 0x87c   : > { %v8022_v34 = vor.u32 %v9273_v24, %v8019_v14 }
 0x87e   : > { %3386 = vmatpush.bf16.msra.mxu3 %v8022_v34 }
 0x87f   : > { %3374 = vmatpush.bf16.msra.mxu2 %v7950_v31 }
 0x882   : > { %7891 = vmatmul.msk.f32.gmra.mxu2 %vm686_vm0, %v10795_v51  ;;  %3387 = vmatpush.bf16.msra.mxu3 %v8014_v46 }
 0x883   : > { %7900 = vmatmul.msk.f32.gmra.mxu3 %vm686_vm0, %v10795_v51 }
 0x88a   : > { %7892 = vmatmul.msk.f32.gmra.mxu2 %vm686_vm0, %v10809_v54 }
 0x88b   : > { %7901 = vmatmul.msk.f32.gmra.mxu3 %vm686_vm0, %v10809_v54 }
 0x892   : > { %7893 = vmatmul.msk.f32.gmra.mxu2 %vm686_vm0, %v10818_v62 }
 0x893   : > { %7902 = vmatmul.msk.f32.gmra.mxu3 %vm686_vm0, %v10818_v62  ;;  %v11101_v62 = vld [vmem:[%s13982_s5] sm:$0xff] }
 0x89a   : > { %7894 = vmatmul.msk.f32.gmra.mxu2 %vm686_vm0, %v10827_v27 }
 0x89b   : > { %7903 = vmatmul.msk.f32.gmra.mxu3 %vm686_vm0, %v10827_v27 }
 0x8a2   : > { %7895 = vmatmul.msk.f32.gmra.mxu2 %vm686_vm0, %v10836_v3 }
 0x8a3   : > { %7904 = vmatmul.msk.f32.gmra.mxu3 %vm686_vm0, %v10836_v3  ;;  %v11108_v3 = vld [vmem:[%s13982_s5 + $0x8] sm:$0xff] }
 0x8aa   : > { %3375 = vmatmul.bf16.vlgmr.msra.gmra.mxu2 %v9848_v35 }
 0x8ab   : > { %3388 = vmatmul.bf16.vlgmr.msra.gmra.mxu3 %v9850_v36 }
 0x8ce   : > { %v3350_v51 = vpop.f32.mrf.mxu0 }
 0x8cf   : > { %v3363_v54 = vpop.f32.mrf.mxu1 }
 0x8d0   : > { %v3364_v2 = vadd.f32 %v3363_v54, %v3350_v51 }
 0x8d2   : > { %3408 = vmatpush.msrb.mxu0 %v3364_v2 }
 0x8d3   : > { %8071 = vmatmul.msk.f32.vlgmr.msrb.gmra.mxu0 %vm686_vm0, %v11101_v62 }
 0x8d6   : > { %v3352_v27 = vpop.f32.mrf.mxu0 }
 0x8d7   : > { %v3365_v21 = vpop.f32.mrf.mxu1 }
 0x8db   : > { %8072 = vmatmul.msk.f32.gmra.mxu0 %vm686_vm0, %v11108_v3 }
 0x8e3   : > { %8073 = vmatmul.msk.f32.gmra.mxu0 %vm686_vm0, %v11119_v40 }
 0x8e5   : > { %v11112_v15 = vpop.f32.mrf.mxu2 }
 0x8e6   : > { %14041 = vst [vmem:[#allocation51_spill] sm:$0xff] %v11112_v15  ;;  %v11114_v52 = vpop.f32.mrf.mxu3  ;;  %v9332_v15 = vld [vmem:[%s9776_s14 + $0x664] sm:$0xf0] }
 0x8e7   : > { %14042 = vst [vmem:[#allocation52_spill] sm:$0xff] %v11114_v52 }
 0x8eb   : > { %8074 = vmatmul.msk.f32.gmra.mxu0 %vm686_vm0, %v11130_v10 }
 0x8ed   : > { %v11123_v26 = vpop.f32.mrf.mxu2 }
 0x8ee   : > { %14043 = vst [vmem:[#allocation53_spill] sm:$0xff] %v11123_v26  ;;  %v11125_v58 = vpop.f32.mrf.mxu3 }
 0x8ef   : > { %14044 = vst [vmem:[#allocation54_spill] sm:$0xff] %v11125_v58  ;;  %v9302_v58 = vld [vmem:[%s9776_s14 + $0x574] sm:$0xf0] }
 0x8f3   : > { %8075 = vmatmul.msk.f32.gmra.mxu0 %vm686_vm0, %v11141_v29 }
 0x8f5   : > { %v11134_v44 = vpop.f32.mrf.mxu2 }
 0x8f6   : > { %14045 = vst [vmem:[#allocation55_spill] sm:$0xff] %v11134_v44  ;;  %v11136_v0 = vpop.f32.mrf.mxu3 }
 0x8f7   : > { %14046 = vst [vmem:[#allocation56_spill] sm:$0xff] %v11136_v0 }
 0x8fb   : > { %8076 = vmatmul.msk.f32.gmra.mxu0 %vm686_vm0, %v11152_v49 }
 0x8fd   : > { %v11145_v1 = vpop.f32.mrf.mxu2 }
 0x8fe   : > { %14047 = vst [vmem:[#allocation57_spill] sm:$0xff] %v11145_v1  ;;  %v11147_v41 = vpop.f32.mrf.mxu3 }
 0x8ff   : > { %14048 = vst [vmem:[#allocation58_spill] sm:$0xff] %v11147_v41 }
 0x903   : > { %8077 = vmatmul.msk.f32.gmra.mxu0 %vm686_vm0, %v11163_v48 }
 0x905   : > { %v11156_v39 = vpop.f32.mrf.mxu2 }
 0x906   : > { %14049 = vst [vmem:[#allocation59_spill] sm:$0xff] %v11156_v39  ;;  %v11158_v50 = vpop.f32.mrf.mxu3 }
 0x907   : > { %14050 = vst [vmem:[#allocation60_spill] sm:$0xff] %v11158_v50 }
 0x90b   : > { %8078 = vmatmul.msk.f32.gmra.mxu0 %vm686_vm0, %v11174_v19 }
 0x90d   : > { %v11167_v55 = vpop.f32.mrf.mxu2 }
 0x90e   : > { %14051 = vst [vmem:[#allocation61_spill] sm:$0xff] %v11167_v55  ;;  %v11169_v53 = vpop.f32.mrf.mxu3 }
 0x90f   : > { %14052 = vst [vmem:[#allocation62_spill] sm:$0xff] %v11169_v53 }
 0x913   : > { %8079 = vmatmul.msk.f32.gmra.mxu0 %vm686_vm0, %v11185_v25 }
 0x915   : > { %v11178_v16 = vpop.f32.mrf.mxu2 }
 0x916   : > { %14053 = vst [vmem:[#allocation63_spill] sm:$0xff] %v11178_v16  ;;  %v11180_v28 = vpop.f32.mrf.mxu3 }
 0x917   : > { %14054 = vst [vmem:[#allocation64_spill] sm:$0xff] %v11180_v28 }
 0x91d   : > { %v11189_v24 = vpop.f32.mrf.mxu2 }
 0x91e   : > { %14055 = vst [vmem:[#allocation65_spill] sm:$0xff] %v11189_v24  ;;  %v11191_v11 = vpop.f32.mrf.mxu3 }
 0x91f   : > { %14056 = vst [vmem:[#allocation66_spill] sm:$0xff] %v11191_v11 }
 0x925   : > { %v11193_v14 = vpop.f32.mrf.mxu2 }
 0x926   : > { %14057 = vst [vmem:[#allocation67_spill] sm:$0xff] %v11193_v14  ;;  %v11195_v34 = vpop.f32.mrf.mxu3 }
 0x927   : > { %14058 = vst [vmem:[#allocation68_spill] sm:$0xff] %v11195_v34 }
 0x92d   : > { %v3376_v42 = vpop.f32.mrf.mxu2 }
 0x92e   : > { %v3389_v30 = vpop.f32.mrf.mxu3 }
 0x92f   : > { %v3390_v23 = vadd.f32 %v3389_v30, %v3376_v42 }
 0x931   : > { %3452 = vmatpush.msrb.mxu1 %v3390_v23 }
 0x932   : > { %8080 = vmatmul.msk.f32.vlgmr.msrb.gmra.mxu1 %vm686_vm0, %v11101_v62 }
 0x935   : > { %v3378_v31 = vpop.f32.mrf.mxu2 }
 0x936   : > { %v3391_v59 = vpop.f32.mrf.mxu3 }
 0x93a   : > { %8081 = vmatmul.msk.f32.gmra.mxu1 %vm686_vm0, %v11108_v3 }
 0x942   : > { %8082 = vmatmul.msk.f32.gmra.mxu1 %vm686_vm0, %v11119_v40 }
 0x94a   : > { %8083 = vmatmul.msk.f32.gmra.mxu1 %vm686_vm0, %v11130_v10 }
 0x950   : > { %v3410_v46 = vpop.f32.mrf.mxu0 }
 0x951   : > { %3481 = vrot.lane.b32.xlu2 %v3410_v46, %s9702_s20 }
 0x952   : > { %8084 = vmatmul.msk.f32.gmra.mxu1 %vm686_vm0, %v11141_v29 }
 0x958   : > { %v3413_v51 = vpop.f32.mrf.mxu0 }
 0x959   : > { %3489 = vrot.lane.b32.xlu1 %v3413_v51, %s9703_s21 }
 0x95a   : > { %8085 = vmatmul.msk.f32.gmra.mxu1 %vm686_vm0, %v11152_v49 }
 0x960   : > { %v3416_v54 = vpop.f32.mrf.mxu0 }
 0x961   : > { %3499 = vrot.lane.b32.xlu0 %v3416_v54, %s9704_s22 }
 0x962   : > { %8086 = vmatmul.msk.f32.gmra.mxu1 %vm686_vm0, %v11163_v48 }
 0x968   : > { %v3419_v2 = vpop.f32.mrf.mxu0 }
 0x969   : > { %3509 = vrot.lane.b32.xlu2 %v3419_v2, %s9705_s23 }
 0x96a   : > { %8087 = vmatmul.msk.f32.gmra.mxu1 %vm686_vm0, %v11174_v19 }
 0x970   : > { %v11219_v27 = vpop.f32.mrf.mxu0 }
 0x972   : > { %8088 = vmatmul.msk.f32.gmra.mxu1 %vm686_vm0, %v11185_v25 }
 0x978   : > { %v3425_v21 = vpop.f32.mrf.mxu0 }
 0x979   : > { %3521 = vrot.lane.b32.xlu1 %v3425_v21, %s9706_s24 }
 0x980   : > { %v3428_v42 = vpop.f32.mrf.mxu0 }
 0x981   : > { %3531 = vrot.lane.b32.xlu0 %v3428_v42, %s9708_s25 }
 0x988   : > { %v3431_v30 = vpop.f32.mrf.mxu0 }
 0x989   : > { %3541 = vrot.lane.b32.xlu2 %v3431_v30, %s9709_s26 }
 0x990   : > { %v3434_v21 = vpop.f32.mrf.mxu0 }
 0x9af   : > { %v3454_v23 = vpop.f32.mrf.mxu1 }
 0x9b0   : > { %3483 = vrot.lane.b32.xlu0 %v3454_v23, %s9702_s20  ;;  %v3482_v23 = vpop.permute.xlu2 %3481 }
 0x9b7   : > { %v3457_v31 = vpop.f32.mrf.mxu1 }
 0x9b8   : > { %3491 = vrot.lane.b32.xlu2 %v3457_v31, %s9703_s21 }
 0x9bf   : > { %v3460_v59 = vpop.f32.mrf.mxu1 }
 0x9c0   : > { %3501 = vrot.lane.b32.xlu1 %v3460_v59, %s9704_s22 }
 0x9c3   : > { %v3510_v59 = vpop.permute.xlu2 %3509 }
 0x9c7   : > { %v3463_v46 = vpop.f32.mrf.mxu1 }
 0x9c8   : > { %3511 = vrot.lane.b32.xlu0 %v3463_v46, %s9705_s23 }
 0x9cb   : > { %v3490_v46 = vpop.permute.xlu1 %3489 }
 0x9cf   : > { %v11228_v51 = vpop.f32.mrf.mxu1 }
 0x9d3   : > { %v3500_v31 = vpop.permute.xlu0 %3499 }
 0x9d7   : > { %v3469_v54 = vpop.f32.mrf.mxu1 }
 0x9d8   : > { %3523 = vrot.lane.b32.xlu2 %v3469_v54, %s9706_s24 }
 0x9df   : > { %v3472_v2 = vpop.f32.mrf.mxu1 }
 0x9e0   : > { %3533 = vrot.lane.b32.xlu1 %v3472_v2, %s9708_s25 }
 0x9e3   : > { %v11235_v39 = vpop.permute.xlu2 %3541 }
 0x9e7   : > { %v3475_v42 = vpop.f32.mrf.mxu1 }
 0x9e8   : > { %3543 = vrot.lane.b32.xlu0 %v3475_v42, %s9709_s26  ;;  %3551 = vrot.lane.b32.xlu1 %v3434_v21, %s9710_s27 }
 0x9eb   : > { %v3522_v54 = vpop.permute.xlu1 %3521 }
 0x9ef   : > { %v3478_v30 = vpop.f32.mrf.mxu1 }
 0x9f0   : > { %3553 = vrot.lane.b32.xlu2 %v3478_v30, %s9710_s27 }
 0x9f3   : > { %v3532_v50 = vpop.permute.xlu0 %3531 }
 0xa12   : > { %v3492_v28 = vpop.permute.xlu2 %3491 }
 0xa13   : > { %v3493_v30 = vsel %vm820_vm1, %v3490_v46, %v3492_v28  ;;  %v3494_v0 = vsel %vm820_vm1, %v3492_v28, %v3490_v46 }
 0xa14   : > { %v3495_v28 = vmul.f32 %v3494_v0, %v9979_v33  ;;  %v3496_v46 = vmul.f32 %v3493_v30, %v9981_v37  ;;  %v8203_v30 = vld [vmem:[%s9776_s14 + $0x570] sm:$0xf] }
 0xa15   : > { %v8204_v26 = vor.u32 %v9302_v58, %v8203_v30 }
 0xa17   : > { %3988 = vmatpush.bf16.msra.mxu0 %v8204_v26 }
 0xa22   : > { %v3484_v14 = vpop.permute.xlu0 %3483 }
 0xa23   : > { %v3485_v53 = vsel %vm806_vm2, %v3482_v23, %v3484_v14  ;;  %v3486_v21 = vsel %vm806_vm2, %v3484_v14, %v3482_v23 }
 0xa24   : > { %v3487_v16 = vmul.f32 %v3486_v21, %v9988_v43  ;;  %v3488_v24 = vmul.f32 %v3485_v53, %v9992_v45 }
 0xa26   : > { %v3497_v21 = vadd.f32 %v3495_v28, %v3487_v16  ;;  %v3498_v53 = vadd.f32 %v3496_v46, %v3488_v24  ;;  %v8195_v28 = vld [vmem:[%s9776_s14 + $0x560] sm:$0xf]  ;;  %v9300_v46 = vld [vmem:[%s9776_s14 + $0x564] sm:$0xf0] }
 0xa27   : > { %v8196_v58 = vor.u32 %v9300_v46, %v8195_v28 }
 0xa29   : > { %3989 = vmatpush.bf16.msra.mxu0 %v8196_v58 }
 0xa32   : > { %v3502_v2 = vpop.permute.xlu1 %3501  ;;  %v3524_v41 = vpop.permute.xlu2 %3523 }
 0xa33   : > { %v3503_v11 = vsel %vm836_vm3, %v3500_v31, %v3502_v2  ;;  %v3504_v34 = vsel %vm836_vm3, %v3502_v2, %v3500_v31  ;;  %v3525_v16 = vsel %vm870_vm5, %v3522_v54, %v3524_v41 }
 0xa34   : > { %v3505_v31 = vmul.f32 %v3504_v34, %v10005_v60  ;;  %v3506_v2 = vmul.f32 %v3503_v11, %v10007_v61  ;;  %v8267_v34 = vld [vmem:[%s9776_s14 + $0x5f0] sm:$0xf]  ;;  %v9318_v11 = vld [vmem:[%s9776_s14 + $0x5f4] sm:$0xf0] }
 0xa3a   : > { %v3512_v42 = vpop.permute.xlu0 %3511 }
 0xa3b   : > { %v3513_v14 = vsel %vm852_vm4, %v3510_v59, %v3512_v42  ;;  %v3514_v23 = vsel %vm852_vm4, %v3512_v42, %v3510_v59  ;;  %v3507_v59 = vadd.f32 %v3505_v31, %v3497_v21  ;;  %v3508_v42 = vadd.f32 %v3506_v2, %v3498_v53  ;;  %v9316_v2 = vld [vmem:[%s9776_s14 + $0x5e4] sm:$0xf0] }
 0xa3c   : > { %v3515_v55 = vmul.f32 %v3514_v23, %v10010_v63  ;;  %v3516_v1 = vmul.f32 %v3513_v14, %v10015_v4  ;;  %v8268_v23 = vor.u32 %v9318_v11, %v8267_v34  ;;  %v8259_v14 = vld [vmem:[%s9776_s14 + $0x5e0] sm:$0xf]  ;;  %v3526_v31 = vsel %vm870_vm5, %v3524_v41, %v3522_v54  ;;  %v8187_v11 = vld [vmem:[%s9776_s14 + $0x550] sm:$0xf] }
 0xa3d   : > { %v3527_v41 = vmul.f32 %v3525_v16, %v10031_v20  ;;  %v3528_v54 = vmul.f32 %v3526_v31, %v10033_v22 }
 0xa3e   : > { %v3517_v0 = vadd.f32 %v3515_v55, %v3507_v59  ;;  %v3518_v44 = vadd.f32 %v3516_v1, %v3508_v42  ;;  %4001 = vmatpush.bf16.msra.mxu1 %v8268_v23  ;;  %v8260_v59 = vor.u32 %v9316_v2, %v8259_v14 }
 0xa40   : > { %v3519_v21 = vadd.f32 %v3517_v0, %v11219_v27  ;;  %v3520_v53 = vadd.f32 %v3518_v44, %v11228_v51  ;;  %v9298_v27 = vld [vmem:[%s9776_s14 + $0x554] sm:$0xf0]  ;;  %v8251_v0 = vld [vmem:[%s9776_s14 + $0x5d0] sm:$0xf] }
 0xa41   : > { %v8188_v44 = vor.u32 %v9298_v27, %v8187_v11  ;;  %v9314_v51 = vld [vmem:[%s9776_s14 + $0x5d4] sm:$0xf0]  ;;  %v8235_v27 = vld [vmem:[%s9776_s14 + $0x5b0] sm:$0xf] }
 0xa42   : > { %v3530_v30 = vadd.f32 %v3528_v54, %v3520_v53  ;;  %4002 = vmatpush.bf16.msra.mxu1 %v8260_v59  ;;  %v8252_v46 = vor.u32 %v9314_v51, %v8251_v0  ;;  %v8179_v59 = vld [vmem:[%s9776_s14 + $0x540] sm:$0xf]  ;;  %v9310_v0 = vld [vmem:[%s9776_s14 + $0x5b4] sm:$0xf0] }
 0xa43   : > { %3990 = vmatpush.bf16.msra.mxu0 %v8188_v44 }
 0xa46   : > { %4003 = vmatpush.bf16.msra.mxu1 %v8252_v46 }
 0xa4a   : > { %v3554_v34 = vpop.permute.xlu2 %3553 }
 0xa52   : > { %v3534_v24 = vpop.permute.xlu1 %3533 }
 0xa53   : > { %v3535_v1 = vsel %vm886_vm6, %v3532_v50, %v3534_v24  ;;  %v3536_v55 = vsel %vm886_vm6, %v3534_v24, %v3532_v50  ;;  %v3529_v50 = vadd.f32 %v3527_v41, %v3519_v21  ;;  %v8243_v41 = vld [vmem:[%s9776_s14 + $0x5c0] sm:$0xf] }
 0xa54   : > { %v3537_v42 = vmul.f32 %v3535_v1, %v10047_v32  ;;  %v3538_v26 = vmul.f32 %v3536_v55, %v10051_v38 }
 0xa56   : > { %v3539_v24 = vadd.f32 %v3537_v42, %v3529_v50  ;;  %v3540_v16 = vadd.f32 %v3538_v26, %v3530_v30  ;;  %v9312_v42 = vld [vmem:[%s9776_s14 + $0x5c4] sm:$0xf0]  ;;  %v8171_v26 = vld [vmem:[%s9776_s14 + $0x530] sm:$0xf]  ;;  %v9294_v50 = vld [vmem:[%s9776_s14 + $0x534] sm:$0xf0] }
 0xa57   : > { %v8244_v11 = vor.u32 %v9312_v42, %v8243_v41  ;;  %v8172_v44 = vor.u32 %v9294_v50, %v8171_v26  ;;  %v9290_v41 = vld [vmem:[%s9776_s14 + $0x514] sm:$0xf0]  ;;  %v8219_v42 = vld [vmem:[%s9776_s14 + $0x590] sm:$0xf] }
 0xa58   : > { %v9306_v26 = vld [vmem:[%s9776_s14 + $0x594] sm:$0xf0] }
 0xa59   : > { %4004 = vmatpush.bf16.msra.mxu1 %v8244_v11  ;;  %v8220_v50 = vor.u32 %v9306_v26, %v8219_v42  ;;  %v8211_v11 = vld [vmem:[%s9776_s14 + $0x580] sm:$0xf]  ;;  %v9315_v42 = vld [vmem:[%s9776_s14 + $0x5e4] sm:$0xf]  ;;  %v8261_v26 = vld [vmem:[%s9776_s14 + $0x5e8] sm:$0xf0] }
 0xa5a   : > { %v3544_v23 = vpop.permute.xlu0 %3543  ;;  %v3552_v28 = vpop.permute.xlu1 %3551 }
 0xa5b   : > { %v3545_v14 = vsel %vm902_vm7, %v11235_v39, %v3544_v23  ;;  %v3546_v31 = vsel %vm902_vm7, %v3544_v23, %v11235_v39  ;;  %v3555_v1 = vsel %vm918_vm8, %v3552_v28, %v3554_v34  ;;  %v3556_v55 = vsel %vm918_vm8, %v3554_v34, %v3552_v28  ;;  %v9296_v39 = vld [vmem:[%s9776_s14 + $0x544] sm:$0xf0] }
 0xa5c   : > { %v3547_v58 = vmul.f32 %v3545_v14, %v10058_v47  ;;  %v3548_v2 = vmul.f32 %v3546_v31, %v10061_v56  ;;  %v3557_v21 = vmul.f32 %v3555_v1, %v10079_v12  ;;  %v3558_v53 = vmul.f32 %v3556_v55, %v10081_v13  ;;  %v8163_v31 = vld [vmem:[%s9776_s14 + $0x520] sm:$0xf]  ;;  %v9292_v1 = vld [vmem:[%s9776_s14 + $0x524] sm:$0xf0] }
 0xa5d   : > { %v8180_v54 = vor.u32 %v9296_v39, %v8179_v59  ;;  %v8236_v28 = vor.u32 %v9310_v0, %v8235_v27  ;;  %v8164_v55 = vor.u32 %v9292_v1, %v8163_v31  ;;  %v9304_v0 = vld [vmem:[%s9776_s14 + $0x584] sm:$0xf0]  ;;  %v8269_v31 = vld [vmem:[%s9776_s14 + $0x5f8] sm:$0xf0] }
 0xa5e   : > { %v3549_v30 = vadd.f32 %v3547_v58, %v3539_v24  ;;  %v3550_v34 = vadd.f32 %v3548_v2, %v3540_v16  ;;  %v8227_v58 = vld [vmem:[%s9776_s14 + $0x5a0] sm:$0xf]  ;;  %v9308_v2 = vld [vmem:[%s9776_s14 + $0x5a4] sm:$0xf0] }
 0xa5f   : > { %3991 = vmatpush.bf16.msra.mxu0 %v8180_v54  ;;  %4005 = vmatpush.bf16.msra.mxu1 %v8236_v28  ;;  %v8228_v39 = vor.u32 %v9308_v2, %v8227_v58  ;;  %v11330_v58 = vld [vmem:[%s10117_s12] sm:$0xff] }
 0xa60   : > { %v3559_v51 = vadd.f32 %v3557_v21, %v3549_v30  ;;  %v3560_v23 = vadd.f32 %v3558_v53, %v3550_v34  ;;  %v8155_v21 = vld [vmem:[%s9776_s14 + $0x510] sm:$0xf]  ;;  %v8147_v30 = vld [vmem:[%s9776_s14 + $0x500] sm:$0xf]  ;;  %v9288_v34 = vld [vmem:[%s9776_s14 + $0x504] sm:$0xf0] }
 0xa61   : > { %v8156_v54 = vor.u32 %v9290_v41, %v8155_v21  ;;  %v8148_v27 = vor.u32 %v9288_v34, %v8147_v30  ;;  %v9299_v41 = vld [vmem:[%s9776_s14 + $0x564] sm:$0xf]  ;;  %v8264_v34 = vor.u32 %v9315_v42, %v8261_v26  ;;  %v11383_v42 = vld [vmem:[%s13984_s7 + $0x18] sm:$0xff] }
 0xa62   : > { %v3561_v46 = vadd.f32 %v3559_v51, %v10097_v57  ;;  %v3562_v24 = vadd.f32 %v3560_v23, %v10097_v57  ;;  %v8212_v51 = vor.u32 %v9304_v0, %v8211_v11  ;;  %v9297_v11 = vld [vmem:[%s9776_s14 + $0x554] sm:$0xf]  ;;  %v9291_v26 = vld [vmem:[%s9776_s14 + $0x524] sm:$0xf] }
 0xa63   : > { %3992 = vmatpush.bf16.msra.mxu0 %v8172_v44  ;;  %4006 = vmatpush.bf16.msra.mxu1 %v8228_v39  ;;  %v9313_v0 = vld [vmem:[%s9776_s14 + $0x5d4] sm:$0xf] }
 0xa64   : > { %v3563_v16 = vsub.f32 0.0, %v3561_v46  ;;  %v3564_v14 = vsub.f32 0.0, %v3562_v24  ;;  %v9301_v24 = vld [vmem:[%s9776_s14 + $0x574] sm:$0xf] }
 0xa66   : > { %v3565_v53 = vmul.f32 1.442695, %v3563_v16  ;;  %v3567_v59 = vmul.f32 1.442695, %v3564_v14  ;;  %v8205_v16 = vld [vmem:[%s9776_s14 + $0x578] sm:$0xf0] }
 0xa67   : > { %3993 = vmatpush.bf16.msra.mxu0 %v8164_v55  ;;  %4007 = vmatpush.bf16.msra.mxu1 %v8220_v50  ;;  %v9317_v14 = vld [vmem:[%s9776_s14 + $0x5f4] sm:$0xf]  ;;  %v8208_v21 = vor.u32 %v9301_v24, %v8205_v16  ;;  %v11344_v50 = vld [vmem:[%s13984_s7] sm:$0xff]  ;;  %v8181_v24 = vld [vmem:[%s9776_s14 + $0x548] sm:$0xf0] }
 0xa68   : > { %9542 = vpow2.f32 %v3565_v53  ;;  %v11334_v53 = vld [vmem:[%s10117_s12 + $0x8] sm:$0xff]  ;;  %v8272_v39 = vor.u32 %v9317_v14, %v8269_v31  ;;  %v9311_v16 = vld [vmem:[%s9776_s14 + $0x5c4] sm:$0xf] }
 0xa69   : > { %9544 = vpow2.f32 %v3567_v59  ;;  %v8245_v31 = vld [vmem:[%s9776_s14 + $0x5c8] sm:$0xf0] }
 0xa6b   : > { %3994 = vmatpush.bf16.msra.mxu0 %v8156_v54  ;;  %4008 = vmatpush.bf16.msra.mxu1 %v8212_v51  ;;  %v8197_v54 = vld [vmem:[%s9776_s14 + $0x568] sm:$0xf0] }
 0xa6c   : > { %v8200_v30 = vor.u32 %v9299_v41, %v8197_v54  ;;  %v8237_v41 = vld [vmem:[%s9776_s14 + $0x5b8] sm:$0xf0] }
 0xa6e   : > { %v9543_v44 = vpop.eup %9542  ;;  %4009 = vmatmul.bf16.vlgmr.msra.gmra.mxu1 %v9850_v36 }
 0xa6f   : > { %v9545_v23 = vpop.eup %9544  ;;  %v3569_v28 = vadd.f32 1.0, %v9543_v44  ;;  %3995 = vmatpush.bf16.msra.mxu0 %v8148_v27  ;;  %v8189_v27 = vld [vmem:[%s9776_s14 + $0x558] sm:$0xf0] }
 0xa70   : > { %v3570_v46 = vadd.f32 1.0, %v9545_v23  ;;  %v8253_v44 = vld [vmem:[%s9776_s14 + $0x5d8] sm:$0xf0]  ;;  %v8192_v51 = vor.u32 %v9297_v11, %v8189_v27  ;;  %v8229_v27 = vld [vmem:[%s9776_s14 + $0x5a8] sm:$0xf0] }
 0xa71   : > { %9546 = vrcp.f32 %v3569_v28  ;;  %v8256_v23 = vor.u32 %v9313_v0, %v8253_v44  ;;  %v11357_v28 = vld [vmem:[%s13984_s7 + $0x8] sm:$0xff]  ;;  %v9289_v44 = vld [vmem:[%s9776_s14 + $0x514] sm:$0xf] }
 0xa72   : > { %9548 = vrcp.f32 %v3570_v46  ;;  %3996 = vmatmul.bf16.vlgmr.msra.gmra.mxu0 %v9848_v35  ;;  %v9295_v46 = vld [vmem:[%s9776_s14 + $0x544] sm:$0xf] }
 0xa73   : > { %v8184_v14 = vor.u32 %v9295_v46, %v8181_v24  ;;  %v11399_v46 = vld [vmem:[%s13984_s7 + $0x20] sm:$0xff] }
 0xa77   : > { %v9547_v1 = vpop.eup %9546 }
 0xa78   : > { %v9549_v55 = vpop.eup %9548  ;;  %v3573_v2 = vmul.f32 %v11330_v58, %v9547_v1  ;;  %v8248_v1 = vor.u32 %v9311_v16, %v8245_v31  ;;  %v8221_v16 = vld [vmem:[%s9776_s14 + $0x598] sm:$0xf0]  ;;  %v9287_v31 = vld [vmem:[%s9776_s14 + $0x504] sm:$0xf] }
 0xa79   : > { %v3574_v59 = vmul.f32 %v11334_v53, %v9549_v55  ;;  %v11370_v55 = vld [vmem:[%s13984_s7 + $0x10] sm:$0xff] }
 0xa7a   : > { %3590 = vmatpush.msrb.mxu2 %v3573_v2  ;;  %v9293_v2 = vld [vmem:[%s9776_s14 + $0x534] sm:$0xf] }
 0xa7b   : > { %3634 = vmatpush.msrb.mxu3 %v3574_v59  ;;  %8089 = vmatmul.msk.f32.vlgmr.msrb.gmra.mxu2 %vm686_vm0, %v11344_v50  ;;  %v9309_v59 = vld [vmem:[%s9776_s14 + $0x5b4] sm:$0xf] }
 0xa7c   : > { %8098 = vmatmul.msk.f32.vlgmr.msrb.gmra.mxu3 %vm686_vm0, %v11344_v50  ;;  %4014 = vmatpush.bf16.msra.mxu2 %v8208_v21  ;;  %v8173_v21 = vld [vmem:[%s9776_s14 + $0x538] sm:$0xf0]  ;;  %v8240_v54 = vor.u32 %v9309_v59, %v8237_v41  ;;  %v8213_v59 = vld [vmem:[%s9776_s14 + $0x588] sm:$0xf0] }
 0xa7d   : > { %4027 = vmatpush.bf16.msra.mxu3 %v8272_v39  ;;  %v8176_v39 = vor.u32 %v9293_v2, %v8173_v21  ;;  %v9303_v2 = vld [vmem:[%s9776_s14 + $0x584] sm:$0xf]  ;;  %v11413_v41 = vld [vmem:[%s13984_s7 + $0x28] sm:$0xff] }
 0xa80   : > { %4015 = vmatpush.bf16.msra.mxu2 %v8200_v30  ;;  %v8165_v30 = vld [vmem:[%s9776_s14 + $0x528] sm:$0xf0] }
 0xa81   : > { %4028 = vmatpush.bf16.msra.mxu3 %v8264_v34  ;;  %v9307_v34 = vld [vmem:[%s9776_s14 + $0x5a4] sm:$0xf]  ;;  %v8168_v11 = vor.u32 %v9291_v26, %v8165_v30  ;;  %v11431_v26 = vld [vmem:[%s13984_s7 + $0x38] sm:$0xff] }
 0xa82   : > { %v8232_v0 = vor.u32 %v9307_v34, %v8229_v27  ;;  %v11440_v30 = vld [vmem:[%s13984_s7 + $0x40] sm:$0xff] }
 0xa83   : > { %8090 = vmatmul.msk.f32.gmra.mxu2 %vm686_vm0, %v11357_v28 }
 0xa84   : > { %8099 = vmatmul.msk.f32.gmra.mxu3 %vm686_vm0, %v11357_v28  ;;  %4016 = vmatpush.bf16.msra.mxu2 %v8192_v51  ;;  %v8157_v51 = vld [vmem:[%s9776_s14 + $0x518] sm:$0xf0] }
 0xa85   : > { %4029 = vmatpush.bf16.msra.mxu3 %v8256_v23  ;;  %v9305_v23 = vld [vmem:[%s9776_s14 + $0x594] sm:$0xf]  ;;  %v8160_v24 = vor.u32 %v9289_v44, %v8157_v51 }
 0xa88   : > { %4017 = vmatpush.bf16.msra.mxu2 %v8184_v14  ;;  %v8224_v14 = vor.u32 %v9305_v23, %v8221_v16 }
 0xa89   : > { %4030 = vmatpush.bf16.msra.mxu3 %v8248_v1  ;;  %v8149_v1 = vld [vmem:[%s9776_s14 + $0x508] sm:$0xf0] }
 0xa8a   : > { %v8152_v21 = vor.u32 %v9287_v31, %v8149_v1 }
 0xa8b   : > { %8091 = vmatmul.msk.f32.gmra.mxu2 %vm686_vm0, %v11370_v55 }
 0xa8c   : > { %8100 = vmatmul.msk.f32.gmra.mxu3 %vm686_vm0, %v11370_v55  ;;  %4018 = vmatpush.bf16.msra.mxu2 %v8176_v39  ;;  %v8216_v39 = vor.u32 %v9303_v2, %v8213_v59 }
 0xa8d   : > { %4031 = vmatpush.bf16.msra.mxu3 %v8240_v54  ;;  %v11422_v54 = vld [vmem:[%s13984_s7 + $0x30] sm:$0xff] }
 0xa90   : > { %4019 = vmatpush.bf16.msra.mxu2 %v8168_v11 }
 0xa91   : > { %4032 = vmatpush.bf16.msra.mxu3 %v8232_v0 }
 0xa93   : > { %8092 = vmatmul.msk.f32.gmra.mxu2 %vm686_vm0, %v11383_v42 }
 0xa94   : > { %8101 = vmatmul.msk.f32.gmra.mxu3 %vm686_vm0, %v11383_v42  ;;  %4020 = vmatpush.bf16.msra.mxu2 %v8160_v24 }
 0xa95   : > { %4033 = vmatpush.bf16.msra.mxu3 %v8224_v14 }
 0xa98   : > { %4021 = vmatpush.bf16.msra.mxu2 %v8152_v21 }
 0xa99   : > { %4034 = vmatpush.bf16.msra.mxu3 %v8216_v39 }
 0xa9b   : > { %8093 = vmatmul.msk.f32.gmra.mxu2 %vm686_vm0, %v11399_v46 }
 0xa9c   : > { %8102 = vmatmul.msk.f32.gmra.mxu3 %vm686_vm0, %v11399_v46 }
 0xaa3   : > { %8094 = vmatmul.msk.f32.gmra.mxu2 %vm686_vm0, %v11413_v41 }
 0xaa4   : > { %8103 = vmatmul.msk.f32.gmra.mxu3 %vm686_vm0, %v11413_v41 }
 0xaab   : > { %8095 = vmatmul.msk.f32.gmra.mxu2 %vm686_vm0, %v11422_v54 }
 0xaac   : > { %8104 = vmatmul.msk.f32.gmra.mxu3 %vm686_vm0, %v11422_v54 }
 0xab3   : > { %8096 = vmatmul.msk.f32.gmra.mxu2 %vm686_vm0, %v11431_v26 }
 0xab4   : > { %8105 = vmatmul.msk.f32.gmra.mxu3 %vm686_vm0, %v11431_v26 }
 0xabb   : > { %8097 = vmatmul.msk.f32.gmra.mxu2 %vm686_vm0, %v11440_v30 }
 0xabc   : > { %8106 = vmatmul.msk.f32.gmra.mxu3 %vm686_vm0, %v11440_v30 }
 0xac3   : > { %4022 = vmatmul.bf16.vlgmr.msra.gmra.mxu2 %v9848_v35 }
 0xac4   : > { %4035 = vmatmul.bf16.vlgmr.msra.gmra.mxu3 %v9850_v36 }
 0xaeb   : > { %v4010_v11 = vpop.f32.mrf.mxu1 }
 0xaef   : > { %v3997_v34 = vpop.f32.mrf.mxu0 }
 0xaf0   : > { %v4011_v27 = vadd.f32 %v4010_v11, %v3997_v34 }
 0xaf2   : > { %4055 = vmatpush.msrb.mxu0 %v4011_v27 }
 0xaf3   : > { %8273 = vmatmul.msk.f32.vlgmr.msrb.gmra.mxu0 %vm686_vm0, %v11101_v62  ;;  %v4012_v44 = vpop.f32.mrf.mxu1 }
 0xaf7   : > { %v3999_v0 = vpop.f32.mrf.mxu0 }
 0xafb   : > { %8274 = vmatmul.msk.f32.gmra.mxu0 %vm686_vm0, %v11108_v3 }
 0xafe   : > { %v11452_v51 = vpop.f32.mrf.mxu2 }
 0xaff   : > { %14059 = vst [vmem:[#allocation69_spill] sm:$0xff] %v11452_v51  ;;  %v11454_v23 = vpop.f32.mrf.mxu3 }
 0xb00   : > { %14060 = vst [vmem:[#allocation70_spill] sm:$0xff] %v11454_v23 }
 0xb03   : > { %8275 = vmatmul.msk.f32.gmra.mxu0 %vm686_vm0, %v11119_v40 }
 0xb06   : > { %v11458_v24 = vpop.f32.mrf.mxu2 }
 0xb07   : > { %14061 = vst [vmem:[#allocation71_spill] sm:$0xff] %v11458_v24  ;;  %v11460_v16 = vpop.f32.mrf.mxu3 }
 0xb08   : > { %14062 = vst [vmem:[#allocation72_spill] sm:$0xff] %v11460_v16 }
 0xb0b   : > { %8276 = vmatmul.msk.f32.gmra.mxu0 %vm686_vm0, %v11130_v10 }
 0xb0e   : > { %v11464_v14 = vpop.f32.mrf.mxu2 }
 0xb0f   : > { %14063 = vst [vmem:[#allocation73_spill] sm:$0xff] %v11464_v14  ;;  %v11466_v31 = vpop.f32.mrf.mxu3 }
 0xb10   : > { %14064 = vst [vmem:[#allocation74_spill] sm:$0xff] %v11466_v31 }
 0xb13   : > { %8277 = vmatmul.msk.f32.gmra.mxu0 %vm686_vm0, %v11141_v29 }
 0xb16   : > { %v11470_v1 = vpop.f32.mrf.mxu2 }
 0xb17   : > { %14065 = vst [vmem:[#allocation75_spill] sm:$0xff] %v11470_v1  ;;  %v11472_v2 = vpop.f32.mrf.mxu3 }
 0xb18   : > { %14066 = vst [vmem:[#allocation76_spill] sm:$0xff] %v11472_v2 }
 0xb1b   : > { %8278 = vmatmul.msk.f32.gmra.mxu0 %vm686_vm0, %v11152_v49 }
 0xb1e   : > { %v11476_v21 = vpop.f32.mrf.mxu2 }
 0xb1f   : > { %14067 = vst [vmem:[#allocation77_spill] sm:$0xff] %v11476_v21  ;;  %v11478_v59 = vpop.f32.mrf.mxu3 }
 0xb20   : > { %14068 = vst [vmem:[#allocation78_spill] sm:$0xff] %v11478_v59 }
 0xb23   : > { %8279 = vmatmul.msk.f32.gmra.mxu0 %vm686_vm0, %v11163_v48 }
 0xb26   : > { %v11482_v39 = vpop.f32.mrf.mxu2 }
 0xb27   : > { %14069 = vst [vmem:[#allocation79_spill] sm:$0xff] %v11482_v39  ;;  %v11484_v34 = vpop.f32.mrf.mxu3 }
 0xb28   : > { %14070 = vst [vmem:[#allocation80_spill] sm:$0xff] %v11484_v34 }
 0xb2b   : > { %8280 = vmatmul.msk.f32.gmra.mxu0 %vm686_vm0, %v11174_v19 }
 0xb2e   : > { %v11488_v11 = vpop.f32.mrf.mxu2 }
 0xb2f   : > { %14071 = vst [vmem:[#allocation81_spill] sm:$0xff] %v11488_v11  ;;  %v11490_v27 = vpop.f32.mrf.mxu3 }
 0xb30   : > { %14072 = vst [vmem:[#allocation82_spill] sm:$0xff] %v11490_v27 }
 0xb33   : > { %8281 = vmatmul.msk.f32.gmra.mxu0 %vm686_vm0, %v11185_v25 }
 0xb36   : > { %v11494_v0 = vpop.f32.mrf.mxu2 }
 0xb37   : > { %14073 = vst [vmem:[#allocation83_spill] sm:$0xff] %v11494_v0  ;;  %v11496_v44 = vpop.f32.mrf.mxu3 }
 0xb38   : > { %14074 = vst [vmem:[#allocation84_spill] sm:$0xff] %v11496_v44 }
 0xb3e   : > { %v11498_v59 = vpop.f32.mrf.mxu2 }
 0xb3f   : > { %14075 = vst [vmem:[#allocation85_spill] sm:$0xff] %v11498_v59  ;;  %v11500_v21 = vpop.f32.mrf.mxu3 }
 0xb40   : > { %14076 = vst [vmem:[#allocation86_spill] sm:$0xff] %v11500_v21 }
 0xb46   : > { %v4023_v1 = vpop.f32.mrf.mxu2 }
 0xb47   : > { %v4036_v34 = vpop.f32.mrf.mxu3 }
 0xb48   : > { %v4037_v2 = vadd.f32 %v4036_v34, %v4023_v1 }
 0xb4a   : > { %4099 = vmatpush.msrb.mxu1 %v4037_v2 }
 0xb4b   : > { %8282 = vmatmul.msk.f32.vlgmr.msrb.gmra.mxu1 %vm686_vm0, %v11101_v62 }
 0xb4e   : > { %v4025_v11 = vpop.f32.mrf.mxu2 }
 0xb4f   : > { %v4038_v14 = vpop.f32.mrf.mxu3 }
 0xb53   : > { %8283 = vmatmul.msk.f32.gmra.mxu1 %vm686_vm0, %v11108_v3 }
 0xb5b   : > { %8284 = vmatmul.msk.f32.gmra.mxu1 %vm686_vm0, %v11119_v40 }
 0xb63   : > { %8285 = vmatmul.msk.f32.gmra.mxu1 %vm686_vm0, %v11130_v10 }
 0xb6b   : > { %8286 = vmatmul.msk.f32.gmra.mxu1 %vm686_vm0, %v11141_v29 }
 0xb70   : > { %v4057_v21 = vpop.f32.mrf.mxu0 }
 0xb71   : > { %4128 = vrot.lane.b32.xlu0 %v4057_v21, %s9702_s20 }
 0xb73   : > { %8287 = vmatmul.msk.f32.gmra.mxu1 %vm686_vm0, %v11152_v49 }
 0xb78   : > { %v4060_v62 = vpop.f32.mrf.mxu0 }
 0xb79   : > { %4136 = vrot.lane.b32.xlu2 %v4060_v62, %s9703_s21 }
 0xb7b   : > { %8288 = vmatmul.msk.f32.gmra.mxu1 %vm686_vm0, %v11163_v48 }
 0xb80   : > { %v4063_v3 = vpop.f32.mrf.mxu0 }
 0xb81   : > { %4146 = vrot.lane.b32.xlu1 %v4063_v3, %s9704_s22 }
 0xb83   : > { %8289 = vmatmul.msk.f32.gmra.mxu1 %vm686_vm0, %v11174_v19 }
 0xb88   : > { %v4066_v40 = vpop.f32.mrf.mxu0 }
 0xb89   : > { %4156 = vrot.lane.b32.xlu0 %v4066_v40, %s9705_s23 }
 0xb8b   : > { %8290 = vmatmul.msk.f32.gmra.mxu1 %vm686_vm0, %v11185_v25 }
 0xb90   : > { %v11524_v10 = vpop.f32.mrf.mxu0 }
 0xb98   : > { %v4072_v29 = vpop.f32.mrf.mxu0 }
 0xb99   : > { %4168 = vrot.lane.b32.xlu2 %v4072_v29, %s9706_s24 }
 0xba0   : > { %v4075_v49 = vpop.f32.mrf.mxu0 }
 0xba1   : > { %4178 = vrot.lane.b32.xlu1 %v4075_v49, %s9708_s25 }
 0xba8   : > { %v4078_v48 = vpop.f32.mrf.mxu0 }
 0xba9   : > { %4188 = vrot.lane.b32.xlu0 %v4078_v48, %s9709_s26 }
 0xbb0   : > { %v4081_v11 = vpop.f32.mrf.mxu0 }
 0xbc8   : > { %v4101_v14 = vpop.f32.mrf.mxu1 }
 0xbc9   : > { %4130 = vrot.lane.b32.xlu1 %v4101_v14, %s9702_s20 }
 0xbd0   : > { %v4104_v19 = vpop.f32.mrf.mxu1 }
 0xbd1   : > { %4138 = vrot.lane.b32.xlu0 %v4104_v19, %s9703_s21 }
 0xbd3   : > { %v4137_v48 = vpop.permute.xlu2 %4136 }
 0xbd8   : > { %v4107_v1 = vpop.f32.mrf.mxu1 }
 0xbd9   : > { %4148 = vrot.lane.b32.xlu2 %v4107_v1, %s9704_s22 }
 0xbe0   : > { %v4110_v25 = vpop.f32.mrf.mxu1 }
 0xbe1   : > { %4158 = vrot.lane.b32.xlu1 %v4110_v25, %s9705_s23 }
 0xbe3   : > { %v4129_v40 = vpop.permute.xlu0 %4128 }
 0xbe8   : > { %v11533_v2 = vpop.f32.mrf.mxu1 }
 0xbf0   : > { %v4116_v21 = vpop.f32.mrf.mxu1 }
 0xbf1   : > { %4170 = vrot.lane.b32.xlu0 %v4116_v21, %s9706_s24 }
 0xbf3   : > { %v4147_v29 = vpop.permute.xlu1 %4146  ;;  %v4169_v1 = vpop.permute.xlu2 %4168 }
 0xbf8   : > { %v4119_v34 = vpop.f32.mrf.mxu1 }
 0xbf9   : > { %4180 = vrot.lane.b32.xlu2 %v4119_v34, %s9708_s25 }
 0xbfb   : > { %v4157_v49 = vpop.permute.xlu0 %4156 }
 0xc00   : > { %v4122_v62 = vpop.f32.mrf.mxu1 }
 0xc01   : > { %4190 = vrot.lane.b32.xlu1 %v4122_v62, %s9709_s26  ;;  %4198 = vrot.lane.b32.xlu2 %v4081_v11, %s9710_s27 }
 0xc08   : > { %v4125_v3 = vpop.f32.mrf.mxu1 }
 0xc09   : > { %4200 = vrot.lane.b32.xlu0 %v4125_v3, %s9710_s27 }
 0xc13   : > { %v4179_v14 = vpop.permute.xlu1 %4178 }
 0xc1b   : > { %v4189_v19 = vpop.permute.xlu0 %4188 }
 0xc33   : > { %v4149_v0 = vpop.permute.xlu2 %4148 }
 0xc34   : > { %v4151_v31 = vsel %vm836_vm3, %v4149_v0, %v4147_v29 }
 0xc3b   : > { %v4131_v25 = vpop.permute.xlu1 %4130 }
 0xc3c   : > { %v4133_v11 = vsel %vm806_vm2, %v4131_v25, %v4129_v40  ;;  %v4132_v3 = vsel %vm806_vm2, %v4129_v40, %v4131_v25  ;;  %v4150_v40 = vsel %vm836_vm3, %v4147_v29, %v4149_v0 }
 0xc3d   : > { %v4134_v39 = vmul.f32 %v4133_v11, %v9988_v43  ;;  %v4152_v11 = vmul.f32 %v4151_v31, %v10005_v60 }
 0xc43   : > { %v4139_v21 = vpop.permute.xlu0 %4138 }
 0xc44   : > { %v4141_v34 = vsel %vm820_vm1, %v4139_v21, %v4137_v48  ;;  %v4140_v62 = vsel %vm820_vm1, %v4137_v48, %v4139_v21  ;;  %v4135_v48 = vmul.f32 %v4132_v3, %v9992_v45  ;;  %v4153_v3 = vmul.f32 %v4150_v40, %v10007_v61 }
 0xc45   : > { %v4142_v44 = vmul.f32 %v4141_v34, %v9979_v33  ;;  %v4143_v27 = vmul.f32 %v4140_v62, %v9981_v37 }
 0xc47   : > { %v4144_v25 = vadd.f32 %v4142_v44, %v4134_v39  ;;  %v4145_v62 = vadd.f32 %v4143_v27, %v4135_v48  ;;  %v9334_v27 = vld [vmem:[%s9776_s14 + $0x674] sm:$0xf0]  ;;  %v8469_v44 = vld [vmem:[%s9776_s14 + $0x6f0] sm:$0xf] }
 0xc48   : > { %v9350_v48 = vld [vmem:[%s9776_s14 + $0x6f4] sm:$0xf0] }
 0xc49   : > { %v4154_v51 = vadd.f32 %v4152_v11, %v4144_v25  ;;  %v4155_v0 = vadd.f32 %v4153_v3, %v4145_v62  ;;  %v8470_v52 = vor.u32 %v9350_v48, %v8469_v44  ;;  %v8461_v25 = vld [vmem:[%s9776_s14 + $0x6e0] sm:$0xf]  ;;  %v9348_v3 = vld [vmem:[%s9776_s14 + $0x6e4] sm:$0xf0]  ;;  %v9330_v44 = vld [vmem:[%s9776_s14 + $0x654] sm:$0xf0] }
 0xc4a   : > { %v9346_v48 = vld [vmem:[%s9776_s14 + $0x6d4] sm:$0xf0] }
 0xc4b   : > { %4648 = vmatpush.bf16.msra.mxu1 %v8470_v52 }
 0xc53   : > { %v4159_v59 = vpop.permute.xlu1 %4158  ;;  %v4181_v40 = vpop.permute.xlu2 %4180 }
 0xc54   : > { %v4161_v21 = vsel %vm852_vm4, %v4159_v59, %v4157_v49  ;;  %v4160_v34 = vsel %vm852_vm4, %v4157_v49, %v4159_v59  ;;  %v8405_v59 = vld [vmem:[%s9776_s14 + $0x670] sm:$0xf] }
 0xc55   : > { %v4162_v16 = vmul.f32 %v4161_v21, %v10010_v63  ;;  %v4163_v23 = vmul.f32 %v4160_v34, %v10015_v4  ;;  %v8406_v49 = vor.u32 %v9334_v27, %v8405_v59  ;;  %v8397_v34 = vld [vmem:[%s9776_s14 + $0x660] sm:$0xf] }
 0xc56   : > { %v8398_v11 = vor.u32 %v9332_v15, %v8397_v34 }
 0xc57   : > { %v4164_v31 = vadd.f32 %v4162_v16, %v4154_v51  ;;  %v4165_v21 = vadd.f32 %v4163_v23, %v4155_v0  ;;  %4635 = vmatpush.bf16.msra.mxu0 %v8406_v49 }
 0xc59   : > { %v4166_v23 = vadd.f32 %v4164_v31, %v11524_v10  ;;  %v4167_v0 = vadd.f32 %v4165_v21, %v11533_v2  ;;  %v8389_v10 = vld [vmem:[%s9776_s14 + $0x650] sm:$0xf] }
 0xc5a   : > { %v8453_v31 = vld [vmem:[%s9776_s14 + $0x6d0] sm:$0xf]  ;;  %v8390_v49 = vor.u32 %v9330_v44, %v8389_v10 }
 0xc5b   : > { %4636 = vmatpush.bf16.msra.mxu0 %v8398_v11  ;;  %v4199_v21 = vpop.permute.xlu2 %4198  ;;  %v8381_v11 = vld [vmem:[%s9776_s14 + $0x640] sm:$0xf]  ;;  %v8437_v44 = vld [vmem:[%s9776_s14 + $0x6b0] sm:$0xf] }
 0xc5f   : > { %4637 = vmatpush.bf16.msra.mxu0 %v8390_v49 }
 0xc63   : > { %v4171_v24 = vpop.permute.xlu0 %4170 }
 0xc64   : > { %v4172_v39 = vsel %vm870_vm5, %v4169_v1, %v4171_v24  ;;  %v4173_v29 = vsel %vm870_vm5, %v4171_v24, %v4169_v1  ;;  %v8462_v24 = vor.u32 %v9348_v3, %v8461_v25  ;;  %v4182_v1 = vsel %vm886_vm6, %v4179_v14, %v4181_v40  ;;  %v9328_v3 = vld [vmem:[%s9776_s14 + $0x644] sm:$0xf0] }
 0xc65   : > { %v4174_v62 = vmul.f32 %v4172_v39, %v10031_v20  ;;  %v4175_v51 = vmul.f32 %v4173_v29, %v10033_v22  ;;  %v4183_v39 = vsel %vm886_vm6, %v4181_v40, %v4179_v14  ;;  %v4184_v2 = vmul.f32 %v4182_v1, %v10047_v32 }
 0xc66   : > { %4649 = vmatpush.bf16.msra.mxu1 %v8462_v24  ;;  %v4185_v14 = vmul.f32 %v4183_v39, %v10051_v38  ;;  %v8454_v40 = vor.u32 %v9346_v48, %v8453_v31  ;;  %v8382_v1 = vor.u32 %v9328_v3, %v8381_v11  ;;  %v9326_v39 = vld [vmem:[%s9776_s14 + $0x634] sm:$0xf0]  ;;  %v8429_v11 = vld [vmem:[%s9776_s14 + $0x6a0] sm:$0xf]  ;;  %v9340_v3 = vld [vmem:[%s9776_s14 + $0x6a4] sm:$0xf0] }
 0xc67   : > { %v4176_v59 = vadd.f32 %v4174_v62, %v4166_v23  ;;  %v4177_v52 = vadd.f32 %v4175_v51, %v4167_v0  ;;  %v8445_v51 = vld [vmem:[%s9776_s14 + $0x6c0] sm:$0xf]  ;;  %v9344_v0 = vld [vmem:[%s9776_s14 + $0x6c4] sm:$0xf0]  ;;  %v9342_v31 = vld [vmem:[%s9776_s14 + $0x6b4] sm:$0xf0] }
 0xc68   : > { %v8446_v10 = vor.u32 %v9344_v0, %v8445_v51  ;;  %4638 = vmatpush.bf16.msra.mxu0 %v8382_v1  ;;  %v8438_v48 = vor.u32 %v9342_v31, %v8437_v44  ;;  %v8357_v51 = vld [vmem:[%s9776_s14 + $0x610] sm:$0xf]  ;;  %v9322_v1 = vld [vmem:[%s9776_s14 + $0x614] sm:$0xf0]  ;;  %v9336_v31 = vld [vmem:[%s9776_s14 + $0x684] sm:$0xf0] }
 0xc69   : > { %v4186_v34 = vadd.f32 %v4184_v2, %v4176_v59  ;;  %v4187_v25 = vadd.f32 %v4185_v14, %v4177_v52  ;;  %v8358_v0 = vor.u32 %v9322_v1, %v8357_v51  ;;  %v9347_v1 = vld [vmem:[%s9776_s14 + $0x6e4] sm:$0xf] }
 0xc6a   : > { %4650 = vmatpush.bf16.msra.mxu1 %v8454_v40 }
 0xc6e   : > { %4651 = vmatpush.bf16.msra.mxu1 %v8446_v10  ;;  %v8413_v10 = vld [vmem:[%s9776_s14 + $0x680] sm:$0xf] }
 0xc72   : > { %4652 = vmatpush.bf16.msra.mxu1 %v8438_v48 }
 0xc73   : > { %v4191_v16 = vpop.permute.xlu1 %4190 }
 0xc74   : > { %v4192_v15 = vsel %vm902_vm7, %v4189_v19, %v4191_v16  ;;  %v4193_v27 = vsel %vm902_vm7, %v4191_v16, %v4189_v19 }
 0xc75   : > { %v4194_v29 = vmul.f32 %v4192_v15, %v10058_v47  ;;  %v4195_v19 = vmul.f32 %v4193_v27, %v10061_v56  ;;  %v8373_v15 = vld [vmem:[%s9776_s14 + $0x630] sm:$0xf] }
 0xc76   : > { %v8374_v2 = vor.u32 %v9326_v39, %v8373_v15  ;;  %v8421_v15 = vld [vmem:[%s9776_s14 + $0x690] sm:$0xf]  ;;  %v9338_v39 = vld [vmem:[%s9776_s14 + $0x694] sm:$0xf0] }
 0xc77   : > { %v4196_v16 = vadd.f32 %v4194_v29, %v4186_v34  ;;  %v4197_v59 = vadd.f32 %v4195_v19, %v4187_v25  ;;  %v8365_v34 = vld [vmem:[%s9776_s14 + $0x620] sm:$0xf]  ;;  %v9324_v25 = vld [vmem:[%s9776_s14 + $0x624] sm:$0xf0] }
 0xc78   : > { %4639 = vmatpush.bf16.msra.mxu0 %v8374_v2 }
 0xc7b   : > { %v4201_v62 = vpop.permute.xlu0 %4200 }
 0xc7c   : > { %v4202_v24 = vsel %vm918_vm8, %v4199_v21, %v4201_v62  ;;  %v4203_v23 = vsel %vm918_vm8, %v4201_v62, %v4199_v21  ;;  %v8366_v62 = vor.u32 %v9324_v25, %v8365_v34  ;;  %v8471_v34 = vld [vmem:[%s9776_s14 + $0x6f8] sm:$0xf0] }
 0xc7d   : > { %v4204_v27 = vmul.f32 %v4202_v24, %v10079_v12  ;;  %v4205_v52 = vmul.f32 %v4203_v23, %v10081_v13  ;;  %v8430_v23 = vor.u32 %v9340_v3, %v8429_v11 }
 0xc7e   : > { %4640 = vmatpush.bf16.msra.mxu0 %v8366_v62 }
 0xc7f   : > { %v4206_v29 = vadd.f32 %v4204_v27, %v4196_v16  ;;  %v4207_v49 = vadd.f32 %v4205_v52, %v4197_v59  ;;  %4653 = vmatpush.bf16.msra.mxu1 %v8430_v23  ;;  %v8422_v59 = vor.u32 %v9338_v39, %v8421_v15  ;;  %v8349_v27 = vld [vmem:[%s9776_s14 + $0x600] sm:$0xf]  ;;  %v9320_v52 = vld [vmem:[%s9776_s14 + $0x604] sm:$0xf0]  ;;  %v8399_v23 = vld [vmem:[%s9776_s14 + $0x668] sm:$0xf0] }
 0xc80   : > { %v8350_v44 = vor.u32 %v9320_v52, %v8349_v27  ;;  %v9329_v15 = vld [vmem:[%s9776_s14 + $0x654] sm:$0xf]  ;;  %v8391_v39 = vld [vmem:[%s9776_s14 + $0x658] sm:$0xf0] }
 0xc81   : > { %v4208_v14 = vadd.f32 %v4206_v29, %v10097_v57  ;;  %v4209_v19 = vadd.f32 %v4207_v49, %v10097_v57  ;;  %v8414_v29 = vor.u32 %v9336_v31, %v8413_v10  ;;  %v8455_v27 = vld [vmem:[%s9776_s14 + $0x6d8] sm:$0xf0]  ;;  %v8394_v52 = vor.u32 %v9329_v15, %v8391_v39  ;;  %v9343_v31 = vld [vmem:[%s9776_s14 + $0x6c4] sm:$0xf]  ;;  %v8415_v39 = vld [vmem:[%s9776_s14 + $0x688] sm:$0xf0] }
 0xc82   : > { %4641 = vmatpush.bf16.msra.mxu0 %v8358_v0  ;;  %v8463_v0 = vld [vmem:[%s9776_s14 + $0x6e8] sm:$0xf0] }
 0xc83   : > { %v4210_v21 = vsub.f32 0.0, %v4208_v14  ;;  %v4211_v40 = vsub.f32 0.0, %v4209_v19  ;;  %4654 = vmatpush.bf16.msra.mxu1 %v8422_v59  ;;  %v9333_v19 = vld [vmem:[%s9776_s14 + $0x674] sm:$0xf] }
 0xc84   : > { %v9345_v59 = vld [vmem:[%s9776_s14 + $0x6d4] sm:$0xf] }
 0xc85   : > { %v4212_v16 = vmul.f32 1.442695, %v4210_v21  ;;  %v4214_v24 = vmul.f32 1.442695, %v4211_v40  ;;  %v8407_v21 = vld [vmem:[%s9776_s14 + $0x678] sm:$0xf0]  ;;  %v8458_v10 = vor.u32 %v9345_v59, %v8455_v27 }
 0xc86   : > { %4642 = vmatpush.bf16.msra.mxu0 %v8350_v44  ;;  %v9349_v40 = vld [vmem:[%s9776_s14 + $0x6f4] sm:$0xf]  ;;  %v8410_v3 = vor.u32 %v9333_v19, %v8407_v21  ;;  %v8383_v44 = vld [vmem:[%s9776_s14 + $0x648] sm:$0xf0]  ;;  %v8439_v21 = vld [vmem:[%s9776_s14 + $0x6b8] sm:$0xf0] }
 0xc87   : > { %9550 = vpow2.f32 %v4212_v16  ;;  %4655 = vmatpush.bf16.msra.mxu1 %v8414_v29  ;;  %v8474_v16 = vor.u32 %v9349_v40, %v8471_v34  ;;  %v8447_v29 = vld [vmem:[%s9776_s14 + $0x6c8] sm:$0xf0]  ;;  %v9323_v34 = vld [vmem:[%s9776_s14 + $0x624] sm:$0xf] }
 0xc88   : > { %9552 = vpow2.f32 %v4214_v24  ;;  %v9331_v24 = vld [vmem:[%s9776_s14 + $0x664] sm:$0xf] }
 0xc89   : > { %4643 = vmatmul.bf16.vlgmr.msra.gmra.mxu0 %v9848_v35 }
 0xc8a   : > { %4656 = vmatmul.bf16.vlgmr.msra.gmra.mxu1 %v9850_v36 }
 0xc8d   : > { %v9551_v2 = vpop.eup %9550 }
 0xc8e   : > { %v9553_v49 = vpop.eup %9552  ;;  %v4216_v48 = vadd.f32 1.0, %v9551_v2 }
 0xc8f   : > { %v4217_v14 = vadd.f32 1.0, %v9553_v49  ;;  %v8450_v49 = vor.u32 %v9343_v31, %v8447_v29  ;;  %v11730_v29 = vld [vmem:[%s13982_s5 + $0x18] sm:$0xff] }
 0xc90   : > { %9554 = vrcp.f32 %v4216_v48  ;;  %v8375_v48 = vld [vmem:[%s9776_s14 + $0x638] sm:$0xf0] }
 0xc91   : > { %9556 = vrcp.f32 %v4217_v14  ;;  %v9341_v14 = vld [vmem:[%s9776_s14 + $0x6b4] sm:$0xf] }
 0xc92   : > { %v8442_v40 = vor.u32 %v9341_v14, %v8439_v21  ;;  %v11752_v21 = vld [vmem:[%s13982_s5 + $0x28] sm:$0xff] }
 0xc96   : > { %v9555_v25 = vpop.eup %9554 }
 0xc97   : > { %v9557_v62 = vpop.eup %9556  ;;  %v4220_v11 = vmul.f32 %v11330_v58, %v9555_v25  ;;  %v8402_v58 = vor.u32 %v9331_v24, %v8399_v23  ;;  %v9339_v25 = vld [vmem:[%s9776_s14 + $0x6a4] sm:$0xf]  ;;  %v9337_v24 = vld [vmem:[%s9776_s14 + $0x694] sm:$0xf] }
 0xc98   : > { %v4221_v51 = vmul.f32 %v11334_v53, %v9557_v62  ;;  %v8466_v53 = vor.u32 %v9347_v1, %v8463_v0  ;;  %v9319_v0 = vld [vmem:[%s9776_s14 + $0x604] sm:$0xf] }
 0xc99   : > { %4237 = vmatpush.msrb.mxu2 %v4220_v11  ;;  %v8431_v11 = vld [vmem:[%s9776_s14 + $0x6a8] sm:$0xf0] }
 0xc9a   : > { %4281 = vmatpush.msrb.mxu3 %v4221_v51  ;;  %8291 = vmatmul.msk.f32.vlgmr.msrb.gmra.mxu2 %vm686_vm0, %v11344_v50  ;;  %v9321_v51 = vld [vmem:[%s9776_s14 + $0x614] sm:$0xf] }
 0xc9b   : > { %8300 = vmatmul.msk.f32.vlgmr.msrb.gmra.mxu3 %vm686_vm0, %v11344_v50  ;;  %4661 = vmatpush.bf16.msra.mxu2 %v8410_v3  ;;  %v9327_v50 = vld [vmem:[%s9776_s14 + $0x644] sm:$0xf]  ;;  %v8434_v3 = vor.u32 %v9339_v25, %v8431_v11  ;;  %v11774_v11 = vld [vmem:[%s13982_s5 + $0x38] sm:$0xff] }
 0xc9c   : > { %4674 = vmatpush.bf16.msra.mxu3 %v8474_v16  ;;  %v8386_v2 = vor.u32 %v9327_v50, %v8383_v44  ;;  %v8359_v16 = vld [vmem:[%s9776_s14 + $0x618] sm:$0xf0]  ;;  %v11719_v44 = vld [vmem:[%s13982_s5 + $0x10] sm:$0xff] }
 0xc9d   : > { %v8362_v23 = vor.u32 %v9321_v51, %v8359_v16  ;;  %v11785_v16 = vld [vmem:[%s13982_s5 + $0x40] sm:$0xff] }
 0xc9f   : > { %4662 = vmatpush.bf16.msra.mxu2 %v8402_v58  ;;  %v8351_v58 = vld [vmem:[%s9776_s14 + $0x608] sm:$0xf0] }
 0xca0   : > { %4675 = vmatpush.bf16.msra.mxu3 %v8466_v53  ;;  %v9335_v53 = vld [vmem:[%s9776_s14 + $0x684] sm:$0xf]  ;;  %v8354_v15 = vor.u32 %v9319_v0, %v8351_v58 }
 0xca1   : > { %v8418_v59 = vor.u32 %v9335_v53, %v8415_v39 }
 0xca2   : > { %8292 = vmatmul.msk.f32.gmra.mxu2 %vm686_vm0, %v11357_v28 }
 0xca3   : > { %8301 = vmatmul.msk.f32.gmra.mxu3 %vm686_vm0, %v11357_v28  ;;  %4663 = vmatpush.bf16.msra.mxu2 %v8394_v52  ;;  %v9325_v28 = vld [vmem:[%s9776_s14 + $0x634] sm:$0xf] }
 0xca4   : > { %4676 = vmatpush.bf16.msra.mxu3 %v8458_v10  ;;  %v8378_v19 = vor.u32 %v9325_v28, %v8375_v48  ;;  %v11741_v48 = vld [vmem:[%s13982_s5 + $0x20] sm:$0xff] }
 0xca7   : > { %4664 = vmatpush.bf16.msra.mxu2 %v8386_v2 }
 0xca8   : > { %4677 = vmatpush.bf16.msra.mxu3 %v8450_v49 }
 0xcaa   : > { %8293 = vmatmul.msk.f32.gmra.mxu2 %vm686_vm0, %v11370_v55 }
 0xcab   : > { %8302 = vmatmul.msk.f32.gmra.mxu3 %vm686_vm0, %v11370_v55  ;;  %4665 = vmatpush.bf16.msra.mxu2 %v8378_v19  ;;  %v8367_v55 = vld [vmem:[%s9776_s14 + $0x628] sm:$0xf0] }
 0xcac   : > { %4678 = vmatpush.bf16.msra.mxu3 %v8442_v40  ;;  %v8370_v62 = vor.u32 %v9323_v34, %v8367_v55  ;;  %v11763_v55 = vld [vmem:[%s13982_s5 + $0x30] sm:$0xff] }
 0xcaf   : > { %4666 = vmatpush.bf16.msra.mxu2 %v8370_v62 }
 0xcb0   : > { %4679 = vmatpush.bf16.msra.mxu3 %v8434_v3 }
 0xcb2   : > { %8294 = vmatmul.msk.f32.gmra.mxu2 %vm686_vm0, %v11383_v42 }
 0xcb3   : > { %8303 = vmatmul.msk.f32.gmra.mxu3 %vm686_vm0, %v11383_v42  ;;  %v8423_v42 = vld [vmem:[%s9776_s14 + $0x698] sm:$0xf0]  ;;  %4667 = vmatpush.bf16.msra.mxu2 %v8362_v23 }
 0xcb4   : > { %v8426_v1 = vor.u32 %v9337_v24, %v8423_v42 }
 0xcb6   : > { %4680 = vmatpush.bf16.msra.mxu3 %v8426_v1 }
 0xcb7   : > { %4668 = vmatpush.bf16.msra.mxu2 %v8354_v15 }
 0xcba   : > { %8295 = vmatmul.msk.f32.gmra.mxu2 %vm686_vm0, %v11399_v46  ;;  %4681 = vmatpush.bf16.msra.mxu3 %v8418_v59 }
 0xcbb   : > { %8304 = vmatmul.msk.f32.gmra.mxu3 %vm686_vm0, %v11399_v46 }
 0xcc2   : > { %8296 = vmatmul.msk.f32.gmra.mxu2 %vm686_vm0, %v11413_v41 }
 0xcc3   : > { %8305 = vmatmul.msk.f32.gmra.mxu3 %vm686_vm0, %v11413_v41 }
 0xcca   : > { %8297 = vmatmul.msk.f32.gmra.mxu2 %vm686_vm0, %v11422_v54 }
 0xccb   : > { %8306 = vmatmul.msk.f32.gmra.mxu3 %vm686_vm0, %v11422_v54  ;;  %v11701_v54 = vld [vmem:[%s13982_s5] sm:$0xff] }
 0xcd2   : > { %8298 = vmatmul.msk.f32.gmra.mxu2 %vm686_vm0, %v11431_v26 }
 0xcd3   : > { %8307 = vmatmul.msk.f32.gmra.mxu3 %vm686_vm0, %v11431_v26 }
 0xcda   : > { %8299 = vmatmul.msk.f32.gmra.mxu2 %vm686_vm0, %v11440_v30 }
 0xcdb   : > { %8308 = vmatmul.msk.f32.gmra.mxu3 %vm686_vm0, %v11440_v30  ;;  %v11708_v30 = vld [vmem:[%s13982_s5 + $0x8] sm:$0xff] }
 0xce2   : > { %4669 = vmatmul.bf16.vlgmr.msra.gmra.mxu2 %v9848_v35 }
 0xce3   : > { %4682 = vmatmul.bf16.vlgmr.msra.gmra.mxu3 %v9850_v36 }
 0xd06   : > { %v4644_v46 = vpop.f32.mrf.mxu0 }
 0xd07   : > { %v4657_v41 = vpop.f32.mrf.mxu1 }
 0xd08   : > { %v4658_v27 = vadd.f32 %v4657_v41, %v4644_v46 }
 0xd0a   : > { %4702 = vmatpush.msrb.mxu0 %v4658_v27 }
 0xd0b   : > { %8475 = vmatmul.msk.f32.vlgmr.msrb.gmra.mxu0 %vm686_vm0, %v11701_v54 }
 0xd0e   : > { %v4646_v26 = vpop.f32.mrf.mxu0 }
 0xd0f   : > { %v4659_v52 = vpop.f32.mrf.mxu1 }
 0xd13   : > { %8476 = vmatmul.msk.f32.gmra.mxu0 %vm686_vm0, %v11708_v30 }
 0xd1b   : > { %8477 = vmatmul.msk.f32.gmra.mxu0 %vm686_vm0, %v11719_v44 }
 0xd1d   : > { %v11712_v10 = vpop.f32.mrf.mxu2 }
 0xd1e   : > { %14077 = vst [vmem:[#allocation87_spill] sm:$0xff] %v11712_v10  ;;  %v11714_v50 = vpop.f32.mrf.mxu3 }
 0xd1f   : > { %14078 = vst [vmem:[#allocation88_spill] sm:$0xff] %v11714_v50  ;;  %v8663_v50 = vld [vmem:[%s9776_s14 + $0x7e0] sm:$0xf] }
 0xd23   : > { %8478 = vmatmul.msk.f32.gmra.mxu0 %vm686_vm0, %v11730_v29 }
 0xd25   : > { %v11723_v31 = vpop.f32.mrf.mxu2 }
 0xd26   : > { %14079 = vst [vmem:[#allocation89_spill] sm:$0xff] %v11723_v31  ;;  %v11725_v2 = vpop.f32.mrf.mxu3  ;;  %v9366_v31 = vld [vmem:[%s9776_s14 + $0x774] sm:$0xf0] }
 0xd27   : > { %14080 = vst [vmem:[#allocation90_spill] sm:$0xff] %v11725_v2 }
 0xd2b   : > { %8479 = vmatmul.msk.f32.gmra.mxu0 %vm686_vm0, %v11741_v48 }
 0xd2d   : > { %v11734_v49 = vpop.f32.mrf.mxu2 }
 0xd2e   : > { %14081 = vst [vmem:[#allocation91_spill] sm:$0xff] %v11734_v49  ;;  %v11736_v28 = vpop.f32.mrf.mxu3 }
 0xd2f   : > { %14082 = vst [vmem:[#allocation92_spill] sm:$0xff] %v11736_v28 }
 0xd33   : > { %8480 = vmatmul.msk.f32.gmra.mxu0 %vm686_vm0, %v11752_v21 }
 0xd35   : > { %v11745_v14 = vpop.f32.mrf.mxu2 }
 0xd36   : > { %14083 = vst [vmem:[#allocation93_spill] sm:$0xff] %v11745_v14  ;;  %v11747_v19 = vpop.f32.mrf.mxu3 }
 0xd37   : > { %14084 = vst [vmem:[#allocation94_spill] sm:$0xff] %v11747_v19 }
 0xd3b   : > { %8481 = vmatmul.msk.f32.gmra.mxu0 %vm686_vm0, %v11763_v55 }
 0xd3d   : > { %v11756_v40 = vpop.f32.mrf.mxu2 }
 0xd3e   : > { %14085 = vst [vmem:[#allocation95_spill] sm:$0xff] %v11756_v40  ;;  %v11758_v34 = vpop.f32.mrf.mxu3 }
 0xd3f   : > { %14086 = vst [vmem:[#allocation96_spill] sm:$0xff] %v11758_v34 }
 0xd43   : > { %8482 = vmatmul.msk.f32.gmra.mxu0 %vm686_vm0, %v11774_v11 }
 0xd45   : > { %v11767_v25 = vpop.f32.mrf.mxu2 }
 0xd46   : > { %14087 = vst [vmem:[#allocation97_spill] sm:$0xff] %v11767_v25  ;;  %v11769_v62 = vpop.f32.mrf.mxu3 }
 0xd47   : > { %14088 = vst [vmem:[#allocation98_spill] sm:$0xff] %v11769_v62 }
 0xd4b   : > { %8483 = vmatmul.msk.f32.gmra.mxu0 %vm686_vm0, %v11785_v16 }
 0xd4d   : > { %v11778_v3 = vpop.f32.mrf.mxu2 }
 0xd4e   : > { %14089 = vst [vmem:[#allocation99_spill] sm:$0xff] %v11778_v3  ;;  %v11780_v51 = vpop.f32.mrf.mxu3 }
 0xd4f   : > { %14090 = vst [vmem:[#allocation100_spill] sm:$0xff] %v11780_v51  ;;  %v9398_v51 = vld [vmem:[%s9776_s14 + $0x874] sm:$0xf0] }
 0xd55   : > { %v11789_v24 = vpop.f32.mrf.mxu2 }
 0xd56   : > { %14091 = vst [vmem:[#allocation101_spill] sm:$0xff] %v11789_v24  ;;  %v11791_v23 = vpop.f32.mrf.mxu3 }
 0xd57   : > { %14092 = vst [vmem:[#allocation102_spill] sm:$0xff] %v11791_v23 }
 0xd5d   : > { %v11793_v42 = vpop.f32.mrf.mxu2 }
 0xd5e   : > { %14093 = vst [vmem:[#allocation103_spill] sm:$0xff] %v11793_v42  ;;  %v11795_v1 = vpop.f32.mrf.mxu3 }
 0xd5f   : > { %14094 = vst [vmem:[#allocation104_spill] sm:$0xff] %v11795_v1 }
 0xd65   : > { %v4670_v0 = vpop.f32.mrf.mxu2 }
 0xd66   : > { %v4683_v58 = vpop.f32.mrf.mxu3 }
 0xd67   : > { %v4684_v53 = vadd.f32 %v4683_v58, %v4670_v0 }
 0xd69   : > { %4746 = vmatpush.msrb.mxu1 %v4684_v53 }
 0xd6a   : > { %8484 = vmatmul.msk.f32.vlgmr.msrb.gmra.mxu1 %vm686_vm0, %v11701_v54 }
 0xd6d   : > { %v4672_v15 = vpop.f32.mrf.mxu2 }
 0xd6e   : > { %v4685_v39 = vpop.f32.mrf.mxu3 }
 0xd72   : > { %8485 = vmatmul.msk.f32.gmra.mxu1 %vm686_vm0, %v11708_v30 }
 0xd7a   : > { %8486 = vmatmul.msk.f32.gmra.mxu1 %vm686_vm0, %v11719_v44 }
 0xd82   : > { %8487 = vmatmul.msk.f32.gmra.mxu1 %vm686_vm0, %v11730_v29 }
 0xd88   : > { %v4704_v59 = vpop.f32.mrf.mxu0 }
 0xd89   : > { %4775 = vrot.lane.b32.xlu1 %v4704_v59, %s9702_s20 }
 0xd8a   : > { %8488 = vmatmul.msk.f32.gmra.mxu1 %vm686_vm0, %v11741_v48 }
 0xd90   : > { %v4707_v46 = vpop.f32.mrf.mxu0 }
 0xd91   : > { %4783 = vrot.lane.b32.xlu0 %v4707_v46, %s9703_s21 }
 0xd92   : > { %8489 = vmatmul.msk.f32.gmra.mxu1 %vm686_vm0, %v11752_v21 }
 0xd98   : > { %v4710_v41 = vpop.f32.mrf.mxu0 }
 0xd99   : > { %4793 = vrot.lane.b32.xlu2 %v4710_v41, %s9704_s22 }
 0xd9a   : > { %8490 = vmatmul.msk.f32.gmra.mxu1 %vm686_vm0, %v11763_v55 }
 0xda0   : > { %v4713_v27 = vpop.f32.mrf.mxu0 }
 0xda1   : > { %4803 = vrot.lane.b32.xlu1 %v4713_v27, %s9705_s23 }
 0xda2   : > { %8491 = vmatmul.msk.f32.gmra.mxu1 %vm686_vm0, %v11774_v11 }
 0xda8   : > { %v11819_v26 = vpop.f32.mrf.mxu0 }
 0xdaa   : > { %8492 = vmatmul.msk.f32.gmra.mxu1 %vm686_vm0, %v11785_v16 }
 0xdb0   : > { %v4719_v52 = vpop.f32.mrf.mxu0 }
 0xdb1   : > { %4815 = vrot.lane.b32.xlu0 %v4719_v52, %s9706_s24 }
 0xdb8   : > { %v4722_v0 = vpop.f32.mrf.mxu0 }
 0xdb9   : > { %4825 = vrot.lane.b32.xlu2 %v4722_v0, %s9708_s25 }
 0xdc0   : > { %v4725_v58 = vpop.f32.mrf.mxu0 }
 0xdc1   : > { %4835 = vrot.lane.b32.xlu1 %v4725_v58, %s9709_s26 }
 0xdc8   : > { %v4728_v52 = vpop.f32.mrf.mxu0 }
 0xde7   : > { %v4748_v53 = vpop.f32.mrf.mxu1 }
 0xde8   : > { %4777 = vrot.lane.b32.xlu2 %v4748_v53, %s9702_s20 }
 0xdef   : > { %v4751_v15 = vpop.f32.mrf.mxu1 }
 0xdf0   : > { %4785 = vrot.lane.b32.xlu1 %v4751_v15, %s9703_s21 }
 0xdf3   : > { %v4794_v15 = vpop.permute.xlu2 %4793 }
 0xdf7   : > { %v4754_v39 = vpop.f32.mrf.mxu1 }
 0xdf8   : > { %4795 = vrot.lane.b32.xlu0 %v4754_v39, %s9704_s22 }
 0xdfb   : > { %v4776_v53 = vpop.permute.xlu1 %4775 }
 0xdff   : > { %v4757_v59 = vpop.f32.mrf.mxu1 }
 0xe00   : > { %4805 = vrot.lane.b32.xlu2 %v4757_v59, %s9705_s23 }
 0xe03   : > { %v4784_v59 = vpop.permute.xlu0 %4783 }
 0xe07   : > { %v11828_v46 = vpop.f32.mrf.mxu1 }
 0xe0f   : > { %v4763_v41 = vpop.f32.mrf.mxu1 }
 0xe10   : > { %4817 = vrot.lane.b32.xlu1 %v4763_v41, %s9706_s24 }
 0xe13   : > { %v4804_v39 = vpop.permute.xlu1 %4803  ;;  %v4826_v34 = vpop.permute.xlu2 %4825 }
 0xe17   : > { %v4766_v27 = vpop.f32.mrf.mxu1 }
 0xe18   : > { %4827 = vrot.lane.b32.xlu0 %v4766_v27, %s9708_s25 }
 0xe1f   : > { %v4769_v0 = vpop.f32.mrf.mxu1 }
 0xe20   : > { %4837 = vrot.lane.b32.xlu2 %v4769_v0, %s9709_s26  ;;  %4845 = vrot.lane.b32.xlu0 %v4728_v52, %s9710_s27 }
 0xe23   : > { %v4816_v41 = vpop.permute.xlu0 %4815 }
 0xe27   : > { %v4772_v58 = vpop.f32.mrf.mxu1 }
 0xe28   : > { %4847 = vrot.lane.b32.xlu1 %v4772_v58, %s9710_s27 }
 0xe33   : > { %v11835_v40 = vpop.permute.xlu1 %4835 }
 0xe42   : > { %v4778_v1 = vpop.permute.xlu2 %4777 }
 0xe43   : > { %v4780_v0 = vsel %vm806_vm2, %v4778_v1, %v4776_v53  ;;  %v4779_v28 = vsel %vm806_vm2, %v4776_v53, %v4778_v1 }
 0xe44   : > { %v4781_v19 = vmul.f32 %v4780_v0, %v9988_v43  ;;  %v4782_v49 = vmul.f32 %v4779_v28, %v9992_v45 }
 0xe62   : > { %v4786_v24 = vpop.permute.xlu1 %4785 }
 0xe63   : > { %v4788_v62 = vsel %vm820_vm1, %v4786_v24, %v4784_v59  ;;  %v4787_v52 = vsel %vm820_vm1, %v4784_v59, %v4786_v24  ;;  %v4806_v24 = vpop.permute.xlu2 %4805 }
 0xe64   : > { %v4789_v23 = vmul.f32 %v4788_v62, %v9979_v33  ;;  %v4790_v25 = vmul.f32 %v4787_v52, %v9981_v37  ;;  %v4808_v62 = vsel %vm852_vm4, %v4806_v24, %v4804_v39 }
 0xe66   : > { %v4791_v1 = vadd.f32 %v4789_v23, %v4781_v19  ;;  %v4792_v53 = vadd.f32 %v4790_v25, %v4782_v49  ;;  %v8607_v23 = vld [vmem:[%s9776_s14 + $0x770] sm:$0xf] }
 0xe67   : > { %v8671_v49 = vld [vmem:[%s9776_s14 + $0x7f0] sm:$0xf] }
 0xe6a   : > { %v4796_v27 = vpop.permute.xlu0 %4795 }
 0xe6b   : > { %v4798_v58 = vsel %vm836_vm3, %v4796_v27, %v4794_v15  ;;  %v4797_v3 = vsel %vm836_vm3, %v4794_v15, %v4796_v27  ;;  %v4807_v15 = vsel %vm852_vm4, %v4804_v39, %v4806_v24  ;;  %v8608_v24 = vor.u32 %v9366_v31, %v8607_v23 }
 0xe6c   : > { %v4799_v59 = vmul.f32 %v4798_v58, %v10005_v60  ;;  %v4800_v2 = vmul.f32 %v4797_v3, %v10007_v61  ;;  %v4809_v58 = vmul.f32 %v4808_v62, %v10010_v63  ;;  %v4810_v3 = vmul.f32 %v4807_v15, %v10015_v4  ;;  %v9364_v15 = vld [vmem:[%s9776_s14 + $0x764] sm:$0xf0] }
 0xe6d   : > { %5282 = vmatpush.bf16.msra.mxu0 %v8608_v24 }
 0xe6e   : > { %v4801_v27 = vadd.f32 %v4799_v59, %v4791_v1  ;;  %v4802_v0 = vadd.f32 %v4800_v2, %v4792_v53  ;;  %v9382_v2 = vld [vmem:[%s9776_s14 + $0x7f4] sm:$0xf0]  ;;  %v8599_v53 = vld [vmem:[%s9776_s14 + $0x760] sm:$0xf] }
 0xe6f   : > { %v8672_v62 = vor.u32 %v9382_v2, %v8671_v49 }
 0xe70   : > { %v4811_v25 = vadd.f32 %v4809_v58, %v4801_v27  ;;  %v4812_v59 = vadd.f32 %v4810_v3, %v4802_v0  ;;  %v8600_v27 = vor.u32 %v9364_v15, %v8599_v53  ;;  %v8583_v15 = vld [vmem:[%s9776_s14 + $0x740] sm:$0xf] }
 0xe71   : > { %5295 = vmatpush.bf16.msra.mxu1 %v8672_v62 }
 0xe72   : > { %v4813_v58 = vadd.f32 %v4811_v25, %v11819_v26  ;;  %5283 = vmatpush.bf16.msra.mxu0 %v8600_v27  ;;  %v8655_v26 = vld [vmem:[%s9776_s14 + $0x7d0] sm:$0xf]  ;;  %v8647_v27 = vld [vmem:[%s9776_s14 + $0x7c0] sm:$0xf] }
 0xe7a   : > { %v4838_v0 = vpop.permute.xlu2 %4837 }
 0xe7b   : > { %v4839_v23 = vsel %vm902_vm7, %v11835_v40, %v4838_v0 }
 0xe82   : > { %v4818_v52 = vpop.permute.xlu1 %4817 }
 0xe83   : > { %v4819_v19 = vsel %vm870_vm5, %v4816_v41, %v4818_v52  ;;  %v4820_v39 = vsel %vm870_vm5, %v4818_v52, %v4816_v41  ;;  %v9380_v41 = vld [vmem:[%s9776_s14 + $0x7e4] sm:$0xf0] }
 0xe84   : > { %v4821_v10 = vmul.f32 %v4819_v19, %v10031_v20  ;;  %v4822_v31 = vmul.f32 %v4820_v39, %v10033_v22  ;;  %v8664_v52 = vor.u32 %v9380_v41, %v8663_v50  ;;  %v4814_v19 = vadd.f32 %v4812_v59, %v11828_v46  ;;  %v8591_v50 = vld [vmem:[%s9776_s14 + $0x750] sm:$0xf]  ;;  %v9362_v39 = vld [vmem:[%s9776_s14 + $0x754] sm:$0xf0] }
 0xe85   : > { %v4840_v46 = vsel %vm902_vm7, %v4838_v0, %v11835_v40  ;;  %v9360_v40 = vld [vmem:[%s9776_s14 + $0x744] sm:$0xf0] }
 0xe86   : > { %v4824_v49 = vadd.f32 %v4822_v31, %v4814_v19  ;;  %5296 = vmatpush.bf16.msra.mxu1 %v8664_v52  ;;  %v4842_v62 = vmul.f32 %v4840_v46, %v10061_v56  ;;  %v8584_v0 = vor.u32 %v9360_v40, %v8583_v15  ;;  %v9358_v19 = vld [vmem:[%s9776_s14 + $0x734] sm:$0xf0]  ;;  %v8631_v15 = vld [vmem:[%s9776_s14 + $0x7a0] sm:$0xf]  ;;  %v9372_v40 = vld [vmem:[%s9776_s14 + $0x7a4] sm:$0xf0] }
 0xe8a   : > { %v4828_v28 = vpop.permute.xlu0 %4827 }
 0xe8b   : > { %v4829_v1 = vsel %vm886_vm6, %v4826_v34, %v4828_v28  ;;  %v4830_v42 = vsel %vm886_vm6, %v4828_v28, %v4826_v34  ;;  %v4823_v28 = vadd.f32 %v4821_v10, %v4813_v58  ;;  %v9378_v10 = vld [vmem:[%s9776_s14 + $0x7d4] sm:$0xf0]  ;;  %v9376_v58 = vld [vmem:[%s9776_s14 + $0x7c4] sm:$0xf0] }
 0xe8c   : > { %v4831_v3 = vmul.f32 %v4829_v1, %v10047_v32  ;;  %v4832_v34 = vmul.f32 %v4830_v42, %v10051_v38  ;;  %v8592_v42 = vor.u32 %v9362_v39, %v8591_v50  ;;  %v8656_v59 = vor.u32 %v9378_v10, %v8655_v26  ;;  %v8639_v50 = vld [vmem:[%s9776_s14 + $0x7b0] sm:$0xf]  ;;  %v9374_v39 = vld [vmem:[%s9776_s14 + $0x7b4] sm:$0xf0] }
 0xe8d   : > { %v4841_v1 = vmul.f32 %v4839_v23, %v10058_v47 }
 0xe8e   : > { %v4833_v25 = vadd.f32 %v4831_v3, %v4823_v28  ;;  %v4834_v24 = vadd.f32 %v4832_v34, %v4824_v49  ;;  %5284 = vmatpush.bf16.msra.mxu0 %v8592_v42  ;;  %5297 = vmatpush.bf16.msra.mxu1 %v8656_v59  ;;  %v8575_v3 = vld [vmem:[%s9776_s14 + $0x730] sm:$0xf]  ;;  %v8648_v49 = vor.u32 %v9376_v58, %v8647_v27 }
 0xe8f   : > { %v8576_v26 = vor.u32 %v9358_v19, %v8575_v3  ;;  %v8640_v42 = vor.u32 %v9374_v39, %v8639_v50  ;;  %v8559_v27 = vld [vmem:[%s9776_s14 + $0x710] sm:$0xf]  ;;  %v9370_v19 = vld [vmem:[%s9776_s14 + $0x794] sm:$0xf0]  ;;  %v9368_v39 = vld [vmem:[%s9776_s14 + $0x784] sm:$0xf0] }
 0xe90   : > { %v4843_v41 = vadd.f32 %v4841_v1, %v4833_v25  ;;  %v4844_v34 = vadd.f32 %v4842_v62, %v4834_v24  ;;  %v8567_v1 = vld [vmem:[%s9776_s14 + $0x720] sm:$0xf]  ;;  %v9356_v62 = vld [vmem:[%s9776_s14 + $0x724] sm:$0xf0]  ;;  %v8623_v3 = vld [vmem:[%s9776_s14 + $0x790] sm:$0xf] }
 0xe92   : > { %v4846_v2 = vpop.permute.xlu0 %4845  ;;  %5285 = vmatpush.bf16.msra.mxu0 %v8584_v0  ;;  %5298 = vmatpush.bf16.msra.mxu1 %v8648_v49  ;;  %v9354_v0 = vld [vmem:[%s9776_s14 + $0x714] sm:$0xf0]  ;;  %v8615_v49 = vld [vmem:[%s9776_s14 + $0x780] sm:$0xf] }
 0xe93   : > { %v8560_v58 = vor.u32 %v9354_v0, %v8559_v27  ;;  %v9363_v0 = vld [vmem:[%s9776_s14 + $0x764] sm:$0xf] }
 0xe96   : > { %5286 = vmatpush.bf16.msra.mxu0 %v8576_v26  ;;  %5299 = vmatpush.bf16.msra.mxu1 %v8640_v42 }
 0xe9a   : > { %v4848_v53 = vpop.permute.xlu1 %4847 }
 0xe9b   : > { %v4849_v31 = vsel %vm918_vm8, %v4846_v2, %v4848_v53  ;;  %v4850_v52 = vsel %vm918_vm8, %v4848_v53, %v4846_v2  ;;  %v8568_v53 = vor.u32 %v9356_v62, %v8567_v1  ;;  %v8673_v1 = vld [vmem:[%s9776_s14 + $0x7f8] sm:$0xf0] }
 0xe9c   : > { %v4851_v28 = vmul.f32 %v4849_v31, %v10079_v12  ;;  %v4852_v23 = vmul.f32 %v4850_v52, %v10081_v13  ;;  %v8632_v52 = vor.u32 %v9372_v40, %v8631_v15  ;;  %v11930_v15 = vld [vmem:[%s10117_s12] sm:$0xff] }
 0xe9d   : > { %5287 = vmatpush.bf16.msra.mxu0 %v8568_v53 }
 0xe9e   : > { %v4853_v46 = vadd.f32 %v4851_v28, %v4843_v41  ;;  %v4854_v25 = vadd.f32 %v4852_v23, %v4844_v34  ;;  %5300 = vmatpush.bf16.msra.mxu1 %v8632_v52  ;;  %v8624_v34 = vor.u32 %v9370_v19, %v8623_v3  ;;  %v8551_v28 = vld [vmem:[%s9776_s14 + $0x700] sm:$0xf]  ;;  %v9352_v23 = vld [vmem:[%s9776_s14 + $0x704] sm:$0xf0]  ;;  %v9379_v3 = vld [vmem:[%s9776_s14 + $0x7e4] sm:$0xf] }
 0xe9f   : > { %v8552_v50 = vor.u32 %v9352_v23, %v8551_v28  ;;  %v8665_v19 = vld [vmem:[%s9776_s14 + $0x7e8] sm:$0xf0] }
 0xea0   : > { %v4855_v10 = vadd.f32 %v4853_v46, %v10097_v57  ;;  %v4856_v24 = vadd.f32 %v4854_v25, %v10097_v57  ;;  %v8616_v46 = vor.u32 %v9368_v39, %v8615_v49  ;;  %v8668_v23 = vor.u32 %v9379_v3, %v8665_v19  ;;  %v9361_v49 = vld [vmem:[%s9776_s14 + $0x754] sm:$0xf]  ;;  %v11983_v3 = vld [vmem:[%s13984_s7 + $0x18] sm:$0xff]  ;;  %v9355_v19 = vld [vmem:[%s9776_s14 + $0x724] sm:$0xf] }
 0xea1   : > { %5288 = vmatpush.bf16.msra.mxu0 %v8560_v58  ;;  %v8601_v58 = vld [vmem:[%s9776_s14 + $0x768] sm:$0xf0]  ;;  %v9377_v39 = vld [vmem:[%s9776_s14 + $0x7d4] sm:$0xf] }
 0xea2   : > { %v4857_v2 = vsub.f32 0.0, %v4855_v10  ;;  %v4858_v59 = vsub.f32 0.0, %v4856_v24  ;;  %5301 = vmatpush.bf16.msra.mxu1 %v8624_v34  ;;  %v9365_v24 = vld [vmem:[%s9776_s14 + $0x774] sm:$0xf]  ;;  %v11944_v34 = vld [vmem:[%s13984_s7] sm:$0xff]  ;;  %v8604_v28 = vor.u32 %v9363_v0, %v8601_v58 }
 0xea3   : > { %v8641_v0 = vld [vmem:[%s9776_s14 + $0x7b8] sm:$0xf0] }
 0xea4   : > { %v4859_v41 = vmul.f32 1.442695, %v4857_v2  ;;  %v4861_v31 = vmul.f32 1.442695, %v4858_v59  ;;  %v8609_v2 = vld [vmem:[%s9776_s14 + $0x778] sm:$0xf0] }
 0xea5   : > { %5289 = vmatpush.bf16.msra.mxu0 %v8552_v50  ;;  %v9381_v59 = vld [vmem:[%s9776_s14 + $0x7f4] sm:$0xf]  ;;  %v8612_v27 = vor.u32 %v9365_v24, %v8609_v2  ;;  %v8593_v50 = vld [vmem:[%s9776_s14 + $0x758] sm:$0xf0]  ;;  %v8585_v24 = vld [vmem:[%s9776_s14 + $0x748] sm:$0xf0] }
 0xea6   : > { %9558 = vpow2.f32 %v4859_v41  ;;  %5302 = vmatpush.bf16.msra.mxu1 %v8616_v46  ;;  %v11934_v41 = vld [vmem:[%s10117_s12 + $0x8] sm:$0xff]  ;;  %v8676_v52 = vor.u32 %v9381_v59, %v8673_v1  ;;  %v8596_v46 = vor.u32 %v9361_v49, %v8593_v50  ;;  %v9375_v2 = vld [vmem:[%s9776_s14 + $0x7c4] sm:$0xf] }
 0xea7   : > { %9560 = vpow2.f32 %v4861_v31  ;;  %v8649_v1 = vld [vmem:[%s9776_s14 + $0x7c8] sm:$0xf0] }
 0xea8   : > { %5290 = vmatmul.bf16.vlgmr.msra.gmra.mxu0 %v9848_v35  ;;  %v8633_v50 = vld [vmem:[%s9776_s14 + $0x7a8] sm:$0xf0] }
 0xea9   : > { %5303 = vmatmul.bf16.vlgmr.msra.gmra.mxu1 %v9850_v36 }
 0xeac   : > { %v9559_v26 = vpop.eup %9558 }
 0xead   : > { %v9561_v25 = vpop.eup %9560  ;;  %v4863_v42 = vadd.f32 1.0, %v9559_v26  ;;  %v8657_v26 = vld [vmem:[%s9776_s14 + $0x7d8] sm:$0xf0] }
 0xeae   : > { %v4864_v10 = vadd.f32 1.0, %v9561_v25  ;;  %v8660_v25 = vor.u32 %v9377_v39, %v8657_v26  ;;  %v9353_v26 = vld [vmem:[%s9776_s14 + $0x714] sm:$0xf] }
 0xeaf   : > { %9562 = vrcp.f32 %v4863_v42  ;;  %v11957_v42 = vld [vmem:[%s13984_s7 + $0x8] sm:$0xff] }
 0xeb0   : > { %9564 = vrcp.f32 %v4864_v10  ;;  %v9359_v10 = vld [vmem:[%s9776_s14 + $0x744] sm:$0xf] }
 0xeb1   : > { %v8588_v59 = vor.u32 %v9359_v10, %v8585_v24  ;;  %v11999_v10 = vld [vmem:[%s13984_s7 + $0x20] sm:$0xff] }
 0xeb5   : > { %v9563_v62 = vpop.eup %9562 }
 0xeb6   : > { %v9565_v53 = vpop.eup %9564  ;;  %v4867_v40 = vmul.f32 %v11930_v15, %v9563_v62  ;;  %v8652_v62 = vor.u32 %v9375_v2, %v8649_v1  ;;  %v8625_v2 = vld [vmem:[%s9776_s14 + $0x798] sm:$0xf0]  ;;  %v9351_v1 = vld [vmem:[%s9776_s14 + $0x704] sm:$0xf] }
 0xeb7   : > { %v4868_v31 = vmul.f32 %v11934_v41, %v9565_v53  ;;  %v11970_v53 = vld [vmem:[%s13984_s7 + $0x10] sm:$0xff] }
 0xeb8   : > { %4884 = vmatpush.msrb.mxu2 %v4867_v40  ;;  %v9357_v40 = vld [vmem:[%s9776_s14 + $0x734] sm:$0xf] }
 0xeb9   : > { %4928 = vmatpush.msrb.mxu3 %v4868_v31  ;;  %8493 = vmatmul.msk.f32.vlgmr.msrb.gmra.mxu2 %vm686_vm0, %v11944_v34  ;;  %v9373_v31 = vld [vmem:[%s9776_s14 + $0x7b4] sm:$0xf] }
 0xeba   : > { %8502 = vmatmul.msk.f32.vlgmr.msrb.gmra.mxu3 %vm686_vm0, %v11944_v34  ;;  %5308 = vmatpush.bf16.msra.mxu2 %v8612_v27  ;;  %v8577_v27 = vld [vmem:[%s9776_s14 + $0x738] sm:$0xf0]  ;;  %v8644_v58 = vor.u32 %v9373_v31, %v8641_v0  ;;  %v8617_v31 = vld [vmem:[%s9776_s14 + $0x788] sm:$0xf0] }
 0xebb   : > { %5321 = vmatpush.bf16.msra.mxu3 %v8676_v52  ;;  %v8580_v52 = vor.u32 %v9357_v40, %v8577_v27  ;;  %v9367_v40 = vld [vmem:[%s9776_s14 + $0x784] sm:$0xf]  ;;  %v12013_v0 = vld [vmem:[%s13984_s7 + $0x28] sm:$0xff] }
 0xebe   : > { %5309 = vmatpush.bf16.msra.mxu2 %v8604_v28  ;;  %v8569_v28 = vld [vmem:[%s9776_s14 + $0x728] sm:$0xf0] }
 0xebf   : > { %5322 = vmatpush.bf16.msra.mxu3 %v8668_v23  ;;  %v9371_v23 = vld [vmem:[%s9776_s14 + $0x7a4] sm:$0xf]  ;;  %v8572_v49 = vor.u32 %v9355_v19, %v8569_v28  ;;  %v12031_v19 = vld [vmem:[%s13984_s7 + $0x38] sm:$0xff] }
 0xec0   : > { %v8636_v39 = vor.u32 %v9371_v23, %v8633_v50  ;;  %v12040_v28 = vld [vmem:[%s13984_s7 + $0x40] sm:$0xff] }
 0xec1   : > { %8494 = vmatmul.msk.f32.gmra.mxu2 %vm686_vm0, %v11957_v42 }
 0xec2   : > { %8503 = vmatmul.msk.f32.gmra.mxu3 %vm686_vm0, %v11957_v42  ;;  %5310 = vmatpush.bf16.msra.mxu2 %v8596_v46  ;;  %v8561_v46 = vld [vmem:[%s9776_s14 + $0x718] sm:$0xf0] }
 0xec3   : > { %5323 = vmatpush.bf16.msra.mxu3 %v8660_v25  ;;  %v9369_v25 = vld [vmem:[%s9776_s14 + $0x794] sm:$0xf]  ;;  %v8564_v24 = vor.u32 %v9353_v26, %v8561_v46 }
 0xec6   : > { %5311 = vmatpush.bf16.msra.mxu2 %v8588_v59  ;;  %v8628_v59 = vor.u32 %v9369_v25, %v8625_v2 }
 0xec7   : > { %5324 = vmatpush.bf16.msra.mxu3 %v8652_v62  ;;  %v8553_v62 = vld [vmem:[%s9776_s14 + $0x708] sm:$0xf0] }
 0xec8   : > { %v8556_v27 = vor.u32 %v9351_v1, %v8553_v62 }
 0xec9   : > { %8495 = vmatmul.msk.f32.gmra.mxu2 %vm686_vm0, %v11970_v53 }
 0xeca   : > { %8504 = vmatmul.msk.f32.gmra.mxu3 %vm686_vm0, %v11970_v53  ;;  %5312 = vmatpush.bf16.msra.mxu2 %v8580_v52  ;;  %v8620_v52 = vor.u32 %v9367_v40, %v8617_v31 }
 0xecb   : > { %5325 = vmatpush.bf16.msra.mxu3 %v8644_v58  ;;  %v12022_v58 = vld [vmem:[%s13984_s7 + $0x30] sm:$0xff] }
 0xece   : > { %5313 = vmatpush.bf16.msra.mxu2 %v8572_v49 }
 0xecf   : > { %5326 = vmatpush.bf16.msra.mxu3 %v8636_v39 }
 0xed1   : > { %8496 = vmatmul.msk.f32.gmra.mxu2 %vm686_vm0, %v11983_v3 }
 0xed2   : > { %8505 = vmatmul.msk.f32.gmra.mxu3 %vm686_vm0, %v11983_v3  ;;  %5314 = vmatpush.bf16.msra.mxu2 %v8564_v24 }
 0xed3   : > { %5327 = vmatpush.bf16.msra.mxu3 %v8628_v59 }
 0xed6   : > { %5315 = vmatpush.bf16.msra.mxu2 %v8556_v27 }
 0xed7   : > { %5328 = vmatpush.bf16.msra.mxu3 %v8620_v52 }
 0xed9   : > { %8497 = vmatmul.msk.f32.gmra.mxu2 %vm686_vm0, %v11999_v10 }
 0xeda   : > { %8506 = vmatmul.msk.f32.gmra.mxu3 %vm686_vm0, %v11999_v10 }
 0xee1   : > { %8498 = vmatmul.msk.f32.gmra.mxu2 %vm686_vm0, %v12013_v0 }
 0xee2   : > { %8507 = vmatmul.msk.f32.gmra.mxu3 %vm686_vm0, %v12013_v0 }
 0xee9   : > { %8499 = vmatmul.msk.f32.gmra.mxu2 %vm686_vm0, %v12022_v58 }
 0xeea   : > { %8508 = vmatmul.msk.f32.gmra.mxu3 %vm686_vm0, %v12022_v58 }
 0xef1   : > { %8500 = vmatmul.msk.f32.gmra.mxu2 %vm686_vm0, %v12031_v19 }
 0xef2   : > { %8509 = vmatmul.msk.f32.gmra.mxu3 %vm686_vm0, %v12031_v19 }
 0xef9   : > { %8501 = vmatmul.msk.f32.gmra.mxu2 %vm686_vm0, %v12040_v28 }
 0xefa   : > { %8510 = vmatmul.msk.f32.gmra.mxu3 %vm686_vm0, %v12040_v28 }
 0xf01   : > { %5316 = vmatmul.bf16.vlgmr.msra.gmra.mxu2 %v9848_v35 }
 0xf02   : > { %5329 = vmatmul.bf16.vlgmr.msra.gmra.mxu3 %v9850_v36 }
 0xf25   : > { %v5291_v23 = vpop.f32.mrf.mxu0 }
 0xf26   : > { %v5304_v49 = vpop.f32.mrf.mxu1 }
 0xf27   : > { %v5305_v50 = vadd.f32 %v5304_v49, %v5291_v23 }
 0xf29   : > { %5349 = vmatpush.msrb.mxu0 %v5305_v50 }
 0xf2a   : > { %8677 = vmatmul.msk.f32.vlgmr.msrb.gmra.mxu0 %vm686_vm0, %v11701_v54 }
 0xf2d   : > { %v5293_v39 = vpop.f32.mrf.mxu0 }
 0xf2e   : > { %v5306_v26 = vpop.f32.mrf.mxu1 }
 0xf32   : > { %8678 = vmatmul.msk.f32.gmra.mxu0 %vm686_vm0, %v11708_v30 }
 0xf3a   : > { %8679 = vmatmul.msk.f32.gmra.mxu0 %vm686_vm0, %v11719_v44 }
 0xf3c   : > { %v12052_v46 = vpop.f32.mrf.mxu2 }
 0xf3d   : > { %14095 = vst [vmem:[#allocation105_spill] sm:$0xff] %v12052_v46  ;;  %v12054_v25 = vpop.f32.mrf.mxu3 }
 0xf3e   : > { %14096 = vst [vmem:[#allocation106_spill] sm:$0xff] %v12054_v25 }
 0xf42   : > { %8680 = vmatmul.msk.f32.gmra.mxu0 %vm686_vm0, %v11730_v29 }
 0xf44   : > { %v12058_v24 = vpop.f32.mrf.mxu2 }
 0xf45   : > { %14097 = vst [vmem:[#allocation107_spill] sm:$0xff] %v12058_v24  ;;  %v12060_v2 = vpop.f32.mrf.mxu3 }
 0xf46   : > { %14098 = vst [vmem:[#allocation108_spill] sm:$0xff] %v12060_v2 }
 0xf4a   : > { %8681 = vmatmul.msk.f32.gmra.mxu0 %vm686_vm0, %v11741_v48 }
 0xf4c   : > { %v12064_v59 = vpop.f32.mrf.mxu2 }
 0xf4d   : > { %14099 = vst [vmem:[#allocation109_spill] sm:$0xff] %v12064_v59  ;;  %v12066_v1 = vpop.f32.mrf.mxu3 }
 0xf4e   : > { %14100 = vst [vmem:[#allocation110_spill] sm:$0xff] %v12066_v1 }
 0xf52   : > { %8682 = vmatmul.msk.f32.gmra.mxu0 %vm686_vm0, %v11752_v21 }
 0xf54   : > { %v12070_v62 = vpop.f32.mrf.mxu2 }
 0xf55   : > { %14101 = vst [vmem:[#allocation111_spill] sm:$0xff] %v12070_v62  ;;  %v12072_v40 = vpop.f32.mrf.mxu3 }
 0xf56   : > { %14102 = vst [vmem:[#allocation112_spill] sm:$0xff] %v12072_v40 }
 0xf5a   : > { %8683 = vmatmul.msk.f32.gmra.mxu0 %vm686_vm0, %v11763_v55 }
 0xf5c   : > { %v12076_v27 = vpop.f32.mrf.mxu2 }
 0xf5d   : > { %14103 = vst [vmem:[#allocation113_spill] sm:$0xff] %v12076_v27  ;;  %v12078_v31 = vpop.f32.mrf.mxu3 }
 0xf5e   : > { %14104 = vst [vmem:[#allocation114_spill] sm:$0xff] %v12078_v31 }
 0xf62   : > { %8684 = vmatmul.msk.f32.gmra.mxu0 %vm686_vm0, %v11774_v11 }
 0xf64   : > { %v12082_v52 = vpop.f32.mrf.mxu2 }
 0xf65   : > { %14105 = vst [vmem:[#allocation115_spill] sm:$0xff] %v12082_v52  ;;  %v12084_v23 = vpop.f32.mrf.mxu3 }
 0xf66   : > { %14106 = vst [vmem:[#allocation116_spill] sm:$0xff] %v12084_v23 }
 0xf6a   : > { %8685 = vmatmul.msk.f32.gmra.mxu0 %vm686_vm0, %v11785_v16 }
 0xf6c   : > { %v12088_v49 = vpop.f32.mrf.mxu2 }
 0xf6d   : > { %14107 = vst [vmem:[#allocation117_spill] sm:$0xff] %v12088_v49  ;;  %v12090_v50 = vpop.f32.mrf.mxu3 }
 0xf6e   : > { %14108 = vst [vmem:[#allocation118_spill] sm:$0xff] %v12090_v50 }
 0xf74   : > { %v12094_v39 = vpop.f32.mrf.mxu2 }
 0xf75   : > { %14109 = vst [vmem:[#allocation119_spill] sm:$0xff] %v12094_v39  ;;  %v12096_v26 = vpop.f32.mrf.mxu3 }
 0xf76   : > { %14110 = vst [vmem:[#allocation120_spill] sm:$0xff] %v12096_v26 }
 0xf7c   : > { %v12098_v31 = vpop.f32.mrf.mxu2 }
 0xf7d   : > { %14111 = vst [vmem:[#allocation121_spill] sm:$0xff] %v12098_v31  ;;  %v12100_v27 = vpop.f32.mrf.mxu3 }
 0xf7e   : > { %14112 = vst [vmem:[#allocation122_spill] sm:$0xff] %v12100_v27 }
 0xf84   : > { %v5317_v1 = vpop.f32.mrf.mxu2 }
 0xf85   : > { %v5330_v23 = vpop.f32.mrf.mxu3 }
 0xf86   : > { %v5331_v52 = vadd.f32 %v5330_v23, %v5317_v1 }
 0xf88   : > { %5393 = vmatpush.msrb.mxu1 %v5331_v52 }
 0xf89   : > { %8686 = vmatmul.msk.f32.vlgmr.msrb.gmra.mxu1 %vm686_vm0, %v11701_v54 }
 0xf8c   : > { %v5319_v49 = vpop.f32.mrf.mxu2 }
 0xf8d   : > { %v5332_v40 = vpop.f32.mrf.mxu3 }
 0xf91   : > { %8687 = vmatmul.msk.f32.gmra.mxu1 %vm686_vm0, %v11708_v30 }
 0xf99   : > { %8688 = vmatmul.msk.f32.gmra.mxu1 %vm686_vm0, %v11719_v44 }
 0xfa1   : > { %8689 = vmatmul.msk.f32.gmra.mxu1 %vm686_vm0, %v11730_v29 }
 0xfa7   : > { %v5351_v26 = vpop.f32.mrf.mxu0 }
 0xfa8   : > { %5422 = vrot.lane.b32.xlu2 %v5351_v26, %s9702_s20 }
 0xfa9   : > { %8690 = vmatmul.msk.f32.gmra.mxu1 %vm686_vm0, %v11741_v48 }
 0xfaf   : > { %v5354_v54 = vpop.f32.mrf.mxu0 }
 0xfb0   : > { %5430 = vrot.lane.b32.xlu1 %v5354_v54, %s9703_s21 }
 0xfb1   : > { %8691 = vmatmul.msk.f32.gmra.mxu1 %vm686_vm0, %v11752_v21 }
 0xfb7   : > { %v5357_v30 = vpop.f32.mrf.mxu0 }
 0xfb8   : > { %5440 = vrot.lane.b32.xlu0 %v5357_v30, %s9704_s22 }
 0xfb9   : > { %8692 = vmatmul.msk.f32.gmra.mxu1 %vm686_vm0, %v11763_v55 }
 0xfbf   : > { %v5360_v44 = vpop.f32.mrf.mxu0 }
 0xfc0   : > { %5450 = vrot.lane.b32.xlu2 %v5360_v44, %s9705_s23 }
 0xfc1   : > { %8693 = vmatmul.msk.f32.gmra.mxu1 %vm686_vm0, %v11774_v11 }
 0xfc7   : > { %v12124_v29 = vpop.f32.mrf.mxu0 }
 0xfc9   : > { %8694 = vmatmul.msk.f32.gmra.mxu1 %vm686_vm0, %v11785_v16 }
 0xfcf   : > { %v5366_v48 = vpop.f32.mrf.mxu0 }
 0xfd0   : > { %5462 = vrot.lane.b32.xlu1 %v5366_v48, %s9706_s24 }
 0xfd7   : > { %v5369_v21 = vpop.f32.mrf.mxu0 }
 0xfd8   : > { %5472 = vrot.lane.b32.xlu0 %v5369_v21, %s9708_s25 }
 0xfdf   : > { %v5372_v55 = vpop.f32.mrf.mxu0 }
 0xfe0   : > { %5482 = vrot.lane.b32.xlu2 %v5372_v55, %s9709_s26 }
 0xfe7   : > { %v5375_v26 = vpop.f32.mrf.mxu0 }
0x1002   : > { %v5423_v44 = vpop.permute.xlu2 %5422 }
0x1006   : > { %v5395_v1 = vpop.f32.mrf.mxu1 }
0x1007   : > { %5424 = vrot.lane.b32.xlu0 %v5395_v1, %s9702_s20 }
0x100e   : > { %v5398_v11 = vpop.f32.mrf.mxu1 }
0x100f   : > { %5432 = vrot.lane.b32.xlu2 %v5398_v11, %s9703_s21 }
0x1016   : > { %v5401_v40 = vpop.f32.mrf.mxu1 }
0x1017   : > { %5442 = vrot.lane.b32.xlu1 %v5401_v40, %s9704_s22 }
0x101a   : > { %v5451_v21 = vpop.permute.xlu2 %5450 }
0x101e   : > { %v5404_v16 = vpop.f32.mrf.mxu1 }
0x101f   : > { %5452 = vrot.lane.b32.xlu0 %v5404_v16, %s9705_s23 }
0x1022   : > { %v5431_v55 = vpop.permute.xlu1 %5430 }
0x1026   : > { %v12133_v52 = vpop.f32.mrf.mxu1 }
0x102a   : > { %v5441_v48 = vpop.permute.xlu0 %5440 }
0x102e   : > { %v5410_v23 = vpop.f32.mrf.mxu1 }
0x102f   : > { %5464 = vrot.lane.b32.xlu2 %v5410_v23, %s9706_s24 }
0x1036   : > { %v5413_v49 = vpop.f32.mrf.mxu1 }
0x1037   : > { %5474 = vrot.lane.b32.xlu1 %v5413_v49, %s9708_s25 }
0x103a   : > { %v12140_v11 = vpop.permute.xlu2 %5482 }
0x103e   : > { %v5416_v54 = vpop.f32.mrf.mxu1 }
0x103f   : > { %5484 = vrot.lane.b32.xlu0 %v5416_v54, %s9709_s26  ;;  %5492 = vrot.lane.b32.xlu1 %v5375_v26, %s9710_s27 }
0x1042   : > { %v5463_v40 = vpop.permute.xlu1 %5462 }
0x1046   : > { %v5419_v30 = vpop.f32.mrf.mxu1 }
0x1047   : > { %5494 = vrot.lane.b32.xlu2 %v5419_v30, %s9710_s27 }
0x104a   : > { %v5473_v1 = vpop.permute.xlu0 %5472 }
0x1069   : > { %v5433_v23 = vpop.permute.xlu2 %5432 }
0x106a   : > { %v5434_v30 = vsel %vm820_vm1, %v5431_v55, %v5433_v23  ;;  %v5435_v39 = vsel %vm820_vm1, %v5433_v23, %v5431_v55 }
0x106b   : > { %v5436_v55 = vmul.f32 %v5435_v39, %v9979_v33  ;;  %v5437_v23 = vmul.f32 %v5434_v30, %v9981_v37  ;;  %v8809_v30 = vld [vmem:[%s9776_s14 + $0x870] sm:$0xf] }
0x106c   : > { %v8810_v14 = vor.u32 %v9398_v51, %v8809_v30 }
0x106e   : > { %5929 = vmatpush.bf16.msra.mxu0 %v8810_v14 }
0x1079   : > { %v5425_v16 = vpop.permute.xlu0 %5424 }
0x107a   : > { %v5426_v27 = vsel %vm806_vm2, %v5423_v44, %v5425_v16  ;;  %v5427_v26 = vsel %vm806_vm2, %v5425_v16, %v5423_v44 }
0x107b   : > { %v5428_v24 = vmul.f32 %v5427_v26, %v9988_v43  ;;  %v5429_v25 = vmul.f32 %v5426_v27, %v9992_v45 }
0x107d   : > { %v5438_v26 = vadd.f32 %v5436_v55, %v5428_v24  ;;  %v5439_v27 = vadd.f32 %v5437_v23, %v5429_v25  ;;  %v8801_v55 = vld [vmem:[%s9776_s14 + $0x860] sm:$0xf]  ;;  %v9396_v23 = vld [vmem:[%s9776_s14 + $0x864] sm:$0xf0] }
0x107e   : > { %v8802_v51 = vor.u32 %v9396_v23, %v8801_v55 }
0x1080   : > { %5930 = vmatpush.bf16.msra.mxu0 %v8802_v51 }
0x1089   : > { %v5443_v49 = vpop.permute.xlu1 %5442  ;;  %v5465_v50 = vpop.permute.xlu2 %5464 }
0x108a   : > { %v5444_v59 = vsel %vm836_vm3, %v5441_v48, %v5443_v49  ;;  %v5445_v2 = vsel %vm836_vm3, %v5443_v49, %v5441_v48  ;;  %v5466_v25 = vsel %vm870_vm5, %v5463_v40, %v5465_v50 }
0x108b   : > { %v5446_v48 = vmul.f32 %v5445_v2, %v10005_v60  ;;  %v5447_v49 = vmul.f32 %v5444_v59, %v10007_v61  ;;  %v8873_v2 = vld [vmem:[%s9776_s14 + $0x8f0] sm:$0xf]  ;;  %v9414_v59 = vld [vmem:[%s9776_s14 + $0x8f4] sm:$0xf0] }
0x1091   : > { %v5453_v54 = vpop.permute.xlu0 %5452 }
0x1092   : > { %v5454_v44 = vsel %vm852_vm4, %v5451_v21, %v5453_v54  ;;  %v5455_v16 = vsel %vm852_vm4, %v5453_v54, %v5451_v21  ;;  %v5448_v21 = vadd.f32 %v5446_v48, %v5438_v26  ;;  %v5449_v54 = vadd.f32 %v5447_v49, %v5439_v27  ;;  %v9412_v49 = vld [vmem:[%s9776_s14 + $0x8e4] sm:$0xf0] }
0x1093   : > { %v5456_v46 = vmul.f32 %v5455_v16, %v10010_v63  ;;  %v5457_v31 = vmul.f32 %v5454_v44, %v10015_v4  ;;  %v8874_v16 = vor.u32 %v9414_v59, %v8873_v2  ;;  %v8865_v44 = vld [vmem:[%s9776_s14 + $0x8e0] sm:$0xf]  ;;  %v5467_v48 = vsel %vm870_vm5, %v5465_v50, %v5463_v40  ;;  %v8793_v59 = vld [vmem:[%s9776_s14 + $0x850] sm:$0xf] }
0x1094   : > { %v5468_v50 = vmul.f32 %v5466_v25, %v10031_v20  ;;  %v5469_v40 = vmul.f32 %v5467_v48, %v10033_v22 }
0x1095   : > { %v5458_v39 = vadd.f32 %v5456_v46, %v5448_v21  ;;  %v5459_v62 = vadd.f32 %v5457_v31, %v5449_v54  ;;  %5942 = vmatpush.bf16.msra.mxu1 %v8874_v16  ;;  %v8866_v21 = vor.u32 %v9412_v49, %v8865_v44 }
0x1097   : > { %v5460_v26 = vadd.f32 %v5458_v39, %v12124_v29  ;;  %v5461_v27 = vadd.f32 %v5459_v62, %v12133_v52  ;;  %v9394_v29 = vld [vmem:[%s9776_s14 + $0x854] sm:$0xf0]  ;;  %v8857_v39 = vld [vmem:[%s9776_s14 + $0x8d0] sm:$0xf] }
0x1098   : > { %v8794_v62 = vor.u32 %v9394_v29, %v8793_v59  ;;  %v9410_v52 = vld [vmem:[%s9776_s14 + $0x8d4] sm:$0xf0]  ;;  %v8841_v29 = vld [vmem:[%s9776_s14 + $0x8b0] sm:$0xf] }
0x1099   : > { %v5471_v30 = vadd.f32 %v5469_v40, %v5461_v27  ;;  %5943 = vmatpush.bf16.msra.mxu1 %v8866_v21  ;;  %v8858_v23 = vor.u32 %v9410_v52, %v8857_v39  ;;  %v8785_v21 = vld [vmem:[%s9776_s14 + $0x840] sm:$0xf]  ;;  %v9406_v39 = vld [vmem:[%s9776_s14 + $0x8b4] sm:$0xf0] }
0x109a   : > { %5931 = vmatpush.bf16.msra.mxu0 %v8794_v62 }
0x109d   : > { %5944 = vmatpush.bf16.msra.mxu1 %v8858_v23 }
0x10a1   : > { %v5495_v2 = vpop.permute.xlu2 %5494 }
0x10a9   : > { %v5475_v24 = vpop.permute.xlu1 %5474 }
0x10aa   : > { %v5476_v46 = vsel %vm886_vm6, %v5473_v1, %v5475_v24  ;;  %v5477_v31 = vsel %vm886_vm6, %v5475_v24, %v5473_v1  ;;  %v5470_v1 = vadd.f32 %v5468_v50, %v5460_v26  ;;  %v8849_v50 = vld [vmem:[%s9776_s14 + $0x8c0] sm:$0xf] }
0x10ab   : > { %v5478_v54 = vmul.f32 %v5476_v46, %v10047_v32  ;;  %v5479_v14 = vmul.f32 %v5477_v31, %v10051_v38 }
0x10ad   : > { %v5480_v24 = vadd.f32 %v5478_v54, %v5470_v1  ;;  %v5481_v25 = vadd.f32 %v5479_v14, %v5471_v30  ;;  %v9408_v54 = vld [vmem:[%s9776_s14 + $0x8c4] sm:$0xf0]  ;;  %v8777_v14 = vld [vmem:[%s9776_s14 + $0x830] sm:$0xf]  ;;  %v9390_v1 = vld [vmem:[%s9776_s14 + $0x834] sm:$0xf0] }
0x10ae   : > { %v8850_v59 = vor.u32 %v9408_v54, %v8849_v50  ;;  %v8778_v62 = vor.u32 %v9390_v1, %v8777_v14  ;;  %v9386_v50 = vld [vmem:[%s9776_s14 + $0x814] sm:$0xf0]  ;;  %v8825_v54 = vld [vmem:[%s9776_s14 + $0x890] sm:$0xf] }
0x10af   : > { %v9402_v14 = vld [vmem:[%s9776_s14 + $0x894] sm:$0xf0] }
0x10b0   : > { %5945 = vmatpush.bf16.msra.mxu1 %v8850_v59  ;;  %v8826_v1 = vor.u32 %v9402_v14, %v8825_v54  ;;  %v8817_v59 = vld [vmem:[%s9776_s14 + $0x880] sm:$0xf]  ;;  %v9393_v54 = vld [vmem:[%s9776_s14 + $0x854] sm:$0xf]  ;;  %v8795_v14 = vld [vmem:[%s9776_s14 + $0x858] sm:$0xf0] }
0x10b1   : > { %v5485_v16 = vpop.permute.xlu0 %5484  ;;  %v5493_v55 = vpop.permute.xlu1 %5492 }
0x10b2   : > { %v5486_v44 = vsel %vm902_vm7, %v12140_v11, %v5485_v16  ;;  %v5487_v48 = vsel %vm902_vm7, %v5485_v16, %v12140_v11  ;;  %v5496_v46 = vsel %vm918_vm8, %v5493_v55, %v5495_v2  ;;  %v5497_v31 = vsel %vm918_vm8, %v5495_v2, %v5493_v55  ;;  %v9392_v11 = vld [vmem:[%s9776_s14 + $0x844] sm:$0xf0] }
0x10b3   : > { %v5488_v51 = vmul.f32 %v5486_v44, %v10058_v47  ;;  %v5489_v49 = vmul.f32 %v5487_v48, %v10061_v56  ;;  %v5498_v26 = vmul.f32 %v5496_v46, %v10079_v12  ;;  %v5499_v27 = vmul.f32 %v5497_v31, %v10081_v13  ;;  %v8769_v48 = vld [vmem:[%s9776_s14 + $0x820] sm:$0xf]  ;;  %v9388_v46 = vld [vmem:[%s9776_s14 + $0x824] sm:$0xf0] }
0x10b4   : > { %v8786_v40 = vor.u32 %v9392_v11, %v8785_v21  ;;  %v8842_v55 = vor.u32 %v9406_v39, %v8841_v29  ;;  %v8770_v31 = vor.u32 %v9388_v46, %v8769_v48  ;;  %v9400_v39 = vld [vmem:[%s9776_s14 + $0x884] sm:$0xf0]  ;;  %v8875_v48 = vld [vmem:[%s9776_s14 + $0x8f8] sm:$0xf0] }
0x10b5   : > { %v5490_v30 = vadd.f32 %v5488_v51, %v5480_v24  ;;  %v5491_v2 = vadd.f32 %v5489_v49, %v5481_v25  ;;  %v8833_v51 = vld [vmem:[%s9776_s14 + $0x8a0] sm:$0xf]  ;;  %v9404_v49 = vld [vmem:[%s9776_s14 + $0x8a4] sm:$0xf0] }
0x10b6   : > { %5932 = vmatpush.bf16.msra.mxu0 %v8786_v40  ;;  %5946 = vmatpush.bf16.msra.mxu1 %v8842_v55  ;;  %v8834_v11 = vor.u32 %v9404_v49, %v8833_v51 }
0x10b7   : > { %v5500_v52 = vadd.f32 %v5498_v26, %v5490_v30  ;;  %v5501_v16 = vadd.f32 %v5499_v27, %v5491_v2  ;;  %v8761_v26 = vld [vmem:[%s9776_s14 + $0x810] sm:$0xf]  ;;  %v8753_v30 = vld [vmem:[%s9776_s14 + $0x800] sm:$0xf]  ;;  %v9384_v2 = vld [vmem:[%s9776_s14 + $0x804] sm:$0xf0] }
0x10b8   : > { %v8762_v40 = vor.u32 %v9386_v50, %v8761_v26  ;;  %v8754_v29 = vor.u32 %v9384_v2, %v8753_v30  ;;  %v9411_v50 = vld [vmem:[%s9776_s14 + $0x8e4] sm:$0xf]  ;;  %v8859_v30 = vld [vmem:[%s9776_s14 + $0x8d8] sm:$0xf0]  ;;  %v8798_v2 = vor.u32 %v9393_v54, %v8795_v14  ;;  %v8819_v14 = vld [vmem:[%s9776_s14 + $0x888] sm:$0xf0] }
0x10b9   : > { %v5502_v23 = vadd.f32 %v5500_v52, %v10097_v57  ;;  %v5503_v24 = vadd.f32 %v5501_v16, %v10097_v57  ;;  %v8818_v52 = vor.u32 %v9400_v39, %v8817_v59  ;;  %v9407_v39 = vld [vmem:[%s9776_s14 + $0x8c4] sm:$0xf] }
0x10ba   : > { %5933 = vmatpush.bf16.msra.mxu0 %v8778_v62  ;;  %5947 = vmatpush.bf16.msra.mxu1 %v8834_v11  ;;  %v8803_v11 = vld [vmem:[%s9776_s14 + $0x868] sm:$0xf0] }
0x10bb   : > { %v5504_v25 = vsub.f32 0.0, %v5502_v23  ;;  %v5505_v44 = vsub.f32 0.0, %v5503_v24  ;;  %v9397_v24 = vld [vmem:[%s9776_s14 + $0x874] sm:$0xf] }
0x10bd   : > { %v5506_v27 = vmul.f32 1.442695, %v5504_v25  ;;  %v5508_v21 = vmul.f32 1.442695, %v5505_v44  ;;  %v8811_v25 = vld [vmem:[%s9776_s14 + $0x878] sm:$0xf0] }
0x10be   : > { %5934 = vmatpush.bf16.msra.mxu0 %v8770_v31  ;;  %5948 = vmatpush.bf16.msra.mxu1 %v8826_v1  ;;  %v9413_v44 = vld [vmem:[%s9776_s14 + $0x8f4] sm:$0xf]  ;;  %v8814_v49 = vor.u32 %v9397_v24, %v8811_v25  ;;  %v8843_v25 = vld [vmem:[%s9776_s14 + $0x8b8] sm:$0xf0] }
0x10bf   : > { %9566 = vpow2.f32 %v5506_v27  ;;  %v8878_v27 = vor.u32 %v9413_v44, %v8875_v48  ;;  %v9409_v1 = vld [vmem:[%s9776_s14 + $0x8d4] sm:$0xf]  ;;  %v9387_v48 = vld [vmem:[%s9776_s14 + $0x824] sm:$0xf] }
0x10c0   : > { %9568 = vpow2.f32 %v5508_v21  ;;  %v9395_v21 = vld [vmem:[%s9776_s14 + $0x864] sm:$0xf]  ;;  %v8862_v59 = vor.u32 %v9409_v1, %v8859_v30 }
0x10c2   : > { %5935 = vmatpush.bf16.msra.mxu0 %v8762_v40  ;;  %5949 = vmatpush.bf16.msra.mxu1 %v8818_v52  ;;  %v8867_v40 = vld [vmem:[%s9776_s14 + $0x8e8] sm:$0xf0] }
0x10c3   : > { %v8851_v52 = vld [vmem:[%s9776_s14 + $0x8c8] sm:$0xf0] }
0x10c5   : > { %v9567_v62 = vpop.eup %9566  ;;  %5950 = vmatmul.bf16.vlgmr.msra.gmra.mxu1 %v9850_v36 }
0x10c6   : > { %v9569_v16 = vpop.eup %9568  ;;  %v5510_v55 = vadd.f32 1.0, %v9567_v62  ;;  %5936 = vmatpush.bf16.msra.mxu0 %v8754_v29  ;;  %v8787_v29 = vld [vmem:[%s9776_s14 + $0x848] sm:$0xf0] }
0x10c7   : > { %v5511_v23 = vadd.f32 1.0, %v9569_v16  ;;  %v8854_v16 = vor.u32 %v9407_v39, %v8851_v52  ;;  %v9655_v52 = vld [vmem:[%s13982_s5 + $0x18] sm:$0xff] }
0x10c8   : > { %9570 = vrcp.f32 %v5510_v55  ;;  %v8779_v55 = vld [vmem:[%s9776_s14 + $0x838] sm:$0xf0] }
0x10c9   : > { %9572 = vrcp.f32 %v5511_v23  ;;  %5937 = vmatmul.bf16.vlgmr.msra.gmra.mxu0 %v9848_v35  ;;  %v9405_v23 = vld [vmem:[%s9776_s14 + $0x8b4] sm:$0xf] }
0x10ca   : > { %v8846_v44 = vor.u32 %v9405_v23, %v8843_v25  ;;  %v9657_v25 = vld [vmem:[%s13982_s5 + $0x28] sm:$0xff] }
0x10ce   : > { %v9571_v46 = vpop.eup %9570 }
0x10cf   : > { %v9573_v31 = vpop.eup %9572  ;;  %v5514_v51 = vmul.f32 %v11930_v15, %v9571_v46  ;;  %v8806_v15 = vor.u32 %v9395_v21, %v8803_v11  ;;  %v9403_v46 = vld [vmem:[%s9776_s14 + $0x8a4] sm:$0xf]  ;;  %v9401_v21 = vld [vmem:[%s9776_s14 + $0x894] sm:$0xf] }
0x10d0   : > { %v5515_v26 = vmul.f32 %v11934_v41, %v9573_v31  ;;  %v8870_v41 = vor.u32 %v9411_v50, %v8867_v40  ;;  %v9383_v40 = vld [vmem:[%s9776_s14 + $0x804] sm:$0xf] }
0x10d1   : > { %5531 = vmatpush.msrb.mxu2 %v5514_v51  ;;  %v8835_v51 = vld [vmem:[%s9776_s14 + $0x8a8] sm:$0xf0] }
0x10d2   : > { %5575 = vmatpush.msrb.mxu3 %v5515_v26  ;;  %8695 = vmatmul.msk.f32.vlgmr.msrb.gmra.mxu2 %vm686_vm0, %v11944_v34  ;;  %v9385_v26 = vld [vmem:[%s9776_s14 + $0x814] sm:$0xf] }
0x10d3   : > { %8704 = vmatmul.msk.f32.vlgmr.msrb.gmra.mxu3 %vm686_vm0, %v11944_v34  ;;  %5955 = vmatpush.bf16.msra.mxu2 %v8814_v49  ;;  %v9391_v34 = vld [vmem:[%s9776_s14 + $0x844] sm:$0xf]  ;;  %v8838_v49 = vor.u32 %v9403_v46, %v8835_v51  ;;  %v9659_v51 = vld [vmem:[%s13982_s5 + $0x38] sm:$0xff] }
0x10d4   : > { %5968 = vmatpush.bf16.msra.mxu3 %v8878_v27  ;;  %v8790_v62 = vor.u32 %v9391_v34, %v8787_v29  ;;  %v8763_v27 = vld [vmem:[%s9776_s14 + $0x818] sm:$0xf0]  ;;  %v9654_v29 = vld [vmem:[%s13982_s5 + $0x10] sm:$0xff] }
0x10d5   : > { %v8766_v11 = vor.u32 %v9385_v26, %v8763_v27  ;;  %v9660_v27 = vld [vmem:[%s13982_s5 + $0x40] sm:$0xff] }
0x10d7   : > { %5956 = vmatpush.bf16.msra.mxu2 %v8806_v15  ;;  %v8755_v15 = vld [vmem:[%s9776_s14 + $0x808] sm:$0xf0] }
0x10d8   : > { %5969 = vmatpush.bf16.msra.mxu3 %v8870_v41  ;;  %v9399_v41 = vld [vmem:[%s9776_s14 + $0x884] sm:$0xf]  ;;  %v8758_v54 = vor.u32 %v9383_v40, %v8755_v15 }
0x10d9   : > { %v8822_v1 = vor.u32 %v9399_v41, %v8819_v14 }
0x10da   : > { %8696 = vmatmul.msk.f32.gmra.mxu2 %vm686_vm0, %v11957_v42 }
0x10db   : > { %8705 = vmatmul.msk.f32.gmra.mxu3 %vm686_vm0, %v11957_v42  ;;  %5957 = vmatpush.bf16.msra.mxu2 %v8798_v2  ;;  %v9389_v42 = vld [vmem:[%s9776_s14 + $0x834] sm:$0xf] }
0x10dc   : > { %5970 = vmatpush.bf16.msra.mxu3 %v8862_v59  ;;  %v8782_v24 = vor.u32 %v9389_v42, %v8779_v55  ;;  %v9656_v55 = vld [vmem:[%s13982_s5 + $0x20] sm:$0xff] }
0x10df   : > { %5958 = vmatpush.bf16.msra.mxu2 %v8790_v62 }
0x10e0   : > { %5971 = vmatpush.bf16.msra.mxu3 %v8854_v16 }
0x10e2   : > { %8697 = vmatmul.msk.f32.gmra.mxu2 %vm686_vm0, %v11970_v53 }
0x10e3   : > { %8706 = vmatmul.msk.f32.gmra.mxu3 %vm686_vm0, %v11970_v53  ;;  %5959 = vmatpush.bf16.msra.mxu2 %v8782_v24  ;;  %v8771_v53 = vld [vmem:[%s9776_s14 + $0x828] sm:$0xf0] }
0x10e4   : > { %5972 = vmatpush.bf16.msra.mxu3 %v8846_v44  ;;  %v8774_v31 = vor.u32 %v9387_v48, %v8771_v53  ;;  %v9658_v53 = vld [vmem:[%s13982_s5 + $0x30] sm:$0xff] }
0x10e7   : > { %5960 = vmatpush.bf16.msra.mxu2 %v8774_v31 }
0x10e8   : > { %5973 = vmatpush.bf16.msra.mxu3 %v8838_v49 }
0x10ea   : > { %8698 = vmatmul.msk.f32.gmra.mxu2 %vm686_vm0, %v11983_v3 }
0x10eb   : > { %8707 = vmatmul.msk.f32.gmra.mxu3 %vm686_vm0, %v11983_v3  ;;  %v8827_v3 = vld [vmem:[%s9776_s14 + $0x898] sm:$0xf0]  ;;  %5961 = vmatpush.bf16.msra.mxu2 %v8766_v11 }
0x10ec   : > { %v8830_v50 = vor.u32 %v9401_v21, %v8827_v3 }
0x10ee   : > { %5974 = vmatpush.bf16.msra.mxu3 %v8830_v50 }
0x10ef   : > { %5962 = vmatpush.bf16.msra.mxu2 %v8758_v54 }
0x10f2   : > { %8699 = vmatmul.msk.f32.gmra.mxu2 %vm686_vm0, %v11999_v10  ;;  %5975 = vmatpush.bf16.msra.mxu3 %v8822_v1 }
0x10f3   : > { %8708 = vmatmul.msk.f32.gmra.mxu3 %vm686_vm0, %v11999_v10 }
0x10fa   : > { %8700 = vmatmul.msk.f32.gmra.mxu2 %vm686_vm0, %v12013_v0 }
0x10fb   : > { %8709 = vmatmul.msk.f32.gmra.mxu3 %vm686_vm0, %v12013_v0 }
0x1102   : > { %8701 = vmatmul.msk.f32.gmra.mxu2 %vm686_vm0, %v12022_v58 }
0x1103   : > { %8710 = vmatmul.msk.f32.gmra.mxu3 %vm686_vm0, %v12022_v58  ;;  %v12305_v58 = vld [vmem:[%s13982_s5] sm:$0xff] }
0x110a   : > { %8702 = vmatmul.msk.f32.gmra.mxu2 %vm686_vm0, %v12031_v19 }
0x110b   : > { %8711 = vmatmul.msk.f32.gmra.mxu3 %vm686_vm0, %v12031_v19 }
0x1112   : > { %8703 = vmatmul.msk.f32.gmra.mxu2 %vm686_vm0, %v12040_v28 }
0x1113   : > { %8712 = vmatmul.msk.f32.gmra.mxu3 %vm686_vm0, %v12040_v28  ;;  %v9653_v28 = vld [vmem:[%s13982_s5 + $0x8] sm:$0xff] }
0x111a   : > { %5963 = vmatmul.bf16.vlgmr.msra.gmra.mxu2 %v9848_v35 }
0x111b   : > { %5976 = vmatmul.bf16.vlgmr.msra.gmra.mxu3 %v9850_v36 }
0x1142   : > { %v5951_v0 = vpop.f32.mrf.mxu1 }
0x1146   : > { %v5938_v10 = vpop.f32.mrf.mxu0 }
0x1147   : > { %v5952_v30 = vadd.f32 %v5951_v0, %v5938_v10 }
0x1149   : > { %5996 = vmatpush.msrb.mxu0 %v5952_v30 }
0x114a   : > { %8879 = vmatmul.msk.f32.vlgmr.msrb.gmra.mxu0 %vm686_vm0, %v12305_v58  ;;  %v5953_v2 = vpop.f32.mrf.mxu1 }
0x114e   : > { %v5940_v19 = vpop.f32.mrf.mxu0 }
0x1152   : > { %8880 = vmatmul.msk.f32.gmra.mxu0 %vm686_vm0, %v9653_v28 }
0x1155   : > { %v12313_v59 = vpop.f32.mrf.mxu2 }
0x1156   : > { %v12315_v34 = vpop.f32.mrf.mxu3 }
0x1157   : > { %14113 = vst [vmem:[#allocation123_spill] sm:$0xff] %v12315_v34 }
0x115a   : > { %8881 = vmatmul.msk.f32.gmra.mxu0 %vm686_vm0, %v9654_v29 }
0x115d   : > { %v12321_v39 = vpop.f32.mrf.mxu2 }
0x115e   : > { %14114 = vst [vmem:[#allocation124_spill] sm:$0xff] %v12321_v39  ;;  %v12323_v62 = vpop.f32.mrf.mxu3 }
0x115f   : > { %14115 = vst [vmem:[#allocation125_spill] sm:$0xff] %v12323_v62 }
0x1162   : > { %8882 = vmatmul.msk.f32.gmra.mxu0 %vm686_vm0, %v9655_v52 }
0x1165   : > { %v12329_v16 = vpop.f32.mrf.mxu2 }
0x1166   : > { %14116 = vst [vmem:[#allocation126_spill] sm:$0xff] %v12329_v16  ;;  %v12331_v42 = vpop.f32.mrf.mxu3 }
0x1167   : > { %14117 = vst [vmem:[#allocation127_spill] sm:$0xff] %v12331_v42 }
0x116a   : > { %8883 = vmatmul.msk.f32.gmra.mxu0 %vm686_vm0, %v9656_v55 }
0x116d   : > { %v12337_v23 = vpop.f32.mrf.mxu2 }
0x116e   : > { %14118 = vst [vmem:[#allocation128_spill] sm:$0xff] %v12337_v23  ;;  %v12339_v24 = vpop.f32.mrf.mxu3 }
0x1172   : > { %8884 = vmatmul.msk.f32.gmra.mxu0 %vm686_vm0, %v9657_v25 }
0x1175   : > { %v12345_v44 = vpop.f32.mrf.mxu2 }
0x1176   : > { %14119 = vst [vmem:[#allocation129_spill] sm:$0xff] %v12345_v44  ;;  %v12347_v48 = vpop.f32.mrf.mxu3 }
0x1177   : > { %14120 = vst [vmem:[#allocation130_spill] sm:$0xff] %v12347_v48 }
0x117a   : > { %8885 = vmatmul.msk.f32.gmra.mxu0 %vm686_vm0, %v9658_v53 }
0x117d   : > { %v12353_v46 = vpop.f32.mrf.mxu2 }
0x117e   : > { %14121 = vst [vmem:[#allocation131_spill] sm:$0xff] %v12353_v46  ;;  %v12355_v31 = vpop.f32.mrf.mxu3 }
0x1182   : > { %8886 = vmatmul.msk.f32.gmra.mxu0 %vm686_vm0, %v9659_v51 }
0x1185   : > { %v12361_v49 = vpop.f32.mrf.mxu2 }
0x1186   : > { %v12363_v26 = vpop.f32.mrf.mxu3 }
0x1187   : > { %14122 = vst [vmem:[#allocation132_spill] sm:$0xff] %v12363_v26 }
0x118a   : > { %8887 = vmatmul.msk.f32.gmra.mxu0 %vm686_vm0, %v9660_v27 }
0x118d   : > { %v12369_v21 = vpop.f32.mrf.mxu2 }
0x118e   : > { %14123 = vst [vmem:[#allocation133_spill] sm:$0xff] %v12369_v21  ;;  %v12371_v11 = vpop.f32.mrf.mxu3 }
0x118f   : > { %14124 = vst [vmem:[#allocation134_spill] sm:$0xff] %v12371_v11 }
0x1195   : > { %v12373_v3 = vpop.f32.mrf.mxu2 }
0x1196   : > { %14125 = vst [vmem:[#allocation135_spill] sm:$0xff] %v12373_v3  ;;  %v12375_v50 = vpop.f32.mrf.mxu3 }
0x1197   : > { %14126 = vst [vmem:[#allocation136_spill] sm:$0xff] %v12375_v50 }
0x119d   : > { %v5964_v40 = vpop.f32.mrf.mxu2 }
0x119e   : > { %v5977_v15 = vpop.f32.mrf.mxu3 }
0x119f   : > { %v5978_v41 = vadd.f32 %v5977_v15, %v5964_v40 }
0x11a1   : > { %6040 = vmatpush.msrb.mxu1 %v5978_v41 }
0x11a2   : > { %8888 = vmatmul.msk.f32.vlgmr.msrb.gmra.mxu1 %vm686_vm0, %v12305_v58 }
0x11a5   : > { %v5966_v54 = vpop.f32.mrf.mxu2 }
0x11a6   : > { %v5979_v14 = vpop.f32.mrf.mxu3 }
0x11a7   : > { %v14128_v14 = vld [vmem:[#allocation4_spill] sm:$0xff] }
0x11aa   : > { %8889 = vmatmul.msk.f32.gmra.mxu1 %vm686_vm0, %v9653_v28 }
0x11b2   : > { %8890 = vmatmul.msk.f32.gmra.mxu1 %vm686_vm0, %v9654_v29 }
0x11ba   : > { %8891 = vmatmul.msk.f32.gmra.mxu1 %vm686_vm0, %v9655_v52 }
0x11c2   : > { %8892 = vmatmul.msk.f32.gmra.mxu1 %vm686_vm0, %v9656_v55 }
0x11c7   : > { %v5998_v1 = vpop.f32.mrf.mxu0 }
0x11c8   : > { %6069 = vrot.lane.b32.xlu0 %v5998_v1, %s9702_s20  ;;  %v14133_v1 = vld [vmem:[#allocation11_spill] sm:$0xff] }
0x11ca   : > { %8893 = vmatmul.msk.f32.gmra.mxu1 %vm686_vm0, %v9657_v25 }
0x11cf   : > { %v6001_v10 = vpop.f32.mrf.mxu0 }
0x11d0   : > { %6077 = vrot.lane.b32.xlu2 %v6001_v10, %s9703_s21  ;;  %v14134_v10 = vld [vmem:[#allocation10_spill] sm:$0xff] }
0x11d2   : > { %8894 = vmatmul.msk.f32.gmra.mxu1 %vm686_vm0, %v9658_v53 }
0x11d7   : > { %v6004_v0 = vpop.f32.mrf.mxu0 }
0x11d8   : > { %6087 = vrot.lane.b32.xlu1 %v6004_v0, %s9704_s22  ;;  %v14135_v0 = vld [vmem:[#allocation15_spill] sm:$0xff] }
0x11da   : > { %8895 = vmatmul.msk.f32.gmra.mxu1 %vm686_vm0, %v9659_v51 }
0x11df   : > { %v6007_v30 = vpop.f32.mrf.mxu0 }
0x11e0   : > { %6097 = vrot.lane.b32.xlu0 %v6007_v30, %s9705_s23  ;;  %v14136_v30 = vld [vmem:[#allocation14_spill] sm:$0xff] }
0x11e2   : > { %8896 = vmatmul.msk.f32.gmra.mxu1 %vm686_vm0, %v9660_v27 }
0x11e7   : > { %v12391_v19 = vpop.f32.mrf.mxu0 }
0x11ef   : > { %v6013_v2 = vpop.f32.mrf.mxu0 }
0x11f0   : > { %6109 = vrot.lane.b32.xlu2 %v6013_v2, %s9706_s24  ;;  %v14137_v2 = vld [vmem:[#allocation13_spill] sm:$0xff] }
0x11f7   : > { %v6016_v28 = vpop.f32.mrf.mxu0 }
0x11f8   : > { %6119 = vrot.lane.b32.xlu1 %v6016_v28, %s9708_s25  ;;  %v14138_v28 = vld [vmem:[#allocation16_spill] sm:$0xff] }
0x11ff   : > { %v6019_v29 = vpop.f32.mrf.mxu0 }
0x1200   : > { %6129 = vrot.lane.b32.xlu0 %v6019_v29, %s9709_s26  ;;  %v14139_v29 = vld [vmem:[#allocation17_spill] sm:$0xff] }
0x1207   : > { %v6022_v52 = vpop.f32.mrf.mxu0 }
0x1208   : > { %6139 = vrot.lane.b32.xlu2 %v6022_v52, %s9710_s27 }
0x121f   : > { %v6042_v55 = vpop.f32.mrf.mxu1 }
0x1220   : > { %6071 = vrot.lane.b32.xlu1 %v6042_v55, %s9702_s20 }
0x1227   : > { %v6045_v25 = vpop.f32.mrf.mxu1 }
0x1228   : > { %6079 = vrot.lane.b32.xlu0 %v6045_v25, %s9703_s21  ;;  %v14140_v25 = vld [vmem:[#allocation18_spill] sm:$0xff] }
0x122a   : > { %v6078_v55 = vpop.permute.xlu2 %6077 }
0x122f   : > { %v6048_v53 = vpop.f32.mrf.mxu1 }
0x1230   : > { %6089 = vrot.lane.b32.xlu2 %v6048_v53, %s9704_s22 }
0x1237   : > { %v6051_v51 = vpop.f32.mrf.mxu1 }
0x1238   : > { %6099 = vrot.lane.b32.xlu1 %v6051_v51, %s9705_s23 }
0x123a   : > { %v6070_v52 = vpop.permute.xlu0 %6069 }
0x123f   : > { %v12401_v27 = vpop.f32.mrf.mxu1 }
0x1247   : > { %v6057_v40 = vpop.f32.mrf.mxu1 }
0x1248   : > { %6111 = vrot.lane.b32.xlu0 %v6057_v40, %s9706_s24 }
0x124a   : > { %v6088_v53 = vpop.permute.xlu1 %6087  ;;  %v6110_v40 = vpop.permute.xlu2 %6109 }
0x124f   : > { %v6060_v15 = vpop.f32.mrf.mxu1 }
0x1250   : > { %6121 = vrot.lane.b32.xlu2 %v6060_v15, %s9708_s25  ;;  %v14141_v15 = vld [vmem:[#allocation19_spill] sm:$0xff] }
0x1252   : > { %v6098_v51 = vpop.permute.xlu0 %6097 }
0x1257   : > { %v6063_v41 = vpop.f32.mrf.mxu1 }
0x1258   : > { %1066 = vrot.lane.b32.xlu2 %v10250_v6, %s9702_s20  ;;  %6131 = vrot.lane.b32.xlu1 %v6063_v41, %s9709_s26  ;;  %v14127_v6 = vld [vmem:[#allocation9_spill] sm:$0xff]  ;;  %v12459_v41 = vld [vmem:[%s12456_s28 + $0x10] sm:$0xff] }
0x125f   : > { %v6066_v54 = vpop.f32.mrf.mxu1 }
0x1260   : > { %1082 = vrot.lane.b32.xlu2 %v10260_v9, %s9704_s22  ;;  %1064 = vrot.lane.b32.xlu1 %v10248_v5, %s9702_s20  ;;  %v14129_v9 = vld [vmem:[#allocation3_spill] sm:$0xff]  ;;  %v14130_v5 = vld [vmem:[#allocation12_spill] sm:$0xff] }
0x1261   : > { %6141 = vrot.lane.b32.xlu0 %v6066_v54, %s9710_s27  ;;  %v12462_v54 = vld [vmem:[%s12456_s28 + $0x18] sm:$0xff] }
0x1268   : > { %1094 = vrot.lane.b32.xlu2 %v10268_v17, %s9705_s23  ;;  %1074 = vrot.lane.b32.xlu1 %v10256_v8, %s9703_s21  ;;  %v14131_v17 = vld [vmem:[#allocation8_spill] sm:$0xff]  ;;  %v14132_v8 = vld [vmem:[#allocation7_spill] sm:$0xff] }
0x1269   : > { %1072 = vrot.lane.b32.xlu0 %v10254_v7, %s9703_s21  ;;  %v428_v7 = vld [vmem:[%s13985_s8] sm:$0xff] }
0x1270   : > { %1114 = vrot.lane.b32.xlu2 %v14127_v6, %s9708_s25  ;;  %1092 = vrot.lane.b32.xlu1 %v14128_v14, %s9705_s23  ;;  %v6120_v6 = vpop.permute.xlu1 %6119  ;;  %v1190_v14 = vadd.f32 %v12462_v54, %v12459_v41 }
0x1271   : > { %1084 = vrot.lane.b32.xlu0 %v14129_v9, %s9704_s22 }
0x1272   : > { %v6130_v9 = vpop.permute.xlu0 %6129 }
0x1278   : > { %1126 = vrot.lane.b32.xlu2 %v14130_v5, %s9709_s26  ;;  %1106 = vrot.lane.b32.xlu1 %v14131_v17, %s9706_s24  ;;  %v14142_v5 = vld [vmem:[#allocation20_spill] sm:$0xff]  ;;  %v6140_v17 = vpop.permute.xlu2 %6139 }
0x1279   : > { %1104 = vrot.lane.b32.xlu0 %v14132_v8, %s9706_s24 }
0x1280   : > { %1146 = vperm.xlu2 %9508, %v428_v7   ;;  %1124 = vrot.lane.b32.xlu1 %v14133_v1, %s9709_s26  ;;  %v14143_v7 = vld [vmem:[#allocation25_spill] sm:$0xff] }
0x1281   : > { %1116 = vrot.lane.b32.xlu0 %v14134_v10, %s9708_s25 }
0x1288   : > { %1722 = vrot.lane.b32.xlu2 %v14135_v0, %s9702_s20  ;;  %1136 = vrot.lane.b32.xlu1 %v14136_v30, %s9710_s27 }
0x1289   : > { %1134 = vrot.lane.b32.xlu0 %v14137_v2, %s9710_s27 }
0x128a   : > { %v6090_v10 = vpop.permute.xlu2 %6089 }
0x1290   : > { %1724 = vrot.lane.b32.xlu2 %v14138_v28, %s9702_s20 }
0x1292   : > { %v6072_v8 = vpop.permute.xlu1 %6071 }
0x1293   : > { %v6073_v2 = vsel %vm806_vm2, %v6070_v52, %v6072_v8  ;;  %v6074_v28 = vsel %vm806_vm2, %v6072_v8, %v6070_v52 }
0x1298   : > { %1730 = vrot.lane.b32.xlu2 %v14139_v29, %s9703_s21 }
0x129a   : > { %v6080_v1 = vpop.permute.xlu0 %6079 }
0x129b   : > { %v6081_v0 = vsel %vm820_vm1, %v6078_v55, %v6080_v1  ;;  %v6082_v30 = vsel %vm820_vm1, %v6080_v1, %v6078_v55  ;;  %v6091_v55 = vsel %vm836_vm3, %v6088_v53, %v6090_v10  ;;  %v6092_v1 = vsel %vm836_vm3, %v6090_v10, %v6088_v53 }
0x129c   : > { %v6083_v29 = vmul.f32 %v6082_v30, %v9979_v33 }
0x12a0   : > { %1732 = vrot.lane.b32.xlu2 %v14140_v25, %s9703_s21  ;;  %v6084_v25 = vmul.f32 %v6081_v0, %v9981_v37 }
0x12a8   : > { %1740 = vrot.lane.b32.xlu2 %v14141_v15, %s9704_s22 }
0x12aa   : > { %v6100_v15 = vpop.permute.xlu1 %6099  ;;  %v6122_v48 = vpop.permute.xlu2 %6121 }
0x12ab   : > { %v6101_v52 = vsel %vm852_vm4, %v6098_v51, %v6100_v15  ;;  %v6102_v8 = vsel %vm852_vm4, %v6100_v15, %v6098_v51 }
0x12ac   : > { %v6104_v44 = vmul.f32 %v6101_v52, %v10015_v4 }
0x12b0   : > { %1742 = vrot.lane.b32.xlu2 %v14142_v5, %s9704_s22  ;;  %v6075_v5 = vmul.f32 %v6074_v28, %v9988_v43  ;;  %v6094_v28 = vmul.f32 %v6091_v55, %v10007_v61 }
0x12b2   : > { %1191 = vadd.xlane.f32.xlu1 %v1190_v14  ;;  %v14144_v14 = vld [vmem:[#allocation26_spill] sm:$0xff]  ;;  %v6085_v0 = vadd.f32 %v6083_v29, %v6075_v5  ;;  %v14145_v29 = vld [vmem:[#allocation28_spill] sm:$0xff] }
0x12b8   : > { %1762 = vrot.lane.b32.xlu2 %v14143_v7, %s9706_s24  ;;  %v6076_v7 = vmul.f32 %v6073_v2, %v9992_v45  ;;  %v6103_v2 = vmul.f32 %v6102_v8, %v10010_v63 }
0x12ba   : > { %v6086_v30 = vadd.f32 %v6084_v25, %v6076_v7  ;;  %v6112_v50 = vpop.permute.xlu0 %6111 }
0x12bb   : > { %v6113_v10 = vsel %vm870_vm5, %v6110_v40, %v6112_v50  ;;  %v6114_v51 = vsel %vm870_vm5, %v6112_v50, %v6110_v40  ;;  %v6123_v50 = vsel %vm886_vm6, %v6120_v6, %v6122_v48  ;;  %v6124_v40 = vsel %vm886_vm6, %v6122_v48, %v6120_v6 }
0x12bc   : > { %v6096_v53 = vadd.f32 %v6094_v28, %v6086_v30  ;;  %v6115_v7 = vmul.f32 %v6113_v10, %v10031_v20  ;;  %v6116_v55 = vmul.f32 %v6114_v51, %v10033_v22  ;;  %v14147_v28 = vld [vmem:[#allocation31_spill] sm:$0xff] }
0x12be   : > { %v6106_v15 = vadd.f32 %v6104_v44, %v6096_v53 }
0x12c0   : > { %1764 = vrot.lane.b32.xlu2 %v14144_v14, %s9706_s24  ;;  %v6093_v14 = vmul.f32 %v6092_v1, %v10005_v60  ;;  %v14146_v1 = vld [vmem:[#allocation22_spill] sm:$0xff]  ;;  %v6108_v8 = vadd.f32 %v6106_v15, %v12401_v27  ;;  %v6126_v27 = vmul.f32 %v6124_v40, %v10051_v38 }
0x12c2   : > { %v6095_v11 = vadd.f32 %v6093_v14, %v6085_v0  ;;  %v6118_v14 = vadd.f32 %v6116_v55, %v6108_v8 }
0x12c4   : > { %v6105_v25 = vadd.f32 %v6103_v2, %v6095_v11  ;;  %v1067_v11 = vpop.permute.xlu2 %1066  ;;  %v6128_v10 = vadd.f32 %v6126_v27, %v6118_v14  ;;  %v14149_v14 = vld [vmem:[#allocation32_spill] sm:$0xff] }
0x12c5   : > { %v9011_v27 = vld [vmem:[%s9776_s14 + $0x970] sm:$0xf] }
0x12c6   : > { %v6107_v52 = vadd.f32 %v6105_v25, %v12391_v19  ;;  %v6125_v19 = vmul.f32 %v6123_v50, %v10047_v32 }
0x12c8   : > { %1774 = vrot.lane.b32.xlu2 %v14145_v29, %s9708_s25  ;;  %v6117_v30 = vadd.f32 %v6115_v7, %v6107_v52  ;;  %v14148_v29 = vld [vmem:[#allocation29_spill] sm:$0xff] }
0x12ca   : > { %v6132_v5 = vpop.permute.xlu1 %6131  ;;  %v6127_v53 = vadd.f32 %v6125_v19, %v6117_v30 }
0x12cb   : > { %1752 = vrot.lane.b32.xlu1 %v14146_v1, %s9705_s23  ;;  %v6133_v44 = vsel %vm902_vm7, %v6130_v9, %v6132_v5  ;;  %v6134_v0 = vsel %vm902_vm7, %v6132_v5, %v6130_v9 }
0x12cc   : > { %v6135_v2 = vmul.f32 %v6133_v44, %v10058_v47  ;;  %v6136_v48 = vmul.f32 %v6134_v0, %v10061_v56  ;;  %v1083_v8 = vpop.permute.xlu2 %1082 }
0x12ce   : > { %v6137_v15 = vadd.f32 %v6135_v2, %v6127_v53  ;;  %v6138_v5 = vadd.f32 %v6136_v48, %v6128_v10  ;;  %v9430_v2 = vld [vmem:[%s9776_s14 + $0x974] sm:$0xf0]  ;;  %v9075_v48 = vld [vmem:[%s9776_s14 + $0x9f0] sm:$0xf] }
0x12cf   : > { %v9012_v53 = vor.u32 %v9430_v2, %v9011_v27  ;;  %v9446_v10 = vld [vmem:[%s9776_s14 + $0x9f4] sm:$0xf0] }
0x12d0   : > { %1792 = vrot.lane.b32.xlu2 %v14147_v28, %s9710_s27  ;;  %v9426_v27 = vld [vmem:[%s9776_s14 + $0x954] sm:$0xf0] }
0x12d1   : > { %6576 = vmatpush.bf16.msra.mxu0 %v9012_v53 }
0x12d2   : > { %v1065_v6 = vpop.permute.xlu1 %1064 }
0x12d3   : > { %v6142_v51 = vpop.permute.xlu0 %6141  ;;  %1782 = vrot.lane.b32.xlu1 %v14148_v29, %s9709_s26 }
0x12d4   : > { %v6143_v9 = vsel %vm918_vm8, %v6140_v17, %v6142_v51  ;;  %v6144_v25 = vsel %vm918_vm8, %v6142_v51, %v6140_v17  ;;  %v9076_v51 = vor.u32 %v9446_v10, %v9075_v48  ;;  %v1095_v29 = vpop.permute.xlu2 %1094 }
0x12d5   : > { %v6145_v7 = vmul.f32 %v6143_v9, %v10079_v12  ;;  %v6146_v55 = vmul.f32 %v6144_v25, %v10081_v13 }
0x12d6   : > { %6589 = vmatpush.bf16.msra.mxu1 %v9076_v51  ;;  %v9059_v51 = vld [vmem:[%s9776_s14 + $0x9d0] sm:$0xf] }
0x12d7   : > { %v6147_v1 = vadd.f32 %v6145_v7, %v6137_v15  ;;  %v6148_v52 = vadd.f32 %v6146_v55, %v6138_v5  ;;  %v14150_v7 = vld [vmem:[#allocation33_spill] sm:$0xff]  ;;  %v9003_v55 = vld [vmem:[%s9776_s14 + $0x960] sm:$0xf] }
0x12d9   : > { %v6149_v50 = vadd.f32 %v6147_v1, %v10097_v57  ;;  %v6150_v40 = vadd.f32 %v6148_v52, %v10097_v57  ;;  %v9428_v1 = vld [vmem:[%s9776_s14 + $0x964] sm:$0xf0]  ;;  %v9067_v52 = vld [vmem:[%s9776_s14 + $0x9e0] sm:$0xf] }
0x12da   : > { %v1075_v44 = vpop.permute.xlu1 %1074 }
0x12db   : > { %v6151_v0 = vsub.f32 0.0, %v6149_v50  ;;  %v6152_v17 = vsub.f32 0.0, %v6150_v40  ;;  %v1073_v30 = vpop.permute.xlu0 %1072  ;;  %1794 = vrot.lane.b32.xlu1 %v14149_v14, %s9710_s27  ;;  %v1068_v50 = vsel %vm806_vm2, %v1065_v6, %v1067_v11  ;;  %v1069_v40 = vsel %vm806_vm2, %v1067_v11, %v1065_v6  ;;  %v9442_v11 = vld [vmem:[%s9776_s14 + $0x9d4] sm:$0xf0] }
0x12dc   : > { %v1076_v25 = vsel %vm820_vm1, %v1073_v30, %v1075_v44  ;;  %v1077_v15 = vsel %vm820_vm1, %v1075_v44, %v1073_v30  ;;  %v9004_v14 = vor.u32 %v9428_v1, %v9003_v55  ;;  %v1070_v6 = vmul.f32 %v1069_v40, %v9988_v43 }
0x12dd   : > { %v6153_v28 = vmul.f32 1.442695, %v6151_v0  ;;  %v6155_v19 = vmul.f32 1.442695, %v6152_v17  ;;  %v9444_v0 = vld [vmem:[%s9776_s14 + $0x9e4] sm:$0xf0]  ;;  %v1078_v53 = vmul.f32 %v1077_v15, %v9979_v33  ;;  %v1079_v10 = vmul.f32 %v1076_v25, %v9981_v37 }
0x12de   : > { %6577 = vmatpush.bf16.msra.mxu0 %v9004_v14  ;;  %v9060_v25 = vor.u32 %v9442_v11, %v9059_v51  ;;  %v1115_v14 = vpop.permute.xlu2 %1114  ;;  %v8979_v51 = vld [vmem:[%s9776_s14 + $0x930] sm:$0xf]  ;;  %v9422_v11 = vld [vmem:[%s9776_s14 + $0x934] sm:$0xf0] }
0x12df   : > { %9574 = vpow2.f32 %v6153_v28  ;;  %v9068_v28 = vor.u32 %v9444_v0, %v9067_v52  ;;  %v1080_v55 = vadd.f32 %v1078_v53, %v1070_v6  ;;  %v9043_v6 = vld [vmem:[%s9776_s14 + $0x9b0] sm:$0xf] }
0x12e0   : > { %9576 = vpow2.f32 %v6155_v19  ;;  %v8995_v19 = vld [vmem:[%s9776_s14 + $0x950] sm:$0xf] }
0x12e1   : > { %6590 = vmatpush.bf16.msra.mxu1 %v9068_v28  ;;  %v8996_v15 = vor.u32 %v9426_v27, %v8995_v19  ;;  %v9440_v27 = vld [vmem:[%s9776_s14 + $0x9c4] sm:$0xf0] }
0x12e2   : > { %v1093_v9 = vpop.permute.xlu1 %1092 }
0x12e3   : > { %v1085_v5 = vpop.permute.xlu0 %1084  ;;  %2369 = vrot.lane.b32.xlu1 %v14150_v7, %s9702_s20  ;;  %v1071_v7 = vmul.f32 %v1068_v50, %v9992_v45  ;;  %v1096_v50 = vsel %vm852_vm4, %v1093_v9, %v1095_v29  ;;  %v1097_v40 = vsel %vm852_vm4, %v1095_v29, %v1093_v9  ;;  %6578 = vmatpush.bf16.msra.mxu0 %v8996_v15  ;;  %v9711_v9 = vmov 0.01   ;;  %v9661_v15 = vld [vmem:[%s10117_s12] sm:$0xff] }
0x12e4   : > { %v1086_v44 = vsel %vm836_vm3, %v1083_v8, %v1085_v5  ;;  %v1087_v30 = vsel %vm836_vm3, %v1085_v5, %v1083_v8  ;;  %v1098_v53 = vmul.f32 %v1097_v40, %v10010_v63 }
0x12e5   : > { %v9575_v17 = vpop.eup %9574  ;;  %v1088_v8 = vmul.f32 %v1087_v30, %v10005_v60  ;;  %v1089_v5 = vmul.f32 %v1086_v44, %v10007_v61  ;;  %v1081_v1 = vadd.f32 %v1079_v10, %v1071_v7  ;;  %v8987_v30 = vld [vmem:[%s9776_s14 + $0x940] sm:$0xf]  ;;  %v9424_v44 = vld [vmem:[%s9776_s14 + $0x944] sm:$0xf0]  ;;  %6591 = vmatpush.bf16.msra.mxu1 %v9060_v25  ;;  %v1099_v10 = vmul.f32 %v1096_v50, %v10015_v4  ;;  %v12592_v50 = vld [vmem:[%s12456_s28 + $0x38] sm:$0xff] }
0x12e6   : > { %v9577_v2 = vpop.eup %9576  ;;  %v6157_v48 = vadd.f32 1.0, %v9575_v17  ;;  %v14151_v17 = vld [vmem:[#allocation34_spill] sm:$0xff] }
0x12e7   : > { %v6158_v46 = vadd.f32 1.0, %v9577_v2  ;;  %v1090_v28 = vadd.f32 %v1088_v8, %v1080_v55  ;;  %v1091_v19 = vadd.f32 %v1089_v5, %v1081_v1  ;;  %v8988_v2 = vor.u32 %v9424_v44, %v8987_v30  ;;  %v9438_v55 = vld [vmem:[%s9776_s14 + $0x9b4] sm:$0xf0]  ;;  %v9662_v30 = vld [vmem:[%s10117_s12 + $0x8] sm:$0xff]  ;;  %v12589_v44 = vld [vmem:[%s12456_s28 + $0x30] sm:$0xff] }
0x12e8   : > { %9578 = vrcp.f32 %v6157_v48 }
0x12e9   : > { %9580 = vrcp.f32 %v6158_v46  ;;  %v9051_v46 = vld [vmem:[%s9776_s14 + $0x9c0] sm:$0xf]  ;;  %v1100_v1 = vadd.f32 %v1098_v53, %v1090_v28  ;;  %6579 = vmatpush.bf16.msra.mxu0 %v8988_v2 }
0x12ea   : > { %v1107_v52 = vpop.permute.xlu1 %1106  ;;  %v9052_v29 = vor.u32 %v9440_v27, %v9051_v46  ;;  %9582 = vrcp.f32 %v9711_v9  ;;  %v8980_v46 = vor.u32 %v9422_v11, %v8979_v51  ;;  %v9044_v27 = vor.u32 %v9438_v55, %v9043_v6  ;;  %v9663_v28 = vld [vmem:[%s13984_s7] sm:$0xff]  ;;  %v14153_v11 = vld [vmem:[#allocation5_spill] sm:$0xff] }
0x12eb   : > { %v1105_v0 = vpop.permute.xlu0 %1104  ;;  %2371 = vrot.lane.b32.xlu1 %v14151_v17, %s9702_s20  ;;  %v1101_v17 = vadd.f32 %v1099_v10, %v1091_v19  ;;  %v8971_v53 = vld [vmem:[%s9776_s14 + $0x920] sm:$0xf]  ;;  %v9420_v10 = vld [vmem:[%s9776_s14 + $0x924] sm:$0xf0]  ;;  %v1102_v6 = vadd.f32 %v1100_v1, %v14153_v11  ;;  %v8963_v1 = vld [vmem:[%s9776_s14 + $0x910] sm:$0xf] }
0x12ec   : > { %v1108_v8 = vsel %vm870_vm5, %v1105_v0, %v1107_v52  ;;  %v1109_v5 = vsel %vm870_vm5, %v1107_v52, %v1105_v0  ;;  %6592 = vmatpush.bf16.msra.mxu1 %v9052_v29  ;;  %v14152_v29 = vld [vmem:[#allocation35_spill] sm:$0xff]  ;;  %v9035_v51 = vld [vmem:[%s9776_s14 + $0x9a0] sm:$0xf] }
0x12ed   : > { %v1110_v52 = vmul.f32 %v1108_v8, %v10031_v20  ;;  %v1111_v0 = vmul.f32 %v1109_v5, %v10033_v22  ;;  %6580 = vmatpush.bf16.msra.mxu0 %v8980_v46  ;;  %v9434_v46 = vld [vmem:[%s9776_s14 + $0x994] sm:$0xf0] }
0x12ee   : > { %v9579_v48 = vpop.eup %9578 }
0x12ef   : > { %v9581_v7 = vpop.eup %9580  ;;  %v6161_v25 = vmul.f32 %v9661_v15, %v9579_v48  ;;  %v1837_v48 = vadd.f32 %v12592_v50, %v12589_v44  ;;  %v1112_v11 = vadd.f32 %v1110_v52, %v1102_v6  ;;  %v9013_v6 = vld [vmem:[%s9776_s14 + $0x978] sm:$0xf0] }
0x12f0   : > { %v6162_v40 = vmul.f32 %v9662_v30, %v9581_v7  ;;  %v12600_v2 = vpop.eup %9582  ;;  %v14154_v7 = vld [vmem:[#allocation6_spill] sm:$0xff]  ;;  %6593 = vmatpush.bf16.msra.mxu1 %v9044_v27 }
0x12f1   : > { %6178 = vmatpush.msrb.mxu2 %v6161_v25  ;;  %v1103_v8 = vadd.f32 %v1101_v17, %v14154_v7  ;;  %v9436_v25 = vld [vmem:[%s9776_s14 + $0x9a4] sm:$0xf0]  ;;  %v1127_v17 = vpop.permute.xlu2 %1126  ;;  %v1166_v23 = vmul.f32 0.01, %v12600_v2  ;;  %vm1170_vm9 = vweird.f32 %v12600_v2 }
0x12f2   : > { %6222 = vmatpush.msrb.mxu3 %v6162_v40  ;;  %8897 = vmatmul.msk.f32.vlgmr.msrb.gmra.mxu2 %vm686_vm0, %v9663_v28  ;;  %v1125_v19 = vpop.permute.xlu1 %1124  ;;  %v8972_v40 = vor.u32 %v9420_v10, %v8971_v53 }
0x12f3   : > { %8906 = vmatmul.msk.f32.vlgmr.msrb.gmra.mxu3 %vm686_vm0, %v9663_v28  ;;  %v1117_v9 = vpop.permute.xlu0 %1116  ;;  %2377 = vrot.lane.b32.xlu1 %v14152_v29, %s9703_s21  ;;  %v9036_v28 = vor.u32 %v9436_v25, %v9035_v51  ;;  %v9418_v29 = vld [vmem:[%s9776_s14 + $0x914] sm:$0xf0]  ;;  %v1113_v7 = vadd.f32 %v1111_v0, %v1103_v8  ;;  %v1129_v27 = vsel %vm902_vm7, %v1127_v17, %v1125_v19  ;;  %v9429_v0 = vld [vmem:[%s9776_s14 + $0x974] sm:$0xf] }
0x12f4   : > { %v1118_v5 = vsel %vm886_vm6, %v1115_v14, %v1117_v9  ;;  %v1119_v15 = vsel %vm886_vm6, %v1117_v9, %v1115_v14  ;;  %v9027_v14 = vld [vmem:[%s9776_s14 + $0x990] sm:$0xf]  ;;  %v1128_v9 = vsel %vm902_vm7, %v1125_v19, %v1127_v17  ;;  %6581 = vmatpush.bf16.msra.mxu0 %v8972_v40  ;;  %v8964_v51 = vor.u32 %v9418_v29, %v8963_v1  ;;  %v9445_v8 = vld [vmem:[%s9776_s14 + $0x9f4] sm:$0xf]  ;;  %v9664_v19 = vld [vmem:[%s13984_s7 + $0x8] sm:$0xff] }
0x12f5   : > { %v1120_v55 = vmul.f32 %v1118_v5, %v10047_v32  ;;  %v1121_v30 = vmul.f32 %v1119_v15, %v10051_v38  ;;  %6594 = vmatpush.bf16.msra.mxu1 %v9036_v28  ;;  %v9028_v52 = vor.u32 %v9434_v46, %v9027_v14  ;;  %v1130_v5 = vmul.f32 %v1128_v9, %v10058_v47  ;;  %v14155_v28 = vld [vmem:[#allocation36_spill] sm:$0xff]  ;;  %v8955_v29 = vld [vmem:[%s9776_s14 + $0x900] sm:$0xf]  ;;  %v9416_v17 = vld [vmem:[%s9776_s14 + $0x904] sm:$0xf0] }
0x12f6   : > { %v1131_v15 = vmul.f32 %v1129_v27, %v10061_v56  ;;  %v9432_v9 = vld [vmem:[%s9776_s14 + $0x984] sm:$0xf0]  ;;  %v9427_v27 = vld [vmem:[%s9776_s14 + $0x964] sm:$0xf] }
0x12f7   : > { %v1122_v53 = vadd.f32 %v1120_v55, %v1112_v11  ;;  %v1123_v10 = vadd.f32 %v1121_v30, %v1113_v7  ;;  %v9016_v55 = vor.u32 %v9429_v0, %v9013_v6  ;;  %v9077_v30 = vld [vmem:[%s9776_s14 + $0x9f8] sm:$0xf0]  ;;  %v9019_v11 = vld [vmem:[%s9776_s14 + $0x980] sm:$0xf]  ;;  %v9005_v0 = vld [vmem:[%s9776_s14 + $0x968] sm:$0xf0] }
0x12f8   : > { %v9080_v1 = vor.u32 %v9445_v8, %v9077_v30  ;;  %6582 = vmatpush.bf16.msra.mxu0 %v8964_v51  ;;  %v9008_v51 = vor.u32 %v9427_v27, %v9005_v0  ;;  %v14156_v27 = vld [vmem:[#allocation37_spill] sm:$0xff] }
0x12f9   : > { %1838 = vadd.xlane.f32.xlu2 %v1837_v48  ;;  %v1167_v48 = vsub.f32 1.0, %v1166_v23  ;;  %v1132_v7 = vadd.f32 %v1130_v5, %v1122_v53  ;;  %v1133_v14 = vadd.f32 %v1131_v15, %v1123_v10  ;;  %6595 = vmatpush.bf16.msra.mxu1 %v9028_v52  ;;  %v8956_v53 = vor.u32 %v9416_v17, %v8955_v29  ;;  %v9443_v10 = vld [vmem:[%s9776_s14 + $0x9e4] sm:$0xf]  ;;  %v9069_v5 = vld [vmem:[%s9776_s14 + $0x9e8] sm:$0xf0] }
0x12fa   : > { %8898 = vmatmul.msk.f32.gmra.mxu2 %vm686_vm0, %v9664_v19  ;;  %v1137_v25 = vpop.permute.xlu1 %1136  ;;  %6615 = vmatpush.bf16.msra.mxu3 %v9080_v1  ;;  %v9020_v15 = vor.u32 %v9432_v9, %v9019_v11  ;;  %v9072_v30 = vor.u32 %v9443_v10, %v9069_v5  ;;  %v9425_v1 = vld [vmem:[%s9776_s14 + $0x954] sm:$0xf]  ;;  %v8997_v17 = vld [vmem:[%s9776_s14 + $0x958] sm:$0xf0]  ;;  %v9423_v10 = vld [vmem:[%s9776_s14 + $0x944] sm:$0xf] }
0x12fb   : > { %8907 = vmatmul.msk.f32.gmra.mxu3 %vm686_vm0, %v9664_v19  ;;  %v1135_v40 = vpop.permute.xlu0 %1134  ;;  %2379 = vrot.lane.b32.xlu1 %v14155_v28, %s9703_s21  ;;  %v1151_v28 = vld [vmem:[%s12456_s28] sm:$0xff]  ;;  %v1168_v52 = vmul.f32 %v12600_v2, %v1167_v48  ;;  %v9441_v11 = vld [vmem:[%s9776_s14 + $0x9d4] sm:$0xf]  ;;  %v9061_v48 = vld [vmem:[%s9776_s14 + $0x9d8] sm:$0xf0] }
0x12fc   : > { %v1138_v23 = vsel %vm918_vm8, %v1135_v40, %v1137_v25  ;;  %v1139_v46 = vsel %vm918_vm8, %v1137_v25, %v1135_v40  ;;  %6602 = vmatpush.bf16.msra.mxu2 %v9016_v55  ;;  %v12655_v40 = vpop.permute.xlu2 %1146  ;;  %6583 = vmatpush.bf16.msra.mxu0 %v8956_v53  ;;  %v9064_v0 = vor.u32 %v9441_v11, %v9061_v48  ;;  %v8989_v5 = vld [vmem:[%s9776_s14 + $0x948] sm:$0xf0]  ;;  %v9666_v11 = vld [vmem:[%s13984_s7 + $0x18] sm:$0xff] }
0x12fd   : > { %v1140_v6 = vmul.f32 %v1138_v23, %v10079_v12  ;;  %v1141_v8 = vmul.f32 %v1139_v46, %v10081_v13  ;;  %v1152_v23 = vld [vmem:[%s12456_s28 + $0x8] sm:$0xff]  ;;  %6596 = vmatpush.bf16.msra.mxu1 %v9020_v15  ;;  %v9439_v15 = vld [vmem:[%s9776_s14 + $0x9c4] sm:$0xf] }
0x12fe   : > { %6616 = vmatpush.bf16.msra.mxu3 %v9072_v30 }
0x12ff   : > { %v1142_v19 = vadd.f32 %v1140_v6, %v1132_v7  ;;  %v1143_v25 = vadd.f32 %v1141_v8, %v1133_v14  ;;  %v9665_v7 = vld [vmem:[%s13984_s7 + $0x10] sm:$0xff]  ;;  %v9000_v14 = vor.u32 %v9425_v1, %v8997_v17  ;;  %v1169_v6 = vadd.f32 %v12600_v2, %v1168_v52  ;;  %6584 = vmatmul.bf16.vlgmr.msra.gmra.mxu0 %v9848_v35  ;;  %v8981_v1 = vld [vmem:[%s9776_s14 + $0x938] sm:$0xf0] }
0x1300   : > { %6603 = vmatpush.bf16.msra.mxu2 %v9008_v51  ;;  %6597 = vmatmul.bf16.vlgmr.msra.gmra.mxu1 %v9850_v36  ;;  %v9053_v51 = vld [vmem:[%s9776_s14 + $0x9c8] sm:$0xf0]  ;;  %v9437_v17 = vld [vmem:[%s9776_s14 + $0x9b4] sm:$0xf] }
0x1301   : > { %v1149_v55 = vadd.f32 %v12655_v40, %v1142_v19  ;;  %v1150_v29 = vadd.f32 %v12655_v40, %v1143_v25  ;;  %v12682_v30 = vsel %vm1170_vm9, %v12600_v2, %v1169_v6  ;;  %v14157_v2 = vld [vmem:[#allocation40_spill] sm:$0xff] }
0x1302   : > { %8899 = vmatmul.msk.f32.gmra.mxu2 %vm686_vm0, %v9665_v7  ;;  %6617 = vmatpush.bf16.msra.mxu3 %v9064_v0 }
0x1303   : > { %v1155_v46 = vsub.f32 %v1149_v55, %v1151_v28  ;;  %v1156_v9 = vsub.f32 %v1150_v29, %v1152_v23  ;;  %8908 = vmatmul.msk.f32.gmra.mxu3 %vm686_vm0, %v9665_v7  ;;  %2387 = vrot.lane.b32.xlu1 %v14156_v27, %s9704_s22  ;;  %v8992_v28 = vor.u32 %v9423_v10, %v8989_v5  ;;  %v9421_v29 = vld [vmem:[%s9776_s14 + $0x934] sm:$0xf]  ;;  %v9045_v7 = vld [vmem:[%s9776_s14 + $0x9b8] sm:$0xf0]  ;;  %v9419_v10 = vld [vmem:[%s9776_s14 + $0x924] sm:$0xf] }
0x1304   : > { %6604 = vmatpush.bf16.msra.mxu2 %v9000_v14  ;;  %v9056_v23 = vor.u32 %v9439_v15, %v9053_v51  ;;  %v8984_v27 = vor.u32 %v9421_v29, %v8981_v1  ;;  %v9048_v0 = vor.u32 %v9437_v17, %v9045_v7  ;;  %v8973_v5 = vld [vmem:[%s9776_s14 + $0x928] sm:$0xf0]  ;;  %v9435_v15 = vld [vmem:[%s9776_s14 + $0x9a4] sm:$0xf]  ;;  %v8965_v29 = vld [vmem:[%s9776_s14 + $0x918] sm:$0xf0] }
0x1305   : > { %v1157_v8 = vand.u32 2147483647, %v1155_v46  ;;  %v1158_v53 = vand.u32 2147483647, %v1156_v9  ;;  %v9433_v1 = vld [vmem:[%s9776_s14 + $0x994] sm:$0xf] }
0x1306   : > { %6618 = vmatpush.bf16.msra.mxu3 %v9056_v23 }
0x1307   : > { %v1161_v19 = vmul.f32 0.5, %v1157_v8  ;;  %v1162_v25 = vmul.f32 0.5, %v1158_v53  ;;  %vm1159_vm10 = vcmp.lt.f32.partialorder %v1157_v8, 0.01  ;;  %vm1160_vm11 = vcmp.lt.f32.partialorder %v1158_v53, 0.01 }
0x1308   : > { %v7303_v48 = vadd.f32 -0.005, %v1157_v8  ;;  %v7304_v9 = vadd.f32 -0.005, %v1158_v53  ;;  %6605 = vmatpush.bf16.msra.mxu2 %v8992_v28  ;;  %v14158_v28 = vld [vmem:[#allocation39_spill] sm:$0xff] }
0x1309   : > { %v1163_v52 = vmul.f32 %v1161_v19, %v1157_v8  ;;  %v1164_v55 = vmul.f32 %v1162_v25, %v1158_v53  ;;  %v9037_v25 = vld [vmem:[%s9776_s14 + $0x9a8] sm:$0xf0]  ;;  %v8976_v53 = vor.u32 %v9419_v10, %v8973_v5  ;;  %v14161_v10 = vld [vmem:[#allocation44_spill] sm:$0xff]  ;;  %v14162_v5 = vld [vmem:[#allocation49_spill] sm:$0xff] }
0x130a   : > { %8900 = vmatmul.msk.f32.gmra.mxu2 %vm686_vm0, %v9666_v11  ;;  %6619 = vmatpush.bf16.msra.mxu3 %v9048_v0  ;;  %v9040_v23 = vor.u32 %v9435_v15, %v9037_v25  ;;  %v14160_v0 = vld [vmem:[#allocation46_spill] sm:$0xff]  ;;  %v9669_v15 = vld [vmem:[%s13984_s7 + $0x30] sm:$0xff]  ;;  %v9670_v25 = vld [vmem:[%s13984_s7 + $0x38] sm:$0xff] }
0x130b   : > { %8909 = vmatmul.msk.f32.gmra.mxu3 %vm686_vm0, %v9666_v11  ;;  %2399 = vrot.lane.b32.xlu1 %v14157_v2, %s9705_s23  ;;  %v1172_v14 = vmul.f32 %v12682_v30, %v1163_v52  ;;  %v1173_v46 = vmul.f32 %v12682_v30, %v1164_v55  ;;  %v9417_v55 = vld [vmem:[%s9776_s14 + $0x914] sm:$0xf]  ;;  %v14159_v11 = vld [vmem:[#allocation43_spill] sm:$0xff]  ;;  %v9415_v2 = vld [vmem:[%s9776_s14 + $0x904] sm:$0xf] }
0x130c   : > { %6606 = vmatpush.bf16.msra.mxu2 %v8984_v27  ;;  %v8968_v7 = vor.u32 %v9417_v55, %v8965_v29  ;;  %v14169_v55 = vld [vmem:[#allocation52_spill] sm:$0xff] }
0x130d   : > { %v1176_v6 = vsel %vm1159_vm10, %v1172_v14, %v7303_v48  ;;  %v1177_v51 = vsel %vm1160_vm11, %v1173_v46, %v7304_v9  ;;  %v8957_v14 = vld [vmem:[%s9776_s14 + $0x908] sm:$0xf0]  ;;  %v9431_v48 = vld [vmem:[%s9776_s14 + $0x984] sm:$0xf]  ;;  %v12763_v29 = vld [vmem:[%s12456_s28 + $0x50] sm:$0xff] }
0x130e   : > { %v1178_v19 = vmul.f32 %v1176_v6, %v12459_v41  ;;  %v1179_v8 = vmul.f32 %v1177_v51, %v12462_v54  ;;  %v9667_v41 = vld [vmem:[%s13984_s7 + $0x20] sm:$0xff]  ;;  %6620 = vmatpush.bf16.msra.mxu3 %v9040_v23  ;;  %v9029_v54 = vld [vmem:[%s9776_s14 + $0x998] sm:$0xf0]  ;;  %v9021_v46 = vld [vmem:[%s9776_s14 + $0x988] sm:$0xf0]  ;;  %v8960_v27 = vor.u32 %v9415_v2, %v8957_v14 }
0x130f   : > { %v9032_v17 = vor.u32 %v9433_v1, %v9029_v54  ;;  %v9024_v9 = vor.u32 %v9431_v48, %v9021_v46  ;;  %v9668_v6 = vld [vmem:[%s13984_s7 + $0x28] sm:$0xff]  ;;  %v12766_v1 = vld [vmem:[%s12456_s28 + $0x58] sm:$0xff] }
0x1310   : > { %v1180_v52 = vadd.f32 %v1179_v8, %v1178_v19  ;;  %6607 = vmatpush.bf16.msra.mxu2 %v8976_v53  ;;  %v14163_v51 = vld [vmem:[#allocation47_spill] sm:$0xff]  ;;  %v14164_v19 = vld [vmem:[#allocation21_spill] sm:$0xff]  ;;  %v14165_v8 = vld [vmem:[#allocation50_spill] sm:$0xff]  ;;  %v2484_v54 = vadd.f32 %v12766_v1, %v12763_v29 }
0x1311   : > { %2397 = vrot.lane.b32.xlu2 %v14158_v28, %s9705_s23  ;;  %v14166_v23 = vld [vmem:[#allocation27_spill] sm:$0xff]  ;;  %v9671_v53 = vld [vmem:[%s13984_s7 + $0x40] sm:$0xff]  ;;  %v14174_v14 = vld [vmem:[#allocation57_spill] sm:$0xff] }
0x1312   : > { %8901 = vmatmul.msk.f32.gmra.mxu2 %vm686_vm0, %v9667_v41  ;;  %1181 = vadd.xlane.f32.xlu0 %v1180_v52  ;;  %v14167_v28 = vld [vmem:[#allocation51_spill] sm:$0xff]  ;;  %v14168_v52 = vld [vmem:[#allocation30_spill] sm:$0xff]  ;;  %v14175_v48 = vld [vmem:[#allocation61_spill] sm:$0xff] }
0x1313   : > { %8910 = vmatmul.msk.f32.gmra.mxu3 %vm686_vm0, %v9667_v41  ;;  %2409 = vrot.lane.b32.xlu1 %v14159_v11, %s9706_s24  ;;  %v14170_v41 = vld [vmem:[#allocation53_spill] sm:$0xff] }
0x1314   : > { %6621 = vmatpush.bf16.msra.mxu3 %v9032_v17  ;;  %6608 = vmatpush.bf16.msra.mxu2 %v8968_v7  ;;  %v14171_v17 = vld [vmem:[#allocation54_spill] sm:$0xff]  ;;  %v14176_v46 = vld [vmem:[#allocation65_spill] sm:$0xff] }
0x1315   : > { %v14173_v7 = vld [vmem:[#allocation58_spill] sm:$0xff] }
0x1318   : > { %6622 = vmatpush.bf16.msra.mxu3 %v9024_v9  ;;  %6609 = vmatpush.bf16.msra.mxu2 %v8960_v27  ;;  %v14177_v27 = vld [vmem:[#allocation63_spill] sm:$0xff] }
0x1319   : > { %2421 = vrot.lane.b32.xlu2 %v14160_v0, %s9708_s25  ;;  %v14178_v0 = vld [vmem:[#allocation68_spill] sm:$0xff] }
0x131a   : > { %8902 = vmatmul.msk.f32.gmra.mxu2 %vm686_vm0, %v9668_v6 }
0x131b   : > { %8911 = vmatmul.msk.f32.gmra.mxu3 %vm686_vm0, %v9668_v6  ;;  %2411 = vrot.lane.b32.xlu1 %v14161_v10, %s9706_s24  ;;  %v14179_v6 = vld [vmem:[#allocation66_spill] sm:$0xff] }
0x1321   : > { %2439 = vrot.lane.b32.xlu2 %v14162_v5, %s9710_s27 }
0x1322   : > { %8903 = vmatmul.msk.f32.gmra.mxu2 %vm686_vm0, %v9669_v15 }
0x1323   : > { %8912 = vmatmul.msk.f32.gmra.mxu3 %vm686_vm0, %v9669_v15  ;;  %2429 = vrot.lane.b32.xlu1 %v14163_v51, %s9709_s26  ;;  %v14181_v51 = vld [vmem:[#allocation69_spill] sm:$0xff] }
0x1326   : > { %1750 = vrot.lane.b32.xlu0 %v14164_v19, %s9705_s23  ;;  %v1192_v19 = vpop.xlane.xlu1 %1191 }
0x132a   : > { %8904 = vmatmul.msk.f32.gmra.mxu2 %vm686_vm0, %v9670_v25 }
0x132b   : > { %8913 = vmatmul.msk.f32.gmra.mxu3 %vm686_vm0, %v9670_v25  ;;  %2441 = vrot.lane.b32.xlu1 %v14165_v8, %s9710_s27  ;;  %v1193_v8 = vrot.slane %v1192_v19, 4 }
0x132e   : > { %1772 = vrot.lane.b32.xlu0 %v14166_v23, %s9708_s25 }
0x1332   : > { %8905 = vmatmul.msk.f32.gmra.mxu2 %vm686_vm0, %v9671_v53 }
0x1333   : > { %8914 = vmatmul.msk.f32.gmra.mxu3 %vm686_vm0, %v9671_v53  ;;  %3016 = vrot.lane.b32.xlu1 %v14167_v28, %s9702_s20 }
0x1336   : > { %1784 = vrot.lane.b32.xlu0 %v14168_v52, %s9709_s26 }
0x133a   : > { %6610 = vmatmul.bf16.vlgmr.msra.gmra.mxu2 %v9848_v35  ;;  %v1723_v35 = vpop.permute.xlu2 %1722 }
0x133b   : > { %6623 = vmatmul.bf16.vlgmr.msra.gmra.mxu3 %v9850_v36  ;;  %3018 = vrot.lane.b32.xlu1 %v14169_v55, %s9702_s20  ;;  %v14172_v36 = vld [vmem:[#allocation55_spill] sm:$0xff]  ;;  %v1194_v55 = vadd.f32 %v1193_v8, %v1192_v19 }
0x1342   : > { %v1725_v11 = vpop.permute.xlu2 %1724 }
0x1343   : > { %3024 = vrot.lane.b32.xlu1 %v14170_v41, %s9703_s21  ;;  %v14184_v41 = vld [vmem:[#allocation70_spill] sm:$0xff] }
0x134a   : > { %2485 = vadd.xlane.f32.xlu2 %v2484_v54  ;;  %v1731_v2 = vpop.permute.xlu2 %1730 }
0x134b   : > { %3026 = vrot.lane.b32.xlu1 %v14171_v17, %s9703_s21 }
0x1352   : > { %v1733_v9 = vpop.permute.xlu2 %1732 }
0x1353   : > { %3034 = vrot.lane.b32.xlu1 %v14172_v36, %s9704_s22 }
0x135a   : > { %v1741_v5 = vpop.permute.xlu2 %1740 }
0x135b   : > { %3046 = vrot.lane.b32.xlu1 %v14173_v7, %s9705_s23 }
0x1362   : > { %3044 = vrot.lane.b32.xlu2 %v14174_v14, %s9705_s23  ;;  %v1743_v53 = vpop.permute.xlu2 %1742  ;;  %v1195_v14 = vrot.slane %v1194_v55, 2 }
0x1363   : > { %3056 = vrot.lane.b32.xlu1 %v14175_v48, %s9706_s24 }
0x136a   : > { %3076 = vrot.lane.b32.xlu2 %v14176_v46, %s9709_s26  ;;  %v1763_v19 = vpop.permute.xlu2 %1762 }
0x136b   : > { %3066 = vrot.lane.b32.xlu1 %v14177_v27, %s9708_s25 }
0x1372   : > { %3088 = vrot.lane.b32.xlu2 %v14178_v0, %s9710_s27 }
0x1373   : > { %3078 = vrot.lane.b32.xlu1 %v14179_v6, %s9709_s26  ;;  %v14187_v6 = vld [vmem:[#allocation71_spill] sm:$0xff] }
0x1375   : > { %v12790_v10 = vpop.f32.mrf.mxu2 }
0x1376   : > { %v12792_v15 = vpop.f32.mrf.mxu3 }
0x1377   : > { %14180 = vst [vmem:[#allocation9_spill] sm:$0xff] %v12792_v15 }
0x137a   : > { %3663 = vrot.lane.b32.xlu2 %v14181_v51, %s9702_s20  ;;  %v1196_v51 = vadd.f32 %v1195_v14, %v1194_v55  ;;  %v14190_v55 = vld [vmem:[#allocation72_spill] sm:$0xff]  ;;  %v1753_v14 = vpop.permute.xlu1 %1752 }
0x137c   : > { %v6585_v28 = vpop.f32.mrf.mxu0 }
0x137d   : > { %v12796_v25 = vpop.f32.mrf.mxu2  ;;  %v6598_v52 = vpop.f32.mrf.mxu1 }
0x137e   : > { %14182 = vst [vmem:[#allocation4_spill] sm:$0xff] %v12796_v25  ;;  %v12798_v23 = vpop.f32.mrf.mxu3  ;;  %v6599_v54 = vadd.f32 %v6598_v52, %v6585_v28 }
0x137f   : > { %14183 = vst [vmem:[#allocation3_spill] sm:$0xff] %v12798_v23 }
0x1380   : > { %6643 = vmatpush.msrb.mxu0 %v6599_v54  ;;  %v1197_v54 = vrot.slane %v1196_v51, 1 }
0x1381   : > { %9081 = vmatmul.msk.f32.vlgmr.msrb.gmra.mxu0 %vm686_vm0, %v12305_v58  ;;  %v12815_v58 = vld [vmem:[%s13982_s5 + $0x8] sm:$0xff] }
0x1382   : > { %3665 = vrot.lane.b32.xlu2 %v14184_v41, %s9702_s20 }
0x1384   : > { %v6587_v27 = vpop.f32.mrf.mxu0 }
0x1385   : > { %v12802_v17 = vpop.f32.mrf.mxu2  ;;  %v1182_v7 = vpop.xlane.xlu0 %1181  ;;  %v1198_v27 = vadd.f32 %v1197_v54, %v1196_v51  ;;  %v1734_v51 = vsel %vm820_vm1, %v1731_v2, %v1733_v9  ;;  %v1726_v54 = vsel %vm806_vm2, %v1723_v35, %v1725_v11 }
0x1386   : > { %14185 = vst [vmem:[#allocation12_spill] sm:$0xff] %v12802_v17  ;;  %v12806_v36 = vpop.f32.mrf.mxu3  ;;  %v1183_v48 = vrot.slane %v1182_v7, 4  ;;  %v6600_v0 = vpop.f32.mrf.mxu1 }
0x1387   : > { %14186 = vst [vmem:[#allocation8_spill] sm:$0xff] %v12806_v36  ;;  %v1783_v36 = vpop.permute.xlu1 %1782 }
0x1388   : > { %v1184_v46 = vadd.f32 %v1183_v48, %v1182_v7 }
0x1389   : > { %9082 = vmatmul.msk.f32.gmra.mxu0 %vm686_vm0, %v12815_v58 }
0x138a   : > { %3671 = vrot.lane.b32.xlu2 %v14187_v6, %s9703_s21  ;;  %v1185_v8 = vrot.slane %v1184_v46, 2  ;;  %v12828_v6 = vld [vmem:[%s13982_s5 + $0x10] sm:$0xff] }
0x138c   : > { %v1186_v52 = vadd.f32 %v1185_v8, %v1184_v46  ;;  %v1765_v46 = vpop.permute.xlu2 %1764  ;;  %v1735_v8 = vsel %vm820_vm1, %v1733_v9, %v1731_v2 }
0x138d   : > { %v12810_v28 = vpop.f32.mrf.mxu2 }
0x138e   : > { %14188 = vst [vmem:[#allocation7_spill] sm:$0xff] %v12810_v28  ;;  %v12819_v41 = vpop.f32.mrf.mxu3  ;;  %v1187_v7 = vrot.slane %v1186_v52, 1 }
0x138f   : > { %14189 = vst [vmem:[#allocation11_spill] sm:$0xff] %v12819_v41 }
0x1390   : > { %v1188_v48 = vadd.f32 %v1187_v7, %v1186_v52  ;;  %v1727_v7 = vsel %vm806_vm2, %v1725_v11, %v1723_v35  ;;  %v1729_v11 = vmul.f32 %v1726_v54, %v9992_v45 }
0x1391   : > { %9083 = vmatmul.msk.f32.gmra.mxu0 %vm686_vm0, %v12828_v6  ;;  %v1728_v35 = vmul.f32 %v1727_v7, %v9988_v43 }
0x1392   : > { %3673 = vrot.lane.b32.xlu2 %v14190_v55, %s9703_s21  ;;  %9449 = vpush %v1188_v48  ;;  %v1744_v48 = vsel %vm836_vm3, %v1741_v5, %v1743_v53  ;;  %v1736_v55 = vmul.f32 %v1735_v8, %v9979_v33 }
0x1393   : > { %9451 = vpush %v1198_v27  ;;  %v1745_v27 = vsel %vm836_vm3, %v1743_v53, %v1741_v5  ;;  %v1747_v53 = vmul.f32 %v1744_v48, %v10007_v61 }
0x1394   : > { %v1746_v5 = vmul.f32 %v1745_v27, %v10005_v60  ;;  %v1738_v8 = vadd.f32 %v1736_v55, %v1728_v35  ;;  %v14195_v55 = vld [vmem:[#allocation79_spill] sm:$0xff] }
0x1395   : > { %v12823_v0 = vpop.f32.mrf.mxu2 }
0x1396   : > { %14191 = vst [vmem:[#allocation10_spill] sm:$0xff] %v12823_v0  ;;  %v12836_v52 = vpop.f32.mrf.mxu3  ;;  %v1737_v0 = vmul.f32 %v1734_v51, %v9981_v37 }
0x1397   : > { %14192 = vst [vmem:[#allocation15_spill] sm:$0xff] %v12836_v52  ;;  %v14193_v52 = vld [vmem:[#allocation74_spill] sm:$0xff] }
0x1398   : > { %v1751_v41 = vpop.permute.xlu0 %1750  ;;  %v1739_v51 = vadd.f32 %v1737_v0, %v1729_v11  ;;  %v1775_v0 = vpop.permute.xlu2 %1774 }
0x1399   : > { %v1754_v2 = vsel %vm852_vm4, %v1751_v41, %v1753_v14  ;;  %v1755_v9 = vsel %vm852_vm4, %v1753_v14, %v1751_v41  ;;  %v12865_v41 = vld [vmem:[%s13982_s5 + $0x18] sm:$0xff] }
0x139a   : > { %3683 = vrot.lane.b32.xlu2 %v14193_v52, %s9704_s22  ;;  %v1756_v42 = vmul.f32 %v1755_v9, %v10010_v63  ;;  %v1757_v3 = vmul.f32 %v1754_v2, %v10015_v4  ;;  %9084 = vmatmul.msk.f32.gmra.mxu0 %vm686_vm0, %v12865_v41  ;;  %v1748_v52 = vadd.f32 %v1746_v5, %v1738_v8  ;;  %v14196_v5 = vld [vmem:[#allocation23_spill] sm:$0xff] }
0x139b   : > { %v1749_v54 = vadd.f32 %v1747_v53, %v1739_v51  ;;  %v1766_v2 = vsel %vm870_vm5, %v1763_v19, %v1765_v46  ;;  %v1767_v9 = vsel %vm870_vm5, %v1765_v46, %v1763_v19  ;;  %v12888_v51 = vld [vmem:[%s13982_s5 + $0x20] sm:$0xff] }
0x139c   : > { %v1758_v7 = vadd.f32 %v1756_v42, %v1748_v52  ;;  %v14197_v42 = vld [vmem:[#allocation24_spill] sm:$0xff]  ;;  %v1768_v46 = vmul.f32 %v1766_v2, %v10031_v20  ;;  %v1769_v52 = vmul.f32 %v1767_v9, %v10033_v22 }
0x139d   : > { %v12860_v21 = vpop.f32.mrf.mxu2  ;;  %v1759_v48 = vadd.f32 %v1757_v3, %v1749_v54  ;;  %v1795_v54 = vpop.permute.xlu1 %1794 }
0x139e   : > { %14194 = vst [vmem:[#allocation14_spill] sm:$0xff] %v12860_v21  ;;  %v12869_v14 = vpop.f32.mrf.mxu3  ;;  %v1760_v53 = vadd.f32 %v1758_v7, %v14196_v5 }
0x139f   : > { %v1761_v3 = vadd.f32 %v1759_v48, %v14197_v42 }
0x13a0   : > { %v1773_v27 = vpop.permute.xlu0 %1772  ;;  %v1793_v48 = vpop.permute.xlu2 %1792 }
0x13a1   : > { %v1776_v35 = vsel %vm886_vm6, %v1773_v27, %v1775_v0  ;;  %v1777_v11 = vsel %vm886_vm6, %v1775_v0, %v1773_v27  ;;  %v1770_v27 = vadd.f32 %v1768_v46, %v1760_v53  ;;  %v1796_v42 = vsel %vm918_vm8, %v1793_v48, %v1795_v54 }
0x13a2   : > { %3703 = vrot.lane.b32.xlu2 %v14195_v55, %s9706_s24  ;;  %9085 = vmatmul.msk.f32.gmra.mxu0 %vm686_vm0, %v12888_v51  ;;  %v1778_v0 = vmul.f32 %v1776_v35, %v10047_v32  ;;  %v1779_v7 = vmul.f32 %v1777_v11, %v10051_v38  ;;  %v1771_v55 = vadd.f32 %v1769_v52, %v1761_v3  ;;  %v14199_v35 = vld [vmem:[#allocation82_spill] sm:$0xff] }
0x13a3   : > { %v1797_v21 = vsel %vm918_vm8, %v1795_v54, %v1793_v48  ;;  %v1798_v52 = vmul.f32 %v1796_v42, %v10079_v12 }
0x13a4   : > { %v1780_v11 = vadd.f32 %v1778_v0, %v1770_v27  ;;  %v1781_v53 = vadd.f32 %v1779_v7, %v1771_v55  ;;  %v1799_v54 = vmul.f32 %v1797_v21, %v10081_v13  ;;  %v7501_v55 = vld [vmem:[%s12456_s28 + $0x20] sm:$0xff] }
0x13a5   : > { %v12883_v8 = vpop.f32.mrf.mxu2 }
0x13a6   : > { %v12892_v19 = vpop.f32.mrf.mxu3 }
0x13a7   : > { %14198 = vst [vmem:[#allocation13_spill] sm:$0xff] %v12892_v19 }
0x13a8   : > { %v1785_v5 = vpop.permute.xlu0 %1784 }
0x13a9   : > { %v1786_v2 = vsel %vm902_vm7, %v1783_v36, %v1785_v5  ;;  %v1787_v9 = vsel %vm902_vm7, %v1785_v5, %v1783_v36  ;;  %v9676_v36 = vld [vmem:[%s13982_s5 + $0x28] sm:$0xff] }
0x13aa   : > { %3715 = vrot.lane.b32.xlu2 %v14199_v35, %s9708_s25  ;;  %v1788_v3 = vmul.f32 %v1786_v2, %v10058_v47  ;;  %v1789_v46 = vmul.f32 %v1787_v9, %v10061_v56  ;;  %9086 = vmatmul.msk.f32.gmra.mxu0 %vm686_vm0, %v9676_v36  ;;  %v7502_v5 = vld [vmem:[%s12456_s28 + $0x28] sm:$0xff]  ;;  %v14201_v2 = vld [vmem:[#allocation85_spill] sm:$0xff] }
0x13ac   : > { %v1790_v48 = vadd.f32 %v1788_v3, %v1780_v11  ;;  %v1791_v19 = vadd.f32 %v1789_v46, %v1781_v53  ;;  %v9677_v46 = vld [vmem:[%s13982_s5 + $0x30] sm:$0xff] }
0x13ad   : > { %v12912_v26 = vpop.f32.mrf.mxu2 }
0x13ae   : > { %v12918_v0 = vpop.f32.mrf.mxu3  ;;  %v1800_v7 = vadd.f32 %v1798_v52, %v1790_v48  ;;  %v1801_v27 = vadd.f32 %v1799_v54, %v1791_v19 }
0x13af   : > { %14200 = vst [vmem:[#allocation16_spill] sm:$0xff] %v12918_v0 }
0x13b0   : > { %v1802_v42 = vadd.f32 %v1800_v7, %v12655_v40  ;;  %v1803_v21 = vadd.f32 %v1801_v27, %v12655_v40 }
0x13b2   : > { %3733 = vrot.lane.b32.xlu2 %v14201_v2, %s9710_s27  ;;  %v1809_v9 = vsub.f32 %v1802_v42, %v7501_v55  ;;  %v1810_v35 = vsub.f32 %v1803_v21, %v7502_v5  ;;  %9087 = vmatmul.msk.f32.gmra.mxu0 %vm686_vm0, %v9677_v46 }
0x13b4   : > { %v1811_v11 = vand.u32 2147483647, %v1809_v9  ;;  %v1812_v53 = vand.u32 2147483647, %v1810_v35  ;;  %v9678_v35 = vld [vmem:[%s13982_s5 + $0x38] sm:$0xff] }
0x13b5   : > { %v12926_v3 = vpop.f32.mrf.mxu2 }
0x13b6   : > { %14202 = vst [vmem:[#allocation17_spill] sm:$0xff] %v12926_v3  ;;  %v12932_v19 = vpop.f32.mrf.mxu3  ;;  %v1815_v52 = vmul.f32 0.5, %v1811_v11  ;;  %v1816_v54 = vmul.f32 0.5, %v1812_v53  ;;  %v7505_v5 = vadd.f32 -0.005, %v1811_v11 }
0x13b7   : > { %14203 = vst [vmem:[#allocation18_spill] sm:$0xff] %v12932_v19  ;;  %v7506_v42 = vadd.f32 -0.005, %v1812_v53  ;;  %vm1813_vm12 = vcmp.lt.f32.partialorder %v1811_v11, 0.01 }
0x13b8   : > { %v1817_v48 = vmul.f32 %v1815_v52, %v1811_v11  ;;  %v1818_v7 = vmul.f32 %v1816_v54, %v1812_v53  ;;  %vm1814_vm13 = vcmp.lt.f32.partialorder %v1812_v53, 0.01  ;;  %v9679_v11 = vld [vmem:[%s13982_s5] sm:$0xff] }
0x13b9   : > { %v9680_v53 = vld [vmem:[%s13982_s5 + $0x40] sm:$0xff] }
0x13ba   : > { %v1819_v27 = vmul.f32 %v1817_v48, %v12682_v30  ;;  %v1820_v55 = vmul.f32 %v1818_v7, %v12682_v30  ;;  %9088 = vmatmul.msk.f32.gmra.mxu0 %vm686_vm0, %v9678_v35 }
0x13bc   : > { %v1823_v2 = vsel %vm1813_vm12, %v1819_v27, %v7505_v5  ;;  %v1824_v9 = vsel %vm1814_vm13, %v1820_v55, %v7506_v42  ;;  %v14205_v27 = vld [vmem:[#allocation45_spill] sm:$0xff]  ;;  %v14206_v55 = vld [vmem:[#allocation48_spill] sm:$0xff]  ;;  %v2370_v5 = vpop.permute.xlu1 %2369 }
0x13bd   : > { %v6611_v21 = vpop.f32.mrf.mxu2  ;;  %v1825_v52 = vmul.f32 %v12589_v44, %v1823_v2  ;;  %v1826_v54 = vmul.f32 %v12592_v50, %v1824_v9 }
0x13be   : > { %v6624_v19 = vpop.f32.mrf.mxu3 }
0x13bf   : > { %v6625_v48 = vadd.f32 %v6624_v19, %v6611_v21  ;;  %v1827_v7 = vadd.f32 %v1826_v54, %v1825_v52  ;;  %v14204_v19 = vld [vmem:[#allocation38_spill] sm:$0xff]  ;;  %v1839_v54 = vpop.xlane.xlu2 %1838 }
0x13c1   : > { %6687 = vmatpush.msrb.mxu1 %v6625_v48  ;;  %1828 = vadd.xlane.f32.xlu0 %v1827_v7  ;;  %v1840_v7 = vrot.slane %v1839_v54, 4 }
0x13c2   : > { %9090 = vmatmul.msk.f32.vlgmr.msrb.gmra.mxu1 %vm686_vm0, %v9679_v11  ;;  %9089 = vmatmul.msk.f32.gmra.mxu0 %vm686_vm0, %v9680_v53 }
0x13c5   : > { %v6613_v44 = vpop.f32.mrf.mxu2 }
0x13c6   : > { %v6626_v50 = vpop.f32.mrf.mxu3 }
0x13ca   : > { %9091 = vmatmul.msk.f32.gmra.mxu1 %vm686_vm0, %v12815_v58  ;;  %v12967_v58 = vld [vmem:[%s12456_s28 + $0x90] sm:$0xff] }
0x13d2   : > { %9092 = vmatmul.msk.f32.gmra.mxu1 %vm686_vm0, %v12828_v6  ;;  %v12970_v6 = vld [vmem:[%s12456_s28 + $0x98] sm:$0xff] }
0x13d5   : > { %2389 = vrot.lane.b32.xlu0 %v14204_v19, %s9704_s22 }
0x13da   : > { %9093 = vmatmul.msk.f32.gmra.mxu1 %vm686_vm0, %v12865_v41  ;;  %v3778_v41 = vadd.f32 %v12970_v6, %v12967_v58 }
0x13dc   : > { %3779 = vadd.xlane.f32.xlu2 %v3778_v41 }
0x13dd   : > { %2419 = vrot.lane.b32.xlu0 %v14205_v27, %s9708_s25 }
0x13e2   : > { %9094 = vmatmul.msk.f32.gmra.mxu1 %vm686_vm0, %v12888_v51  ;;  %v2372_v51 = vpop.permute.xlu1 %2371 }
0x13e5   : > { %2431 = vrot.lane.b32.xlu0 %v14206_v55, %s9709_s26 }
0x13ea   : > { %9095 = vmatmul.msk.f32.gmra.mxu1 %vm686_vm0, %v9676_v36  ;;  %v2378_v2 = vpop.permute.xlu1 %2377 }
0x13f2   : > { %9096 = vmatmul.msk.f32.gmra.mxu1 %vm686_vm0, %v9677_v46  ;;  %v2380_v46 = vpop.permute.xlu1 %2379 }
0x13fa   : > { %9097 = vmatmul.msk.f32.gmra.mxu1 %vm686_vm0, %v9678_v35  ;;  %v2388_v35 = vpop.permute.xlu1 %2387 }
0x13fe   : > { %v6645_v42 = vpop.f32.mrf.mxu0 }
0x13ff   : > { %6716 = vrot.lane.b32.xlu2 %v6645_v42, %s9702_s20 }
0x1402   : > { %9098 = vmatmul.msk.f32.gmra.mxu1 %vm686_vm0, %v9680_v53  ;;  %v2400_v11 = vpop.permute.xlu1 %2399  ;;  %v1841_v53 = vadd.f32 %v1840_v7, %v1839_v54  ;;  %v2381_v7 = vsel %vm820_vm1, %v2378_v2, %v2380_v46 }
0x1404   : > { %v1842_v50 = vrot.slane %v1841_v53, 2 }
0x1406   : > { %v6648_v21 = vpop.f32.mrf.mxu0  ;;  %v1843_v55 = vadd.f32 %v1842_v50, %v1841_v53  ;;  %v2382_v53 = vsel %vm820_vm1, %v2380_v46, %v2378_v2  ;;  %v2398_v50 = vpop.permute.xlu2 %2397 }
0x1407   : > { %6724 = vrot.lane.b32.xlu2 %v6648_v21, %s9703_s21  ;;  %v2401_v46 = vsel %vm852_vm4, %v2398_v50, %v2400_v11 }
0x1408   : > { %v1844_v3 = vrot.slane %v1843_v55, 1 }
0x140a   : > { %v2410_v41 = vpop.permute.xlu1 %2409  ;;  %v1845_v23 = vadd.f32 %v1844_v3, %v1843_v55  ;;  %v2374_v3 = vsel %vm806_vm2, %v2372_v51, %v2370_v5 }
0x140b   : > { %v2375_v55 = vmul.f32 %v2374_v3, %v9988_v43 }
0x140e   : > { %v6651_v36 = vpop.f32.mrf.mxu0 }
0x140f   : > { %6734 = vrot.lane.b32.xlu2 %v6651_v36, %s9704_s22 }
0x1412   : > { %v2412_v25 = vpop.permute.xlu1 %2411 }
0x1417   : > { %v12978_v9 = vpop.f32.mrf.mxu0 }
0x141a   : > { %v2430_v3 = vpop.permute.xlu1 %2429 }
0x141f   : > { %v12981_v52 = vpop.f32.mrf.mxu0 }
0x1427   : > { %v6660_v48 = vpop.f32.mrf.mxu0 }
0x1428   : > { %6756 = vrot.lane.b32.xlu2 %v6660_v48, %s9706_s24 }
0x142f   : > { %v12984_v44 = vpop.f32.mrf.mxu0 }
0x1434   : > { %v1829_v19 = vpop.xlane.xlu0 %1828 }
0x1435   : > { %v1830_v27 = vrot.slane %v1829_v19, 4 }
0x1437   : > { %v1831_v42 = vadd.f32 %v1830_v27, %v1829_v19  ;;  %v12986_v36 = vpop.f32.mrf.mxu0  ;;  %v2373_v19 = vsel %vm806_vm2, %v2370_v5, %v2372_v51 }
0x1438   : > { %v2376_v2 = vmul.f32 %v2373_v19, %v9992_v45  ;;  %v2404_v19 = vmul.f32 %v2401_v46, %v10015_v4 }
0x1439   : > { %v1832_v21 = vrot.slane %v1831_v42, 2 }
0x143b   : > { %v1833_v0 = vadd.f32 %v1832_v21, %v1831_v42  ;;  %v2402_v42 = vsel %vm852_vm4, %v2400_v11, %v2398_v50  ;;  %v2422_v11 = vpop.permute.xlu2 %2421 }
0x143d   : > { %v1834_v28 = vrot.slane %v1833_v0, 1 }
0x143f   : > { %v12988_v17 = vpop.f32.mrf.mxu1  ;;  %v1835_v48 = vadd.f32 %v1834_v28, %v1833_v0  ;;  %v6669_v54 = vpop.f32.mrf.mxu0  ;;  %v2383_v28 = vmul.f32 %v2382_v53, %v9979_v33  ;;  %v2384_v0 = vmul.f32 %v2381_v7, %v9981_v37  ;;  %v2403_v53 = vmul.f32 %v2402_v42, %v10010_v63 }
0x1440   : > { %6786 = vrot.lane.b32.xlu2 %v6669_v54, %s9710_s27  ;;  %v2442_v42 = vpop.permute.xlu1 %2441 }
0x1441   : > { %9453 = vpush %v1835_v48  ;;  %v2385_v21 = vadd.f32 %v2383_v28, %v2375_v55  ;;  %v2386_v48 = vadd.f32 %v2384_v0, %v2376_v2  ;;  %v2414_v28 = vsel %vm870_vm5, %v2412_v25, %v2410_v41  ;;  %v14207_v0 = vld [vmem:[#allocation41_spill] sm:$0xff]  ;;  %v14208_v2 = vld [vmem:[#allocation42_spill] sm:$0xff] }
0x1442   : > { %9455 = vpush %v1845_v23 }
0x1447   : > { %v13001_v27 = vpop.f32.mrf.mxu1  ;;  %v2390_v23 = vpop.permute.xlu0 %2389 }
0x1448   : > { %v2391_v5 = vsel %vm836_vm3, %v2388_v35, %v2390_v23  ;;  %v2392_v51 = vsel %vm836_vm3, %v2390_v23, %v2388_v35  ;;  %v2413_v35 = vsel %vm870_vm5, %v2410_v41, %v2412_v25 }
0x1449   : > { %v2393_v54 = vmul.f32 %v2392_v51, %v10005_v60  ;;  %v2394_v7 = vmul.f32 %v2391_v5, %v10007_v61 }
0x144b   : > { %v2395_v15 = vadd.f32 %v2393_v54, %v2385_v21  ;;  %v2396_v16 = vadd.f32 %v2394_v7, %v2386_v48 }
0x144d   : > { %v2405_v50 = vadd.f32 %v2403_v53, %v2395_v15  ;;  %v2406_v62 = vadd.f32 %v2404_v19, %v2396_v16  ;;  %v2415_v15 = vmul.f32 %v2413_v35, %v10031_v20 }
0x144f   : > { %v6695_v39 = vpop.f32.mrf.mxu1  ;;  %v2420_v34 = vpop.permute.xlu0 %2419  ;;  %v2407_v55 = vadd.f32 %v2405_v50, %v14207_v0  ;;  %v2408_v23 = vadd.f32 %v2406_v62, %v14208_v2 }
0x1450   : > { %6736 = vrot.lane.b32.xlu2 %v6695_v39, %s9704_s22  ;;  %v2423_v46 = vsel %vm886_vm6, %v2420_v34, %v2422_v11  ;;  %v2424_v16 = vsel %vm886_vm6, %v2422_v11, %v2420_v34  ;;  %v2416_v39 = vmul.f32 %v2414_v28, %v10033_v22  ;;  %v2440_v62 = vpop.permute.xlu2 %2439 }
0x1451   : > { %v2417_v5 = vadd.f32 %v2415_v15, %v2407_v55  ;;  %v2425_v21 = vmul.f32 %v2423_v46, %v10047_v32  ;;  %v2426_v25 = vmul.f32 %v2424_v16, %v10051_v38  ;;  %v2443_v34 = vsel %vm918_vm8, %v2440_v62, %v2442_v42  ;;  %v7703_v16 = vld [vmem:[%s12456_s28 + $0x40] sm:$0xff]  ;;  %v7704_v15 = vld [vmem:[%s12456_s28 + $0x48] sm:$0xff] }
0x1452   : > { %v2418_v51 = vadd.f32 %v2416_v39, %v2408_v23  ;;  %v2444_v54 = vsel %vm918_vm8, %v2442_v42, %v2440_v62  ;;  %v2445_v28 = vmul.f32 %v2443_v34, %v10079_v12 }
0x1453   : > { %v2427_v19 = vadd.f32 %v2425_v21, %v2417_v5  ;;  %v2446_v0 = vmul.f32 %v2444_v54, %v10081_v13 }
0x1454   : > { %v2428_v11 = vadd.f32 %v2426_v25, %v2418_v51 }
0x1457   : > { %v13032_v41 = vpop.f32.mrf.mxu1  ;;  %v2432_v48 = vpop.permute.xlu0 %2431 }
0x1458   : > { %v2433_v7 = vsel %vm902_vm7, %v2430_v3, %v2432_v48  ;;  %v2434_v53 = vsel %vm902_vm7, %v2432_v48, %v2430_v3 }
0x1459   : > { %v2435_v50 = vmul.f32 %v2433_v7, %v10058_v47  ;;  %v2436_v35 = vmul.f32 %v2434_v53, %v10061_v56 }
0x145b   : > { %v2437_v55 = vadd.f32 %v2435_v50, %v2427_v19  ;;  %v2438_v2 = vadd.f32 %v2436_v35, %v2428_v11 }
0x145d   : > { %v2447_v23 = vadd.f32 %v2445_v28, %v2437_v55  ;;  %v2448_v46 = vadd.f32 %v2446_v0, %v2438_v2 }
0x145f   : > { %v13048_v39 = vpop.f32.mrf.mxu1  ;;  %v2449_v3 = vadd.f32 %v2447_v23, %v12655_v40  ;;  %v2450_v42 = vadd.f32 %v2448_v46, %v12655_v40  ;;  %v14209_v46 = vld [vmem:[#allocation93_spill] sm:$0xff] }
0x1461   : > { %v2456_v5 = vsub.f32 %v2449_v3, %v7703_v16  ;;  %v2457_v51 = vsub.f32 %v2450_v42, %v7704_v15  ;;  %v14210_v16 = vld [vmem:[#allocation100_spill] sm:$0xff]  ;;  %v14215_v42 = vld [vmem:[#allocation67_spill] sm:$0xff] }
0x1462   : > { %v14211_v15 = vld [vmem:[#allocation56_spill] sm:$0xff] }
0x1463   : > { %v2458_v21 = vand.u32 2147483647, %v2456_v5  ;;  %v2459_v25 = vand.u32 2147483647, %v2457_v51  ;;  %v14214_v3 = vld [vmem:[#allocation64_spill] sm:$0xff]  ;;  %v13077_v51 = vld [vmem:[%s12456_s28 + $0xb8] sm:$0xff] }
0x1464   : > { %v13074_v5 = vld [vmem:[%s12456_s28 + $0xb0] sm:$0xff]  ;;  %14217 = vst [vmem:[#allocation20_spill] sm:$0xff] %v13077_v51 }
0x1465   : > { %v2462_v62 = vmul.f32 0.5, %v2458_v21  ;;  %v2463_v48 = vmul.f32 0.5, %v2459_v25  ;;  %v7707_v11 = vadd.f32 -0.005, %v2458_v21  ;;  %v7708_v50 = vadd.f32 -0.005, %v2459_v25 }
0x1466   : > { %vm2460_vm14 = vcmp.lt.f32.partialorder %v2458_v21, 0.01  ;;  %vm2461_vm15 = vcmp.lt.f32.partialorder %v2459_v25, 0.01  ;;  %14216 = vst [vmem:[#allocation19_spill] sm:$0xff] %v13074_v5 }
0x1467   : > { %v13052_v34 = vpop.f32.mrf.mxu1  ;;  %v2464_v54 = vmul.f32 %v2462_v62, %v2458_v21  ;;  %v2465_v7 = vmul.f32 %v2463_v48, %v2459_v25  ;;  %v4425_v21 = vadd.f32 %v13077_v51, %v13074_v5  ;;  %v3017_v25 = vpop.permute.xlu1 %3016  ;;  %v13082_v62 = vld [vmem:[%s12456_s28 + $0x70] sm:$0xff]  ;;  %v13085_v48 = vld [vmem:[%s12456_s28 + $0x78] sm:$0xff] }
0x1469   : > { %v2466_v53 = vmul.f32 %v2464_v54, %v12682_v30  ;;  %v2467_v19 = vmul.f32 %v2465_v7, %v12682_v30  ;;  %v3131_v7 = vadd.f32 %v13085_v48, %v13082_v62 }
0x146b   : > { %v2470_v35 = vsel %vm2460_vm14, %v2466_v53, %v7707_v11  ;;  %v2471_v28 = vsel %vm2461_vm15, %v2467_v19, %v7708_v50  ;;  %v14218_v53 = vld [vmem:[#allocation111_spill] sm:$0xff]  ;;  %v14219_v11 = vld [vmem:[#allocation118_spill] sm:$0xff] }
0x146c   : > { %v2472_v0 = vmul.f32 %v12763_v29, %v2470_v35  ;;  %v2473_v55 = vmul.f32 %v12766_v1, %v2471_v28  ;;  %v14212_v29 = vld [vmem:[#allocation103_spill] sm:$0xff]  ;;  %v14213_v1 = vld [vmem:[#allocation62_spill] sm:$0xff]  ;;  %v2486_v35 = vpop.xlane.xlu2 %2485  ;;  %v14220_v28 = vld [vmem:[#allocation121_spill] sm:$0xff] }
0x146e   : > { %v2474_v23 = vadd.f32 %v2473_v55, %v2472_v0  ;;  %v2487_v0 = vrot.slane %v2486_v35, 4  ;;  %v14221_v55 = vld [vmem:[#allocation73_spill] sm:$0xff] }
0x146f   : > { %v6707_v2 = vpop.f32.mrf.mxu1  ;;  %v3019_v54 = vpop.permute.xlu1 %3018 }
0x1470   : > { %6768 = vrot.lane.b32.xlu2 %v6707_v2, %s9708_s25  ;;  %2475 = vadd.xlane.f32.xlu0 %v2474_v23  ;;  %v2488_v2 = vadd.f32 %v2487_v0, %v2486_v35  ;;  %v14224_v0 = vld [vmem:[#allocation84_spill] sm:$0xff] }
0x1477   : > { %v3025_v19 = vpop.permute.xlu1 %3024 }
0x1478   : > { %4338 = vrot.lane.b32.xlu2 %v14209_v46, %s9705_s23  ;;  %v2489_v46 = vrot.slane %v2488_v2, 2 }
0x147f   : > { %v3027_v50 = vpop.permute.xlu1 %3026 }
0x1480   : > { %4362 = vrot.lane.b32.xlu2 %v14210_v16, %s9708_s25  ;;  %v14222_v16 = vld [vmem:[#allocation76_spill] sm:$0xff] }
0x1484   : > { %3036 = vrot.lane.b32.xlu0 %v14211_v15, %s9704_s22 }
0x1487   : > { %v3035_v23 = vpop.permute.xlu1 %3034 }
0x1488   : > { %4380 = vrot.lane.b32.xlu2 %v14212_v29, %s9710_s27 }
0x148c   : > { %3058 = vrot.lane.b32.xlu0 %v14213_v1, %s9706_s24  ;;  %v2490_v1 = vadd.f32 %v2489_v46, %v2488_v2  ;;  %v3028_v46 = vsel %vm820_vm1, %v3025_v19, %v3027_v50 }
0x1494   : > { %3068 = vrot.lane.b32.xlu0 %v14214_v3, %s9708_s25 }
0x149c   : > { %3086 = vrot.lane.b32.xlu0 %v14215_v42, %s9710_s27 }
0x14b1   : > { %4426 = vadd.xlane.f32.xlu2 %v4425_v21  ;;  %v2491_v21 = vrot.slane %v2490_v1, 1 }
0x14b3   : > { %v2492_v51 = vadd.f32 %v2491_v21, %v2490_v1  ;;  %v3045_v21 = vpop.permute.xlu2 %3044 }
0x14c6   : > { %3132 = vadd.xlane.f32.xlu0 %v3131_v7  ;;  %v3047_v7 = vpop.permute.xlu1 %3046 }
0x14c9   : > { %4985 = vrot.lane.b32.xlu2 %v14218_v53, %s9705_s23  ;;  %v14223_v53 = vld [vmem:[#allocation81_spill] sm:$0xff] }
0x14d1   : > { %5009 = vrot.lane.b32.xlu2 %v14219_v11, %s9708_s25 }
0x14d9   : > { %5027 = vrot.lane.b32.xlu2 %v14220_v28, %s9710_s27 }
0x14da   : > { %3681 = vrot.lane.b32.xlu0 %v14221_v55, %s9704_s22  ;;  %v3057_v55 = vpop.permute.xlu1 %3056 }
0x14e2   : > { %3693 = vrot.lane.b32.xlu0 %v14222_v16, %s9705_s23  ;;  %v3029_v16 = vsel %vm820_vm1, %v3027_v50, %v3025_v19  ;;  %v3067_v5 = vpop.permute.xlu1 %3066 }
0x14e3   : > { %v2476_v15 = vpop.xlane.xlu0 %2475 }
0x14e4   : > { %v2477_v29 = vrot.slane %v2476_v15, 4 }
0x14e6   : > { %v2478_v3 = vadd.f32 %v2477_v29, %v2476_v15  ;;  %v3020_v15 = vsel %vm806_vm2, %v3017_v25, %v3019_v54  ;;  %v3021_v29 = vsel %vm806_vm2, %v3019_v54, %v3017_v25 }
0x14e7   : > { %v3022_v19 = vmul.f32 %v3021_v29, %v9988_v43  ;;  %v3023_v50 = vmul.f32 %v3020_v15, %v9992_v45 }
0x14e8   : > { %v2479_v42 = vrot.slane %v2478_v3, 2 }
0x14ea   : > { %3713 = vrot.lane.b32.xlu0 %v14223_v53, %s9708_s25  ;;  %v2480_v11 = vadd.f32 %v2479_v42, %v2478_v3  ;;  %v3030_v3 = vmul.f32 %v3029_v16, %v9979_v33  ;;  %v3031_v42 = vmul.f32 %v3028_v46, %v9981_v37  ;;  %v8513_v53 = vld [vmem:[%s12456_s28 + $0xd0] sm:$0xff]  ;;  %v3049_v46 = vsel %vm852_vm4, %v3047_v7, %v3045_v21 }
0x14eb   : > { %v3050_v15 = vmul.f32 %v3049_v46, %v10010_v63 }
0x14ec   : > { %v2481_v28 = vrot.slane %v2480_v11, 1 }
0x14ee   : > { %v2482_v35 = vadd.f32 %v2481_v28, %v2480_v11  ;;  %v8514_v11 = vld [vmem:[%s12456_s28 + $0xd8] sm:$0xff] }
0x14ef   : > { %v5072_v54 = vadd.f32 %v8514_v11, %v8513_v53 }
0x14f0   : > { %9457 = vpush %v2482_v35  ;;  %v3032_v35 = vadd.f32 %v3030_v3, %v3022_v19  ;;  %v3077_v3 = vpop.permute.xlu2 %3076 }
0x14f1   : > { %9459 = vpush %v2492_v51 }
0x14f2   : > { %3725 = vrot.lane.b32.xlu0 %v14224_v0, %s9709_s26  ;;  %v3033_v0 = vadd.f32 %v3031_v42, %v3023_v50 }
0x14f6   : > { %v3037_v2 = vpop.permute.xlu0 %3036 }
0x14f7   : > { %v3038_v51 = vsel %vm836_vm3, %v3035_v23, %v3037_v2  ;;  %v3039_v1 = vsel %vm836_vm3, %v3037_v2, %v3035_v23  ;;  %v3048_v2 = vsel %vm852_vm4, %v3045_v21, %v3047_v7 }
0x14f8   : > { %v3040_v28 = vmul.f32 %v3039_v1, %v10005_v60  ;;  %v3041_v25 = vmul.f32 %v3038_v51, %v10007_v61  ;;  %v3051_v29 = vmul.f32 %v3048_v2, %v10015_v4 }
0x14fa   : > { %v3042_v16 = vadd.f32 %v3040_v28, %v3032_v35  ;;  %v3043_v57 = vadd.f32 %v3041_v25, %v3033_v0  ;;  %v3079_v28 = vpop.permute.xlu1 %3078  ;;  %v14225_v25 = vld [vmem:[#allocation59_spill] sm:$0xff]  ;;  %v14226_v35 = vld [vmem:[#allocation60_spill] sm:$0xff] }
0x14fb   : > { %v3080_v46 = vsel %vm902_vm7, %v3077_v3, %v3079_v28 }
0x14fc   : > { %v3052_v42 = vadd.f32 %v3050_v15, %v3042_v16  ;;  %v3053_v53 = vadd.f32 %v3051_v29, %v3043_v57  ;;  %v3081_v16 = vsel %vm902_vm7, %v3079_v28, %v3077_v3  ;;  %v3089_v29 = vpop.permute.xlu2 %3088 }
0x14fe   : > { %v3059_v23 = vpop.permute.xlu0 %3058  ;;  %v3055_v0 = vadd.f32 %v3053_v53, %v14226_v35 }
0x14ff   : > { %v3060_v51 = vsel %vm870_vm5, %v3057_v55, %v3059_v23  ;;  %v3061_v1 = vsel %vm870_vm5, %v3059_v23, %v3057_v55 }
0x1500   : > { %v3062_v11 = vmul.f32 %v3060_v51, %v10031_v20  ;;  %v3063_v7 = vmul.f32 %v3061_v1, %v10033_v22  ;;  %v3082_v51 = vmul.f32 %v3080_v46, %v10058_v47  ;;  %v3083_v1 = vmul.f32 %v3081_v16, %v10061_v56 }
0x1502   : > { %5073 = vadd.xlane.f32.xlu2 %v5072_v54  ;;  %v3054_v54 = vadd.f32 %v3052_v42, %v14225_v25  ;;  %v3065_v2 = vadd.f32 %v3063_v7, %v3055_v0  ;;  %v7905_v25 = vld [vmem:[%s12456_s28 + $0x60] sm:$0xff] }
0x1504   : > { %v3064_v23 = vadd.f32 %v3062_v11, %v3054_v54  ;;  %v7906_v54 = vld [vmem:[%s12456_s28 + $0x68] sm:$0xff] }
0x1506   : > { %v3069_v21 = vpop.permute.xlu0 %3068 }
0x1507   : > { %v3070_v19 = vsel %vm886_vm6, %v3067_v5, %v3069_v21  ;;  %v3071_v50 = vsel %vm886_vm6, %v3069_v21, %v3067_v5 }
0x1508   : > { %v3072_v55 = vmul.f32 %v3070_v19, %v10047_v32  ;;  %v3073_v57 = vmul.f32 %v3071_v50, %v10051_v38 }
0x150a   : > { %v3074_v5 = vadd.f32 %v3072_v55, %v3064_v23  ;;  %v3075_v15 = vadd.f32 %v3073_v57, %v3065_v2 }
0x150c   : > { %v3084_v7 = vadd.f32 %v3082_v51, %v3074_v5  ;;  %v3085_v21 = vadd.f32 %v3083_v1, %v3075_v15 }
0x150e   : > { %v3087_v42 = vpop.permute.xlu0 %3086 }
0x150f   : > { %v3090_v53 = vsel %vm918_vm8, %v3087_v42, %v3089_v29  ;;  %v3091_v11 = vsel %vm918_vm8, %v3089_v29, %v3087_v42 }
0x1510   : > { %v3092_v19 = vmul.f32 %v3090_v53, %v10079_v12  ;;  %v3093_v3 = vmul.f32 %v3091_v11, %v10081_v13 }
0x1512   : > { %v3094_v50 = vadd.f32 %v3092_v19, %v3084_v7  ;;  %v3095_v28 = vadd.f32 %v3093_v3, %v3085_v21  ;;  %v14227_v19 = vld [vmem:[#allocation75_spill] sm:$0xff]  ;;  %v3664_v3 = vpop.permute.xlu2 %3663 }
0x1514   : > { %v3096_v35 = vadd.f32 %v3094_v50, %v12655_v40  ;;  %v3097_v0 = vadd.f32 %v3095_v28, %v12655_v40 }
0x1516   : > { %v3103_v55 = vsub.f32 %v3096_v35, %v7905_v25  ;;  %v3104_v57 = vsub.f32 %v3097_v0, %v7906_v54 }
0x1518   : > { %v3105_v23 = vand.u32 2147483647, %v3103_v55  ;;  %v3106_v2 = vand.u32 2147483647, %v3104_v57 }
0x151a   : > { %6251 = vrot.lane.b32.xlu2 %v12790_v10, %s9702_s20  ;;  %v3109_v46 = vmul.f32 0.5, %v3105_v23  ;;  %v3110_v16 = vmul.f32 0.5, %v3106_v2  ;;  %v7909_v1 = vadd.f32 -0.005, %v3105_v23  ;;  %v7910_v42 = vadd.f32 -0.005, %v3106_v2  ;;  %v3666_v50 = vpop.permute.xlu2 %3665 }
0x151b   : > { %vm3107_vm9 = vcmp.lt.f32.partialorder %v3105_v23, 0.01  ;;  %vm3108_vm10 = vcmp.lt.f32.partialorder %v3106_v2, 0.01 }
0x151c   : > { %v3111_v5 = vmul.f32 %v3109_v46, %v3105_v23  ;;  %v3112_v15 = vmul.f32 %v3110_v16, %v3106_v2 }
0x151e   : > { %v3113_v29 = vmul.f32 %v3111_v5, %v12682_v30  ;;  %v3114_v51 = vmul.f32 %v3112_v15, %v12682_v30 }
0x1520   : > { %v3117_v53 = vsel %vm3107_vm9, %v3113_v29, %v7909_v1  ;;  %v3118_v11 = vsel %vm3108_vm10, %v3114_v51, %v7910_v42  ;;  %v13205_v1 = vpop.f32.mrf.mxu1 }
0x1521   : > { %v3119_v7 = vmul.f32 %v13082_v62, %v3117_v53  ;;  %v3120_v10 = vmul.f32 %v13085_v48, %v3118_v11  ;;  %v14232_v62 = vld [vmem:[#allocation88_spill] sm:$0xff]  ;;  %v14234_v48 = vld [vmem:[#allocation90_spill] sm:$0xff]  ;;  %v14237_v11 = vld [vmem:[#allocation97_spill] sm:$0xff] }
0x1522   : > { %5634 = vrot.lane.b32.xlu2 %v12339_v24, %s9705_s23  ;;  %v14228_v24 = vld [vmem:[#allocation80_spill] sm:$0xff]  ;;  %v3672_v35 = vpop.permute.xlu2 %3671 }
0x1523   : > { %v3121_v21 = vadd.f32 %v3120_v10, %v3119_v7 }
0x1525   : > { %3122 = vadd.xlane.f32.xlu1 %v3121_v21 }
0x1528   : > { %v6713_v21 = vpop.f32.mrf.mxu1 }
0x152a   : > { %5646 = vrot.lane.b32.xlu2 %v12355_v31, %s9706_s24  ;;  %v14229_v31 = vld [vmem:[#allocation83_spill] sm:$0xff]  ;;  %v3674_v16 = vpop.permute.xlu2 %3673 }
0x152b   : > { %v3675_v7 = vsel %vm820_vm1, %v3672_v35, %v3674_v16  ;;  %v3676_v10 = vsel %vm820_vm1, %v3674_v16, %v3672_v35 }
0x1532   : > { %5654 = vrot.lane.b32.xlu2 %v12361_v49, %s9708_s25  ;;  %v14230_v49 = vld [vmem:[#allocation86_spill] sm:$0xff]  ;;  %v3684_v42 = vpop.permute.xlu2 %3683 }
0x1539   : > { %v3133_v28 = vpop.xlane.xlu0 %3132 }
0x153a   : > { %6293 = vrot.lane.b32.xlu2 %v12869_v14, %s9706_s24  ;;  %v14231_v14 = vld [vmem:[#allocation87_spill] sm:$0xff]  ;;  %v3134_v25 = vrot.slane %v3133_v28, 4 }
0x153c   : > { %v3135_v54 = vadd.f32 %v3134_v25, %v3133_v28 }
0x153e   : > { %3691 = vrot.lane.b32.xlu1 %v14227_v19, %s9705_s23  ;;  %v3136_v0 = vrot.slane %v3135_v54, 2  ;;  %v3704_v19 = vpop.permute.xlu2 %3703 }
0x1540   : > { %v3137_v2 = vadd.f32 %v3136_v0, %v3135_v54 }
0x1542   : > { %6301 = vrot.lane.b32.xlu2 %v12883_v8, %s9708_s25  ;;  %v14233_v8 = vld [vmem:[#allocation89_spill] sm:$0xff]  ;;  %v3138_v5 = vrot.slane %v3137_v2, 1 }
0x1544   : > { %v3139_v51 = vadd.f32 %v3138_v5, %v3137_v2 }
0x1546   : > { %3705 = vrot.lane.b32.xlu1 %v14228_v24, %s9706_s24  ;;  %v3667_v24 = vsel %vm806_vm2, %v3664_v3, %v3666_v50  ;;  %v3716_v5 = vpop.permute.xlu2 %3715 }
0x154a   : > { %6311 = vrot.lane.b32.xlu2 %v12912_v26, %s9709_s26  ;;  %v14235_v26 = vld [vmem:[#allocation91_spill] sm:$0xff] }
0x154c   : > { %v3682_v29 = vpop.permute.xlu0 %3681 }
0x154e   : > { %3723 = vrot.lane.b32.xlu1 %v14229_v31, %s9709_s26  ;;  %v3668_v31 = vsel %vm806_vm2, %v3666_v50, %v3664_v3  ;;  %v3670_v50 = vmul.f32 %v3667_v24, %v9992_v45 }
0x154f   : > { %v3669_v3 = vmul.f32 %v3668_v31, %v9988_v43 }
0x1554   : > { %v3694_v53 = vpop.permute.xlu0 %3693 }
0x1556   : > { %3735 = vrot.lane.b32.xlu1 %v14230_v49, %s9710_s27  ;;  %v3685_v49 = vsel %vm836_vm3, %v3682_v29, %v3684_v42 }
0x1557   : > { %v3688_v25 = vmul.f32 %v3685_v49, %v10007_v61 }
0x155c   : > { %v3714_v54 = vpop.permute.xlu0 %3713 }
0x155e   : > { %4310 = vrot.lane.b32.xlu1 %v14231_v14, %s9702_s20  ;;  %v3686_v14 = vsel %vm836_vm3, %v3684_v42, %v3682_v29  ;;  %v14238_v29 = vld [vmem:[#allocation99_spill] sm:$0xff] }
0x155f   : > { %v3687_v28 = vmul.f32 %v3686_v14, %v10005_v60 }
0x1566   : > { %4312 = vrot.lane.b32.xlu1 %v14232_v62, %s9702_s20  ;;  %v3677_v62 = vmul.f32 %v3676_v10, %v9979_v33 }
0x1568   : > { %v3679_v0 = vadd.f32 %v3677_v62, %v3669_v3  ;;  %v14241_v3 = vld [vmem:[#allocation102_spill] sm:$0xff] }
0x156a   : > { %v3689_v2 = vadd.f32 %v3687_v28, %v3679_v0 }
0x156e   : > { %4318 = vrot.lane.b32.xlu1 %v14233_v8, %s9703_s21  ;;  %v3678_v8 = vmul.f32 %v3675_v7, %v9981_v37  ;;  %v14240_v7 = vld [vmem:[#allocation78_spill] sm:$0xff] }
0x1576   : > { %4320 = vrot.lane.b32.xlu1 %v14234_v48, %s9703_s21 }
0x157e   : > { %4328 = vrot.lane.b32.xlu1 %v14235_v26, %s9704_s22 }
0x1586   : > { %6744 = vrot.lane.b32.xlu1 %v12978_v9, %s9705_s23 }
0x158e   : > { %6776 = vrot.lane.b32.xlu1 %v12986_v36, %s9709_s26 }
0x1596   : > { %6718 = vrot.lane.b32.xlu1 %v12988_v17, %s9702_s20  ;;  %v14236_v17 = vld [vmem:[#allocation94_spill] sm:$0xff] }
0x1598   : > { %v3123_v55 = vpop.xlane.xlu1 %3122 }
0x1599   : > { %v3124_v57 = vrot.slane %v3123_v55, 4 }
0x159b   : > { %v3125_v23 = vadd.f32 %v3124_v57, %v3123_v55  ;;  %v3680_v55 = vadd.f32 %v3678_v8, %v3670_v50  ;;  %v3734_v50 = vpop.permute.xlu2 %3733 }
0x159d   : > { %v3126_v46 = vrot.slane %v3125_v23, 2 }
0x159e   : > { %6758 = vrot.lane.b32.xlu1 %v13052_v34, %s9706_s24 }
0x159f   : > { %v3127_v9 = vadd.f32 %v3126_v46, %v3125_v23  ;;  %v3690_v46 = vadd.f32 %v3688_v25, %v3680_v55 }
0x15a1   : > { %v3128_v36 = vrot.slane %v3127_v9, 1 }
0x15a3   : > { %v3129_v15 = vadd.f32 %v3128_v36, %v3127_v9 }
0x15a5   : > { %9461 = vpush %v3129_v15 }
0x15a6   : > { %9463 = vpush %v3139_v51  ;;  %4340 = vrot.lane.b32.xlu1 %v14236_v17, %s9705_s23 }
0x15ae   : > { %4350 = vrot.lane.b32.xlu1 %v14237_v11, %s9706_s24  ;;  %v14239_v11 = vld [vmem:[#allocation77_spill] sm:$0xff] }
0x15b0   : > { %v3692_v34 = vpop.permute.xlu1 %3691 }
0x15b1   : > { %v3695_v48 = vsel %vm852_vm4, %v3692_v34, %v3694_v53  ;;  %v3696_v26 = vsel %vm852_vm4, %v3694_v53, %v3692_v34  ;;  %v3726_v53 = vpop.permute.xlu0 %3725 }
0x15b2   : > { %v3697_v57 = vmul.f32 %v3696_v26, %v10010_v63  ;;  %v3698_v23 = vmul.f32 %v3695_v48, %v10015_v4 }
0x15b4   : > { %v3699_v36 = vadd.f32 %v3697_v57, %v3689_v2  ;;  %v3700_v15 = vadd.f32 %v3698_v23, %v3690_v46 }
0x15b6   : > { %6788 = vrot.lane.b32.xlu1 %v6713_v21, %s9710_s27  ;;  %v3701_v34 = vadd.f32 %v3699_v36, %v14239_v11  ;;  %v3702_v10 = vadd.f32 %v3700_v15, %v14240_v7  ;;  %v3717_v21 = vsel %vm886_vm6, %v3714_v54, %v3716_v5 }
0x15b7   : > { %v3719_v62 = vmul.f32 %v3717_v21, %v10047_v32 }
0x15b8   : > { %v3706_v35 = vpop.permute.xlu1 %3705 }
0x15b9   : > { %v3707_v9 = vsel %vm870_vm5, %v3704_v19, %v3706_v35  ;;  %v3708_v16 = vsel %vm870_vm5, %v3706_v35, %v3704_v19  ;;  %v3718_v19 = vsel %vm886_vm6, %v3716_v5, %v3714_v54  ;;  %v8108_v5 = vld [vmem:[%s12456_s28 + $0x88] sm:$0xff] }
0x15ba   : > { %v3709_v51 = vmul.f32 %v3707_v9, %v10031_v20  ;;  %v3710_v17 = vmul.f32 %v3708_v16, %v10033_v22  ;;  %v3720_v8 = vmul.f32 %v3718_v19, %v10051_v38  ;;  %v8107_v16 = vld [vmem:[%s12456_s28 + $0x80] sm:$0xff] }
0x15bc   : > { %v3711_v49 = vadd.f32 %v3709_v51, %v3701_v34  ;;  %v3712_v14 = vadd.f32 %v3710_v17, %v3702_v10 }
0x15be   : > { %4360 = vrot.lane.b32.xlu1 %v14238_v29, %s9708_s25  ;;  %v3721_v28 = vadd.f32 %v3719_v62, %v3711_v49  ;;  %v3722_v25 = vadd.f32 %v3720_v8, %v3712_v14 }
0x15c0   : > { %v3724_v42 = vpop.permute.xlu1 %3723 }
0x15c1   : > { %v3727_v24 = vsel %vm902_vm7, %v3724_v42, %v3726_v53  ;;  %v3728_v31 = vsel %vm902_vm7, %v3726_v53, %v3724_v42 }
0x15c2   : > { %v3729_v48 = vmul.f32 %v3727_v24, %v10058_v47  ;;  %v3730_v26 = vmul.f32 %v3728_v31, %v10061_v56 }
0x15c4   : > { %v3731_v55 = vadd.f32 %v3729_v48, %v3721_v28  ;;  %v3732_v57 = vadd.f32 %v3730_v26, %v3722_v25 }
0x15c6   : > { %4372 = vrot.lane.b32.xlu1 %v14241_v3, %s9709_s26 }
0x15c8   : > { %v3736_v54 = vpop.permute.xlu1 %3735 }
0x15c9   : > { %v3737_v35 = vsel %vm918_vm8, %v3734_v50, %v3736_v54  ;;  %v3738_v0 = vsel %vm918_vm8, %v3736_v54, %v3734_v50 }
0x15ca   : > { %v3739_v23 = vmul.f32 %v3737_v35, %v10079_v12  ;;  %v3740_v2 = vmul.f32 %v3738_v0, %v10081_v13 }
0x15cc   : > { %v3741_v46 = vadd.f32 %v3739_v23, %v3731_v55  ;;  %v3742_v9 = vadd.f32 %v3740_v2, %v3732_v57  ;;  %v14242_v2 = vld [vmem:[#allocation92_spill] sm:$0xff] }
0x15ce   : > { %v3743_v36 = vadd.f32 %v3741_v46, %v12655_v40  ;;  %v3744_v15 = vadd.f32 %v3742_v9, %v12655_v40  ;;  %v14243_v46 = vld [vmem:[#allocation98_spill] sm:$0xff]  ;;  %v14244_v9 = vld [vmem:[#allocation101_spill] sm:$0xff] }
0x15d0   : > { %v3750_v29 = vsub.f32 %v3743_v36, %v8107_v16  ;;  %v3751_v51 = vsub.f32 %v3744_v15, %v8108_v5  ;;  %v4311_v17 = vpop.permute.xlu1 %4310  ;;  %v3780_v16 = vpop.xlane.xlu2 %3779  ;;  %v14248_v15 = vld [vmem:[#allocation107_spill] sm:$0xff] }
0x15d2   : > { %v3752_v42 = vand.u32 2147483647, %v3750_v29  ;;  %v3753_v53 = vand.u32 2147483647, %v3751_v51  ;;  %v3781_v51 = vrot.slane %v3780_v16, 4 }
0x15d4   : > { %v3756_v11 = vmul.f32 0.5, %v3752_v42  ;;  %v3757_v34 = vmul.f32 0.5, %v3753_v53  ;;  %v8111_v31 = vadd.f32 -0.005, %v3752_v42  ;;  %vm3754_vm11 = vcmp.lt.f32.partialorder %v3752_v42, 0.01 }
0x15d5   : > { %v8112_v62 = vadd.f32 -0.005, %v3753_v53  ;;  %vm3755_vm12 = vcmp.lt.f32.partialorder %v3753_v53, 0.01 }
0x15d6   : > { %v3758_v7 = vmul.f32 %v3756_v11, %v3752_v42  ;;  %v3759_v10 = vmul.f32 %v3757_v34, %v3753_v53  ;;  %v14249_v42 = vld [vmem:[#allocation108_spill] sm:$0xff]  ;;  %v3782_v53 = vadd.f32 %v3781_v51, %v3780_v16 }
0x15d8   : > { %v4313_v21 = vpop.permute.xlu1 %4312  ;;  %v3760_v19 = vmul.f32 %v3758_v7, %v12682_v30  ;;  %v3761_v24 = vmul.f32 %v3759_v10, %v12682_v30  ;;  %v6717_v5 = vpop.permute.xlu2 %6716  ;;  %v3783_v34 = vrot.slane %v3782_v53, 2 }
0x15d9   : > { %v4314_v49 = vsel %vm806_vm2, %v4311_v17, %v4313_v21  ;;  %v4315_v14 = vsel %vm806_vm2, %v4313_v21, %v4311_v17  ;;  %v14250_v21 = vld [vmem:[#allocation109_spill] sm:$0xff] }
0x15da   : > { %v3764_v8 = vsel %vm3754_vm11, %v3760_v19, %v8111_v31  ;;  %v3765_v48 = vsel %vm3755_vm12, %v3761_v24, %v8112_v62  ;;  %v4316_v0 = vmul.f32 %v4315_v14, %v9988_v43  ;;  %v4317_v55 = vmul.f32 %v4314_v49, %v9992_v45 }
0x15db   : > { %v3766_v26 = vmul.f32 %v12967_v58, %v3764_v8  ;;  %v3767_v3 = vmul.f32 %v12970_v6, %v3765_v48  ;;  %v3784_v31 = vadd.f32 %v3783_v34, %v3782_v53  ;;  %v14251_v48 = vld [vmem:[#allocation112_spill] sm:$0xff] }
0x15dd   : > { %v3768_v50 = vadd.f32 %v3767_v3, %v3766_v26  ;;  %v3785_v62 = vrot.slane %v3784_v31, 1 }
0x15df   : > { %3769 = vadd.xlane.f32.xlu0 %v3768_v50  ;;  %v3786_v50 = vadd.f32 %v3785_v62, %v3784_v31 }
0x15e0   : > { %v4319_v28 = vpop.permute.xlu1 %4318  ;;  %v6725_v29 = vpop.permute.xlu2 %6724 }
0x15e8   : > { %v4321_v25 = vpop.permute.xlu1 %4320  ;;  %v6735_v11 = vpop.permute.xlu2 %6734 }
0x15e9   : > { %v4322_v54 = vsel %vm820_vm1, %v4319_v28, %v4321_v25  ;;  %v4323_v35 = vsel %vm820_vm1, %v4321_v25, %v4319_v28  ;;  %v14252_v25 = vld [vmem:[#allocation115_spill] sm:$0xff] }
0x15ea   : > { %v4324_v57 = vmul.f32 %v4323_v35, %v9979_v33  ;;  %v4325_v58 = vmul.f32 %v4322_v54, %v9981_v37 }
0x15ec   : > { %v13284_v23 = vadd.f32 %v4324_v57, %v4316_v0  ;;  %v13286_v6 = vadd.f32 %v4325_v58, %v4317_v55  ;;  %v14253_v55 = vld [vmem:[#allocation116_spill] sm:$0xff] }
0x15f0   : > { %v6757_v8 = vpop.permute.xlu2 %6756 }
0x15f3   : > { %6766 = vrot.lane.b32.xlu0 %v12984_v44, %s9708_s25  ;;  %v14245_v44 = vld [vmem:[#allocation104_spill] sm:$0xff] }
0x15f8   : > { %v6787_v54 = vpop.permute.xlu2 %6786 }
0x15fb   : > { %6726 = vrot.lane.b32.xlu0 %v13001_v27, %s9703_s21  ;;  %v14246_v27 = vld [vmem:[#allocation105_spill] sm:$0xff] }
0x1603   : > { %6746 = vrot.lane.b32.xlu0 %v13032_v41, %s9705_s23  ;;  %v13306_v41 = vpop.permute.xlu1 %4328 }
0x160b   : > { %6778 = vrot.lane.b32.xlu0 %v13205_v1, %s9709_s26  ;;  %v14247_v1 = vld [vmem:[#allocation106_spill] sm:$0xff]  ;;  %v6745_v36 = vpop.permute.xlu1 %6744 }
0x1613   : > { %4330 = vrot.lane.b32.xlu0 %v14242_v2, %s9704_s22  ;;  %v13312_v17 = vpop.permute.xlu1 %6776 }
0x161b   : > { %4352 = vrot.lane.b32.xlu0 %v14243_v46, %s9706_s24  ;;  %v6719_v19 = vpop.permute.xlu1 %6718 }
0x161c   : > { %v6720_v58 = vsel %vm806_vm2, %v6717_v5, %v6719_v19  ;;  %v6721_v2 = vsel %vm806_vm2, %v6719_v19, %v6717_v5 }
0x1623   : > { %4370 = vrot.lane.b32.xlu0 %v14244_v9, %s9709_s26  ;;  %v6759_v28 = vpop.permute.xlu1 %6758 }
0x1624   : > { %v6760_v62 = vsel %vm870_vm5, %v6757_v8, %v6759_v28 }
0x162b   : > { %4382 = vrot.lane.b32.xlu0 %v14245_v44, %s9710_s27  ;;  %v13322_v0 = vpop.permute.xlu1 %4340  ;;  %v6737_v44 = vpop.permute.xlu2 %6736 }
0x162c   : > { %v6738_v51 = vsel %vm836_vm3, %v6735_v11, %v6737_v44  ;;  %v6739_v5 = vsel %vm836_vm3, %v6737_v44, %v6735_v11 }
0x1633   : > { %4957 = vrot.lane.b32.xlu0 %v14246_v27, %s9702_s20 }
0x163b   : > { %4959 = vrot.lane.b32.xlu0 %v14247_v1, %s9702_s20  ;;  %v6722_v1 = vmul.f32 %v6721_v2, %v9988_v43 }
0x1643   : > { %4965 = vrot.lane.b32.xlu0 %v14248_v15, %s9703_s21  ;;  %v6723_v15 = vmul.f32 %v6720_v58, %v9992_v45 }
0x164b   : > { %4967 = vrot.lane.b32.xlu0 %v14249_v42, %s9703_s21  ;;  %v13342_v42 = vpop.permute.xlu1 %4350 }
0x1652   : > { %v3770_v7 = vpop.xlane.xlu0 %3769 }
0x1653   : > { %v3771_v10 = vrot.slane %v3770_v7, 4  ;;  %4975 = vrot.lane.b32.xlu0 %v14250_v21, %s9704_s22 }
0x1655   : > { %v3772_v24 = vadd.f32 %v3771_v10, %v3770_v7  ;;  %v6740_v7 = vmul.f32 %v6739_v5, %v10005_v60  ;;  %v6741_v10 = vmul.f32 %v6738_v51, %v10007_v61 }
0x1657   : > { %v3773_v49 = vrot.slane %v3772_v24, 2 }
0x1659   : > { %v3774_v14 = vadd.f32 %v3773_v49, %v3772_v24 }
0x165b   : > { %4987 = vrot.lane.b32.xlu0 %v14251_v48, %s9705_s23  ;;  %v3775_v26 = vrot.slane %v3774_v14, 1  ;;  %v6761_v48 = vsel %vm870_vm5, %v6759_v28, %v6757_v8  ;;  %v6789_v8 = vpop.permute.xlu1 %6788 }
0x165d   : > { %v3776_v3 = vadd.f32 %v3775_v26, %v3774_v14  ;;  %v6769_v26 = vpop.permute.xlu2 %6768 }
0x165f   : > { %9465 = vpush %v3776_v3 }
0x1660   : > { %9467 = vpush %v3786_v50 }
0x1663   : > { %4997 = vrot.lane.b32.xlu0 %v14252_v25, %s9706_s24 }
0x1665   : > { %v6767_v35 = vpop.permute.xlu0 %6766 }
0x1666   : > { %v6770_v25 = vsel %vm886_vm6, %v6767_v35, %v6769_v26 }
0x1667   : > { %v6772_v28 = vmul.f32 %v6770_v25, %v10047_v32  ;;  %v14257_v25 = vld [vmem:[#allocation123_spill] sm:$0xff] }
0x166b   : > { %4999 = vrot.lane.b32.xlu0 %v14253_v55, %s9706_s24  ;;  %v6762_v55 = vmul.f32 %v6760_v62, %v10031_v20 }
0x166d   : > { %v6727_v57 = vpop.permute.xlu0 %6726 }
0x166e   : > { %v6728_v46 = vsel %vm820_vm1, %v6725_v29, %v6727_v57  ;;  %v6729_v9 = vsel %vm820_vm1, %v6727_v57, %v6725_v29  ;;  %v14254_v29 = vld [vmem:[#allocation119_spill] sm:$0xff]  ;;  %v6763_v57 = vmul.f32 %v6761_v48, %v10033_v22  ;;  %v4339_v48 = vpop.permute.xlu2 %4338 }
0x166f   : > { %v6730_v16 = vmul.f32 %v6729_v9, %v9979_v33  ;;  %v6731_v27 = vmul.f32 %v6728_v46, %v9981_v37  ;;  %v14255_v46 = vld [vmem:[#allocation122_spill] sm:$0xff] }
0x1671   : > { %v6732_v53 = vadd.f32 %v6730_v16, %v6722_v1  ;;  %v6733_v34 = vadd.f32 %v6731_v27, %v6723_v15  ;;  %v6791_v1 = vsel %vm918_vm8, %v6789_v8, %v6787_v54 }
0x1673   : > { %5017 = vrot.lane.b32.xlu0 %v14254_v29, %s9709_s26  ;;  %v6742_v31 = vadd.f32 %v6740_v7, %v6732_v53  ;;  %v6743_v11 = vadd.f32 %v6741_v10, %v6733_v34  ;;  %v6793_v29 = vmul.f32 %v6791_v1, %v10081_v13 }
0x1675   : > { %v6747_v21 = vpop.permute.xlu0 %6746 }
0x1676   : > { %v6748_v19 = vsel %vm852_vm4, %v6745_v36, %v6747_v21  ;;  %v6749_v24 = vsel %vm852_vm4, %v6747_v21, %v6745_v36  ;;  %v6771_v36 = vsel %vm886_vm6, %v6769_v26, %v6767_v35  ;;  %v6790_v35 = vsel %vm918_vm8, %v6787_v54, %v6789_v8 }
0x1677   : > { %v6750_v49 = vmul.f32 %v6749_v24, %v10010_v63  ;;  %v6751_v14 = vmul.f32 %v6748_v19, %v10015_v4  ;;  %v6773_v9 = vmul.f32 %v6771_v36, %v10051_v38  ;;  %v6792_v34 = vmul.f32 %v6790_v35, %v10079_v12  ;;  %v14256_v19 = vld [vmem:[#allocation2_spill] sm:$0xff]  ;;  %v4361_v36 = vpop.permute.xlu1 %4360 }
0x1679   : > { %v6752_v3 = vadd.f32 %v6750_v49, %v6742_v31  ;;  %v6753_v50 = vadd.f32 %v6751_v14, %v6743_v11 }
0x167b   : > { %v6754_v58 = vadd.f32 %v6752_v3, %v12981_v52  ;;  %v6755_v2 = vadd.f32 %v6753_v50, %v13048_v39  ;;  %5029 = vrot.lane.b32.xlu0 %v14255_v46, %s9710_s27 }
0x167d   : > { %v6764_v44 = vadd.f32 %v6762_v55, %v6754_v58  ;;  %v6765_v16 = vadd.f32 %v6763_v57, %v6755_v2  ;;  %v6779_v27 = vpop.permute.xlu0 %6778  ;;  %v4342_v57 = vsel %vm852_vm4, %v4339_v48, %v13322_v0 }
0x167e   : > { %v6780_v52 = vsel %vm902_vm7, %v13312_v17, %v6779_v27  ;;  %v6781_v39 = vsel %vm902_vm7, %v6779_v27, %v13312_v17 }
0x167f   : > { %v6774_v15 = vadd.f32 %v6772_v28, %v6764_v44  ;;  %v6775_v51 = vadd.f32 %v6773_v9, %v6765_v16  ;;  %v6782_v5 = vmul.f32 %v6780_v52, %v10058_v47  ;;  %v6783_v53 = vmul.f32 %v6781_v39, %v10061_v56 }
0x1680   : > { %v4345_v28 = vmul.f32 %v4342_v57, %v10015_v4 }
0x1681   : > { %v6784_v7 = vadd.f32 %v6782_v5, %v6774_v15  ;;  %v6785_v54 = vadd.f32 %v6783_v53, %v6775_v51  ;;  %v4373_v5 = vpop.permute.xlu1 %4372 }
0x1683   : > { %v6794_v10 = vadd.f32 %v6792_v34, %v6784_v7  ;;  %v6795_v21 = vadd.f32 %v6793_v29, %v6785_v54  ;;  %5604 = vrot.lane.b32.xlu0 %v12313_v59, %s9702_s20  ;;  %v14260_v34 = vld [vmem:[#allocation96_spill] sm:$0xff] }
0x1685   : > { %v6796_v24 = vadd.f32 %v6794_v10, %v14256_v19  ;;  %v6797_v17 = vadd.f32 %v6795_v21, %v14256_v19  ;;  %v4331_v31 = vpop.permute.xlu0 %4330 }
0x1686   : > { %v4332_v14 = vsel %vm836_vm3, %v13306_v41, %v4331_v31  ;;  %v4333_v62 = vsel %vm836_vm3, %v4331_v31, %v13306_v41  ;;  %v4343_v41 = vsel %vm852_vm4, %v13322_v0, %v4339_v48  ;;  %v4363_v0 = vpop.permute.xlu2 %4362  ;;  %v9681_v48 = vld [vmem:[%s10117_s12] sm:$0xff] }
0x1687   : > { %v6798_v11 = vsub.f32 0.0, %v6796_v24  ;;  %v6799_v49 = vsub.f32 0.0, %v6797_v17  ;;  %v4334_v59 = vmul.f32 %v4333_v62, %v10005_v60  ;;  %v4335_v50 = vmul.f32 %v4332_v14, %v10007_v61  ;;  %v14261_v62 = vld [vmem:[#allocation125_spill] sm:$0xff] }
0x1688   : > { %v4344_v8 = vmul.f32 %v4343_v41, %v10010_v63  ;;  %v4364_v51 = vsel %vm886_vm6, %v4361_v36, %v4363_v0  ;;  %v4365_v7 = vsel %vm886_vm6, %v4363_v0, %v4361_v36 }
0x1689   : > { %v6800_v26 = vmul.f32 1.442695, %v6798_v11  ;;  %v6802_v3 = vmul.f32 1.442695, %v6799_v49  ;;  %v4336_v58 = vadd.f32 %v4334_v59, %v13284_v23  ;;  %v4337_v2 = vadd.f32 %v4335_v50, %v13286_v6  ;;  %v14258_v6 = vld [vmem:[#allocation124_spill] sm:$0xff] }
0x168a   : > { %v4366_v17 = vmul.f32 %v4364_v51, %v10047_v32  ;;  %v4367_v11 = vmul.f32 %v4365_v7, %v10051_v38 }
0x168b   : > { %9584 = vpow2.f32 %v6800_v26  ;;  %5606 = vrot.lane.b32.xlu0 %v14257_v25, %s9702_s20  ;;  %v4346_v23 = vadd.f32 %v4344_v8, %v4336_v58  ;;  %v4347_v1 = vadd.f32 %v4345_v28, %v4337_v2  ;;  %v9683_v58 = vld [vmem:[%s13984_s7] sm:$0xff] }
0x168c   : > { %9586 = vpow2.f32 %v6802_v3  ;;  %v9682_v3 = vld [vmem:[%s10117_s12 + $0x8] sm:$0xff] }
0x168d   : > { %v4353_v55 = vpop.permute.xlu0 %4352  ;;  %v4349_v29 = vadd.f32 %v4347_v1, %v14260_v34 }
0x168e   : > { %v4354_v16 = vsel %vm870_vm5, %v13342_v42, %v4353_v55  ;;  %v4355_v27 = vsel %vm870_vm5, %v4353_v55, %v13342_v42  ;;  %v14259_v42 = vld [vmem:[#allocation95_spill] sm:$0xff]  ;;  %v4381_v50 = vpop.permute.xlu2 %4380 }
0x168f   : > { %v4356_v52 = vmul.f32 %v4354_v16, %v10031_v20  ;;  %v4357_v39 = vmul.f32 %v4355_v27, %v10033_v22  ;;  %v4348_v53 = vadd.f32 %v4346_v23, %v14259_v42  ;;  %v8309_v16 = vld [vmem:[%s12456_s28 + $0xa0] sm:$0xff]  ;;  %v8310_v27 = vld [vmem:[%s12456_s28 + $0xa8] sm:$0xff] }
0x1690   : > { %v14262_v23 = vld [vmem:[#allocation126_spill] sm:$0xff] }
0x1691   : > { %v9585_v46 = vpop.eup %9584  ;;  %v4358_v21 = vadd.f32 %v4356_v52, %v4348_v53  ;;  %v4359_v19 = vadd.f32 %v4357_v39, %v4349_v29  ;;  %v9684_v39 = vld [vmem:[%s13984_s7 + $0x8] sm:$0xff]  ;;  %v14263_v53 = vld [vmem:[#allocation9_spill] sm:$0xff] }
0x1692   : > { %v9587_v9 = vpop.eup %9586  ;;  %v6804_v44 = vadd.f32 1.0, %v9585_v46 }
0x1693   : > { %v6805_v35 = vadd.f32 1.0, %v9587_v9  ;;  %5612 = vrot.lane.b32.xlu0 %v14258_v6, %s9703_s21  ;;  %v4368_v25 = vadd.f32 %v4366_v17, %v4358_v21  ;;  %v4369_v36 = vadd.f32 %v4367_v11, %v4359_v19  ;;  %v14264_v11 = vld [vmem:[#allocation19_spill] sm:$0xff] }
0x1694   : > { %9588 = vrcp.f32 %v6804_v44 }
0x1695   : > { %9590 = vrcp.f32 %v6805_v35  ;;  %v4371_v15 = vpop.permute.xlu0 %4370 }
0x1696   : > { %v4374_v54 = vsel %vm902_vm7, %v4371_v15, %v4373_v5  ;;  %v4375_v10 = vsel %vm902_vm7, %v4373_v5, %v4371_v15 }
0x1697   : > { %v4376_v49 = vmul.f32 %v4374_v54, %v10058_v47  ;;  %v4377_v14 = vmul.f32 %v4375_v10, %v10061_v56 }
0x1699   : > { %v4378_v2 = vadd.f32 %v4376_v49, %v4368_v25  ;;  %v4379_v46 = vadd.f32 %v4377_v14, %v4369_v36  ;;  %v14265_v14 = vld [vmem:[#allocation20_spill] sm:$0xff]  ;;  %v9687_v36 = vld [vmem:[%s13984_s7 + $0x20] sm:$0xff] }
0x169a   : > { %v9589_v24 = vpop.eup %9588 }
0x169b   : > { %v9591_v31 = vpop.eup %9590  ;;  %5614 = vrot.lane.b32.xlu0 %v14261_v62, %s9703_s21  ;;  %v6808_v26 = vmul.f32 %v9681_v48, %v9589_v24  ;;  %v9685_v24 = vld [vmem:[%s13984_s7 + $0x10] sm:$0xff] }
0x169c   : > { %v6809_v59 = vmul.f32 %v9682_v3, %v9591_v31 }
0x169d   : > { %v4383_v55 = vpop.permute.xlu0 %4382  ;;  %6825 = vmatpush.msrb.mxu2 %v6808_v26  ;;  %v14266_v26 = vld [vmem:[#allocation4_spill] sm:$0xff] }
0x169e   : > { %v4384_v57 = vsel %vm918_vm8, %v4381_v50, %v4383_v55  ;;  %v4385_v41 = vsel %vm918_vm8, %v4383_v55, %v4381_v50  ;;  %6869 = vmatpush.msrb.mxu3 %v6809_v59  ;;  %9099 = vmatmul.msk.f32.vlgmr.msrb.gmra.mxu2 %vm686_vm0, %v9683_v58  ;;  %v9686_v59 = vld [vmem:[%s13984_s7 + $0x18] sm:$0xff]  ;;  %v14267_v50 = vld [vmem:[#allocation3_spill] sm:$0xff]  ;;  %v14268_v55 = vld [vmem:[#allocation12_spill] sm:$0xff] }
0x169f   : > { %v4386_v8 = vmul.f32 %v4384_v57, %v10079_v12  ;;  %v4387_v28 = vmul.f32 %v4385_v41, %v10081_v13  ;;  %9108 = vmatmul.msk.f32.vlgmr.msrb.gmra.mxu3 %vm686_vm0, %v9683_v58  ;;  %v9688_v41 = vld [vmem:[%s13984_s7 + $0x28] sm:$0xff] }
0x16a0   : > { %v14269_v58 = vld [vmem:[#allocation7_spill] sm:$0xff] }
0x16a1   : > { %v4388_v9 = vadd.f32 %v4386_v8, %v4378_v2  ;;  %v4389_v44 = vadd.f32 %v4387_v28, %v4379_v46  ;;  %v14270_v46 = vld [vmem:[#allocation110_spill] sm:$0xff]  ;;  %v9689_v8 = vld [vmem:[%s13984_s7 + $0x30] sm:$0xff] }
0x16a2   : > { %v14271_v28 = vld [vmem:[#allocation132_spill] sm:$0xff] }
0x16a3   : > { %v4390_v0 = vadd.f32 %v4388_v9, %v12655_v40  ;;  %v4391_v35 = vadd.f32 %v4389_v44, %v12655_v40  ;;  %5622 = vrot.lane.b32.xlu0 %v14262_v23, %s9704_s22  ;;  %v14272_v44 = vld [vmem:[#allocation117_spill] sm:$0xff]  ;;  %v9691_v23 = vld [vmem:[%s13984_s7 + $0x40] sm:$0xff] }
0x16a5   : > { %v4397_v1 = vsub.f32 %v4390_v0, %v8309_v16  ;;  %v4398_v6 = vsub.f32 %v4391_v35, %v8310_v27  ;;  %v13453_v52 = vpop.permute.xlu0 %4957  ;;  %v9690_v16 = vld [vmem:[%s13984_s7 + $0x38] sm:$0xff]  ;;  %v14274_v35 = vld [vmem:[#allocation120_spill] sm:$0xff] }
0x16a6   : > { %9100 = vmatmul.msk.f32.gmra.mxu2 %vm686_vm0, %v9684_v39  ;;  %v14273_v27 = vld [vmem:[#allocation133_spill] sm:$0xff] }
0x16a7   : > { %v4399_v15 = vand.u32 2147483647, %v4397_v1  ;;  %v4400_v51 = vand.u32 2147483647, %v4398_v6  ;;  %9109 = vmatmul.msk.f32.gmra.mxu3 %vm686_vm0, %v9684_v39  ;;  %v14275_v1 = vld [vmem:[#allocation13_spill] sm:$0xff]  ;;  %v14276_v39 = vld [vmem:[#allocation135_spill] sm:$0xff] }
0x16a9   : > { %v4403_v5 = vmul.f32 0.5, %v4399_v15  ;;  %v4404_v42 = vmul.f32 0.5, %v4400_v51  ;;  %v8313_v21 = vadd.f32 -0.005, %v4399_v15  ;;  %v8314_v19 = vadd.f32 -0.005, %v4400_v51 }
0x16aa   : > { %vm4401_vm13 = vcmp.lt.f32.partialorder %v4399_v15, 0.01  ;;  %vm4402_vm14 = vcmp.lt.f32.partialorder %v4400_v51, 0.01 }
0x16ab   : > { %6253 = vrot.lane.b32.xlu0 %v14263_v53, %s9702_s20  ;;  %v4405_v34 = vmul.f32 %v4403_v5, %v4399_v15  ;;  %v4406_v29 = vmul.f32 %v4404_v42, %v4400_v51  ;;  %v14277_v51 = vld [vmem:[#allocation16_spill] sm:$0xff]  ;;  %v14278_v42 = vld [vmem:[#allocation17_spill] sm:$0xff] }
0x16ad   : > { %v13462_v7 = vpop.permute.xlu0 %4959  ;;  %v4407_v54 = vmul.f32 %v4405_v34, %v12682_v30  ;;  %v4408_v10 = vmul.f32 %v4406_v29, %v12682_v30 }
0x16ae   : > { %9101 = vmatmul.msk.f32.gmra.mxu2 %vm686_vm0, %v9685_v24 }
0x16af   : > { %v4411_v17 = vsel %vm4401_vm13, %v4407_v54, %v8313_v21  ;;  %v4412_v31 = vsel %vm4402_vm14, %v4408_v10, %v8314_v19  ;;  %9110 = vmatmul.msk.f32.gmra.mxu3 %vm686_vm0, %v9685_v24  ;;  %vm3788_vm13 = vcmp.eq.s32.totalorder %v9961_v18, 4  ;;  %vm4435_vm14 = vcmp.eq.s32.totalorder %v9961_v18, 5 }
0x16b0   : > { %v4413_v49 = vmul.f32 %v14264_v11, %v4411_v17  ;;  %v4414_v62 = vmul.f32 %v14265_v14, %v4412_v31 }
0x16b2   : > { %v4415_v48 = vadd.f32 %v4414_v62, %v4413_v49  ;;  %v4427_v62 = vpop.xlane.xlu2 %4426 }
0x16b3   : > { %6259 = vrot.lane.b32.xlu0 %v14266_v26, %s9703_s21 }
0x16b4   : > { %4416 = vadd.xlane.f32.xlu1 %v4415_v48  ;;  %v4428_v48 = vrot.slane %v4427_v62, 4 }
0x16b5   : > { %v13475_v3 = vpop.permute.xlu0 %4965 }
0x16b6   : > { %9102 = vmatmul.msk.f32.gmra.mxu2 %vm686_vm0, %v9686_v59  ;;  %v4429_v26 = vadd.f32 %v4428_v48, %v4427_v62 }
0x16b7   : > { %9111 = vmatmul.msk.f32.gmra.mxu3 %vm686_vm0, %v9686_v59 }
0x16b8   : > { %v4430_v59 = vrot.slane %v4429_v26, 2 }
0x16bb   : > { %6261 = vrot.lane.b32.xlu0 %v14267_v50, %s9703_s21 }
0x16bd   : > { %v13484_v25 = vpop.permute.xlu0 %4967 }
0x16be   : > { %9103 = vmatmul.msk.f32.gmra.mxu2 %vm686_vm0, %v9687_v36 }
0x16bf   : > { %9112 = vmatmul.msk.f32.gmra.mxu3 %vm686_vm0, %v9687_v36 }
0x16c3   : > { %6269 = vrot.lane.b32.xlu0 %v14268_v55, %s9704_s22  ;;  %v4431_v55 = vadd.f32 %v4430_v59, %v4429_v26  ;;  %v14279_v59 = vld [vmem:[#allocation113_spill] sm:$0xff] }
0x16c5   : > { %v13493_v57 = vpop.permute.xlu0 %4975 }
0x16c6   : > { %9104 = vmatmul.msk.f32.gmra.mxu2 %vm686_vm0, %v9688_v41 }
0x16c7   : > { %9113 = vmatmul.msk.f32.gmra.mxu3 %vm686_vm0, %v9688_v41 }
0x16cb   : > { %6279 = vrot.lane.b32.xlu0 %v14269_v58, %s9705_s23 }
0x16cd   : > { %v13502_v2 = vpop.permute.xlu0 %4987  ;;  %4977 = vrot.lane.b32.xlu1 %v14270_v46, %s9704_s22  ;;  %v4432_v46 = vrot.slane %v4431_v55, 1 }
0x16ce   : > { %9105 = vmatmul.msk.f32.gmra.mxu2 %vm686_vm0, %v9689_v8 }
0x16cf   : > { %9114 = vmatmul.msk.f32.gmra.mxu3 %vm686_vm0, %v9689_v8 }
0x16d3   : > { %5656 = vrot.lane.b32.xlu0 %v14271_v28, %s9708_s25 }
0x16d5   : > { %v13513_v9 = vpop.permute.xlu0 %4997  ;;  %5007 = vrot.lane.b32.xlu1 %v14272_v44, %s9708_s25  ;;  %v4433_v44 = vadd.f32 %v4432_v46, %v4431_v55 }
0x16d6   : > { %9106 = vmatmul.msk.f32.gmra.mxu2 %vm686_vm0, %v9690_v16 }
0x16d7   : > { %9115 = vmatmul.msk.f32.gmra.mxu3 %vm686_vm0, %v9690_v16 }
0x16db   : > { %5664 = vrot.lane.b32.xlu0 %v14273_v27, %s9709_s26  ;;  %v4969_v27 = vsel %vm820_vm1, %v13475_v3, %v13484_v25 }
0x16dd   : > { %v13524_v0 = vpop.permute.xlu0 %4999  ;;  %5019 = vrot.lane.b32.xlu1 %v14274_v35, %s9709_s26  ;;  %v4970_v35 = vsel %vm820_vm1, %v13484_v25, %v13475_v3 }
0x16de   : > { %9107 = vmatmul.msk.f32.gmra.mxu2 %vm686_vm0, %v9691_v23  ;;  %v5002_v26 = vsel %vm870_vm5, %v13524_v0, %v13513_v9 }
0x16df   : > { %9116 = vmatmul.msk.f32.gmra.mxu3 %vm686_vm0, %v9691_v23  ;;  %v4986_v23 = vpop.permute.xlu2 %4985 }
0x16e0   : > { %v4989_v25 = vsel %vm852_vm4, %v4986_v23, %v13502_v2 }
0x16e3   : > { %6303 = vrot.lane.b32.xlu0 %v14275_v1, %s9708_s25  ;;  %v4961_v1 = vsel %vm806_vm2, %v13453_v52, %v13462_v7 }
0x16e5   : > { %v13535_v6 = vpop.permute.xlu0 %5017 }
0x16eb   : > { %5674 = vrot.lane.b32.xlu0 %v14276_v39, %s9710_s27  ;;  %v4962_v39 = vsel %vm806_vm2, %v13462_v7, %v13453_v52 }
0x16ed   : > { %v13539_v15 = vpop.permute.xlu0 %5029 }
0x16f3   : > { %6313 = vrot.lane.b32.xlu0 %v14277_v51, %s9709_s26  ;;  %v4971_v51 = vmul.f32 %v4970_v35, %v9979_v33 }
0x16f5   : > { %v5605_v5 = vpop.permute.xlu0 %5604 }
0x16fb   : > { %6321 = vrot.lane.b32.xlu0 %v14278_v42, %s9710_s27  ;;  %v4963_v42 = vmul.f32 %v4962_v39, %v9988_v43 }
0x16fd   : > { %v5607_v53 = vpop.permute.xlu0 %5606 }
0x16fe   : > { %v5608_v34 = vsel %vm806_vm2, %v5605_v5, %v5607_v53  ;;  %v5609_v29 = vsel %vm806_vm2, %v5607_v53, %v5605_v5  ;;  %v4972_v5 = vmul.f32 %v4969_v27, %v9981_v37  ;;  %v4964_v53 = vmul.f32 %v4961_v1, %v9992_v45 }
0x16ff   : > { %v5610_v24 = vmul.f32 %v5609_v29, %v9988_v43  ;;  %v5611_v17 = vmul.f32 %v5608_v34, %v9992_v45  ;;  %v4990_v34 = vsel %vm852_vm4, %v13502_v2, %v4986_v23  ;;  %v4973_v29 = vadd.f32 %v4971_v51, %v4963_v42 }
0x1705   : > { %v5613_v54 = vpop.permute.xlu0 %5612 }
0x170d   : > { %v5615_v10 = vpop.permute.xlu0 %5614 }
0x170e   : > { %v5616_v21 = vsel %vm820_vm1, %v5613_v54, %v5615_v10  ;;  %v5617_v19 = vsel %vm820_vm1, %v5615_v10, %v5613_v54  ;;  %v4974_v54 = vadd.f32 %v4972_v5, %v4964_v53 }
0x170f   : > { %v5618_v31 = vmul.f32 %v5617_v19, %v9979_v33  ;;  %v5619_v11 = vmul.f32 %v5616_v21, %v9981_v37  ;;  %v4991_v19 = vmul.f32 %v4990_v34, %v10010_v63 }
0x1711   : > { %v13557_v49 = vadd.f32 %v5618_v31, %v5610_v24  ;;  %v13559_v14 = vadd.f32 %v5619_v11, %v5611_v17  ;;  %v4992_v24 = vmul.f32 %v4989_v25, %v10015_v4  ;;  %v5010_v31 = vpop.permute.xlu2 %5009 }
0x1727   : > { %v4417_v50 = vpop.xlane.xlu1 %4416 }
0x1728   : > { %v4418_v36 = vrot.slane %v4417_v50, 4 }
0x172a   : > { %v4419_v41 = vadd.f32 %v4418_v36, %v4417_v50  ;;  %v14280_v36 = vld [vmem:[#allocation114_spill] sm:$0xff] }
0x172c   : > { %v4420_v58 = vrot.slane %v4419_v41, 2 }
0x172e   : > { %v4421_v8 = vadd.f32 %v4420_v58, %v4419_v41 }
0x1730   : > { %v4422_v28 = vrot.slane %v4421_v8, 1 }
0x1732   : > { %v4423_v16 = vadd.f32 %v4422_v28, %v4421_v8  ;;  %v5004_v8 = vmul.f32 %v5002_v26, %v10033_v22 }
0x1734   : > { %9469 = vpush %v4423_v16 }
0x1735   : > { %9471 = vpush %v4433_v44 }
0x173f   : > { %v4978_v3 = vpop.permute.xlu1 %4977 }
0x1740   : > { %v4979_v52 = vsel %vm836_vm3, %v13493_v57, %v4978_v3  ;;  %v4980_v7 = vsel %vm836_vm3, %v4978_v3, %v13493_v57  ;;  %v5001_v57 = vsel %vm870_vm5, %v13513_v9, %v13524_v0  ;;  %v5028_v0 = vpop.permute.xlu2 %5027 }
0x1741   : > { %v4981_v10 = vmul.f32 %v4980_v7, %v10005_v60  ;;  %v4982_v21 = vmul.f32 %v4979_v52, %v10007_v61  ;;  %v5003_v46 = vmul.f32 %v5001_v57, %v10031_v20  ;;  %v5031_v35 = vsel %vm918_vm8, %v5028_v0, %v13539_v15 }
0x1742   : > { %v5032_v23 = vsel %vm918_vm8, %v13539_v15, %v5028_v0  ;;  %v5033_v3 = vmul.f32 %v5031_v35, %v10079_v12 }
0x1743   : > { %v4983_v17 = vadd.f32 %v4981_v10, %v4973_v29  ;;  %v4984_v2 = vadd.f32 %v4982_v21, %v4974_v54  ;;  %v5034_v25 = vmul.f32 %v5032_v23, %v10081_v13  ;;  %v8511_v29 = vld [vmem:[%s12456_s28 + $0xc0] sm:$0xff]  ;;  %v8512_v54 = vld [vmem:[%s12456_s28 + $0xc8] sm:$0xff] }
0x1745   : > { %v4993_v11 = vadd.f32 %v4991_v19, %v4983_v17  ;;  %v4994_v62 = vadd.f32 %v4992_v24, %v4984_v2 }
0x1747   : > { %v5008_v48 = vpop.permute.xlu1 %5007  ;;  %v4995_v50 = vadd.f32 %v4993_v11, %v14279_v59  ;;  %v4996_v55 = vadd.f32 %v4994_v62, %v14280_v36 }
0x1748   : > { %v5011_v41 = vsel %vm886_vm6, %v5008_v48, %v5010_v31  ;;  %v5012_v58 = vsel %vm886_vm6, %v5010_v31, %v5008_v48 }
0x1749   : > { %v5005_v28 = vadd.f32 %v5003_v46, %v4995_v50  ;;  %v5006_v44 = vadd.f32 %v5004_v8, %v4996_v55  ;;  %v5013_v16 = vmul.f32 %v5011_v41, %v10047_v32  ;;  %v5014_v9 = vmul.f32 %v5012_v58, %v10051_v38  ;;  %v9692_v55 = vld [vmem:[%s12456_s28 + $0xd0] sm:$0xff]  ;;  %v9693_v58 = vld [vmem:[%s12456_s28 + $0xd8] sm:$0xff] }
0x174b   : > { %v5015_v51 = vadd.f32 %v5013_v16, %v5005_v28  ;;  %v5016_v5 = vadd.f32 %v5014_v9, %v5006_v44  ;;  %v6871_v28 = vpop.f32.mrf.mxu3  ;;  %v14281_v16 = vld [vmem:[#allocation127_spill] sm:$0xff]  ;;  %v6827_v9 = vpop.f32.mrf.mxu2 }
0x174c   : > { %6900 = vrot.lane.b32.xlu0 %v6871_v28, %s9702_s20  ;;  %6898 = vrot.lane.b32.xlu2 %v6827_v9, %s9702_s20  ;;  %s13881_s20 = spop %9449 }
0x174f   : > { %v5020_v27 = vpop.permute.xlu1 %5019 }
0x1750   : > { %v5021_v1 = vsel %vm902_vm7, %v13535_v6, %v5020_v27  ;;  %v5022_v39 = vsel %vm902_vm7, %v5020_v27, %v13535_v6  ;;  %v14282_v27 = vld [vmem:[#allocation128_spill] sm:$0xff] }
0x1751   : > { %v5023_v42 = vmul.f32 %v5021_v1, %v10058_v47  ;;  %v5024_v53 = vmul.f32 %v5022_v39, %v10061_v56  ;;  %v14283_v1 = vld [vmem:[#allocation8_spill] sm:$0xff] }
0x1753   : > { %v5025_v34 = vadd.f32 %v5023_v42, %v5015_v51  ;;  %v5026_v15 = vadd.f32 %v5024_v53, %v5016_v5  ;;  %v6874_v44 = vpop.f32.mrf.mxu3  ;;  %v6830_v35 = vpop.f32.mrf.mxu2  ;;  %v14284_v5 = vld [vmem:[#allocation11_spill] sm:$0xff] }
0x1754   : > { %6908 = vrot.lane.b32.xlu2 %v6874_v44, %s9703_s21 }
0x1755   : > { %v5035_v52 = vadd.f32 %v5033_v3, %v5025_v34  ;;  %v5036_v7 = vadd.f32 %v5034_v25, %v5026_v15  ;;  %v14285_v3 = vld [vmem:[#allocation131_spill] sm:$0xff]  ;;  %v14286_v15 = vld [vmem:[#allocation14_spill] sm:$0xff] }
0x1757   : > { %v5037_v10 = vadd.f32 %v5035_v52, %v12655_v40  ;;  %v5038_v6 = vadd.f32 %v5036_v7, %v12655_v40 }
0x1759   : > { %v5044_v21 = vsub.f32 %v5037_v10, %v8511_v29  ;;  %v5045_v19 = vsub.f32 %v5038_v6, %v8512_v54  ;;  %v14287_v29 = vld [vmem:[#allocation134_spill] sm:$0xff]  ;;  %v14288_v10 = vld [vmem:[#allocation136_spill] sm:$0xff] }
0x175b   : > { %v5046_v24 = vand.u32 2147483647, %v5044_v21  ;;  %v5047_v17 = vand.u32 2147483647, %v5045_v19  ;;  %v6877_v0 = vpop.f32.mrf.mxu3  ;;  %v6833_v39 = vpop.f32.mrf.mxu2  ;;  %v14289_v21 = vld [vmem:[#allocation18_spill] sm:$0xff] }
0x175c   : > { %6918 = vrot.lane.b32.xlu0 %v6877_v0, %s9704_s22  ;;  %6916 = vrot.lane.b32.xlu2 %v6833_v39, %s9704_s22  ;;  %v5623_v19 = vpop.permute.xlu0 %5622 }
0x175d   : > { %v5050_v2 = vmul.f32 0.5, %v5046_v24  ;;  %v5051_v31 = vmul.f32 0.5, %v5047_v17  ;;  %v8515_v26 = vadd.f32 -0.005, %v5046_v24  ;;  %v8516_v59 = vadd.f32 -0.005, %v5047_v17 }
0x175e   : > { %vm5048_vm0 = vcmp.lt.f32.partialorder %v5046_v24, 0.01  ;;  %vm5049_vm15 = vcmp.lt.f32.partialorder %v5047_v17, 0.01 }
0x175f   : > { %v5052_v11 = vmul.f32 %v5050_v2, %v5046_v24  ;;  %v5053_v62 = vmul.f32 %v5051_v31, %v5047_v17  ;;  %v5074_v17 = vpop.xlane.xlu2 %5073 }
0x1760   : > { %v5075_v2 = vrot.slane %v5074_v17, 4 }
0x1761   : > { %v5054_v48 = vmul.f32 %v5052_v11, %v12682_v30  ;;  %v5055_v57 = vmul.f32 %v5053_v62, %v12682_v30 }
0x1762   : > { %v5076_v31 = vadd.f32 %v5075_v2, %v5074_v17 }
0x1763   : > { %v5058_v50 = vsel %vm5048_vm0, %v5054_v48, %v8515_v26  ;;  %v5059_v36 = vsel %vm5049_vm15, %v5055_v57, %v8516_v59  ;;  %v6880_v23 = vpop.f32.mrf.mxu3  ;;  %v6836_v42 = vpop.f32.mrf.mxu2  ;;  %vm5082_vm0 = vcmp.eq.s32.totalorder %v9961_v18, 6  ;;  %vm5729_vm15 = vcmp.eq.s32.totalorder %v9961_v18, 7 }
0x1764   : > { %v5060_v41 = vmul.f32 %v9692_v55, %v5058_v50  ;;  %v5061_v46 = vmul.f32 %v9693_v58, %v5059_v36  ;;  %6926 = vrot.lane.b32.xlu0 %v6836_v42, %s9705_s23  ;;  %v6254_v24 = vpop.permute.xlu0 %6253  ;;  %v5077_v62 = vrot.slane %v5076_v31, 2 }
0x1766   : > { %v5062_v8 = vadd.f32 %v5061_v46, %v5060_v41  ;;  %v5078_v59 = vadd.f32 %v5077_v62, %v5076_v31 }
0x1767   : > { %v6252_v26 = vpop.permute.xlu2 %6251 }
0x1768   : > { %5063 = vadd.xlane.f32.xlu1 %v5062_v8  ;;  %v5079_v58 = vrot.slane %v5078_v59, 1 }
0x176a   : > { %v5080_v28 = vadd.f32 %v5079_v58, %v5078_v59 }
0x176b   : > { %v13649_v51 = vpop.f32.mrf.mxu3  ;;  %v13658_v34 = vpop.f32.mrf.mxu2 }
0x176c   : > { %v6260_v11 = vpop.permute.xlu0 %6259 }
0x176f   : > { %v5635_v9 = vpop.permute.xlu2 %5634 }
0x1773   : > { %v6886_v53 = vpop.f32.mrf.mxu3  ;;  %v6842_v7 = vpop.f32.mrf.mxu2 }
0x1774   : > { %6940 = vrot.lane.b32.xlu2 %v6886_v53, %s9706_s24  ;;  %v6262_v41 = vpop.permute.xlu0 %6261 }
0x1775   : > { %v6264_v31 = vsel %vm820_vm1, %v6262_v41, %v6260_v11 }
0x177b   : > { %v6889_v25 = vpop.f32.mrf.mxu3  ;;  %v6845_v54 = vpop.f32.mrf.mxu2 }
0x177c   : > { %6950 = vrot.lane.b32.xlu2 %v6889_v25, %s9708_s25  ;;  %v6270_v0 = vpop.permute.xlu0 %6269 }
0x1781   : > { %5624 = vrot.lane.b32.xlu1 %v14281_v16, %s9704_s22 }
0x1783   : > { %v6892_v52 = vpop.f32.mrf.mxu3  ;;  %v6848_v6 = vpop.f32.mrf.mxu2 }
0x1784   : > { %6960 = vrot.lane.b32.xlu0 %v6892_v52, %s9709_s26  ;;  %6958 = vrot.lane.b32.xlu2 %v6848_v6, %s9709_s26  ;;  %v6280_v39 = vpop.permute.xlu0 %6279 }
0x1789   : > { %5632 = vrot.lane.b32.xlu1 %v14282_v27, %s9705_s23  ;;  %v5647_v27 = vpop.permute.xlu2 %5646 }
0x178b   : > { %v6895_v36 = vpop.f32.mrf.mxu3  ;;  %v6851_v16 = vpop.f32.mrf.mxu2 }
0x178c   : > { %6970 = vrot.lane.b32.xlu2 %v6895_v36, %s9710_s27  ;;  %v5657_v52 = vpop.permute.xlu0 %5656 }
0x1791   : > { %6271 = vrot.lane.b32.xlu1 %v14283_v1, %s9704_s22  ;;  %v5655_v25 = vpop.permute.xlu2 %5654 }
0x1799   : > { %6281 = vrot.lane.b32.xlu1 %v14284_v5, %s9705_s23 }
0x17a1   : > { %5644 = vrot.lane.b32.xlu1 %v14285_v3, %s9706_s24 }
0x17a9   : > { %6291 = vrot.lane.b32.xlu1 %v14286_v15, %s9706_s24 }
0x17b1   : > { %5666 = vrot.lane.b32.xlu1 %v14287_v29, %s9709_s26  ;;  %v6294_v29 = vpop.permute.xlu2 %6293 }
0x17b9   : > { %5676 = vrot.lane.b32.xlu1 %v14288_v10, %s9710_s27  ;;  %v13685_v6 = vpop.permute.xlu2 %6301 }
0x17c1   : > { %6323 = vrot.lane.b32.xlu1 %v14289_v21, %s9710_s27  ;;  %v13689_v17 = vpop.permute.xlu2 %6311 }
0x17c9   : > { %6906 = vrot.lane.b32.xlu1 %v6830_v35, %s9703_s21  ;;  %s9452_s21 = spop %9451 }
0x17ca   : > { %s9454_s22 = spop %9453 }
0x17d1   : > { %6928 = vrot.lane.b32.xlu1 %v6880_v23, %s9705_s23  ;;  %s9456_s23 = spop %9455 }
0x17d9   : > { %6938 = vrot.lane.b32.xlu1 %v6842_v7, %s9706_s24  ;;  %s13883_s24 = spop %9457 }
0x17db   : > { %v5064_v48 = vpop.xlane.xlu1 %5063 }
0x17dc   : > { %v5065_v57 = vrot.slane %v5064_v48, 4 }
0x17de   : > { %v5066_v50 = vadd.f32 %v5065_v57, %v5064_v48  ;;  %v6255_v48 = vsel %vm806_vm2, %v6252_v26, %v6254_v24  ;;  %v6256_v57 = vsel %vm806_vm2, %v6254_v24, %v6252_v26 }
0x17df   : > { %v6258_v24 = vmul.f32 %v6255_v48, %v9992_v45 }
0x17e0   : > { %v5067_v55 = vrot.slane %v5066_v50, 2 }
0x17e1   : > { %6948 = vrot.lane.b32.xlu1 %v6845_v54, %s9708_s25  ;;  %v5665_v54 = vpop.permute.xlu0 %5664  ;;  %s9460_s25 = spop %9459 }
0x17e2   : > { %v5068_v46 = vadd.f32 %v5067_v55, %v5066_v50  ;;  %s13885_s26 = spop %9461 }
0x17e4   : > { %v5069_v8 = vrot.slane %v5068_v46, 1 }
0x17e6   : > { %v5070_v44 = vadd.f32 %v5069_v8, %v5068_v46  ;;  %v6257_v46 = vmul.f32 %v6256_v57, %v9988_v43  ;;  %v14291_v57 = vld [vmem:[#allocation130_spill] sm:$0xff] }
0x17e8   : > { %9473 = vpush %v5070_v44 }
0x17e9   : > { %9475 = vpush %v5080_v28  ;;  %6968 = vrot.lane.b32.xlu1 %v6851_v16, %s9710_s27  ;;  %v13687_v21 = vpop.permute.xlu0 %6303  ;;  %s9464_s27 = spop %9463 }
0x17f1   : > { %v5675_v59 = vpop.permute.xlu0 %5674 }
0x17f3   : > { %v5625_v35 = vpop.permute.xlu1 %5624 }
0x17f4   : > { %v5626_v23 = vsel %vm836_vm3, %v5623_v19, %v5625_v35  ;;  %v5627_v1 = vsel %vm836_vm3, %v5625_v35, %v5623_v19  ;;  %v13727_v35 = vld [vmem:[%s12456_s28 + $0xf8] sm:$0xff] }
0x17f5   : > { %v5628_v5 = vmul.f32 %v5627_v1, %v10005_v60  ;;  %v5629_v42 = vmul.f32 %v5626_v23, %v10007_v61 }
0x17f7   : > { %v5630_v53 = vadd.f32 %v5628_v5, %v13557_v49  ;;  %v5631_v3 = vadd.f32 %v5629_v42, %v13559_v14  ;;  %v6263_v14 = vsel %vm820_vm1, %v6260_v11, %v6262_v41  ;;  %v6265_v41 = vmul.f32 %v6264_v31, %v9979_v33  ;;  %v13729_v5 = vpop.permute.xlu2 %6898  ;;  %v14290_v31 = vld [vmem:[#allocation129_spill] sm:$0xff] }
0x17f8   : > { %v6266_v58 = vmul.f32 %v6263_v14, %v9981_v37 }
0x17f9   : > { %v6267_v42 = vadd.f32 %v6265_v41, %v6257_v46 }
0x17fb   : > { %v5633_v15 = vpop.permute.xlu1 %5632 }
0x17fc   : > { %v5636_v2 = vsel %vm852_vm4, %v5633_v15, %v5635_v9  ;;  %v5637_v49 = vsel %vm852_vm4, %v5635_v9, %v5633_v15  ;;  %v6268_v15 = vadd.f32 %v6266_v58, %v6258_v24 }
0x17fd   : > { %v5638_v50 = vmul.f32 %v5637_v49, %v10010_v63  ;;  %v5639_v36 = vmul.f32 %v5636_v2, %v10015_v4 }
0x17ff   : > { %v5640_v23 = vadd.f32 %v5638_v50, %v5630_v53  ;;  %v5641_v1 = vadd.f32 %v5639_v36, %v5631_v3  ;;  %v5658_v53 = vsel %vm886_vm6, %v5655_v25, %v5657_v52  ;;  %v5659_v3 = vsel %vm886_vm6, %v5657_v52, %v5655_v25  ;;  %v6314_v52 = vpop.permute.xlu0 %6313 }
0x1801   : > { %v5642_v48 = vadd.f32 %v5640_v23, %v14290_v31  ;;  %v5643_v50 = vadd.f32 %v5641_v1, %v14291_v57  ;;  %v14293_v23 = vld [vmem:[#allocation15_spill] sm:$0xff]  ;;  %v6316_v57 = vsel %vm902_vm7, %v6314_v52, %v13689_v17 }
0x1803   : > { %v6272_v7 = vpop.permute.xlu1 %6271 }
0x1804   : > { %v6273_v55 = vsel %vm836_vm3, %v6270_v0, %v6272_v7  ;;  %v6274_v11 = vsel %vm836_vm3, %v6272_v7, %v6270_v0  ;;  %v13724_v0 = vld [vmem:[%s12456_s28 + $0xf0] sm:$0xff] }
0x1805   : > { %v6275_v28 = vmul.f32 %v6274_v11, %v10005_v60  ;;  %v6276_v44 = vmul.f32 %v6273_v55, %v10007_v61 }
0x1807   : > { %v6277_v49 = vadd.f32 %v6275_v28, %v6267_v42  ;;  %v6278_v14 = vadd.f32 %v6276_v44, %v6268_v15  ;;  %v5660_v28 = vmul.f32 %v5658_v53, %v10047_v32  ;;  %v5661_v44 = vmul.f32 %v5659_v3, %v10051_v38  ;;  %v13767_v42 = vpop.permute.xlu2 %6908 }
0x180b   : > { %v6282_v10 = vpop.permute.xlu1 %6281 }
0x180c   : > { %v6283_v26 = vsel %vm852_vm4, %v6280_v39, %v6282_v10  ;;  %v6284_v8 = vsel %vm852_vm4, %v6282_v10, %v6280_v39  ;;  %v5719_v39 = vadd.f32 %v13727_v35, %v13724_v0 }
0x180d   : > { %v6285_v7 = vmul.f32 %v6284_v8, %v10010_v63  ;;  %v6286_v10 = vmul.f32 %v6283_v26, %v10015_v4 }
0x180f   : > { %v6287_v11 = vadd.f32 %v6285_v7, %v6277_v49  ;;  %v6288_v41 = vadd.f32 %v6286_v10, %v6278_v14 }
0x1811   : > { %v6290_v1 = vadd.f32 %v6288_v41, %v14293_v23  ;;  %v8714_v41 = vld [vmem:[%s12456_s28 + $0xe8] sm:$0xff] }
0x1813   : > { %v5645_v19 = vpop.permute.xlu1 %5644  ;;  %5720 = vadd.xlane.f32.xlu1 %v5719_v39  ;;  %v6306_v39 = vsel %vm886_vm6, %v13687_v21, %v13685_v6 }
0x1814   : > { %v5648_v16 = vsel %vm870_vm5, %v5645_v19, %v5647_v27  ;;  %v5649_v9 = vsel %vm870_vm5, %v5647_v27, %v5645_v19  ;;  %v6308_v31 = vmul.f32 %v6306_v39, %v10051_v38 }
0x1815   : > { %v5650_v2 = vmul.f32 %v5648_v16, %v10031_v20  ;;  %v5651_v27 = vmul.f32 %v5649_v9, %v10033_v22  ;;  %v14292_v16 = vld [vmem:[#allocation10_spill] sm:$0xff] }
0x1816   : > { %v6289_v9 = vadd.f32 %v6287_v11, %v14292_v16  ;;  %v8713_v11 = vld [vmem:[%s12456_s28 + $0xe0] sm:$0xff]  ;;  %v13793_v16 = vpop.permute.xlu2 %6916 }
0x1817   : > { %v5652_v46 = vadd.f32 %v5650_v2, %v5642_v48  ;;  %v5653_v24 = vadd.f32 %v5651_v27, %v5643_v50  ;;  %v6315_v48 = vsel %vm902_vm7, %v13689_v17, %v6314_v52 }
0x1819   : > { %v5662_v15 = vadd.f32 %v5660_v28, %v5652_v46  ;;  %v5663_v7 = vadd.f32 %v5661_v44, %v5653_v24  ;;  %v6317_v24 = vmul.f32 %v6315_v48, %v10058_v47 }
0x181b   : > { %v6292_v62 = vpop.permute.xlu1 %6291 }
0x181c   : > { %v6295_v36 = vsel %vm870_vm5, %v6292_v62, %v6294_v29  ;;  %v6296_v55 = vsel %vm870_vm5, %v6294_v29, %v6292_v62 }
0x181d   : > { %v6297_v26 = vmul.f32 %v6295_v36, %v10031_v20  ;;  %v6298_v8 = vmul.f32 %v6296_v55, %v10033_v22 }
0x181f   : > { %v6299_v2 = vadd.f32 %v6297_v26, %v6289_v9  ;;  %v6300_v27 = vadd.f32 %v6298_v8, %v6290_v1  ;;  %v6318_v26 = vmul.f32 %v6316_v57, %v10061_v56 }
0x1821   : > { %v6310_v55 = vadd.f32 %v6308_v31, %v6300_v27 }
0x1823   : > { %v5667_v19 = vpop.permute.xlu1 %5666  ;;  %v6320_v44 = vadd.f32 %v6318_v26, %v6310_v55 }
0x1824   : > { %v5668_v58 = vsel %vm902_vm7, %v5665_v54, %v5667_v19  ;;  %v5669_v25 = vsel %vm902_vm7, %v5667_v19, %v5665_v54  ;;  %v6305_v54 = vsel %vm886_vm6, %v13685_v6, %v13687_v21 }
0x1825   : > { %v5670_v29 = vmul.f32 %v5668_v58, %v10058_v47  ;;  %v5671_v62 = vmul.f32 %v5669_v25, %v10061_v56  ;;  %v6307_v21 = vmul.f32 %v6305_v54, %v10047_v32  ;;  %v6322_v58 = vpop.permute.xlu0 %6321 }
0x1827   : > { %v5672_v3 = vadd.f32 %v5670_v29, %v5662_v15  ;;  %v5673_v49 = vadd.f32 %v5671_v62, %v5663_v7  ;;  %v6309_v36 = vadd.f32 %v6307_v21, %v6299_v2  ;;  %v8915_v7 = vld [vmem:[%s12456_s28 + $0x100] sm:$0xff] }
0x1829   : > { %v6319_v52 = vadd.f32 %v6317_v24, %v6309_v36 }
0x182b   : > { %v5677_v10 = vpop.permute.xlu1 %5676 }
0x182c   : > { %v5678_v19 = vsel %vm918_vm8, %v5675_v59, %v5677_v10  ;;  %v5679_v53 = vsel %vm918_vm8, %v5677_v10, %v5675_v59  ;;  %v8916_v10 = vld [vmem:[%s12456_s28 + $0x108] sm:$0xff] }
0x182d   : > { %v5680_v14 = vmul.f32 %v5678_v19, %v10079_v12  ;;  %v5681_v6 = vmul.f32 %v5679_v53, %v10081_v13  ;;  %v6901_v19 = vpop.permute.xlu0 %6900 }
0x182f   : > { %v5682_v50 = vadd.f32 %v5680_v14, %v5672_v3  ;;  %v5683_v59 = vadd.f32 %v5681_v6, %v5673_v49 }
0x1831   : > { %v5684_v25 = vadd.f32 %v5682_v50, %v12655_v40  ;;  %v5685_v46 = vadd.f32 %v5683_v59, %v12655_v40 }
0x1833   : > { %v5691_v8 = vsub.f32 %v5684_v25, %v8713_v11  ;;  %v5692_v28 = vsub.f32 %v5685_v46, %v8714_v41  ;;  %v6324_v17 = vpop.permute.xlu1 %6323  ;;  %v6941_v11 = vpop.permute.xlu2 %6940 }
0x1834   : > { %v6325_v29 = vsel %vm918_vm8, %v6322_v58, %v6324_v17  ;;  %v6326_v62 = vsel %vm918_vm8, %v6324_v17, %v6322_v58 }
0x1835   : > { %v5693_v9 = vand.u32 2147483647, %v5691_v8  ;;  %v5694_v23 = vand.u32 2147483647, %v5692_v28  ;;  %v6327_v1 = vmul.f32 %v6325_v29, %v10079_v12  ;;  %v6328_v54 = vmul.f32 %v6326_v62, %v10081_v13  ;;  %v6919_v8 = vpop.permute.xlu0 %6918 }
0x1837   : > { %v6329_v39 = vadd.f32 %v6327_v1, %v6319_v52  ;;  %v6330_v15 = vadd.f32 %v6328_v54, %v6320_v44  ;;  %v5697_v2 = vmul.f32 0.5, %v5693_v9  ;;  %v5698_v27 = vmul.f32 0.5, %v5694_v23 }
0x1838   : > { %vm5695_vm9 = vcmp.lt.f32.partialorder %v5693_v9, 0.01  ;;  %v8717_v50 = vadd.f32 -0.005, %v5693_v9  ;;  %v8718_v59 = vadd.f32 -0.005, %v5694_v23 }
0x1839   : > { %v6331_v53 = vadd.f32 %v6329_v39, %v12655_v40  ;;  %v6332_v3 = vadd.f32 %v6330_v15, %v12655_v40  ;;  %v5699_v49 = vmul.f32 %v5697_v2, %v5693_v9  ;;  %v5700_v14 = vmul.f32 %v5698_v27, %v5694_v23  ;;  %v8917_v9 = vld [vmem:[%s12456_s28 + $0x110] sm:$0xff] }
0x183a   : > { %vm5696_vm10 = vcmp.lt.f32.partialorder %v5694_v23, 0.01  ;;  %v6902_v39 = vsel %vm806_vm2, %v13729_v5, %v6901_v19 }
0x183b   : > { %v6338_v6 = vsub.f32 %v6331_v53, %v8915_v7  ;;  %v6339_v21 = vsub.f32 %v6332_v3, %v8916_v10  ;;  %v6907_v31 = vpop.permute.xlu1 %6906  ;;  %v5701_v48 = vmul.f32 %v5699_v49, %v12682_v30  ;;  %v5702_v57 = vmul.f32 %v5700_v14, %v12682_v30  ;;  %v6951_v53 = vpop.permute.xlu2 %6950 }
0x183c   : > { %v6910_v44 = vsel %vm820_vm1, %v6907_v31, %v13767_v42  ;;  %v6911_v29 = vsel %vm820_vm1, %v13767_v42, %v6907_v31  ;;  %v6903_v42 = vsel %vm806_vm2, %v6901_v19, %v13729_v5  ;;  %v6920_v5 = vsel %vm836_vm3, %v13793_v16, %v6919_v8 }
0x183d   : > { %v6340_v36 = vand.u32 2147483647, %v6338_v6  ;;  %v6341_v55 = vand.u32 2147483647, %v6339_v21  ;;  %v5705_v41 = vsel %vm5695_vm9, %v5701_v48, %v8717_v50  ;;  %v5706_v58 = vsel %vm5696_vm10, %v5702_v57, %v8718_v59  ;;  %v6927_v21 = vpop.permute.xlu0 %6926  ;;  %v13836_v57 = vld [vmem:[%s12456_s28 + $0x130] sm:$0xff]  ;;  %v13839_v50 = vld [vmem:[%s12456_s28 + $0x138] sm:$0xff] }
0x183e   : > { %v5707_v25 = vmul.f32 %v13724_v0, %v5705_v41  ;;  %v5708_v46 = vmul.f32 %v13727_v35, %v5706_v58  ;;  %v8918_v0 = vld [vmem:[%s12456_s28 + $0x118] sm:$0xff]  ;;  %v6912_v2 = vmul.f32 %v6911_v29, %v9979_v33  ;;  %v6913_v27 = vmul.f32 %v6910_v44, %v9981_v37 }
0x183f   : > { %v6344_v24 = vmul.f32 0.5, %v6340_v36  ;;  %v6345_v26 = vmul.f32 0.5, %v6341_v55  ;;  %v8919_v1 = vadd.f32 -0.005, %v6340_v36  ;;  %v8920_v54 = vadd.f32 -0.005, %v6341_v55 }
0x1840   : > { %v5709_v28 = vadd.f32 %v5708_v46, %v5707_v25  ;;  %vm6342_vm11 = vcmp.lt.f32.partialorder %v6340_v36, 0.01  ;;  %vm6343_vm12 = vcmp.lt.f32.partialorder %v6341_v55, 0.01  ;;  %v6366_v15 = vadd.f32 %v8918_v0, %v8917_v9 }
0x1841   : > { %v6346_v17 = vmul.f32 %v6344_v24, %v6340_v36  ;;  %v6347_v52 = vmul.f32 %v6345_v26, %v6341_v55  ;;  %v6904_v14 = vmul.f32 %v6903_v42, %v9988_v43  ;;  %v6905_v6 = vmul.f32 %v6902_v39, %v9992_v45 }
0x1842   : > { %5710 = vadd.xlane.f32.xlu0 %v5709_v28  ;;  %v6921_v33 = vsel %vm836_vm3, %v6919_v8, %v13793_v16  ;;  %v6923_v36 = vmul.f32 %v6920_v5, %v10007_v61  ;;  %v7013_v25 = vadd.f32 %v13839_v50, %v13836_v57  ;;  %vm6376_vm9 = vcmp.eq.s32.totalorder %v9961_v18, 8 }
0x1843   : > { %v6929_v62 = vpop.permute.xlu1 %6928  ;;  %v6348_v35 = vmul.f32 %v6346_v17, %v12682_v30  ;;  %v6349_v23 = vmul.f32 %v6347_v52, %v12682_v30  ;;  %v6914_v48 = vadd.f32 %v6912_v2, %v6904_v14  ;;  %v6915_v43 = vadd.f32 %v6913_v27, %v6905_v6  ;;  %v9117_v27 = vld [vmem:[%s12456_s28 + $0x120] sm:$0xff] }
0x1844   : > { %v6930_v37 = vsel %vm852_vm4, %v6927_v21, %v6929_v62  ;;  %v6931_v19 = vsel %vm852_vm4, %v6929_v62, %v6927_v21  ;;  %v6922_v59 = vmul.f32 %v6921_v33, %v10005_v60  ;;  %v6959_v60 = vpop.permute.xlu2 %6958  ;;  %vm7023_vm10 = vcmp.eq.s32.totalorder %v9961_v18, 9 }
0x1845   : > { %v6352_v7 = vsel %vm6342_vm11, %v6348_v35, %v8919_v1  ;;  %v6353_v10 = vsel %vm6343_vm12, %v6349_v23, %v8920_v54  ;;  %v6932_v16 = vmul.f32 %v6931_v19, %v10010_v63  ;;  %v6933_v55 = vmul.f32 %v6930_v37, %v10015_v4  ;;  %v6961_v52 = vpop.permute.xlu0 %6960 }
0x1846   : > { %v6354_v3 = vmul.f32 %v8917_v9, %v6352_v7  ;;  %v6355_v49 = vmul.f32 %v8918_v0, %v6353_v10  ;;  %v6924_v41 = vadd.f32 %v6922_v59, %v6914_v48  ;;  %v6925_v58 = vadd.f32 %v6923_v36, %v6915_v43 }
0x1847   : > { %v6963_v0 = vsel %vm902_vm7, %v6961_v52, %v6959_v60 }
0x1848   : > { %v6356_v31 = vadd.f32 %v6355_v49, %v6354_v3  ;;  %v6934_v26 = vadd.f32 %v6932_v16, %v6924_v41  ;;  %v6935_v8 = vadd.f32 %v6933_v55, %v6925_v58 }
0x184a   : > { %6367 = vadd.xlane.f32.xlu0 %v6366_v15  ;;  %6357 = vadd.xlane.f32.xlu2 %v6356_v31  ;;  %v6936_v44 = vadd.f32 %v6934_v26, %v13658_v34 }
0x184b   : > { %v6939_v45 = vpop.permute.xlu1 %6938 }
0x184c   : > { %v6942_v46 = vsel %vm870_vm5, %v6939_v45, %v6941_v11  ;;  %v6943_v24 = vsel %vm870_vm5, %v6941_v11, %v6939_v45  ;;  %v6937_v11 = vadd.f32 %v6935_v8, %v13649_v51  ;;  %v6971_v1 = vpop.permute.xlu2 %6970  ;;  %v6965_v51 = vmul.f32 %v6963_v0, %v10061_v56 }
0x184d   : > { %v6944_v61 = vmul.f32 %v6942_v46, %v10031_v20  ;;  %v6945_v63 = vmul.f32 %v6943_v24, %v10033_v22  ;;  %v6962_v22 = vsel %vm902_vm7, %v6959_v60, %v6961_v52  ;;  %vm1847_vm5 = vcmp.eq.s32.totalorder %v9961_v18, 1 }
0x184e   : > { %v6964_v34 = vmul.f32 %v6962_v22, %v10058_v47  ;;  %vm2494_vm7 = vcmp.eq.s32.totalorder %v9961_v18, 2 }
0x184f   : > { %v6946_v20 = vadd.f32 %v6944_v61, %v6936_v44  ;;  %v6947_v9 = vadd.f32 %v6945_v63, %v6937_v11 }
0x1852   : > { %7014 = vadd.xlane.f32.xlu2 %v7013_v25 }
0x1853   : > { %v6949_v28 = vpop.permute.xlu1 %6948 }
0x1854   : > { %v6952_v4 = vsel %vm886_vm6, %v6949_v28, %v6951_v53  ;;  %v6953_v17 = vsel %vm886_vm6, %v6951_v53, %v6949_v28  ;;  %v9118_v53 = vld [vmem:[%s12456_s28 + $0x128] sm:$0xff]  ;;  %s13887_s28 = spop %9465  ;;  %vm1200_vm6 = vcmp.eq.s32.totalorder %v9961_v18, 0 }
0x1855   : > { %v6954_v29 = vmul.f32 %v6952_v4, %v10047_v32  ;;  %v6955_v62 = vmul.f32 %v6953_v17, %v10051_v38  ;;  %s13892_s14 = spop %9467 }
0x1856   : > { %s13894_s18 = spop %9469 }
0x1857   : > { %v6956_v35 = vadd.f32 %v6954_v29, %v6946_v20  ;;  %v6957_v23 = vadd.f32 %v6955_v62, %v6947_v9  ;;  %s13897_s12 = spop %9471 }
0x1858   : > { %s13901_s19 = spop %9473 }
0x1859   : > { %v6966_v39 = vadd.f32 %v6964_v34, %v6956_v35  ;;  %v6967_v42 = vadd.f32 %v6965_v51, %v6957_v23  ;;  %s13910_s29 = spop %9475 }
0x185b   : > { %v6969_v32 = vpop.permute.xlu1 %6968 }
0x185c   : > { %v6972_v38 = vsel %vm918_vm8, %v6969_v32, %v6971_v1  ;;  %v6973_v54 = vsel %vm918_vm8, %v6971_v1, %v6969_v32  ;;  %vm3141_vm8 = vcmp.eq.s32.totalorder %v9961_v18, 3 }
0x185d   : > { %v6974_v15 = vmul.f32 %v6972_v38, %v10079_v12  ;;  %v6975_v7 = vmul.f32 %v6973_v54, %v10081_v13 }
0x185f   : > { %v6976_v10 = vadd.f32 %v6974_v15, %v6966_v39  ;;  %v6977_v2 = vadd.f32 %v6975_v7, %v6967_v42 }
0x1861   : > { %v6978_v47 = vadd.f32 %v6976_v10, %v12655_v40  ;;  %v6979_v56 = vadd.f32 %v6977_v2, %v12655_v40 }
0x1863   : > { %v6985_v3 = vsub.f32 %v6978_v47, %v9117_v27  ;;  %v6986_v49 = vsub.f32 %v6979_v56, %v9118_v53  ;;  %v14294_v27 = vlaneseq  ;;  %v1848_v47 = vstv %s9456_s23 }
0x1864   : > { %v1201_v56 = vstv %s9452_s21 }
0x1865   : > { %v6987_v14 = vand.u32 2147483647, %v6985_v3  ;;  %v6988_v6 = vand.u32 2147483647, %v6986_v49  ;;  %v13890_v53 = vshrl.u32 %v14294_v27, 7  ;;  %v2495_v3 = vstv %s9460_s25 }
0x1866   : > { %v1850_v49 = vstv %s9454_s22 }
0x1867   : > { %v6991_v21 = vmul.f32 0.5, %v6987_v14  ;;  %v6992_v31 = vmul.f32 0.5, %v6988_v6  ;;  %v9121_v37 = vadd.f32 -0.005, %v6987_v14  ;;  %v9122_v19 = vadd.f32 -0.005, %v6988_v6 }
0x1868   : > { %vm6989_vm1 = vcmp.lt.f32.partialorder %v6987_v14, 0.01  ;;  %vm6990_vm2 = vcmp.lt.f32.partialorder %v6988_v6, 0.01  ;;  %vm434_vm3 = vcmp.eq.s32.totalorder %v13890_v53, 1  ;;  %vm433_vm4 = vcmp.eq.s32.totalorder %v13890_v53, 0 }
0x1869   : > { %v6993_v5 = vmul.f32 %v6991_v21, %v6987_v14  ;;  %v6994_v33 = vmul.f32 %v6992_v31, %v6988_v6  ;;  %v1849_v14 = vsel %vm434_vm3, %v1848_v47, 0.0  ;;  %v3142_v6 = vstv %s9464_s27 }
0x186a   : > { %v1203_v21 = vstv %s13881_s20  ;;  %v1202_v31 = vsel %vm434_vm3, %v1201_v56, 0.0 }
0x186b   : > { %v6995_v12 = vmul.f32 %v6993_v5, %v12682_v30  ;;  %v6996_v13 = vmul.f32 %v6994_v33, %v12682_v30  ;;  %v2497_v5 = vstv %s13883_s24  ;;  %v2496_v33 = vsel %vm434_vm3, %v2495_v3, 0.0  ;;  %s390_s24 = scalar_lea.vmem %s13986_s9, %s9125_s15 }
0x186d   : > { %v6999_v48 = vsel %vm6989_vm1, %v6995_v12, %v9121_v37  ;;  %v7000_v43 = vsel %vm6990_vm2, %v6996_v13, %v9122_v19  ;;  %v1851_v12 = vsel %vm433_vm4, %v1850_v49, %v1849_v14  ;;  %v3789_v13 = vstv %s13892_s14 }
0x186e   : > { %v7001_v40 = vmul.f32 %v13836_v57, %v6999_v48  ;;  %v7002_v45 = vmul.f32 %v13839_v50, %v7000_v43  ;;  %v3144_v37 = vstv %s13885_s26  ;;  %v3143_v19 = vsel %vm434_vm3, %v3142_v6, 0.0 }
0x186f   : > { %v1204_v48 = vsel %vm433_vm4, %v1203_v21, %v1202_v31  ;;  %v2498_v43 = vsel %vm433_vm4, %v2497_v5, %v2496_v33 }
0x1870   : > { %v7003_v59 = vadd.f32 %v7002_v45, %v7001_v40  ;;  %v4436_v40 = vstv %s13897_s12  ;;  %v1852_v45 = vsel %vm1847_vm5, %v1851_v12, 0.0 }
0x1872   : > { %7004 = vadd.xlane.f32.xlu1 %v7003_v59  ;;  %v3791_v59 = vstv %s13887_s28 }
0x1886   : > { %v5721_v36 = vpop.xlane.xlu1 %5720 }
0x1887   : > { %v5722_v16 = vrot.slane %v5721_v36, 4 }
0x1889   : > { %v5723_v55 = vadd.f32 %v5722_v16, %v5721_v36  ;;  %v3790_v36 = vsel %vm434_vm3, %v3789_v13, 0.0  ;;  %v3145_v16 = vsel %vm433_vm4, %v3144_v37, %v3143_v19 }
0x188b   : > { %v5724_v41 = vrot.slane %v5723_v55, 2 }
0x188d   : > { %v5725_v46 = vadd.f32 %v5724_v41, %v5723_v55  ;;  %v5083_v55 = vstv %s13910_s29  ;;  %v1205_v41 = vsel %vm1200_vm6, %v1204_v48, 0.0 }
0x188f   : > { %v5726_v26 = vrot.slane %v5725_v46, 1 }
0x1891   : > { %v5727_v4 = vadd.f32 %v5726_v26, %v5725_v46  ;;  %v4437_v46 = vsel %vm434_vm3, %v4436_v40, 0.0 }
0x18b5   : > { %v5711_v58 = vpop.xlane.xlu0 %5710 }
0x18b6   : > { %v5712_v25 = vrot.slane %v5711_v58, 4 }
0x18b8   : > { %v5713_v30 = vadd.f32 %v5712_v25, %v5711_v58  ;;  %v2499_v58 = vsel %vm2494_vm7, %v2498_v43, 0.0  ;;  %v4438_v25 = vstv %s13894_s18 }
0x18ba   : > { %v5714_v24 = vrot.slane %v5713_v30, 2 }
0x18bc   : > { %v5715_v8 = vadd.f32 %v5714_v24, %v5713_v30  ;;  %v1853_v30 = vadd.f32 %v1852_v45, %v1205_v41  ;;  %v3792_v24 = vsel %vm433_vm4, %v3791_v59, %v3790_v36 }
0x18bd   : > { %v6368_v60 = vpop.xlane.xlu0 %6367  ;;  %v6358_v61 = vpop.xlane.xlu2 %6357 }
0x18be   : > { %v6369_v63 = vrot.slane %v6368_v60, 4  ;;  %v6359_v28 = vrot.slane %v6358_v61, 4  ;;  %v5716_v57 = vrot.slane %v5715_v8, 1 }
0x18c0   : > { %v6370_v50 = vadd.f32 %v6369_v63, %v6368_v60  ;;  %v6360_v17 = vadd.f32 %v6359_v28, %v6358_v61  ;;  %v5717_v52 = vadd.f32 %v5716_v57, %v5715_v8  ;;  %v3146_v8 = vsel %vm3141_vm8, %v3145_v16, 0.0 }
0x18c1   : > { %v5085_v60 = vstv %s13901_s19  ;;  %v5084_v61 = vsel %vm434_vm3, %v5083_v55, 0.0  ;;  %v2500_v63 = vadd.f32 %v2499_v58, %v1853_v30  ;;  %v4439_v28 = vsel %vm433_vm4, %v4438_v25, %v4437_v46 }
0x18c2   : > { %v6371_v44 = vrot.slane %v6370_v50, 2  ;;  %v6361_v11 = vrot.slane %v6360_v17, 2  ;;  %9477 = vpush %v5717_v52 }
0x18c3   : > { %9479 = vpush %v5727_v4  ;;  %v3793_v4 = vsel %vm3788_vm13, %v3792_v24, 0.0  ;;  %v3147_v52 = vadd.f32 %v3146_v8, %v2500_v63 }
0x18c4   : > { %v6372_v29 = vadd.f32 %v6371_v44, %v6370_v50  ;;  %v6362_v62 = vadd.f32 %v6361_v11, %v6360_v17  ;;  %v5086_v44 = vsel %vm433_vm4, %v5085_v60, %v5084_v61  ;;  %v4440_v11 = vsel %vm4435_vm14, %v4439_v28, 0.0 }
0x18c5   : > { %v7015_v35 = vpop.xlane.xlu2 %7014 }
0x18c6   : > { %v6363_v20 = vrot.slane %v6362_v62, 1  ;;  %v6373_v9 = vrot.slane %v6372_v29, 1  ;;  %v7016_v23 = vrot.slane %v7015_v35, 4 }
0x18c8   : > { %v6364_v22 = vadd.f32 %v6363_v20, %v6362_v62  ;;  %v6374_v0 = vadd.f32 %v6373_v9, %v6372_v29  ;;  %v7017_v1 = vadd.f32 %v7016_v23, %v7015_v35  ;;  %v3794_v20 = vadd.f32 %v3793_v4, %v3147_v52 }
0x18ca   : > { %9481 = vpush %v6364_v22  ;;  %v7018_v34 = vrot.slane %v7017_v1, 2  ;;  %v5087_v22 = vsel %vm5082_vm0, %v5086_v44, 0.0 }
0x18cb   : > { %9483 = vpush %v6374_v0  ;;  %v4441_v0 = vadd.f32 %v4440_v11, %v3794_v20 }
0x18cc   : > { %v7019_v54 = vadd.f32 %v7018_v34, %v7017_v1 }
0x18cd   : > { %v5088_v1 = vadd.f32 %v5087_v22, %v4441_v0 }
0x18ce   : > { %v7020_v15 = vrot.slane %v7019_v54, 1 }
0x18d0   : > { %v7021_v2 = vadd.f32 %v7020_v15, %v7019_v54 }
0x18e5   : > { %v7005_v51 = vpop.xlane.xlu1 %7004 }
0x18e6   : > { %v7006_v32 = vrot.slane %v7005_v51, 4 }
0x18e8   : > { %v7007_v38 = vadd.f32 %v7006_v32, %v7005_v51 }
0x18ea   : > { %v7008_v39 = vrot.slane %v7007_v38, 2 }
0x18ec   : > { %v7009_v42 = vadd.f32 %v7008_v39, %v7007_v38 }
0x18ee   : > { %v7010_v7 = vrot.slane %v7009_v42, 1 }
0x18f0   : > { %v7011_v10 = vadd.f32 %v7010_v7, %v7009_v42 }
0x18f2   : > { %9485 = vpush %v7011_v10 }
0x18f3   : > { %9487 = vpush %v7021_v2  ;;  %s13916_s11 = spop %9477 }
0x18f4   : > { %s9480_s13 = spop %9479  ;;  %v5732_v50 = vstv %s13916_s11 }
0x18f5   : > { %v5730_v26 = vstv %s9480_s13 }
0x18f6   : > { %v5731_v17 = vsel %vm434_vm3, %v5730_v26, 0.0 }
0x18f7   : > { %v5733_v9 = vsel %vm433_vm4, %v5732_v50, %v5731_v17 }
0x18f8   : > { %v5734_v23 = vsel %vm5729_vm15, %v5733_v9, 0.0 }
0x18f9   : > { %v5735_v32 = vadd.f32 %v5734_v23, %v5088_v1 }
0x18fb   : > { %s13931_s16 = spop %9481 }
0x18fc   : > { %s9484_s17 = spop %9483  ;;  %v6379_v29 = vstv %s13931_s16 }
0x18fd   : > { %v6377_v57 = vstv %s9484_s17 }
0x18fe   : > { %v6378_v62 = vsel %vm434_vm3, %v6377_v57, 0.0 }
0x18ff   : > { %v6380_v35 = vsel %vm433_vm4, %v6379_v29, %v6378_v62 }
0x1900   : > { %v6381_v34 = vsel %vm6376_vm9, %v6380_v35, 0.0 }
0x1901   : > { %v6382_v39 = vadd.f32 %v6381_v34, %v5735_v32 }
0x1923   : > { %s9486_s20 = spop %9485 }
0x1924   : > { %v7026_v51 = vstv %s9486_s20  ;;  %s9488_s21 = spop %9487 }
0x1925   : > { %v7024_v38 = vstv %s9488_s21 }
0x1926   : > { %v7025_v54 = vsel %vm434_vm3, %v7024_v38, 0.0 }
0x1927   : > { %v7027_v42 = vsel %vm433_vm4, %v7026_v51, %v7025_v54 }
0x1928   : > { %v7028_v15 = vsel %vm7023_vm10, %v7027_v42, 0.0 }
0x1929   : > { %v7029_v7 = vadd.f32 %v7028_v15, %v6382_v39 }
0x192b   : > { %7030 = vst [vmem:[%s390_s24] sm:$0xff] %v7029_v7 }
0x192c PF: > { %s19_s30 = sadd.s32 1, %s9700_s30  }
0x192d   : > { %p16_p4 = scmp.ge.s32.totalorder %s19_s30, 4  }
0x192f   :  { %18 = sbr.rel (!%p16_p4) target bundleno = 1 (0x1), region = 120 }

</bundles_post_ra>
